<compile_context>
chip_gen: v7x
topology: tpu7x:2x2x1
jax: 0.10.0
libtpu: 0.0.40
codegen_flags: <defaults>
</compile_context>

<pallas_src>
import jax
import jax.numpy as jnp
from jax.experimental import pallas as pl
from jax.experimental.pallas import tpu as pltpu

# Small, module-consistent sizes.
B, DIN, H, NC, T, M = 4, 16, 32, 8, 5, 6   # batch, input_dim, hidden, classes, seq, ticks


def _act_seq_kernel(x_ref, p_ref, ypn_ref, hh_ref):
    """Entire sequence: T outer steps x M ACT ticks of an LSTMCell + fused heads.

    x_ref  : (T*B, DIN)              inputs, time-major rows
    p_ref  : (DIN+H+1, 4H+NC+1)      packed params:
               rows [0:DIN]      cols [0:4H]   = W_ih^T   (i/f/o cols pre-scaled x0.5)
               rows [DIN:DIN+H]  cols [:]      = [W_hh^T (scaled) | W_dec^T | W_halt^T]
               row  [DIN+H]      cols [0:4H]   = b_ih + b_hh (scaled)
               row  [DIN+H]      cols [4H:]    = [b_dec | b_halt]
    ypn_ref: (T, B, NC+2)            packed [y | pt | nt] per outer step
    hh_ref : (T, M, B, H)            h history per tick
    """
    Tk, Mk, Bk, Hk = hh_ref.shape
    NCk = ypn_ref.shape[2] - 2
    DINk = x_ref.shape[1]
    G = 4 * Hk
    hp = jax.lax.Precision.HIGHEST

    # Static, aligned slices of the packed parameter slab (loaded once).
    wih = p_ref[0:DINk, 0:G]                         # (DIN, 4H)
    wfu = p_ref[DINk:DINk + Hk, :]                   # (H, 4H + NC + 1)
    bias = p_ref[DINk + Hk:DINk + Hk + 1, 0:G]       # (1, 4H)
    bout = p_ref[DINk + Hk:DINk + Hk + 1, G:]        # (1, NC + 1)
    bout_b = jnp.broadcast_to(bout, (Bk, NCk + 1))   # hoisted broadcast

    # Tick-invariant input contribution for the whole sequence: one MXU pass.
    xb_all = jnp.dot(x_ref[...], wih, precision=hp,
                     preferred_element_type=jnp.float32) + bias        # (T*B, 4H)

    # sx is None -> LSTMCell starts from zero (h, c).
    h = jnp.zeros((Bk, Hk), jnp.float32)
    c = jnp.zeros((Bk, Hk), jnp.float32)

    for t in range(Tk):                      # T, M small & static: fully unrolled.
        xb = xb_all[t * Bk:(t + 1) * Bk]                                # (B, 4H)

        # Prologue fused matmul on the carried state: its gate part feeds tick 0
        # (its head part is unused -- it rides along in the same MXU pass).
        fused = jnp.dot(h, wfu, precision=hp,
                        preferred_element_type=jnp.float32)            # (B, 4H+NC+1)

        st = jnp.zeros((Bk, Hk), jnp.float32)
        ct = jnp.zeros((Bk, Hk), jnp.float32)
        yt = jnp.zeros((Bk, NCk), jnp.float32)
        cum = jnp.zeros((Bk, 1), jnp.float32)
        pmax_prev = jnp.zeros((Bk, 1), jnp.float32)
        nt = jnp.zeros((Bk, 1), jnp.float32)
        pm_last_lt1 = jnp.zeros((Bk, 1), jnp.float32)

        for n in range(Mk):
            # PyTorch LSTMCell gate order: i, f, g, o.  i/f/o columns of the
            # weights/bias were pre-scaled by 0.5, so ONE tanh over the full
            # (B, 4H) vreg gives every gate: sigmoid(z) = 0.5*tanh(z/2) + 0.5.
            gates = xb + fused[:, :G]                                   # (B, 4H)
            tg = jnp.tanh(gates)
            i_g = 0.5 * tg[:, 0 * Hk:1 * Hk] + 0.5
            f_g = 0.5 * tg[:, 1 * Hk:2 * Hk] + 0.5
            g_g = tg[:, 2 * Hk:3 * Hk]
            o_g = 0.5 * tg[:, 3 * Hk:4 * Hk] + 0.5
            c = f_g * c + i_g * g_g
            h = o_g * jnp.tanh(c)
            hh_ref[t, n, :, :] = h                                      # per-tick store

            # Fused matmul on the new h: gates for tick n+1 AND head for tick n.
            fused = jnp.dot(h, wfu, precision=hp,
                            preferred_element_type=jnp.float32)
            out = fused[:, G:] + bout_b                                 # (B, NC+1)
            y = out[:, :NCk]                                            # decoder
            pn = jax.nn.sigmoid(out[:, NCk:NCk + 1])                    # halting

            # p_max = min(1, cumsum(p)); p_max[:, -1] = 1.0  -- computed online.
            if n < Mk - 1:
                cum = cum + pn
                pmax = jnp.minimum(1.0, cum)
            else:
                pmax = jnp.ones((Bk, 1), jnp.float32)
            ph = pmax - pmax_prev      # ph = cat([p_max[:, :1], diff(p_max)], -1)[:, n]
            st = st + ph * h
            ct = ct + ph * c
            yt = yt + ph * y
            # nt = argmax(p_max) = #columns with p_max < 1 (monotone, clamped).
            nt = nt + (pmax < 1.0).astype(jnp.float32)
            # value at the last column where p_max < 1 (== p_max[:, nt-1]).
            pm_last_lt1 = jnp.where(pmax < 1.0, pmax, pm_last_lt1)
            pmax_prev = pmax

        # rt = 1 - p_max[b, nt-1]; torch negative indexing wraps nt==0 -> last col (=1.0).
        rt = jnp.where(nt > 0.0, 1.0 - pm_last_lt1, 0.0)
        pt = nt + rt

        # carry ACT-weighted state to the next outer step.
        h = st
        c = ct

        ypn_ref[t, :, :] = jnp.concatenate([yt, pt, nt], axis=-1)       # (B, NC+2)


def init_params(key):
    """Deterministic parameter init (same shapes as the nn.Module's layers)."""
    ks = jax.random.split(key, 8)
    s = 1.0 / jnp.sqrt(jnp.float32(H))
    u = lambda k, shape: jax.random.uniform(k, shape, jnp.float32, -s, s)
    return {
        "w_ih": u(ks[0], (4 * H, DIN)),   # LSTMCell weight_ih
        "w_hh": u(ks[1], (4 * H, H)),     # LSTMCell weight_hh
        "b_ih": u(ks[2], (4 * H,)),
        "b_hh": u(ks[3], (4 * H,)),
        "w_dec": u(ks[4], (NC, H)),       # self.dec
        "b_dec": u(ks[5], (NC,)),
        "w_halt": u(ks[6], (1, H)),       # self.halt
        "b_halt": u(ks[7], (1,)),
    }


def _pack_params(params):
    """Pack all parameters into one (DIN+H+1, 4H+NC+1) f32 slab (2 input DMAs total)."""
    wih_t = params["w_ih"].T.astype(jnp.float32)                        # (DIN, 4H)
    whh_t = params["w_hh"].T.astype(jnp.float32)                        # (H, 4H)
    bias = (params["b_ih"] + params["b_hh"]).astype(jnp.float32)        # (4H,)
    wout = jnp.concatenate([params["w_dec"].T, params["w_halt"].T], axis=1)   # (H, NC+1)
    bout = jnp.concatenate([params["b_dec"], params["b_halt"]]).astype(jnp.float32)

    # sigmoid(z) = 0.5*tanh(z/2) + 0.5: pre-scale i/f/o gate columns by 0.5 so a
    # single in-kernel tanh over the full gates vreg yields every activation.
    scale = jnp.concatenate([jnp.full((H,), 0.5, jnp.float32),
                             jnp.full((H,), 0.5, jnp.float32),
                             jnp.ones((H,), jnp.float32),
                             jnp.full((H,), 0.5, jnp.float32)])          # (4H,)
    wih_s = wih_t * scale[None, :]
    whh_s = whh_t * scale[None, :]
    bias_s = bias * scale

    wfu = jnp.concatenate([whh_s, wout], axis=1)                         # (H, 4H+NC+1)

    G, C, R = 4 * H, 4 * H + NC + 1, DIN + H + 1
    p = jnp.zeros((R, C), jnp.float32)
    p = p.at[0:DIN, 0:G].set(wih_s)            # rows 0..15  (8-aligned block)
    p = p.at[DIN:DIN + H, :].set(wfu)          # rows 16..47 (8-aligned block)
    p = p.at[DIN + H, 0:G].set(bias_s)         # row 48
    p = p.at[DIN + H, G:].set(bout)            # row 48, lanes 128..136
    return p


def recurrent_classifier_forward(x, params):
    """Matches RecurrentClassifier.forward(x, step_type='fixed-act', num_fixed_ticks=M)."""
    Bx, Din, Tx = x.shape
    x2d = jnp.transpose(x, (2, 0, 1)).reshape(Tx * Bx, Din).astype(jnp.float32)
    packed = _pack_params(params)

    grid_spec = pltpu.PrefetchScalarGridSpec(
        num_scalar_prefetch=0,
        grid=(1,),                                           # single invocation
        in_specs=[pl.BlockSpec(x2d.shape, lambda i: (0, 0)),
                  pl.BlockSpec(packed.shape, lambda i: (0, 0))],
        out_specs=[
            pl.BlockSpec((Tx, Bx, NC + 2), lambda i: (0, 0, 0)),      # [y | pt | nt]
            pl.BlockSpec((Tx, M, Bx, H), lambda i: (0, 0, 0, 0)),     # h history
        ],
    )
    out_shape = (
        jax.ShapeDtypeStruct((Tx, Bx, NC + 2), jnp.float32),
        jax.ShapeDtypeStruct((Tx, M, Bx, H), jnp.float32),
    )
    ypn, hh = pl.pallas_call(
        _act_seq_kernel,
        out_shape=out_shape,
        grid_spec=grid_spec,
        compiler_params=pltpu.CompilerParams(
            dimension_semantics=("arbitrary",)),             # recurrent: sequential
    )(x2d, packed)

    # Unpack / package exactly like the PyTorch forward.
    Y = jnp.transpose(ypn[:, :, :NC], (1, 2, 0))             # (B, NC, T)
    P = jnp.sum(ypn[:, :, NC], axis=0)                       # (B,)
    # TODO(synk): torch returns nt as int64; int32 is the practical TPU dtype.
    N = jnp.transpose(ypn[:, :, NC + 1], (1, 0)).astype(jnp.int32)   # (B, T)
    # Addtl['h'] stays a Python list of per-t (B, H, M) tensors (not stacked), as in torch.
    Addtl = {"h": [jnp.transpose(hh[t], (1, 2, 0)) for t in range(Tx)]}
    return Y, P, N, Addtl


def ref_forward(x, params, num_fixed_ticks=M):
    """Pure-JAX reference of the same forward (for a sanity check)."""
    hp = jax.lax.Precision.HIGHEST
    dot = lambda a, b: jnp.dot(a, b, precision=hp)
    Bx, _, Tx = x.shape
    h = jnp.zeros((Bx, H), jnp.float32)
    c = jnp.zeros((Bx, H), jnp.float32)
    Ys, Ps, Ns, Hs = [], [], [], []
    for t in range(Tx):
        xi = x[:, :, t]
        p_l, y_l, s_l, c_l = [], [], [], []
        for _ in range(num_fixed_ticks):
            gates = (dot(xi, params["w_ih"].T) + params["b_ih"]
                     + dot(h, params["w_hh"].T) + params["b_hh"])
            i_g = jax.nn.sigmoid(gates[:, :H])
            f_g = jax.nn.sigmoid(gates[:, H:2 * H])
            g_g = jnp.tanh(gates[:, 2 * H:3 * H])
            o_g = jax.nn.sigmoid(gates[:, 3 * H:])
            c = f_g * c + i_g * g_g
            h = o_g * jnp.tanh(c)
            pn = jax.nn.sigmoid(dot(h, params["w_halt"].T) + params["b_halt"])[:, 0]
            y = dot(h, params["w_dec"].T) + params["b_dec"]
            p_l.append(pn); y_l.append(y); s_l.append(h); c_l.append(c)
        p_max = jnp.minimum(1.0, jnp.cumsum(jnp.stack(p_l, -1), -1))
        p_max = p_max.at[:, -1].set(1.0)
        ph = jnp.concatenate([p_max[:, :1], jnp.diff(p_max, axis=-1)], -1)
        st = jnp.sum(ph[:, None, :] * jnp.stack(s_l, -1), -1)
        ct = jnp.sum(ph[:, None, :] * jnp.stack(c_l, -1), -1)
        yt = jnp.sum(ph[:, None, :] * jnp.stack(y_l, -1), -1)
        nt = jnp.argmax(p_max, axis=1)
        rt = 1.0 - p_max[jnp.arange(Bx), (nt - 1) % num_fixed_ticks]
        h, c = st, ct
        Ys.append(yt); Ps.append(nt.astype(jnp.float32) + rt); Ns.append(nt)
        Hs.append(jnp.stack(s_l, -1))                        # (B, H, M)
    return (jnp.stack(Ys, -1), jnp.sum(jnp.stack(Ps, -1), -1),
            jnp.stack(Ns, -1), Hs)


# TODO(synk): step_type='act' (fixed_M=False) breaks the tick loop as soon as all
# batch elements halt -> data-dependent history length; no static-shape Pallas
# equivalent, so the 'fixed-act' variant (static M ticks) is implemented instead.
# The bottleneck_K path (reparameterization sampling) is unused (bottleneck_K=None).

if __name__ == "__main__":
    key = jax.random.PRNGKey(0)
    pkey, xkey = jax.random.split(key)
    params = init_params(pkey)
    x = jax.random.normal(xkey, (B, DIN, T), jnp.float32)    # (batch, input_dim, seq)

    Y, P, N, Addtl = recurrent_classifier_forward(x, params)
    jax.block_until_ready((Y, P, N, Addtl["h"][0]))

    assert Y.shape == (B, NC, T)
    assert P.shape == (B,)
    assert N.shape == (B, T)
    assert len(Addtl["h"]) == T and Addtl["h"][0].shape == (B, H, M)

    # Sanity check vs pure-JAX reference (HIGHEST-precision dots in-kernel -> tight tol).
    Y_ref, P_ref, N_ref, H_ref = ref_forward(x, params)
    assert bool(jnp.allclose(Y, Y_ref, atol=1e-3, rtol=1e-3))
    assert bool(jnp.allclose(P, P_ref, atol=1e-3, rtol=1e-3))
    assert bool(jnp.all(N == N_ref.astype(jnp.int32)))
    for t in range(T):
        assert bool(jnp.allclose(Addtl["h"][t], H_ref[t], atol=1e-3, rtol=1e-3))

    print("KERNEL_OK")
</pallas_src>

<mosaic_0001>
module attributes {stable_mosaic.version = 11 : i64} {
  func.func @_act_seq_kernel(%arg0: i32, %arg1: memref<20x16xf32, #tpu.memory_space<vmem>>, %arg2: memref<49x137xf32, #tpu.memory_space<vmem>>, %arg3: memref<5x4x10xf32, #tpu.memory_space<vmem>>, %arg4: memref<5x6x4x32xf32, #tpu.memory_space<vmem>>) attributes {dimension_semantics = [#tpu.dimension_semantics<arbitrary>], iteration_bounds = array<i64: 1>, scalar_prefetch = 0 : i64, scratch_operands = 0 : i64, tpu.core_type = #tpu.core_type<tc>, window_params = [{pipeline_mode = #tpu.pipeline_mode<synchronous>, transform_indices = @transform_0, window_bounds = array<i64: 20, 16>}, {pipeline_mode = #tpu.pipeline_mode<synchronous>, transform_indices = @transform_1, window_bounds = array<i64: 49, 137>}, {pipeline_mode = #tpu.pipeline_mode<synchronous>, transform_indices = @transform_2, window_bounds = array<i64: 5, 4, 10>}, {pipeline_mode = #tpu.pipeline_mode<synchronous>, transform_indices = @transform_3, window_bounds = array<i64: 5, 6, 4, 32>}]} {
    %c0 = arith.constant 0 : index
    %c0_0 = arith.constant 0 : index
    %0 = vector.load %arg2[%c0, %c0_0] : memref<49x137xf32, #tpu.memory_space<vmem>>, vector<16x128xf32>
    %c16 = arith.constant 16 : index
    %c0_1 = arith.constant 0 : index
    %1 = vector.load %arg2[%c16, %c0_1] : memref<49x137xf32, #tpu.memory_space<vmem>>, vector<32x137xf32>
    %c48 = arith.constant 48 : index
    %c0_2 = arith.constant 0 : index
    %2 = vector.load %arg2[%c48, %c0_2] : memref<49x137xf32, #tpu.memory_space<vmem>>, vector<1x128xf32>
    %c48_3 = arith.constant 48 : index
    %c128 = arith.constant 128 : index
    %3 = vector.load %arg2[%c48_3, %c128] : memref<49x137xf32, #tpu.memory_space<vmem>>, vector<1x9xf32>
    %4 = vector.shape_cast %3 : vector<1x9xf32> to vector<1x9xf32>
    %5 = vector.broadcast %4 : vector<1x9xf32> to vector<4x9xf32>
    %c0_4 = arith.constant 0 : index
    %c0_5 = arith.constant 0 : index
    %6 = vector.load %arg1[%c0_4, %c0_5] : memref<20x16xf32, #tpu.memory_space<vmem>>, vector<20x16xf32>
    %cst = arith.constant dense<0.000000e+00> : vector<20x128xf32>
    %7 = tpu.matmul %6, %0, %cst {dimension_numbers = #tpu.dot_dimension_numbers<[1], [0], [0], [1], [0, 0, 1, 1], [], []>, precision = #tpu.contract_precision<fp32>} : vector<20x16xf32>, vector<16x128xf32>, vector<20x128xf32> -> vector<20x128xf32>
    %8 = vector.broadcast %2 : vector<1x128xf32> to vector<20x128xf32>
    %9 = arith.addf %7, %8 : vector<20x128xf32>
    %cst_6 = arith.constant 0.000000e+00 : f32
    %10 = vector.broadcast %cst_6 : f32 to vector<4x32xf32>
    %cst_7 = arith.constant 0.000000e+00 : f32
    %11 = vector.broadcast %cst_7 : f32 to vector<4x32xf32>
    %12 = vector.extract_strided_slice %9 {offsets = [0, 0], sizes = [4, 128], strides = [1, 1]} : vector<20x128xf32> to vector<4x128xf32>
    %cst_8 = arith.constant dense<0.000000e+00> : vector<4x137xf32>
    %13 = tpu.matmul %10, %1, %cst_8 {dimension_numbers = #tpu.dot_dimension_numbers<[1], [0], [0], [1], [0, 0, 1, 1], [], []>, precision = #tpu.contract_precision<fp32>} : vector<4x32xf32>, vector<32x137xf32>, vector<4x137xf32> -> vector<4x137xf32>
    %cst_9 = arith.constant 0.000000e+00 : f32
    %14 = vector.broadcast %cst_9 : f32 to vector<4x32xf32>
    %cst_10 = arith.constant 0.000000e+00 : f32
    %15 = vector.broadcast %cst_10 : f32 to vector<4x32xf32>
    %cst_11 = arith.constant 0.000000e+00 : f32
    %16 = vector.broadcast %cst_11 : f32 to vector<4x8xf32>
    %cst_12 = arith.constant 0.000000e+00 : f32
    %17 = vector.broadcast %cst_12 : f32 to vector<4x1xf32>
    %cst_13 = arith.constant 0.000000e+00 : f32
    %18 = vector.broadcast %cst_13 : f32 to vector<4x1xf32>
    %cst_14 = arith.constant 0.000000e+00 : f32
    %19 = vector.broadcast %cst_14 : f32 to vector<4x1xf32>
    %cst_15 = arith.constant 0.000000e+00 : f32
    %20 = vector.broadcast %cst_15 : f32 to vector<4x1xf32>
    %21 = vector.extract_strided_slice %13 {offsets = [0, 0], sizes = [4, 128], strides = [1, 1]} : vector<4x137xf32> to vector<4x128xf32>
    %22 = arith.addf %12, %21 : vector<4x128xf32>
    %23 = math.tanh %22 : vector<4x128xf32>
    %24 = vector.extract_strided_slice %23 {offsets = [0, 0], sizes = [4, 32], strides = [1, 1]} : vector<4x128xf32> to vector<4x32xf32>
    %cst_16 = arith.constant 5.000000e-01 : f32
    %25 = vector.broadcast %cst_16 : f32 to vector<4x32xf32>
    %26 = arith.mulf %25, %24 : vector<4x32xf32>
    %cst_17 = arith.constant 5.000000e-01 : f32
    %27 = vector.broadcast %cst_17 : f32 to vector<4x32xf32>
    %28 = arith.addf %26, %27 : vector<4x32xf32>
    %29 = vector.extract_strided_slice %23 {offsets = [0, 32], sizes = [4, 32], strides = [1, 1]} : vector<4x128xf32> to vector<4x32xf32>
    %cst_18 = arith.constant 5.000000e-01 : f32
    %30 = vector.broadcast %cst_18 : f32 to vector<4x32xf32>
    %31 = arith.mulf %30, %29 : vector<4x32xf32>
    %cst_19 = arith.constant 5.000000e-01 : f32
    %32 = vector.broadcast %cst_19 : f32 to vector<4x32xf32>
    %33 = arith.addf %31, %32 : vector<4x32xf32>
    %34 = vector.extract_strided_slice %23 {offsets = [0, 64], sizes = [4, 32], strides = [1, 1]} : vector<4x128xf32> to vector<4x32xf32>
    %35 = vector.extract_strided_slice %23 {offsets = [0, 96], sizes = [4, 32], strides = [1, 1]} : vector<4x128xf32> to vector<4x32xf32>
    %cst_20 = arith.constant 5.000000e-01 : f32
    %36 = vector.broadcast %cst_20 : f32 to vector<4x32xf32>
    %37 = arith.mulf %36, %35 : vector<4x32xf32>
    %cst_21 = arith.constant 5.000000e-01 : f32
    %38 = vector.broadcast %cst_21 : f32 to vector<4x32xf32>
    %39 = arith.addf %37, %38 : vector<4x32xf32>
    %40 = arith.mulf %33, %11 : vector<4x32xf32>
    %41 = arith.mulf %28, %34 : vector<4x32xf32>
    %42 = arith.addf %40, %41 : vector<4x32xf32>
    %43 = math.tanh %42 : vector<4x32xf32>
    %44 = arith.mulf %39, %43 : vector<4x32xf32>
    %c0_22 = arith.constant 0 : index
    %c0_23 = arith.constant 0 : index
    %c0_24 = arith.constant 0 : index
    %c0_25 = arith.constant 0 : index
    %45 = vector.load %arg4[%c0_22, %c0_23, %c0_24, %c0_25] : memref<5x6x4x32xf32, #tpu.memory_space<vmem>>, vector<1x1x4x32xf32>
    %46 = vector.shape_cast %45 : vector<1x1x4x32xf32> to vector<4x32xf32>
    %47 = vector.shape_cast %44 : vector<4x32xf32> to vector<1x1x4x32xf32>
    tpu.vector_store %arg4[%c0_22, %c0_23, %c0_24, %c0_25], %47 {strides = array<i32>} : memref<5x6x4x32xf32, #tpu.memory_space<vmem>>, vector<1x1x4x32xf32>,
    %cst_26 = arith.constant dense<0.000000e+00> : vector<4x137xf32>
    %48 = tpu.matmul %44, %1, %cst_26 {dimension_numbers = #tpu.dot_dimension_numbers<[1], [0], [0], [1], [0, 0, 1, 1], [], []>, precision = #tpu.contract_precision<fp32>} : vector<4x32xf32>, vector<32x137xf32>, vector<4x137xf32> -> vector<4x137xf32>
    %49 = vector.extract_strided_slice %48 {offsets = [0, 128], sizes = [4, 9], strides = [1, 1]} : vector<4x137xf32> to vector<4x9xf32>
    %50 = arith.addf %49, %5 : vector<4x9xf32>
    %51 = vector.extract_strided_slice %50 {offsets = [0, 0], sizes = [4, 8], strides = [1, 1]} : vector<4x9xf32> to vector<4x8xf32>
    %52 = vector.extract_strided_slice %50 {offsets = [0, 8], sizes = [4, 1], strides = [1, 1]} : vector<4x9xf32> to vector<4x1xf32>
    %53 = arith.negf %52 : vector<4x1xf32>
    %54 = math.exp %53 : vector<4x1xf32>
    %cst_27 = arith.constant 1.000000e+00 : f32
    %55 = vector.broadcast %cst_27 : f32 to vector<4x1xf32>
    %56 = arith.addf %55, %54 : vector<4x1xf32>
    %57 = arith.divf %55, %56 : vector<4x1xf32>
    %58 = arith.addf %17, %57 : vector<4x1xf32>
    %cst_28 = arith.constant 1.000000e+00 : f32
    %59 = vector.broadcast %cst_28 : f32 to vector<4x1xf32>
    %60 = arith.minimumf %59, %58 : vector<4x1xf32>
    %61 = arith.subf %60, %18 : vector<4x1xf32>
    %62 = vector.broadcast %61 : vector<4x1xf32> to vector<4x32xf32>
    %63 = arith.mulf %62, %44 : vector<4x32xf32>
    %64 = arith.addf %14, %63 : vector<4x32xf32>
    %65 = vector.broadcast %61 : vector<4x1xf32> to vector<4x32xf32>
    %66 = arith.mulf %65, %42 : vector<4x32xf32>
    %67 = arith.addf %15, %66 : vector<4x32xf32>
    %68 = vector.broadcast %61 : vector<4x1xf32> to vector<4x8xf32>
    %69 = arith.mulf %68, %51 : vector<4x8xf32>
    %70 = arith.addf %16, %69 : vector<4x8xf32>
    %cst_29 = arith.constant 1.000000e+00 : f32
    %71 = vector.broadcast %cst_29 : f32 to vector<4x1xf32>
    %72 = arith.cmpf olt, %60, %71 : vector<4x1xf32>
    %73 = arith.extui %72 : vector<4x1xi1> to vector<4x1xi32>
    %74 = arith.sitofp %73 : vector<4x1xi32> to vector<4x1xf32>
    %75 = arith.addf %19, %74 : vector<4x1xf32>
    %cst_30 = arith.constant 1.000000e+00 : f32
    %76 = vector.broadcast %cst_30 : f32 to vector<4x1xf32>
    %77 = arith.cmpf olt, %60, %76 : vector<4x1xf32>
    %78 = arith.select %77, %60, %20 : vector<4x1xi1>, vector<4x1xf32>
    %79 = vector.extract_strided_slice %48 {offsets = [0, 0], sizes = [4, 128], strides = [1, 1]} : vector<4x137xf32> to vector<4x128xf32>
    %80 = arith.addf %12, %79 : vector<4x128xf32>
    %81 = math.tanh %80 : vector<4x128xf32>
    %82 = vector.extract_strided_slice %81 {offsets = [0, 0], sizes = [4, 32], strides = [1, 1]} : vector<4x128xf32> to vector<4x32xf32>
    %cst_31 = arith.constant 5.000000e-01 : f32
    %83 = vector.broadcast %cst_31 : f32 to vector<4x32xf32>
    %84 = arith.mulf %83, %82 : vector<4x32xf32>
    %cst_32 = arith.constant 5.000000e-01 : f32
    %85 = vector.broadcast %cst_32 : f32 to vector<4x32xf32>
    %86 = arith.addf %84, %85 : vector<4x32xf32>
    %87 = vector.extract_strided_slice %81 {offsets = [0, 32], sizes = [4, 32], strides = [1, 1]} : vector<4x128xf32> to vector<4x32xf32>
    %cst_33 = arith.constant 5.000000e-01 : f32
    %88 = vector.broadcast %cst_33 : f32 to vector<4x32xf32>
    %89 = arith.mulf %88, %87 : vector<4x32xf32>
    %cst_34 = arith.constant 5.000000e-01 : f32
    %90 = vector.broadcast %cst_34 : f32 to vector<4x32xf32>
    %91 = arith.addf %89, %90 : vector<4x32xf32>
    %92 = vector.extract_strided_slice %81 {offsets = [0, 64], sizes = [4, 32], strides = [1, 1]} : vector<4x128xf32> to vector<4x32xf32>
    %93 = vector.extract_strided_slice %81 {offsets = [0, 96], sizes = [4, 32], strides = [1, 1]} : vector<4x128xf32> to vector<4x32xf32>
    %cst_35 = arith.constant 5.000000e-01 : f32
    %94 = vector.broadcast %cst_35 : f32 to vector<4x32xf32>
    %95 = arith.mulf %94, %93 : vector<4x32xf32>
    %cst_36 = arith.constant 5.000000e-01 : f32
    %96 = vector.broadcast %cst_36 : f32 to vector<4x32xf32>
    %97 = arith.addf %95, %96 : vector<4x32xf32>
    %98 = arith.mulf %91, %42 : vector<4x32xf32>
    %99 = arith.mulf %86, %92 : vector<4x32xf32>
    %100 = arith.addf %98, %99 : vector<4x32xf32>
    %101 = math.tanh %100 : vector<4x32xf32>
    %102 = arith.mulf %97, %101 : vector<4x32xf32>
    %c0_37 = arith.constant 0 : index
    %c1 = arith.constant 1 : index
    %c0_38 = arith.constant 0 : index
    %c0_39 = arith.constant 0 : index
    %103 = vector.load %arg4[%c0_37, %c1, %c0_38, %c0_39] : memref<5x6x4x32xf32, #tpu.memory_space<vmem>>, vector<1x1x4x32xf32>
    %104 = vector.shape_cast %103 : vector<1x1x4x32xf32> to vector<4x32xf32>
    %105 = vector.shape_cast %102 : vector<4x32xf32> to vector<1x1x4x32xf32>
    tpu.vector_store %arg4[%c0_37, %c1, %c0_38, %c0_39], %105 {strides = array<i32>} : memref<5x6x4x32xf32, #tpu.memory_space<vmem>>, vector<1x1x4x32xf32>,
    %cst_40 = arith.constant dense<0.000000e+00> : vector<4x137xf32>
    %106 = tpu.matmul %102, %1, %cst_40 {dimension_numbers = #tpu.dot_dimension_numbers<[1], [0], [0], [1], [0, 0, 1, 1], [], []>, precision = #tpu.contract_precision<fp32>} : vector<4x32xf32>, vector<32x137xf32>, vector<4x137xf32> -> vector<4x137xf32>
    %107 = vector.extract_strided_slice %106 {offsets = [0, 128], sizes = [4, 9], strides = [1, 1]} : vector<4x137xf32> to vector<4x9xf32>
    %108 = arith.addf %107, %5 : vector<4x9xf32>
    %109 = vector.extract_strided_slice %108 {offsets = [0, 0], sizes = [4, 8], strides = [1, 1]} : vector<4x9xf32> to vector<4x8xf32>
    %110 = vector.extract_strided_slice %108 {offsets = [0, 8], sizes = [4, 1], strides = [1, 1]} : vector<4x9xf32> to vector<4x1xf32>
    %111 = arith.negf %110 : vector<4x1xf32>
    %112 = math.exp %111 : vector<4x1xf32>
    %cst_41 = arith.constant 1.000000e+00 : f32
    %113 = vector.broadcast %cst_41 : f32 to vector<4x1xf32>
    %114 = arith.addf %113, %112 : vector<4x1xf32>
    %115 = arith.divf %113, %114 : vector<4x1xf32>
    %116 = arith.addf %58, %115 : vector<4x1xf32>
    %cst_42 = arith.constant 1.000000e+00 : f32
    %117 = vector.broadcast %cst_42 : f32 to vector<4x1xf32>
    %118 = arith.minimumf %117, %116 : vector<4x1xf32>
    %119 = arith.subf %118, %60 : vector<4x1xf32>
    %120 = vector.broadcast %119 : vector<4x1xf32> to vector<4x32xf32>
    %121 = arith.mulf %120, %102 : vector<4x32xf32>
    %122 = arith.addf %64, %121 : vector<4x32xf32>
    %123 = vector.broadcast %119 : vector<4x1xf32> to vector<4x32xf32>
    %124 = arith.mulf %123, %100 : vector<4x32xf32>
    %125 = arith.addf %67, %124 : vector<4x32xf32>
    %126 = vector.broadcast %119 : vector<4x1xf32> to vector<4x8xf32>
    %127 = arith.mulf %126, %109 : vector<4x8xf32>
    %128 = arith.addf %70, %127 : vector<4x8xf32>
    %cst_43 = arith.constant 1.000000e+00 : f32
    %129 = vector.broadcast %cst_43 : f32 to vector<4x1xf32>
    %130 = arith.cmpf olt, %118, %129 : vector<4x1xf32>
    %131 = arith.extui %130 : vector<4x1xi1> to vector<4x1xi32>
    %132 = arith.sitofp %131 : vector<4x1xi32> to vector<4x1xf32>
    %133 = arith.addf %75, %132 : vector<4x1xf32>
    %cst_44 = arith.constant 1.000000e+00 : f32
    %134 = vector.broadcast %cst_44 : f32 to vector<4x1xf32>
    %135 = arith.cmpf olt, %118, %134 : vector<4x1xf32>
    %136 = arith.select %135, %118, %78 : vector<4x1xi1>, vector<4x1xf32>
    %137 = vector.extract_strided_slice %106 {offsets = [0, 0], sizes = [4, 128], strides = [1, 1]} : vector<4x137xf32> to vector<4x128xf32>
    %138 = arith.addf %12, %137 : vector<4x128xf32>
    %139 = math.tanh %138 : vector<4x128xf32>
    %140 = vector.extract_strided_slice %139 {offsets = [0, 0], sizes = [4, 32], strides = [1, 1]} : vector<4x128xf32> to vector<4x32xf32>
    %cst_45 = arith.constant 5.000000e-01 : f32
    %141 = vector.broadcast %cst_45 : f32 to vector<4x32xf32>
    %142 = arith.mulf %141, %140 : vector<4x32xf32>
    %cst_46 = arith.constant 5.000000e-01 : f32
    %143 = vector.broadcast %cst_46 : f32 to vector<4x32xf32>
    %144 = arith.addf %142, %143 : vector<4x32xf32>
    %145 = vector.extract_strided_slice %139 {offsets = [0, 32], sizes = [4, 32], strides = [1, 1]} : vector<4x128xf32> to vector<4x32xf32>
    %cst_47 = arith.constant 5.000000e-01 : f32
    %146 = vector.broadcast %cst_47 : f32 to vector<4x32xf32>
    %147 = arith.mulf %146, %145 : vector<4x32xf32>
    %cst_48 = arith.constant 5.000000e-01 : f32
    %148 = vector.broadcast %cst_48 : f32 to vector<4x32xf32>
    %149 = arith.addf %147, %148 : vector<4x32xf32>
    %150 = vector.extract_strided_slice %139 {offsets = [0, 64], sizes = [4, 32], strides = [1, 1]} : vector<4x128xf32> to vector<4x32xf32>
    %151 = vector.extract_strided_slice %139 {offsets = [0, 96], sizes = [4, 32], strides = [1, 1]} : vector<4x128xf32> to vector<4x32xf32>
    %cst_49 = arith.constant 5.000000e-01 : f32
    %152 = vector.broadcast %cst_49 : f32 to vector<4x32xf32>
    %153 = arith.mulf %152, %151 : vector<4x32xf32>
    %cst_50 = arith.constant 5.000000e-01 : f32
    %154 = vector.broadcast %cst_50 : f32 to vector<4x32xf32>
    %155 = arith.addf %153, %154 : vector<4x32xf32>
    %156 = arith.mulf %149, %100 : vector<4x32xf32>
    %157 = arith.mulf %144, %150 : vector<4x32xf32>
    %158 = arith.addf %156, %157 : vector<4x32xf32>
    %159 = math.tanh %158 : vector<4x32xf32>
    %160 = arith.mulf %155, %159 : vector<4x32xf32>
    %c0_51 = arith.constant 0 : index
    %c2 = arith.constant 2 : index
    %c0_52 = arith.constant 0 : index
    %c0_53 = arith.constant 0 : index
    %161 = vector.load %arg4[%c0_51, %c2, %c0_52, %c0_53] : memref<5x6x4x32xf32, #tpu.memory_space<vmem>>, vector<1x1x4x32xf32>
    %162 = vector.shape_cast %161 : vector<1x1x4x32xf32> to vector<4x32xf32>
    %163 = vector.shape_cast %160 : vector<4x32xf32> to vector<1x1x4x32xf32>
    tpu.vector_store %arg4[%c0_51, %c2, %c0_52, %c0_53], %163 {strides = array<i32>} : memref<5x6x4x32xf32, #tpu.memory_space<vmem>>, vector<1x1x4x32xf32>,
    %cst_54 = arith.constant dense<0.000000e+00> : vector<4x137xf32>
    %164 = tpu.matmul %160, %1, %cst_54 {dimension_numbers = #tpu.dot_dimension_numbers<[1], [0], [0], [1], [0, 0, 1, 1], [], []>, precision = #tpu.contract_precision<fp32>} : vector<4x32xf32>, vector<32x137xf32>, vector<4x137xf32> -> vector<4x137xf32>
    %165 = vector.extract_strided_slice %164 {offsets = [0, 128], sizes = [4, 9], strides = [1, 1]} : vector<4x137xf32> to vector<4x9xf32>
    %166 = arith.addf %165, %5 : vector<4x9xf32>
    %167 = vector.extract_strided_slice %166 {offsets = [0, 0], sizes = [4, 8], strides = [1, 1]} : vector<4x9xf32> to vector<4x8xf32>
    %168 = vector.extract_strided_slice %166 {offsets = [0, 8], sizes = [4, 1], strides = [1, 1]} : vector<4x9xf32> to vector<4x1xf32>
    %169 = arith.negf %168 : vector<4x1xf32>
    %170 = math.exp %169 : vector<4x1xf32>
    %cst_55 = arith.constant 1.000000e+00 : f32
    %171 = vector.broadcast %cst_55 : f32 to vector<4x1xf32>
    %172 = arith.addf %171, %170 : vector<4x1xf32>
    %173 = arith.divf %171, %172 : vector<4x1xf32>
    %174 = arith.addf %116, %173 : vector<4x1xf32>
    %cst_56 = arith.constant 1.000000e+00 : f32
    %175 = vector.broadcast %cst_56 : f32 to vector<4x1xf32>
    %176 = arith.minimumf %175, %174 : vector<4x1xf32>
    %177 = arith.subf %176, %118 : vector<4x1xf32>
    %178 = vector.broadcast %177 : vector<4x1xf32> to vector<4x32xf32>
    %179 = arith.mulf %178, %160 : vector<4x32xf32>
    %180 = arith.addf %122, %179 : vector<4x32xf32>
    %181 = vector.broadcast %177 : vector<4x1xf32> to vector<4x32xf32>
    %182 = arith.mulf %181, %158 : vector<4x32xf32>
    %183 = arith.addf %125, %182 : vector<4x32xf32>
    %184 = vector.broadcast %177 : vector<4x1xf32> to vector<4x8xf32>
    %185 = arith.mulf %184, %167 : vector<4x8xf32>
    %186 = arith.addf %128, %185 : vector<4x8xf32>
    %cst_57 = arith.constant 1.000000e+00 : f32
    %187 = vector.broadcast %cst_57 : f32 to vector<4x1xf32>
    %188 = arith.cmpf olt, %176, %187 : vector<4x1xf32>
    %189 = arith.extui %188 : vector<4x1xi1> to vector<4x1xi32>
    %190 = arith.sitofp %189 : vector<4x1xi32> to vector<4x1xf32>
    %191 = arith.addf %133, %190 : vector<4x1xf32>
    %cst_58 = arith.constant 1.000000e+00 : f32
    %192 = vector.broadcast %cst_58 : f32 to vector<4x1xf32>
    %193 = arith.cmpf olt, %176, %192 : vector<4x1xf32>
    %194 = arith.select %193, %176, %136 : vector<4x1xi1>, vector<4x1xf32>
    %195 = vector.extract_strided_slice %164 {offsets = [0, 0], sizes = [4, 128], strides = [1, 1]} : vector<4x137xf32> to vector<4x128xf32>
    %196 = arith.addf %12, %195 : vector<4x128xf32>
    %197 = math.tanh %196 : vector<4x128xf32>
    %198 = vector.extract_strided_slice %197 {offsets = [0, 0], sizes = [4, 32], strides = [1, 1]} : vector<4x128xf32> to vector<4x32xf32>
    %cst_59 = arith.constant 5.000000e-01 : f32
    %199 = vector.broadcast %cst_59 : f32 to vector<4x32xf32>
    %200 = arith.mulf %199, %198 : vector<4x32xf32>
    %cst_60 = arith.constant 5.000000e-01 : f32
    %201 = vector.broadcast %cst_60 : f32 to vector<4x32xf32>
    %202 = arith.addf %200, %201 : vector<4x32xf32>
    %203 = vector.extract_strided_slice %197 {offsets = [0, 32], sizes = [4, 32], strides = [1, 1]} : vector<4x128xf32> to vector<4x32xf32>
    %cst_61 = arith.constant 5.000000e-01 : f32
    %204 = vector.broadcast %cst_61 : f32 to vector<4x32xf32>
    %205 = arith.mulf %204, %203 : vector<4x32xf32>
    %cst_62 = arith.constant 5.000000e-01 : f32
    %206 = vector.broadcast %cst_62 : f32 to vector<4x32xf32>
    %207 = arith.addf %205, %206 : vector<4x32xf32>
    %208 = vector.extract_strided_slice %197 {offsets = [0, 64], sizes = [4, 32], strides = [1, 1]} : vector<4x128xf32> to vector<4x32xf32>
    %209 = vector.extract_strided_slice %197 {offsets = [0, 96], sizes = [4, 32], strides = [1, 1]} : vector<4x128xf32> to vector<4x32xf32>
    %cst_63 = arith.constant 5.000000e-01 : f32
    %210 = vector.broadcast %cst_63 : f32 to vector<4x32xf32>
    %211 = arith.mulf %210, %209 : vector<4x32xf32>
    %cst_64 = arith.constant 5.000000e-01 : f32
    %212 = vector.broadcast %cst_64 : f32 to vector<4x32xf32>
    %213 = arith.addf %211, %212 : vector<4x32xf32>
    %214 = arith.mulf %207, %158 : vector<4x32xf32>
    %215 = arith.mulf %202, %208 : vector<4x32xf32>
    %216 = arith.addf %214, %215 : vector<4x32xf32>
    %217 = math.tanh %216 : vector<4x32xf32>
    %218 = arith.mulf %213, %217 : vector<4x32xf32>
    %c0_65 = arith.constant 0 : index
    %c3 = arith.constant 3 : index
    %c0_66 = arith.constant 0 : index
    %c0_67 = arith.constant 0 : index
    %219 = vector.load %arg4[%c0_65, %c3, %c0_66, %c0_67] : memref<5x6x4x32xf32, #tpu.memory_space<vmem>>, vector<1x1x4x32xf32>
    %220 = vector.shape_cast %219 : vector<1x1x4x32xf32> to vector<4x32xf32>
    %221 = vector.shape_cast %218 : vector<4x32xf32> to vector<1x1x4x32xf32>
    tpu.vector_store %arg4[%c0_65, %c3, %c0_66, %c0_67], %221 {strides = array<i32>} : memref<5x6x4x32xf32, #tpu.memory_space<vmem>>, vector<1x1x4x32xf32>,
    %cst_68 = arith.constant dense<0.000000e+00> : vector<4x137xf32>
    %222 = tpu.matmul %218, %1, %cst_68 {dimension_numbers = #tpu.dot_dimension_numbers<[1], [0], [0], [1], [0, 0, 1, 1], [], []>, precision = #tpu.contract_precision<fp32>} : vector<4x32xf32>, vector<32x137xf32>, vector<4x137xf32> -> vector<4x137xf32>
    %223 = vector.extract_strided_slice %222 {offsets = [0, 128], sizes = [4, 9], strides = [1, 1]} : vector<4x137xf32> to vector<4x9xf32>
    %224 = arith.addf %223, %5 : vector<4x9xf32>
    %225 = vector.extract_strided_slice %224 {offsets = [0, 0], sizes = [4, 8], strides = [1, 1]} : vector<4x9xf32> to vector<4x8xf32>
    %226 = vector.extract_strided_slice %224 {offsets = [0, 8], sizes = [4, 1], strides = [1, 1]} : vector<4x9xf32> to vector<4x1xf32>
    %227 = arith.negf %226 : vector<4x1xf32>
    %228 = math.exp %227 : vector<4x1xf32>
    %cst_69 = arith.constant 1.000000e+00 : f32
    %229 = vector.broadcast %cst_69 : f32 to vector<4x1xf32>
    %230 = arith.addf %229, %228 : vector<4x1xf32>
    %231 = arith.divf %229, %230 : vector<4x1xf32>
    %232 = arith.addf %174, %231 : vector<4x1xf32>
    %cst_70 = arith.constant 1.000000e+00 : f32
    %233 = vector.broadcast %cst_70 : f32 to vector<4x1xf32>
    %234 = arith.minimumf %233, %232 : vector<4x1xf32>
    %235 = arith.subf %234, %176 : vector<4x1xf32>
    %236 = vector.broadcast %235 : vector<4x1xf32> to vector<4x32xf32>
    %237 = arith.mulf %236, %218 : vector<4x32xf32>
    %238 = arith.addf %180, %237 : vector<4x32xf32>
    %239 = vector.broadcast %235 : vector<4x1xf32> to vector<4x32xf32>
    %240 = arith.mulf %239, %216 : vector<4x32xf32>
    %241 = arith.addf %183, %240 : vector<4x32xf32>
    %242 = vector.broadcast %235 : vector<4x1xf32> to vector<4x8xf32>
    %243 = arith.mulf %242, %225 : vector<4x8xf32>
    %244 = arith.addf %186, %243 : vector<4x8xf32>
    %cst_71 = arith.constant 1.000000e+00 : f32
    %245 = vector.broadcast %cst_71 : f32 to vector<4x1xf32>
    %246 = arith.cmpf olt, %234, %245 : vector<4x1xf32>
    %247 = arith.extui %246 : vector<4x1xi1> to vector<4x1xi32>
    %248 = arith.sitofp %247 : vector<4x1xi32> to vector<4x1xf32>
    %249 = arith.addf %191, %248 : vector<4x1xf32>
    %cst_72 = arith.constant 1.000000e+00 : f32
    %250 = vector.broadcast %cst_72 : f32 to vector<4x1xf32>
    %251 = arith.cmpf olt, %234, %250 : vector<4x1xf32>
    %252 = arith.select %251, %234, %194 : vector<4x1xi1>, vector<4x1xf32>
    %253 = vector.extract_strided_slice %222 {offsets = [0, 0], sizes = [4, 128], strides = [1, 1]} : vector<4x137xf32> to vector<4x128xf32>
    %254 = arith.addf %12, %253 : vector<4x128xf32>
    %255 = math.tanh %254 : vector<4x128xf32>
    %256 = vector.extract_strided_slice %255 {offsets = [0, 0], sizes = [4, 32], strides = [1, 1]} : vector<4x128xf32> to vector<4x32xf32>
    %cst_73 = arith.constant 5.000000e-01 : f32
    %257 = vector.broadcast %cst_73 : f32 to vector<4x32xf32>
    %258 = arith.mulf %257, %256 : vector<4x32xf32>
    %cst_74 = arith.constant 5.000000e-01 : f32
    %259 = vector.broadcast %cst_74 : f32 to vector<4x32xf32>
    %260 = arith.addf %258, %259 : vector<4x32xf32>
    %261 = vector.extract_strided_slice %255 {offsets = [0, 32], sizes = [4, 32], strides = [1, 1]} : vector<4x128xf32> to vector<4x32xf32>
    %cst_75 = arith.constant 5.000000e-01 : f32
    %262 = vector.broadcast %cst_75 : f32 to vector<4x32xf32>
    %263 = arith.mulf %262, %261 : vector<4x32xf32>
    %cst_76 = arith.constant 5.000000e-01 : f32
    %264 = vector.broadcast %cst_76 : f32 to vector<4x32xf32>
    %265 = arith.addf %263, %264 : vector<4x32xf32>
    %266 = vector.extract_strided_slice %255 {offsets = [0, 64], sizes = [4, 32], strides = [1, 1]} : vector<4x128xf32> to vector<4x32xf32>
    %267 = vector.extract_strided_slice %255 {offsets = [0, 96], sizes = [4, 32], strides = [1, 1]} : vector<4x128xf32> to vector<4x32xf32>
    %cst_77 = arith.constant 5.000000e-01 : f32
    %268 = vector.broadcast %cst_77 : f32 to vector<4x32xf32>
    %269 = arith.mulf %268, %267 : vector<4x32xf32>
    %cst_78 = arith.constant 5.000000e-01 : f32
    %270 = vector.broadcast %cst_78 : f32 to vector<4x32xf32>
    %271 = arith.addf %269, %270 : vector<4x32xf32>
    %272 = arith.mulf %265, %216 : vector<4x32xf32>
    %273 = arith.mulf %260, %266 : vector<4x32xf32>
    %274 = arith.addf %272, %273 : vector<4x32xf32>
    %275 = math.tanh %274 : vector<4x32xf32>
    %276 = arith.mulf %271, %275 : vector<4x32xf32>
    %c0_79 = arith.constant 0 : index
    %c4 = arith.constant 4 : index
    %c0_80 = arith.constant 0 : index
    %c0_81 = arith.constant 0 : index
    %277 = vector.load %arg4[%c0_79, %c4, %c0_80, %c0_81] : memref<5x6x4x32xf32, #tpu.memory_space<vmem>>, vector<1x1x4x32xf32>
    %278 = vector.shape_cast %277 : vector<1x1x4x32xf32> to vector<4x32xf32>
    %279 = vector.shape_cast %276 : vector<4x32xf32> to vector<1x1x4x32xf32>
    tpu.vector_store %arg4[%c0_79, %c4, %c0_80, %c0_81], %279 {strides = array<i32>} : memref<5x6x4x32xf32, #tpu.memory_space<vmem>>, vector<1x1x4x32xf32>,
    %cst_82 = arith.constant dense<0.000000e+00> : vector<4x137xf32>
    %280 = tpu.matmul %276, %1, %cst_82 {dimension_numbers = #tpu.dot_dimension_numbers<[1], [0], [0], [1], [0, 0, 1, 1], [], []>, precision = #tpu.contract_precision<fp32>} : vector<4x32xf32>, vector<32x137xf32>, vector<4x137xf32> -> vector<4x137xf32>
    %281 = vector.extract_strided_slice %280 {offsets = [0, 128], sizes = [4, 9], strides = [1, 1]} : vector<4x137xf32> to vector<4x9xf32>
    %282 = arith.addf %281, %5 : vector<4x9xf32>
    %283 = vector.extract_strided_slice %282 {offsets = [0, 0], sizes = [4, 8], strides = [1, 1]} : vector<4x9xf32> to vector<4x8xf32>
    %284 = vector.extract_strided_slice %282 {offsets = [0, 8], sizes = [4, 1], strides = [1, 1]} : vector<4x9xf32> to vector<4x1xf32>
    %285 = arith.negf %284 : vector<4x1xf32>
    %286 = math.exp %285 : vector<4x1xf32>
    %cst_83 = arith.constant 1.000000e+00 : f32
    %287 = vector.broadcast %cst_83 : f32 to vector<4x1xf32>
    %288 = arith.addf %287, %286 : vector<4x1xf32>
    %289 = arith.divf %287, %288 : vector<4x1xf32>
    %290 = arith.addf %232, %289 : vector<4x1xf32>
    %cst_84 = arith.constant 1.000000e+00 : f32
    %291 = vector.broadcast %cst_84 : f32 to vector<4x1xf32>
    %292 = arith.minimumf %291, %290 : vector<4x1xf32>
    %293 = arith.subf %292, %234 : vector<4x1xf32>
    %294 = vector.broadcast %293 : vector<4x1xf32> to vector<4x32xf32>
    %295 = arith.mulf %294, %276 : vector<4x32xf32>
    %296 = arith.addf %238, %295 : vector<4x32xf32>
    %297 = vector.broadcast %293 : vector<4x1xf32> to vector<4x32xf32>
    %298 = arith.mulf %297, %274 : vector<4x32xf32>
    %299 = arith.addf %241, %298 : vector<4x32xf32>
    %300 = vector.broadcast %293 : vector<4x1xf32> to vector<4x8xf32>
    %301 = arith.mulf %300, %283 : vector<4x8xf32>
    %302 = arith.addf %244, %301 : vector<4x8xf32>
    %cst_85 = arith.constant 1.000000e+00 : f32
    %303 = vector.broadcast %cst_85 : f32 to vector<4x1xf32>
    %304 = arith.cmpf olt, %292, %303 : vector<4x1xf32>
    %305 = arith.extui %304 : vector<4x1xi1> to vector<4x1xi32>
    %306 = arith.sitofp %305 : vector<4x1xi32> to vector<4x1xf32>
    %307 = arith.addf %249, %306 : vector<4x1xf32>
    %cst_86 = arith.constant 1.000000e+00 : f32
    %308 = vector.broadcast %cst_86 : f32 to vector<4x1xf32>
    %309 = arith.cmpf olt, %292, %308 : vector<4x1xf32>
    %310 = arith.select %309, %292, %252 : vector<4x1xi1>, vector<4x1xf32>
    %311 = vector.extract_strided_slice %280 {offsets = [0, 0], sizes = [4, 128], strides = [1, 1]} : vector<4x137xf32> to vector<4x128xf32>
    %312 = arith.addf %12, %311 : vector<4x128xf32>
    %313 = math.tanh %312 : vector<4x128xf32>
    %314 = vector.extract_strided_slice %313 {offsets = [0, 0], sizes = [4, 32], strides = [1, 1]} : vector<4x128xf32> to vector<4x32xf32>
    %cst_87 = arith.constant 5.000000e-01 : f32
    %315 = vector.broadcast %cst_87 : f32 to vector<4x32xf32>
    %316 = arith.mulf %315, %314 : vector<4x32xf32>
    %cst_88 = arith.constant 5.000000e-01 : f32
    %317 = vector.broadcast %cst_88 : f32 to vector<4x32xf32>
    %318 = arith.addf %316, %317 : vector<4x32xf32>
    %319 = vector.extract_strided_slice %313 {offsets = [0, 32], sizes = [4, 32], strides = [1, 1]} : vector<4x128xf32> to vector<4x32xf32>
    %cst_89 = arith.constant 5.000000e-01 : f32
    %320 = vector.broadcast %cst_89 : f32 to vector<4x32xf32>
    %321 = arith.mulf %320, %319 : vector<4x32xf32>
    %cst_90 = arith.constant 5.000000e-01 : f32
    %322 = vector.broadcast %cst_90 : f32 to vector<4x32xf32>
    %323 = arith.addf %321, %322 : vector<4x32xf32>
    %324 = vector.extract_strided_slice %313 {offsets = [0, 64], sizes = [4, 32], strides = [1, 1]} : vector<4x128xf32> to vector<4x32xf32>
    %325 = vector.extract_strided_slice %313 {offsets = [0, 96], sizes = [4, 32], strides = [1, 1]} : vector<4x128xf32> to vector<4x32xf32>
    %cst_91 = arith.constant 5.000000e-01 : f32
    %326 = vector.broadcast %cst_91 : f32 to vector<4x32xf32>
    %327 = arith.mulf %326, %325 : vector<4x32xf32>
    %cst_92 = arith.constant 5.000000e-01 : f32
    %328 = vector.broadcast %cst_92 : f32 to vector<4x32xf32>
    %329 = arith.addf %327, %328 : vector<4x32xf32>
    %330 = arith.mulf %323, %274 : vector<4x32xf32>
    %331 = arith.mulf %318, %324 : vector<4x32xf32>
    %332 = arith.addf %330, %331 : vector<4x32xf32>
    %333 = math.tanh %332 : vector<4x32xf32>
    %334 = arith.mulf %329, %333 : vector<4x32xf32>
    %c0_93 = arith.constant 0 : index
    %c5 = arith.constant 5 : index
    %c0_94 = arith.constant 0 : index
    %c0_95 = arith.constant 0 : index
    %335 = vector.load %arg4[%c0_93, %c5, %c0_94, %c0_95] : memref<5x6x4x32xf32, #tpu.memory_space<vmem>>, vector<1x1x4x32xf32>
    %336 = vector.shape_cast %335 : vector<1x1x4x32xf32> to vector<4x32xf32>
    %337 = vector.shape_cast %334 : vector<4x32xf32> to vector<1x1x4x32xf32>
    tpu.vector_store %arg4[%c0_93, %c5, %c0_94, %c0_95], %337 {strides = array<i32>} : memref<5x6x4x32xf32, #tpu.memory_space<vmem>>, vector<1x1x4x32xf32>,
    %cst_96 = arith.constant dense<0.000000e+00> : vector<4x137xf32>
    %338 = tpu.matmul %334, %1, %cst_96 {dimension_numbers = #tpu.dot_dimension_numbers<[1], [0], [0], [1], [0, 0, 1, 1], [], []>, precision = #tpu.contract_precision<fp32>} : vector<4x32xf32>, vector<32x137xf32>, vector<4x137xf32> -> vector<4x137xf32>
    %339 = vector.extract_strided_slice %338 {offsets = [0, 128], sizes = [4, 9], strides = [1, 1]} : vector<4x137xf32> to vector<4x9xf32>
    %340 = arith.addf %339, %5 : vector<4x9xf32>
    %341 = vector.extract_strided_slice %340 {offsets = [0, 0], sizes = [4, 8], strides = [1, 1]} : vector<4x9xf32> to vector<4x8xf32>
    %cst_97 = arith.constant 1.000000e+00 : f32
    %342 = vector.broadcast %cst_97 : f32 to vector<4x1xf32>
    %343 = arith.subf %342, %292 : vector<4x1xf32>
    %344 = vector.broadcast %343 : vector<4x1xf32> to vector<4x32xf32>
    %345 = arith.mulf %344, %334 : vector<4x32xf32>
    %346 = arith.addf %296, %345 : vector<4x32xf32>
    %347 = vector.broadcast %343 : vector<4x1xf32> to vector<4x32xf32>
    %348 = arith.mulf %347, %332 : vector<4x32xf32>
    %349 = arith.addf %299, %348 : vector<4x32xf32>
    %350 = vector.broadcast %343 : vector<4x1xf32> to vector<4x8xf32>
    %351 = arith.mulf %350, %341 : vector<4x8xf32>
    %352 = arith.addf %302, %351 : vector<4x8xf32>
    %cst_98 = arith.constant 1.000000e+00 : f32
    %353 = vector.broadcast %cst_98 : f32 to vector<4x1xf32>
    %354 = arith.cmpf olt, %342, %353 : vector<4x1xf32>
    %355 = arith.extui %354 : vector<4x1xi1> to vector<4x1xi32>
    %356 = arith.sitofp %355 : vector<4x1xi32> to vector<4x1xf32>
    %357 = arith.addf %307, %356 : vector<4x1xf32>
    %cst_99 = arith.constant 1.000000e+00 : f32
    %358 = vector.broadcast %cst_99 : f32 to vector<4x1xf32>
    %359 = arith.cmpf olt, %342, %358 : vector<4x1xf32>
    %360 = arith.select %359, %342, %310 : vector<4x1xi1>, vector<4x1xf32>
    %cst_100 = arith.constant 0.000000e+00 : f32
    %361 = vector.broadcast %cst_100 : f32 to vector<4x1xf32>
    %362 = arith.cmpf ogt, %357, %361 : vector<4x1xf32>
    %cst_101 = arith.constant 1.000000e+00 : f32
    %363 = vector.broadcast %cst_101 : f32 to vector<4x1xf32>
    %364 = arith.subf %363, %360 : vector<4x1xf32>
    %cst_102 = arith.constant 0.000000e+00 : f32
    %365 = vector.broadcast %cst_102 : f32 to vector<4x1xf32>
    %366 = arith.select %362, %364, %365 : vector<4x1xi1>, vector<4x1xf32>
    %367 = arith.addf %357, %366 : vector<4x1xf32>
    %368 = tpu.concatenate %352, %367, %357 in 1 : vector<4x8xf32>, vector<4x1xf32>, vector<4x1xf32> -> vector<4x10xf32>
    %c0_103 = arith.constant 0 : index
    %c0_104 = arith.constant 0 : index
    %c0_105 = arith.constant 0 : index
    %369 = vector.load %arg3[%c0_103, %c0_104, %c0_105] : memref<5x4x10xf32, #tpu.memory_space<vmem>>, vector<1x4x10xf32>
    %370 = vector.shape_cast %369 : vector<1x4x10xf32> to vector<4x10xf32>
    %371 = vector.shape_cast %368 : vector<4x10xf32> to vector<1x4x10xf32>
    tpu.vector_store %arg3[%c0_103, %c0_104, %c0_105], %371 {strides = array<i32>} : memref<5x4x10xf32, #tpu.memory_space<vmem>>, vector<1x4x10xf32>,
    %372 = vector.extract_strided_slice %9 {offsets = [4, 0], sizes = [4, 128], strides = [1, 1]} : vector<20x128xf32> to vector<4x128xf32>
    %cst_106 = arith.constant dense<0.000000e+00> : vector<4x137xf32>
    %373 = tpu.matmul %346, %1, %cst_106 {dimension_numbers = #tpu.dot_dimension_numbers<[1], [0], [0], [1], [0, 0, 1, 1], [], []>, precision = #tpu.contract_precision<fp32>} : vector<4x32xf32>, vector<32x137xf32>, vector<4x137xf32> -> vector<4x137xf32>
    %cst_107 = arith.constant 0.000000e+00 : f32
    %374 = vector.broadcast %cst_107 : f32 to vector<4x32xf32>
    %cst_108 = arith.constant 0.000000e+00 : f32
    %375 = vector.broadcast %cst_108 : f32 to vector<4x32xf32>
    %cst_109 = arith.constant 0.000000e+00 : f32
    %376 = vector.broadcast %cst_109 : f32 to vector<4x8xf32>
    %cst_110 = arith.constant 0.000000e+00 : f32
    %377 = vector.broadcast %cst_110 : f32 to vector<4x1xf32>
    %cst_111 = arith.constant 0.000000e+00 : f32
    %378 = vector.broadcast %cst_111 : f32 to vector<4x1xf32>
    %cst_112 = arith.constant 0.000000e+00 : f32
    %379 = vector.broadcast %cst_112 : f32 to vector<4x1xf32>
    %cst_113 = arith.constant 0.000000e+00 : f32
    %380 = vector.broadcast %cst_113 : f32 to vector<4x1xf32>
    %381 = vector.extract_strided_slice %373 {offsets = [0, 0], sizes = [4, 128], strides = [1, 1]} : vector<4x137xf32> to vector<4x128xf32>
    %382 = arith.addf %372, %381 : vector<4x128xf32>
    %383 = math.tanh %382 : vector<4x128xf32>
    %384 = vector.extract_strided_slice %383 {offsets = [0, 0], sizes = [4, 32], strides = [1, 1]} : vector<4x128xf32> to vector<4x32xf32>
    %cst_114 = arith.constant 5.000000e-01 : f32
    %385 = vector.broadcast %cst_114 : f32 to vector<4x32xf32>
    %386 = arith.mulf %385, %384 : vector<4x32xf32>
    %cst_115 = arith.constant 5.000000e-01 : f32
    %387 = vector.broadcast %cst_115 : f32 to vector<4x32xf32>
    %388 = arith.addf %386, %387 : vector<4x32xf32>
    %389 = vector.extract_strided_slice %383 {offsets = [0, 32], sizes = [4, 32], strides = [1, 1]} : vector<4x128xf32> to vector<4x32xf32>
    %cst_116 = arith.constant 5.000000e-01 : f32
    %390 = vector.broadcast %cst_116 : f32 to vector<4x32xf32>
    %391 = arith.mulf %390, %389 : vector<4x32xf32>
    %cst_117 = arith.constant 5.000000e-01 : f32
    %392 = vector.broadcast %cst_117 : f32 to vector<4x32xf32>
    %393 = arith.addf %391, %392 : vector<4x32xf32>
    %394 = vector.extract_strided_slice %383 {offsets = [0, 64], sizes = [4, 32], strides = [1, 1]} : vector<4x128xf32> to vector<4x32xf32>
    %395 = vector.extract_strided_slice %383 {offsets = [0, 96], sizes = [4, 32], strides = [1, 1]} : vector<4x128xf32> to vector<4x32xf32>
    %cst_118 = arith.constant 5.000000e-01 : f32
    %396 = vector.broadcast %cst_118 : f32 to vector<4x32xf32>
    %397 = arith.mulf %396, %395 : vector<4x32xf32>
    %cst_119 = arith.constant 5.000000e-01 : f32
    %398 = vector.broadcast %cst_119 : f32 to vector<4x32xf32>
    %399 = arith.addf %397, %398 : vector<4x32xf32>
    %400 = arith.mulf %393, %349 : vector<4x32xf32>
    %401 = arith.mulf %388, %394 : vector<4x32xf32>
    %402 = arith.addf %400, %401 : vector<4x32xf32>
    %403 = math.tanh %402 : vector<4x32xf32>
    %404 = arith.mulf %399, %403 : vector<4x32xf32>
    %c1_120 = arith.constant 1 : index
    %c0_121 = arith.constant 0 : index
    %c0_122 = arith.constant 0 : index
    %c0_123 = arith.constant 0 : index
    %405 = vector.load %arg4[%c1_120, %c0_121, %c0_122, %c0_123] : memref<5x6x4x32xf32, #tpu.memory_space<vmem>>, vector<1x1x4x32xf32>
    %406 = vector.shape_cast %405 : vector<1x1x4x32xf32> to vector<4x32xf32>
    %407 = vector.shape_cast %404 : vector<4x32xf32> to vector<1x1x4x32xf32>
    tpu.vector_store %arg4[%c1_120, %c0_121, %c0_122, %c0_123], %407 {strides = array<i32>} : memref<5x6x4x32xf32, #tpu.memory_space<vmem>>, vector<1x1x4x32xf32>,
    %cst_124 = arith.constant dense<0.000000e+00> : vector<4x137xf32>
    %408 = tpu.matmul %404, %1, %cst_124 {dimension_numbers = #tpu.dot_dimension_numbers<[1], [0], [0], [1], [0, 0, 1, 1], [], []>, precision = #tpu.contract_precision<fp32>} : vector<4x32xf32>, vector<32x137xf32>, vector<4x137xf32> -> vector<4x137xf32>
    %409 = vector.extract_strided_slice %408 {offsets = [0, 128], sizes = [4, 9], strides = [1, 1]} : vector<4x137xf32> to vector<4x9xf32>
    %410 = arith.addf %409, %5 : vector<4x9xf32>
    %411 = vector.extract_strided_slice %410 {offsets = [0, 0], sizes = [4, 8], strides = [1, 1]} : vector<4x9xf32> to vector<4x8xf32>
    %412 = vector.extract_strided_slice %410 {offsets = [0, 8], sizes = [4, 1], strides = [1, 1]} : vector<4x9xf32> to vector<4x1xf32>
    %413 = arith.negf %412 : vector<4x1xf32>
    %414 = math.exp %413 : vector<4x1xf32>
    %cst_125 = arith.constant 1.000000e+00 : f32
    %415 = vector.broadcast %cst_125 : f32 to vector<4x1xf32>
    %416 = arith.addf %415, %414 : vector<4x1xf32>
    %417 = arith.divf %415, %416 : vector<4x1xf32>
    %418 = arith.addf %377, %417 : vector<4x1xf32>
    %cst_126 = arith.constant 1.000000e+00 : f32
    %419 = vector.broadcast %cst_126 : f32 to vector<4x1xf32>
    %420 = arith.minimumf %419, %418 : vector<4x1xf32>
    %421 = arith.subf %420, %378 : vector<4x1xf32>
    %422 = vector.broadcast %421 : vector<4x1xf32> to vector<4x32xf32>
    %423 = arith.mulf %422, %404 : vector<4x32xf32>
    %424 = arith.addf %374, %423 : vector<4x32xf32>
    %425 = vector.broadcast %421 : vector<4x1xf32> to vector<4x32xf32>
    %426 = arith.mulf %425, %402 : vector<4x32xf32>
    %427 = arith.addf %375, %426 : vector<4x32xf32>
    %428 = vector.broadcast %421 : vector<4x1xf32> to vector<4x8xf32>
    %429 = arith.mulf %428, %411 : vector<4x8xf32>
    %430 = arith.addf %376, %429 : vector<4x8xf32>
    %cst_127 = arith.constant 1.000000e+00 : f32
    %431 = vector.broadcast %cst_127 : f32 to vector<4x1xf32>
    %432 = arith.cmpf olt, %420, %431 : vector<4x1xf32>
    %433 = arith.extui %432 : vector<4x1xi1> to vector<4x1xi32>
    %434 = arith.sitofp %433 : vector<4x1xi32> to vector<4x1xf32>
    %435 = arith.addf %379, %434 : vector<4x1xf32>
    %cst_128 = arith.constant 1.000000e+00 : f32
    %436 = vector.broadcast %cst_128 : f32 to vector<4x1xf32>
    %437 = arith.cmpf olt, %420, %436 : vector<4x1xf32>
    %438 = arith.select %437, %420, %380 : vector<4x1xi1>, vector<4x1xf32>
    %439 = vector.extract_strided_slice %408 {offsets = [0, 0], sizes = [4, 128], strides = [1, 1]} : vector<4x137xf32> to vector<4x128xf32>
    %440 = arith.addf %372, %439 : vector<4x128xf32>
    %441 = math.tanh %440 : vector<4x128xf32>
    %442 = vector.extract_strided_slice %441 {offsets = [0, 0], sizes = [4, 32], strides = [1, 1]} : vector<4x128xf32> to vector<4x32xf32>
    %cst_129 = arith.constant 5.000000e-01 : f32
    %443 = vector.broadcast %cst_129 : f32 to vector<4x32xf32>
    %444 = arith.mulf %443, %442 : vector<4x32xf32>
    %cst_130 = arith.constant 5.000000e-01 : f32
    %445 = vector.broadcast %cst_130 : f32 to vector<4x32xf32>
    %446 = arith.addf %444, %445 : vector<4x32xf32>
    %447 = vector.extract_strided_slice %441 {offsets = [0, 32], sizes = [4, 32], strides = [1, 1]} : vector<4x128xf32> to vector<4x32xf32>
    %cst_131 = arith.constant 5.000000e-01 : f32
    %448 = vector.broadcast %cst_131 : f32 to vector<4x32xf32>
    %449 = arith.mulf %448, %447 : vector<4x32xf32>
    %cst_132 = arith.constant 5.000000e-01 : f32
    %450 = vector.broadcast %cst_132 : f32 to vector<4x32xf32>
    %451 = arith.addf %449, %450 : vector<4x32xf32>
    %452 = vector.extract_strided_slice %441 {offsets = [0, 64], sizes = [4, 32], strides = [1, 1]} : vector<4x128xf32> to vector<4x32xf32>
    %453 = vector.extract_strided_slice %441 {offsets = [0, 96], sizes = [4, 32], strides = [1, 1]} : vector<4x128xf32> to vector<4x32xf32>
    %cst_133 = arith.constant 5.000000e-01 : f32
    %454 = vector.broadcast %cst_133 : f32 to vector<4x32xf32>
    %455 = arith.mulf %454, %453 : vector<4x32xf32>
    %cst_134 = arith.constant 5.000000e-01 : f32
    %456 = vector.broadcast %cst_134 : f32 to vector<4x32xf32>
    %457 = arith.addf %455, %456 : vector<4x32xf32>
    %458 = arith.mulf %451, %402 : vector<4x32xf32>
    %459 = arith.mulf %446, %452 : vector<4x32xf32>
    %460 = arith.addf %458, %459 : vector<4x32xf32>
    %461 = math.tanh %460 : vector<4x32xf32>
    %462 = arith.mulf %457, %461 : vector<4x32xf32>
    %c1_135 = arith.constant 1 : index
    %c1_136 = arith.constant 1 : index
    %c0_137 = arith.constant 0 : index
    %c0_138 = arith.constant 0 : index
    %463 = vector.load %arg4[%c1_135, %c1_136, %c0_137, %c0_138] : memref<5x6x4x32xf32, #tpu.memory_space<vmem>>, vector<1x1x4x32xf32>
    %464 = vector.shape_cast %463 : vector<1x1x4x32xf32> to vector<4x32xf32>
    %465 = vector.shape_cast %462 : vector<4x32xf32> to vector<1x1x4x32xf32>
    tpu.vector_store %arg4[%c1_135, %c1_136, %c0_137, %c0_138], %465 {strides = array<i32>} : memref<5x6x4x32xf32, #tpu.memory_space<vmem>>, vector<1x1x4x32xf32>,
    %cst_139 = arith.constant dense<0.000000e+00> : vector<4x137xf32>
    %466 = tpu.matmul %462, %1, %cst_139 {dimension_numbers = #tpu.dot_dimension_numbers<[1], [0], [0], [1], [0, 0, 1, 1], [], []>, precision = #tpu.contract_precision<fp32>} : vector<4x32xf32>, vector<32x137xf32>, vector<4x137xf32> -> vector<4x137xf32>
    %467 = vector.extract_strided_slice %466 {offsets = [0, 128], sizes = [4, 9], strides = [1, 1]} : vector<4x137xf32> to vector<4x9xf32>
    %468 = arith.addf %467, %5 : vector<4x9xf32>
    %469 = vector.extract_strided_slice %468 {offsets = [0, 0], sizes = [4, 8], strides = [1, 1]} : vector<4x9xf32> to vector<4x8xf32>
    %470 = vector.extract_strided_slice %468 {offsets = [0, 8], sizes = [4, 1], strides = [1, 1]} : vector<4x9xf32> to vector<4x1xf32>
    %471 = arith.negf %470 : vector<4x1xf32>
    %472 = math.exp %471 : vector<4x1xf32>
    %cst_140 = arith.constant 1.000000e+00 : f32
    %473 = vector.broadcast %cst_140 : f32 to vector<4x1xf32>
    %474 = arith.addf %473, %472 : vector<4x1xf32>
    %475 = arith.divf %473, %474 : vector<4x1xf32>
    %476 = arith.addf %418, %475 : vector<4x1xf32>
    %cst_141 = arith.constant 1.000000e+00 : f32
    %477 = vector.broadcast %cst_141 : f32 to vector<4x1xf32>
    %478 = arith.minimumf %477, %476 : vector<4x1xf32>
    %479 = arith.subf %478, %420 : vector<4x1xf32>
    %480 = vector.broadcast %479 : vector<4x1xf32> to vector<4x32xf32>
    %481 = arith.mulf %480, %462 : vector<4x32xf32>
    %482 = arith.addf %424, %481 : vector<4x32xf32>
    %483 = vector.broadcast %479 : vector<4x1xf32> to vector<4x32xf32>
    %484 = arith.mulf %483, %460 : vector<4x32xf32>
    %485 = arith.addf %427, %484 : vector<4x32xf32>
    %486 = vector.broadcast %479 : vector<4x1xf32> to vector<4x8xf32>
    %487 = arith.mulf %486, %469 : vector<4x8xf32>
    %488 = arith.addf %430, %487 : vector<4x8xf32>
    %cst_142 = arith.constant 1.000000e+00 : f32
    %489 = vector.broadcast %cst_142 : f32 to vector<4x1xf32>
    %490 = arith.cmpf olt, %478, %489 : vector<4x1xf32>
    %491 = arith.extui %490 : vector<4x1xi1> to vector<4x1xi32>
    %492 = arith.sitofp %491 : vector<4x1xi32> to vector<4x1xf32>
    %493 = arith.addf %435, %492 : vector<4x1xf32>
    %cst_143 = arith.constant 1.000000e+00 : f32
    %494 = vector.broadcast %cst_143 : f32 to vector<4x1xf32>
    %495 = arith.cmpf olt, %478, %494 : vector<4x1xf32>
    %496 = arith.select %495, %478, %438 : vector<4x1xi1>, vector<4x1xf32>
    %497 = vector.extract_strided_slice %466 {offsets = [0, 0], sizes = [4, 128], strides = [1, 1]} : vector<4x137xf32> to vector<4x128xf32>
    %498 = arith.addf %372, %497 : vector<4x128xf32>
    %499 = math.tanh %498 : vector<4x128xf32>
    %500 = vector.extract_strided_slice %499 {offsets = [0, 0], sizes = [4, 32], strides = [1, 1]} : vector<4x128xf32> to vector<4x32xf32>
    %cst_144 = arith.constant 5.000000e-01 : f32
    %501 = vector.broadcast %cst_144 : f32 to vector<4x32xf32>
    %502 = arith.mulf %501, %500 : vector<4x32xf32>
    %cst_145 = arith.constant 5.000000e-01 : f32
    %503 = vector.broadcast %cst_145 : f32 to vector<4x32xf32>
    %504 = arith.addf %502, %503 : vector<4x32xf32>
    %505 = vector.extract_strided_slice %499 {offsets = [0, 32], sizes = [4, 32], strides = [1, 1]} : vector<4x128xf32> to vector<4x32xf32>
    %cst_146 = arith.constant 5.000000e-01 : f32
    %506 = vector.broadcast %cst_146 : f32 to vector<4x32xf32>
    %507 = arith.mulf %506, %505 : vector<4x32xf32>
    %cst_147 = arith.constant 5.000000e-01 : f32
    %508 = vector.broadcast %cst_147 : f32 to vector<4x32xf32>
    %509 = arith.addf %507, %508 : vector<4x32xf32>
    %510 = vector.extract_strided_slice %499 {offsets = [0, 64], sizes = [4, 32], strides = [1, 1]} : vector<4x128xf32> to vector<4x32xf32>
    %511 = vector.extract_strided_slice %499 {offsets = [0, 96], sizes = [4, 32], strides = [1, 1]} : vector<4x128xf32> to vector<4x32xf32>
    %cst_148 = arith.constant 5.000000e-01 : f32
    %512 = vector.broadcast %cst_148 : f32 to vector<4x32xf32>
    %513 = arith.mulf %512, %511 : vector<4x32xf32>
    %cst_149 = arith.constant 5.000000e-01 : f32
    %514 = vector.broadcast %cst_149 : f32 to vector<4x32xf32>
    %515 = arith.addf %513, %514 : vector<4x32xf32>
    %516 = arith.mulf %509, %460 : vector<4x32xf32>
    %517 = arith.mulf %504, %510 : vector<4x32xf32>
    %518 = arith.addf %516, %517 : vector<4x32xf32>
    %519 = math.tanh %518 : vector<4x32xf32>
    %520 = arith.mulf %515, %519 : vector<4x32xf32>
    %c1_150 = arith.constant 1 : index
    %c2_151 = arith.constant 2 : index
    %c0_152 = arith.constant 0 : index
    %c0_153 = arith.constant 0 : index
    %521 = vector.load %arg4[%c1_150, %c2_151, %c0_152, %c0_153] : memref<5x6x4x32xf32, #tpu.memory_space<vmem>>, vector<1x1x4x32xf32>
    %522 = vector.shape_cast %521 : vector<1x1x4x32xf32> to vector<4x32xf32>
    %523 = vector.shape_cast %520 : vector<4x32xf32> to vector<1x1x4x32xf32>
    tpu.vector_store %arg4[%c1_150, %c2_151, %c0_152, %c0_153], %523 {strides = array<i32>} : memref<5x6x4x32xf32, #tpu.memory_space<vmem>>, vector<1x1x4x32xf32>,
    %cst_154 = arith.constant dense<0.000000e+00> : vector<4x137xf32>
    %524 = tpu.matmul %520, %1, %cst_154 {dimension_numbers = #tpu.dot_dimension_numbers<[1], [0], [0], [1], [0, 0, 1, 1], [], []>, precision = #tpu.contract_precision<fp32>} : vector<4x32xf32>, vector<32x137xf32>, vector<4x137xf32> -> vector<4x137xf32>
    %525 = vector.extract_strided_slice %524 {offsets = [0, 128], sizes = [4, 9], strides = [1, 1]} : vector<4x137xf32> to vector<4x9xf32>
    %526 = arith.addf %525, %5 : vector<4x9xf32>
    %527 = vector.extract_strided_slice %526 {offsets = [0, 0], sizes = [4, 8], strides = [1, 1]} : vector<4x9xf32> to vector<4x8xf32>
    %528 = vector.extract_strided_slice %526 {offsets = [0, 8], sizes = [4, 1], strides = [1, 1]} : vector<4x9xf32> to vector<4x1xf32>
    %529 = arith.negf %528 : vector<4x1xf32>
    %530 = math.exp %529 : vector<4x1xf32>
    %cst_155 = arith.constant 1.000000e+00 : f32
    %531 = vector.broadcast %cst_155 : f32 to vector<4x1xf32>
    %532 = arith.addf %531, %530 : vector<4x1xf32>
    %533 = arith.divf %531, %532 : vector<4x1xf32>
    %534 = arith.addf %476, %533 : vector<4x1xf32>
    %cst_156 = arith.constant 1.000000e+00 : f32
    %535 = vector.broadcast %cst_156 : f32 to vector<4x1xf32>
    %536 = arith.minimumf %535, %534 : vector<4x1xf32>
    %537 = arith.subf %536, %478 : vector<4x1xf32>
    %538 = vector.broadcast %537 : vector<4x1xf32> to vector<4x32xf32>
    %539 = arith.mulf %538, %520 : vector<4x32xf32>
    %540 = arith.addf %482, %539 : vector<4x32xf32>
    %541 = vector.broadcast %537 : vector<4x1xf32> to vector<4x32xf32>
    %542 = arith.mulf %541, %518 : vector<4x32xf32>
    %543 = arith.addf %485, %542 : vector<4x32xf32>
    %544 = vector.broadcast %537 : vector<4x1xf32> to vector<4x8xf32>
    %545 = arith.mulf %544, %527 : vector<4x8xf32>
    %546 = arith.addf %488, %545 : vector<4x8xf32>
    %cst_157 = arith.constant 1.000000e+00 : f32
    %547 = vector.broadcast %cst_157 : f32 to vector<4x1xf32>
    %548 = arith.cmpf olt, %536, %547 : vector<4x1xf32>
    %549 = arith.extui %548 : vector<4x1xi1> to vector<4x1xi32>
    %550 = arith.sitofp %549 : vector<4x1xi32> to vector<4x1xf32>
    %551 = arith.addf %493, %550 : vector<4x1xf32>
    %cst_158 = arith.constant 1.000000e+00 : f32
    %552 = vector.broadcast %cst_158 : f32 to vector<4x1xf32>
    %553 = arith.cmpf olt, %536, %552 : vector<4x1xf32>
    %554 = arith.select %553, %536, %496 : vector<4x1xi1>, vector<4x1xf32>
    %555 = vector.extract_strided_slice %524 {offsets = [0, 0], sizes = [4, 128], strides = [1, 1]} : vector<4x137xf32> to vector<4x128xf32>
    %556 = arith.addf %372, %555 : vector<4x128xf32>
    %557 = math.tanh %556 : vector<4x128xf32>
    %558 = vector.extract_strided_slice %557 {offsets = [0, 0], sizes = [4, 32], strides = [1, 1]} : vector<4x128xf32> to vector<4x32xf32>
    %cst_159 = arith.constant 5.000000e-01 : f32
    %559 = vector.broadcast %cst_159 : f32 to vector<4x32xf32>
    %560 = arith.mulf %559, %558 : vector<4x32xf32>
    %cst_160 = arith.constant 5.000000e-01 : f32
    %561 = vector.broadcast %cst_160 : f32 to vector<4x32xf32>
    %562 = arith.addf %560, %561 : vector<4x32xf32>
    %563 = vector.extract_strided_slice %557 {offsets = [0, 32], sizes = [4, 32], strides = [1, 1]} : vector<4x128xf32> to vector<4x32xf32>
    %cst_161 = arith.constant 5.000000e-01 : f32
    %564 = vector.broadcast %cst_161 : f32 to vector<4x32xf32>
    %565 = arith.mulf %564, %563 : vector<4x32xf32>
    %cst_162 = arith.constant 5.000000e-01 : f32
    %566 = vector.broadcast %cst_162 : f32 to vector<4x32xf32>
    %567 = arith.addf %565, %566 : vector<4x32xf32>
    %568 = vector.extract_strided_slice %557 {offsets = [0, 64], sizes = [4, 32], strides = [1, 1]} : vector<4x128xf32> to vector<4x32xf32>
    %569 = vector.extract_strided_slice %557 {offsets = [0, 96], sizes = [4, 32], strides = [1, 1]} : vector<4x128xf32> to vector<4x32xf32>
    %cst_163 = arith.constant 5.000000e-01 : f32
    %570 = vector.broadcast %cst_163 : f32 to vector<4x32xf32>
    %571 = arith.mulf %570, %569 : vector<4x32xf32>
    %cst_164 = arith.constant 5.000000e-01 : f32
    %572 = vector.broadcast %cst_164 : f32 to vector<4x32xf32>
    %573 = arith.addf %571, %572 : vector<4x32xf32>
    %574 = arith.mulf %567, %518 : vector<4x32xf32>
    %575 = arith.mulf %562, %568 : vector<4x32xf32>
    %576 = arith.addf %574, %575 : vector<4x32xf32>
    %577 = math.tanh %576 : vector<4x32xf32>
    %578 = arith.mulf %573, %577 : vector<4x32xf32>
    %c1_165 = arith.constant 1 : index
    %c3_166 = arith.constant 3 : index
    %c0_167 = arith.constant 0 : index
    %c0_168 = arith.constant 0 : index
    %579 = vector.load %arg4[%c1_165, %c3_166, %c0_167, %c0_168] : memref<5x6x4x32xf32, #tpu.memory_space<vmem>>, vector<1x1x4x32xf32>
    %580 = vector.shape_cast %579 : vector<1x1x4x32xf32> to vector<4x32xf32>
    %581 = vector.shape_cast %578 : vector<4x32xf32> to vector<1x1x4x32xf32>
    tpu.vector_store %arg4[%c1_165, %c3_166, %c0_167, %c0_168], %581 {strides = array<i32>} : memref<5x6x4x32xf32, #tpu.memory_space<vmem>>, vector<1x1x4x32xf32>,
    %cst_169 = arith.constant dense<0.000000e+00> : vector<4x137xf32>
    %582 = tpu.matmul %578, %1, %cst_169 {dimension_numbers = #tpu.dot_dimension_numbers<[1], [0], [0], [1], [0, 0, 1, 1], [], []>, precision = #tpu.contract_precision<fp32>} : vector<4x32xf32>, vector<32x137xf32>, vector<4x137xf32> -> vector<4x137xf32>
    %583 = vector.extract_strided_slice %582 {offsets = [0, 128], sizes = [4, 9], strides = [1, 1]} : vector<4x137xf32> to vector<4x9xf32>
    %584 = arith.addf %583, %5 : vector<4x9xf32>
    %585 = vector.extract_strided_slice %584 {offsets = [0, 0], sizes = [4, 8], strides = [1, 1]} : vector<4x9xf32> to vector<4x8xf32>
    %586 = vector.extract_strided_slice %584 {offsets = [0, 8], sizes = [4, 1], strides = [1, 1]} : vector<4x9xf32> to vector<4x1xf32>
    %587 = arith.negf %586 : vector<4x1xf32>
    %588 = math.exp %587 : vector<4x1xf32>
    %cst_170 = arith.constant 1.000000e+00 : f32
    %589 = vector.broadcast %cst_170 : f32 to vector<4x1xf32>
    %590 = arith.addf %589, %588 : vector<4x1xf32>
    %591 = arith.divf %589, %590 : vector<4x1xf32>
    %592 = arith.addf %534, %591 : vector<4x1xf32>
    %cst_171 = arith.constant 1.000000e+00 : f32
    %593 = vector.broadcast %cst_171 : f32 to vector<4x1xf32>
    %594 = arith.minimumf %593, %592 : vector<4x1xf32>
    %595 = arith.subf %594, %536 : vector<4x1xf32>
    %596 = vector.broadcast %595 : vector<4x1xf32> to vector<4x32xf32>
    %597 = arith.mulf %596, %578 : vector<4x32xf32>
    %598 = arith.addf %540, %597 : vector<4x32xf32>
    %599 = vector.broadcast %595 : vector<4x1xf32> to vector<4x32xf32>
    %600 = arith.mulf %599, %576 : vector<4x32xf32>
    %601 = arith.addf %543, %600 : vector<4x32xf32>
    %602 = vector.broadcast %595 : vector<4x1xf32> to vector<4x8xf32>
    %603 = arith.mulf %602, %585 : vector<4x8xf32>
    %604 = arith.addf %546, %603 : vector<4x8xf32>
    %cst_172 = arith.constant 1.000000e+00 : f32
    %605 = vector.broadcast %cst_172 : f32 to vector<4x1xf32>
    %606 = arith.cmpf olt, %594, %605 : vector<4x1xf32>
    %607 = arith.extui %606 : vector<4x1xi1> to vector<4x1xi32>
    %608 = arith.sitofp %607 : vector<4x1xi32> to vector<4x1xf32>
    %609 = arith.addf %551, %608 : vector<4x1xf32>
    %cst_173 = arith.constant 1.000000e+00 : f32
    %610 = vector.broadcast %cst_173 : f32 to vector<4x1xf32>
    %611 = arith.cmpf olt, %594, %610 : vector<4x1xf32>
    %612 = arith.select %611, %594, %554 : vector<4x1xi1>, vector<4x1xf32>
    %613 = vector.extract_strided_slice %582 {offsets = [0, 0], sizes = [4, 128], strides = [1, 1]} : vector<4x137xf32> to vector<4x128xf32>
    %614 = arith.addf %372, %613 : vector<4x128xf32>
    %615 = math.tanh %614 : vector<4x128xf32>
    %616 = vector.extract_strided_slice %615 {offsets = [0, 0], sizes = [4, 32], strides = [1, 1]} : vector<4x128xf32> to vector<4x32xf32>
    %cst_174 = arith.constant 5.000000e-01 : f32
    %617 = vector.broadcast %cst_174 : f32 to vector<4x32xf32>
    %618 = arith.mulf %617, %616 : vector<4x32xf32>
    %cst_175 = arith.constant 5.000000e-01 : f32
    %619 = vector.broadcast %cst_175 : f32 to vector<4x32xf32>
    %620 = arith.addf %618, %619 : vector<4x32xf32>
    %621 = vector.extract_strided_slice %615 {offsets = [0, 32], sizes = [4, 32], strides = [1, 1]} : vector<4x128xf32> to vector<4x32xf32>
    %cst_176 = arith.constant 5.000000e-01 : f32
    %622 = vector.broadcast %cst_176 : f32 to vector<4x32xf32>
    %623 = arith.mulf %622, %621 : vector<4x32xf32>
    %cst_177 = arith.constant 5.000000e-01 : f32
    %624 = vector.broadcast %cst_177 : f32 to vector<4x32xf32>
    %625 = arith.addf %623, %624 : vector<4x32xf32>
    %626 = vector.extract_strided_slice %615 {offsets = [0, 64], sizes = [4, 32], strides = [1, 1]} : vector<4x128xf32> to vector<4x32xf32>
    %627 = vector.extract_strided_slice %615 {offsets = [0, 96], sizes = [4, 32], strides = [1, 1]} : vector<4x128xf32> to vector<4x32xf32>
    %cst_178 = arith.constant 5.000000e-01 : f32
    %628 = vector.broadcast %cst_178 : f32 to vector<4x32xf32>
    %629 = arith.mulf %628, %627 : vector<4x32xf32>
    %cst_179 = arith.constant 5.000000e-01 : f32
    %630 = vector.broadcast %cst_179 : f32 to vector<4x32xf32>
    %631 = arith.addf %629, %630 : vector<4x32xf32>
    %632 = arith.mulf %625, %576 : vector<4x32xf32>
    %633 = arith.mulf %620, %626 : vector<4x32xf32>
    %634 = arith.addf %632, %633 : vector<4x32xf32>
    %635 = math.tanh %634 : vector<4x32xf32>
    %636 = arith.mulf %631, %635 : vector<4x32xf32>
    %c1_180 = arith.constant 1 : index
    %c4_181 = arith.constant 4 : index
    %c0_182 = arith.constant 0 : index
    %c0_183 = arith.constant 0 : index
    %637 = vector.load %arg4[%c1_180, %c4_181, %c0_182, %c0_183] : memref<5x6x4x32xf32, #tpu.memory_space<vmem>>, vector<1x1x4x32xf32>
    %638 = vector.shape_cast %637 : vector<1x1x4x32xf32> to vector<4x32xf32>
    %639 = vector.shape_cast %636 : vector<4x32xf32> to vector<1x1x4x32xf32>
    tpu.vector_store %arg4[%c1_180, %c4_181, %c0_182, %c0_183], %639 {strides = array<i32>} : memref<5x6x4x32xf32, #tpu.memory_space<vmem>>, vector<1x1x4x32xf32>,
    %cst_184 = arith.constant dense<0.000000e+00> : vector<4x137xf32>
    %640 = tpu.matmul %636, %1, %cst_184 {dimension_numbers = #tpu.dot_dimension_numbers<[1], [0], [0], [1], [0, 0, 1, 1], [], []>, precision = #tpu.contract_precision<fp32>} : vector<4x32xf32>, vector<32x137xf32>, vector<4x137xf32> -> vector<4x137xf32>
    %641 = vector.extract_strided_slice %640 {offsets = [0, 128], sizes = [4, 9], strides = [1, 1]} : vector<4x137xf32> to vector<4x9xf32>
    %642 = arith.addf %641, %5 : vector<4x9xf32>
    %643 = vector.extract_strided_slice %642 {offsets = [0, 0], sizes = [4, 8], strides = [1, 1]} : vector<4x9xf32> to vector<4x8xf32>
    %644 = vector.extract_strided_slice %642 {offsets = [0, 8], sizes = [4, 1], strides = [1, 1]} : vector<4x9xf32> to vector<4x1xf32>
    %645 = arith.negf %644 : vector<4x1xf32>
    %646 = math.exp %645 : vector<4x1xf32>
    %cst_185 = arith.constant 1.000000e+00 : f32
    %647 = vector.broadcast %cst_185 : f32 to vector<4x1xf32>
    %648 = arith.addf %647, %646 : vector<4x1xf32>
    %649 = arith.divf %647, %648 : vector<4x1xf32>
    %650 = arith.addf %592, %649 : vector<4x1xf32>
    %cst_186 = arith.constant 1.000000e+00 : f32
    %651 = vector.broadcast %cst_186 : f32 to vector<4x1xf32>
    %652 = arith.minimumf %651, %650 : vector<4x1xf32>
    %653 = arith.subf %652, %594 : vector<4x1xf32>
    %654 = vector.broadcast %653 : vector<4x1xf32> to vector<4x32xf32>
    %655 = arith.mulf %654, %636 : vector<4x32xf32>
    %656 = arith.addf %598, %655 : vector<4x32xf32>
    %657 = vector.broadcast %653 : vector<4x1xf32> to vector<4x32xf32>
    %658 = arith.mulf %657, %634 : vector<4x32xf32>
    %659 = arith.addf %601, %658 : vector<4x32xf32>
    %660 = vector.broadcast %653 : vector<4x1xf32> to vector<4x8xf32>
    %661 = arith.mulf %660, %643 : vector<4x8xf32>
    %662 = arith.addf %604, %661 : vector<4x8xf32>
    %cst_187 = arith.constant 1.000000e+00 : f32
    %663 = vector.broadcast %cst_187 : f32 to vector<4x1xf32>
    %664 = arith.cmpf olt, %652, %663 : vector<4x1xf32>
    %665 = arith.extui %664 : vector<4x1xi1> to vector<4x1xi32>
    %666 = arith.sitofp %665 : vector<4x1xi32> to vector<4x1xf32>
    %667 = arith.addf %609, %666 : vector<4x1xf32>
    %cst_188 = arith.constant 1.000000e+00 : f32
    %668 = vector.broadcast %cst_188 : f32 to vector<4x1xf32>
    %669 = arith.cmpf olt, %652, %668 : vector<4x1xf32>
    %670 = arith.select %669, %652, %612 : vector<4x1xi1>, vector<4x1xf32>
    %671 = vector.extract_strided_slice %640 {offsets = [0, 0], sizes = [4, 128], strides = [1, 1]} : vector<4x137xf32> to vector<4x128xf32>
    %672 = arith.addf %372, %671 : vector<4x128xf32>
    %673 = math.tanh %672 : vector<4x128xf32>
    %674 = vector.extract_strided_slice %673 {offsets = [0, 0], sizes = [4, 32], strides = [1, 1]} : vector<4x128xf32> to vector<4x32xf32>
    %cst_189 = arith.constant 5.000000e-01 : f32
    %675 = vector.broadcast %cst_189 : f32 to vector<4x32xf32>
    %676 = arith.mulf %675, %674 : vector<4x32xf32>
    %cst_190 = arith.constant 5.000000e-01 : f32
    %677 = vector.broadcast %cst_190 : f32 to vector<4x32xf32>
    %678 = arith.addf %676, %677 : vector<4x32xf32>
    %679 = vector.extract_strided_slice %673 {offsets = [0, 32], sizes = [4, 32], strides = [1, 1]} : vector<4x128xf32> to vector<4x32xf32>
    %cst_191 = arith.constant 5.000000e-01 : f32
    %680 = vector.broadcast %cst_191 : f32 to vector<4x32xf32>
    %681 = arith.mulf %680, %679 : vector<4x32xf32>
    %cst_192 = arith.constant 5.000000e-01 : f32
    %682 = vector.broadcast %cst_192 : f32 to vector<4x32xf32>
    %683 = arith.addf %681, %682 : vector<4x32xf32>
    %684 = vector.extract_strided_slice %673 {offsets = [0, 64], sizes = [4, 32], strides = [1, 1]} : vector<4x128xf32> to vector<4x32xf32>
    %685 = vector.extract_strided_slice %673 {offsets = [0, 96], sizes = [4, 32], strides = [1, 1]} : vector<4x128xf32> to vector<4x32xf32>
    %cst_193 = arith.constant 5.000000e-01 : f32
    %686 = vector.broadcast %cst_193 : f32 to vector<4x32xf32>
    %687 = arith.mulf %686, %685 : vector<4x32xf32>
    %cst_194 = arith.constant 5.000000e-01 : f32
    %688 = vector.broadcast %cst_194 : f32 to vector<4x32xf32>
    %689 = arith.addf %687, %688 : vector<4x32xf32>
    %690 = arith.mulf %683, %634 : vector<4x32xf32>
    %691 = arith.mulf %678, %684 : vector<4x32xf32>
    %692 = arith.addf %690, %691 : vector<4x32xf32>
    %693 = math.tanh %692 : vector<4x32xf32>
    %694 = arith.mulf %689, %693 : vector<4x32xf32>
    %c1_195 = arith.constant 1 : index
    %c5_196 = arith.constant 5 : index
    %c0_197 = arith.constant 0 : index
    %c0_198 = arith.constant 0 : index
    %695 = vector.load %arg4[%c1_195, %c5_196, %c0_197, %c0_198] : memref<5x6x4x32xf32, #tpu.memory_space<vmem>>, vector<1x1x4x32xf32>
    %696 = vector.shape_cast %695 : vector<1x1x4x32xf32> to vector<4x32xf32>
    %697 = vector.shape_cast %694 : vector<4x32xf32> to vector<1x1x4x32xf32>
    tpu.vector_store %arg4[%c1_195, %c5_196, %c0_197, %c0_198], %697 {strides = array<i32>} : memref<5x6x4x32xf32, #tpu.memory_space<vmem>>, vector<1x1x4x32xf32>,
    %cst_199 = arith.constant dense<0.000000e+00> : vector<4x137xf32>
    %698 = tpu.matmul %694, %1, %cst_199 {dimension_numbers = #tpu.dot_dimension_numbers<[1], [0], [0], [1], [0, 0, 1, 1], [], []>, precision = #tpu.contract_precision<fp32>} : vector<4x32xf32>, vector<32x137xf32>, vector<4x137xf32> -> vector<4x137xf32>
    %699 = vector.extract_strided_slice %698 {offsets = [0, 128], sizes = [4, 9], strides = [1, 1]} : vector<4x137xf32> to vector<4x9xf32>
    %700 = arith.addf %699, %5 : vector<4x9xf32>
    %701 = vector.extract_strided_slice %700 {offsets = [0, 0], sizes = [4, 8], strides = [1, 1]} : vector<4x9xf32> to vector<4x8xf32>
    %cst_200 = arith.constant 1.000000e+00 : f32
    %702 = vector.broadcast %cst_200 : f32 to vector<4x1xf32>
    %703 = arith.subf %702, %652 : vector<4x1xf32>
    %704 = vector.broadcast %703 : vector<4x1xf32> to vector<4x32xf32>
    %705 = arith.mulf %704, %694 : vector<4x32xf32>
    %706 = arith.addf %656, %705 : vector<4x32xf32>
    %707 = vector.broadcast %703 : vector<4x1xf32> to vector<4x32xf32>
    %708 = arith.mulf %707, %692 : vector<4x32xf32>
    %709 = arith.addf %659, %708 : vector<4x32xf32>
    %710 = vector.broadcast %703 : vector<4x1xf32> to vector<4x8xf32>
    %711 = arith.mulf %710, %701 : vector<4x8xf32>
    %712 = arith.addf %662, %711 : vector<4x8xf32>
    %cst_201 = arith.constant 1.000000e+00 : f32
    %713 = vector.broadcast %cst_201 : f32 to vector<4x1xf32>
    %714 = arith.cmpf olt, %702, %713 : vector<4x1xf32>
    %715 = arith.extui %714 : vector<4x1xi1> to vector<4x1xi32>
    %716 = arith.sitofp %715 : vector<4x1xi32> to vector<4x1xf32>
    %717 = arith.addf %667, %716 : vector<4x1xf32>
    %cst_202 = arith.constant 1.000000e+00 : f32
    %718 = vector.broadcast %cst_202 : f32 to vector<4x1xf32>
    %719 = arith.cmpf olt, %702, %718 : vector<4x1xf32>
    %720 = arith.select %719, %702, %670 : vector<4x1xi1>, vector<4x1xf32>
    %cst_203 = arith.constant 0.000000e+00 : f32
    %721 = vector.broadcast %cst_203 : f32 to vector<4x1xf32>
    %722 = arith.cmpf ogt, %717, %721 : vector<4x1xf32>
    %cst_204 = arith.constant 1.000000e+00 : f32
    %723 = vector.broadcast %cst_204 : f32 to vector<4x1xf32>
    %724 = arith.subf %723, %720 : vector<4x1xf32>
    %cst_205 = arith.constant 0.000000e+00 : f32
    %725 = vector.broadcast %cst_205 : f32 to vector<4x1xf32>
    %726 = arith.select %722, %724, %725 : vector<4x1xi1>, vector<4x1xf32>
    %727 = arith.addf %717, %726 : vector<4x1xf32>
    %728 = tpu.concatenate %712, %727, %717 in 1 : vector<4x8xf32>, vector<4x1xf32>, vector<4x1xf32> -> vector<4x10xf32>
    %c1_206 = arith.constant 1 : index
    %c0_207 = arith.constant 0 : index
    %c0_208 = arith.constant 0 : index
    %729 = vector.load %arg3[%c1_206, %c0_207, %c0_208] : memref<5x4x10xf32, #tpu.memory_space<vmem>>, vector<1x4x10xf32>
    %730 = vector.shape_cast %729 : vector<1x4x10xf32> to vector<4x10xf32>
    %731 = vector.shape_cast %728 : vector<4x10xf32> to vector<1x4x10xf32>
    tpu.vector_store %arg3[%c1_206, %c0_207, %c0_208], %731 {strides = array<i32>} : memref<5x4x10xf32, #tpu.memory_space<vmem>>, vector<1x4x10xf32>,
    %732 = vector.extract_strided_slice %9 {offsets = [8, 0], sizes = [4, 128], strides = [1, 1]} : vector<20x128xf32> to vector<4x128xf32>
    %cst_209 = arith.constant dense<0.000000e+00> : vector<4x137xf32>
    %733 = tpu.matmul %706, %1, %cst_209 {dimension_numbers = #tpu.dot_dimension_numbers<[1], [0], [0], [1], [0, 0, 1, 1], [], []>, precision = #tpu.contract_precision<fp32>} : vector<4x32xf32>, vector<32x137xf32>, vector<4x137xf32> -> vector<4x137xf32>
    %cst_210 = arith.constant 0.000000e+00 : f32
    %734 = vector.broadcast %cst_210 : f32 to vector<4x32xf32>
    %cst_211 = arith.constant 0.000000e+00 : f32
    %735 = vector.broadcast %cst_211 : f32 to vector<4x32xf32>
    %cst_212 = arith.constant 0.000000e+00 : f32
    %736 = vector.broadcast %cst_212 : f32 to vector<4x8xf32>
    %cst_213 = arith.constant 0.000000e+00 : f32
    %737 = vector.broadcast %cst_213 : f32 to vector<4x1xf32>
    %cst_214 = arith.constant 0.000000e+00 : f32
    %738 = vector.broadcast %cst_214 : f32 to vector<4x1xf32>
    %cst_215 = arith.constant 0.000000e+00 : f32
    %739 = vector.broadcast %cst_215 : f32 to vector<4x1xf32>
    %cst_216 = arith.constant 0.000000e+00 : f32
    %740 = vector.broadcast %cst_216 : f32 to vector<4x1xf32>
    %741 = vector.extract_strided_slice %733 {offsets = [0, 0], sizes = [4, 128], strides = [1, 1]} : vector<4x137xf32> to vector<4x128xf32>
    %742 = arith.addf %732, %741 : vector<4x128xf32>
    %743 = math.tanh %742 : vector<4x128xf32>
    %744 = vector.extract_strided_slice %743 {offsets = [0, 0], sizes = [4, 32], strides = [1, 1]} : vector<4x128xf32> to vector<4x32xf32>
    %cst_217 = arith.constant 5.000000e-01 : f32
    %745 = vector.broadcast %cst_217 : f32 to vector<4x32xf32>
    %746 = arith.mulf %745, %744 : vector<4x32xf32>
    %cst_218 = arith.constant 5.000000e-01 : f32
    %747 = vector.broadcast %cst_218 : f32 to vector<4x32xf32>
    %748 = arith.addf %746, %747 : vector<4x32xf32>
    %749 = vector.extract_strided_slice %743 {offsets = [0, 32], sizes = [4, 32], strides = [1, 1]} : vector<4x128xf32> to vector<4x32xf32>
    %cst_219 = arith.constant 5.000000e-01 : f32
    %750 = vector.broadcast %cst_219 : f32 to vector<4x32xf32>
    %751 = arith.mulf %750, %749 : vector<4x32xf32>
    %cst_220 = arith.constant 5.000000e-01 : f32
    %752 = vector.broadcast %cst_220 : f32 to vector<4x32xf32>
    %753 = arith.addf %751, %752 : vector<4x32xf32>
    %754 = vector.extract_strided_slice %743 {offsets = [0, 64], sizes = [4, 32], strides = [1, 1]} : vector<4x128xf32> to vector<4x32xf32>
    %755 = vector.extract_strided_slice %743 {offsets = [0, 96], sizes = [4, 32], strides = [1, 1]} : vector<4x128xf32> to vector<4x32xf32>
    %cst_221 = arith.constant 5.000000e-01 : f32
    %756 = vector.broadcast %cst_221 : f32 to vector<4x32xf32>
    %757 = arith.mulf %756, %755 : vector<4x32xf32>
    %cst_222 = arith.constant 5.000000e-01 : f32
    %758 = vector.broadcast %cst_222 : f32 to vector<4x32xf32>
    %759 = arith.addf %757, %758 : vector<4x32xf32>
    %760 = arith.mulf %753, %709 : vector<4x32xf32>
    %761 = arith.mulf %748, %754 : vector<4x32xf32>
    %762 = arith.addf %760, %761 : vector<4x32xf32>
    %763 = math.tanh %762 : vector<4x32xf32>
    %764 = arith.mulf %759, %763 : vector<4x32xf32>
    %c2_223 = arith.constant 2 : index
    %c0_224 = arith.constant 0 : index
    %c0_225 = arith.constant 0 : index
    %c0_226 = arith.constant 0 : index
    %765 = vector.load %arg4[%c2_223, %c0_224, %c0_225, %c0_226] : memref<5x6x4x32xf32, #tpu.memory_space<vmem>>, vector<1x1x4x32xf32>
    %766 = vector.shape_cast %765 : vector<1x1x4x32xf32> to vector<4x32xf32>
    %767 = vector.shape_cast %764 : vector<4x32xf32> to vector<1x1x4x32xf32>
    tpu.vector_store %arg4[%c2_223, %c0_224, %c0_225, %c0_226], %767 {strides = array<i32>} : memref<5x6x4x32xf32, #tpu.memory_space<vmem>>, vector<1x1x4x32xf32>,
    %cst_227 = arith.constant dense<0.000000e+00> : vector<4x137xf32>
    %768 = tpu.matmul %764, %1, %cst_227 {dimension_numbers = #tpu.dot_dimension_numbers<[1], [0], [0], [1], [0, 0, 1, 1], [], []>, precision = #tpu.contract_precision<fp32>} : vector<4x32xf32>, vector<32x137xf32>, vector<4x137xf32> -> vector<4x137xf32>
    %769 = vector.extract_strided_slice %768 {offsets = [0, 128], sizes = [4, 9], strides = [1, 1]} : vector<4x137xf32> to vector<4x9xf32>
    %770 = arith.addf %769, %5 : vector<4x9xf32>
    %771 = vector.extract_strided_slice %770 {offsets = [0, 0], sizes = [4, 8], strides = [1, 1]} : vector<4x9xf32> to vector<4x8xf32>
    %772 = vector.extract_strided_slice %770 {offsets = [0, 8], sizes = [4, 1], strides = [1, 1]} : vector<4x9xf32> to vector<4x1xf32>
    %773 = arith.negf %772 : vector<4x1xf32>
    %774 = math.exp %773 : vector<4x1xf32>
    %cst_228 = arith.constant 1.000000e+00 : f32
    %775 = vector.broadcast %cst_228 : f32 to vector<4x1xf32>
    %776 = arith.addf %775, %774 : vector<4x1xf32>
    %777 = arith.divf %775, %776 : vector<4x1xf32>
    %778 = arith.addf %737, %777 : vector<4x1xf32>
    %cst_229 = arith.constant 1.000000e+00 : f32
    %779 = vector.broadcast %cst_229 : f32 to vector<4x1xf32>
    %780 = arith.minimumf %779, %778 : vector<4x1xf32>
    %781 = arith.subf %780, %738 : vector<4x1xf32>
    %782 = vector.broadcast %781 : vector<4x1xf32> to vector<4x32xf32>
    %783 = arith.mulf %782, %764 : vector<4x32xf32>
    %784 = arith.addf %734, %783 : vector<4x32xf32>
    %785 = vector.broadcast %781 : vector<4x1xf32> to vector<4x32xf32>
    %786 = arith.mulf %785, %762 : vector<4x32xf32>
    %787 = arith.addf %735, %786 : vector<4x32xf32>
    %788 = vector.broadcast %781 : vector<4x1xf32> to vector<4x8xf32>
    %789 = arith.mulf %788, %771 : vector<4x8xf32>
    %790 = arith.addf %736, %789 : vector<4x8xf32>
    %cst_230 = arith.constant 1.000000e+00 : f32
    %791 = vector.broadcast %cst_230 : f32 to vector<4x1xf32>
    %792 = arith.cmpf olt, %780, %791 : vector<4x1xf32>
    %793 = arith.extui %792 : vector<4x1xi1> to vector<4x1xi32>
    %794 = arith.sitofp %793 : vector<4x1xi32> to vector<4x1xf32>
    %795 = arith.addf %739, %794 : vector<4x1xf32>
    %cst_231 = arith.constant 1.000000e+00 : f32
    %796 = vector.broadcast %cst_231 : f32 to vector<4x1xf32>
    %797 = arith.cmpf olt, %780, %796 : vector<4x1xf32>
    %798 = arith.select %797, %780, %740 : vector<4x1xi1>, vector<4x1xf32>
    %799 = vector.extract_strided_slice %768 {offsets = [0, 0], sizes = [4, 128], strides = [1, 1]} : vector<4x137xf32> to vector<4x128xf32>
    %800 = arith.addf %732, %799 : vector<4x128xf32>
    %801 = math.tanh %800 : vector<4x128xf32>
    %802 = vector.extract_strided_slice %801 {offsets = [0, 0], sizes = [4, 32], strides = [1, 1]} : vector<4x128xf32> to vector<4x32xf32>
    %cst_232 = arith.constant 5.000000e-01 : f32
    %803 = vector.broadcast %cst_232 : f32 to vector<4x32xf32>
    %804 = arith.mulf %803, %802 : vector<4x32xf32>
    %cst_233 = arith.constant 5.000000e-01 : f32
    %805 = vector.broadcast %cst_233 : f32 to vector<4x32xf32>
    %806 = arith.addf %804, %805 : vector<4x32xf32>
    %807 = vector.extract_strided_slice %801 {offsets = [0, 32], sizes = [4, 32], strides = [1, 1]} : vector<4x128xf32> to vector<4x32xf32>
    %cst_234 = arith.constant 5.000000e-01 : f32
    %808 = vector.broadcast %cst_234 : f32 to vector<4x32xf32>
    %809 = arith.mulf %808, %807 : vector<4x32xf32>
    %cst_235 = arith.constant 5.000000e-01 : f32
    %810 = vector.broadcast %cst_235 : f32 to vector<4x32xf32>
    %811 = arith.addf %809, %810 : vector<4x32xf32>
    %812 = vector.extract_strided_slice %801 {offsets = [0, 64], sizes = [4, 32], strides = [1, 1]} : vector<4x128xf32> to vector<4x32xf32>
    %813 = vector.extract_strided_slice %801 {offsets = [0, 96], sizes = [4, 32], strides = [1, 1]} : vector<4x128xf32> to vector<4x32xf32>
    %cst_236 = arith.constant 5.000000e-01 : f32
    %814 = vector.broadcast %cst_236 : f32 to vector<4x32xf32>
    %815 = arith.mulf %814, %813 : vector<4x32xf32>
    %cst_237 = arith.constant 5.000000e-01 : f32
    %816 = vector.broadcast %cst_237 : f32 to vector<4x32xf32>
    %817 = arith.addf %815, %816 : vector<4x32xf32>
    %818 = arith.mulf %811, %762 : vector<4x32xf32>
    %819 = arith.mulf %806, %812 : vector<4x32xf32>
    %820 = arith.addf %818, %819 : vector<4x32xf32>
    %821 = math.tanh %820 : vector<4x32xf32>
    %822 = arith.mulf %817, %821 : vector<4x32xf32>
    %c2_238 = arith.constant 2 : index
    %c1_239 = arith.constant 1 : index
    %c0_240 = arith.constant 0 : index
    %c0_241 = arith.constant 0 : index
    %823 = vector.load %arg4[%c2_238, %c1_239, %c0_240, %c0_241] : memref<5x6x4x32xf32, #tpu.memory_space<vmem>>, vector<1x1x4x32xf32>
    %824 = vector.shape_cast %823 : vector<1x1x4x32xf32> to vector<4x32xf32>
    %825 = vector.shape_cast %822 : vector<4x32xf32> to vector<1x1x4x32xf32>
    tpu.vector_store %arg4[%c2_238, %c1_239, %c0_240, %c0_241], %825 {strides = array<i32>} : memref<5x6x4x32xf32, #tpu.memory_space<vmem>>, vector<1x1x4x32xf32>,
    %cst_242 = arith.constant dense<0.000000e+00> : vector<4x137xf32>
    %826 = tpu.matmul %822, %1, %cst_242 {dimension_numbers = #tpu.dot_dimension_numbers<[1], [0], [0], [1], [0, 0, 1, 1], [], []>, precision = #tpu.contract_precision<fp32>} : vector<4x32xf32>, vector<32x137xf32>, vector<4x137xf32> -> vector<4x137xf32>
    %827 = vector.extract_strided_slice %826 {offsets = [0, 128], sizes = [4, 9], strides = [1, 1]} : vector<4x137xf32> to vector<4x9xf32>
    %828 = arith.addf %827, %5 : vector<4x9xf32>
    %829 = vector.extract_strided_slice %828 {offsets = [0, 0], sizes = [4, 8], strides = [1, 1]} : vector<4x9xf32> to vector<4x8xf32>
    %830 = vector.extract_strided_slice %828 {offsets = [0, 8], sizes = [4, 1], strides = [1, 1]} : vector<4x9xf32> to vector<4x1xf32>
    %831 = arith.negf %830 : vector<4x1xf32>
    %832 = math.exp %831 : vector<4x1xf32>
    %cst_243 = arith.constant 1.000000e+00 : f32
    %833 = vector.broadcast %cst_243 : f32 to vector<4x1xf32>
    %834 = arith.addf %833, %832 : vector<4x1xf32>
    %835 = arith.divf %833, %834 : vector<4x1xf32>
    %836 = arith.addf %778, %835 : vector<4x1xf32>
    %cst_244 = arith.constant 1.000000e+00 : f32
    %837 = vector.broadcast %cst_244 : f32 to vector<4x1xf32>
    %838 = arith.minimumf %837, %836 : vector<4x1xf32>
    %839 = arith.subf %838, %780 : vector<4x1xf32>
    %840 = vector.broadcast %839 : vector<4x1xf32> to vector<4x32xf32>
    %841 = arith.mulf %840, %822 : vector<4x32xf32>
    %842 = arith.addf %784, %841 : vector<4x32xf32>
    %843 = vector.broadcast %839 : vector<4x1xf32> to vector<4x32xf32>
    %844 = arith.mulf %843, %820 : vector<4x32xf32>
    %845 = arith.addf %787, %844 : vector<4x32xf32>
    %846 = vector.broadcast %839 : vector<4x1xf32> to vector<4x8xf32>
    %847 = arith.mulf %846, %829 : vector<4x8xf32>
    %848 = arith.addf %790, %847 : vector<4x8xf32>
    %cst_245 = arith.constant 1.000000e+00 : f32
    %849 = vector.broadcast %cst_245 : f32 to vector<4x1xf32>
    %850 = arith.cmpf olt, %838, %849 : vector<4x1xf32>
    %851 = arith.extui %850 : vector<4x1xi1> to vector<4x1xi32>
    %852 = arith.sitofp %851 : vector<4x1xi32> to vector<4x1xf32>
    %853 = arith.addf %795, %852 : vector<4x1xf32>
    %cst_246 = arith.constant 1.000000e+00 : f32
    %854 = vector.broadcast %cst_246 : f32 to vector<4x1xf32>
    %855 = arith.cmpf olt, %838, %854 : vector<4x1xf32>
    %856 = arith.select %855, %838, %798 : vector<4x1xi1>, vector<4x1xf32>
    %857 = vector.extract_strided_slice %826 {offsets = [0, 0], sizes = [4, 128], strides = [1, 1]} : vector<4x137xf32> to vector<4x128xf32>
    %858 = arith.addf %732, %857 : vector<4x128xf32>
    %859 = math.tanh %858 : vector<4x128xf32>
    %860 = vector.extract_strided_slice %859 {offsets = [0, 0], sizes = [4, 32], strides = [1, 1]} : vector<4x128xf32> to vector<4x32xf32>
    %cst_247 = arith.constant 5.000000e-01 : f32
    %861 = vector.broadcast %cst_247 : f32 to vector<4x32xf32>
    %862 = arith.mulf %861, %860 : vector<4x32xf32>
    %cst_248 = arith.constant 5.000000e-01 : f32
    %863 = vector.broadcast %cst_248 : f32 to vector<4x32xf32>
    %864 = arith.addf %862, %863 : vector<4x32xf32>
    %865 = vector.extract_strided_slice %859 {offsets = [0, 32], sizes = [4, 32], strides = [1, 1]} : vector<4x128xf32> to vector<4x32xf32>
    %cst_249 = arith.constant 5.000000e-01 : f32
    %866 = vector.broadcast %cst_249 : f32 to vector<4x32xf32>
    %867 = arith.mulf %866, %865 : vector<4x32xf32>
    %cst_250 = arith.constant 5.000000e-01 : f32
    %868 = vector.broadcast %cst_250 : f32 to vector<4x32xf32>
    %869 = arith.addf %867, %868 : vector<4x32xf32>
    %870 = vector.extract_strided_slice %859 {offsets = [0, 64], sizes = [4, 32], strides = [1, 1]} : vector<4x128xf32> to vector<4x32xf32>
    %871 = vector.extract_strided_slice %859 {offsets = [0, 96], sizes = [4, 32], strides = [1, 1]} : vector<4x128xf32> to vector<4x32xf32>
    %cst_251 = arith.constant 5.000000e-01 : f32
    %872 = vector.broadcast %cst_251 : f32 to vector<4x32xf32>
    %873 = arith.mulf %872, %871 : vector<4x32xf32>
    %cst_252 = arith.constant 5.000000e-01 : f32
    %874 = vector.broadcast %cst_252 : f32 to vector<4x32xf32>
    %875 = arith.addf %873, %874 : vector<4x32xf32>
    %876 = arith.mulf %869, %820 : vector<4x32xf32>
    %877 = arith.mulf %864, %870 : vector<4x32xf32>
    %878 = arith.addf %876, %877 : vector<4x32xf32>
    %879 = math.tanh %878 : vector<4x32xf32>
    %880 = arith.mulf %875, %879 : vector<4x32xf32>
    %c2_253 = arith.constant 2 : index
    %c2_254 = arith.constant 2 : index
    %c0_255 = arith.constant 0 : index
    %c0_256 = arith.constant 0 : index
    %881 = vector.load %arg4[%c2_253, %c2_254, %c0_255, %c0_256] : memref<5x6x4x32xf32, #tpu.memory_space<vmem>>, vector<1x1x4x32xf32>
    %882 = vector.shape_cast %881 : vector<1x1x4x32xf32> to vector<4x32xf32>
    %883 = vector.shape_cast %880 : vector<4x32xf32> to vector<1x1x4x32xf32>
    tpu.vector_store %arg4[%c2_253, %c2_254, %c0_255, %c0_256], %883 {strides = array<i32>} : memref<5x6x4x32xf32, #tpu.memory_space<vmem>>, vector<1x1x4x32xf32>,
    %cst_257 = arith.constant dense<0.000000e+00> : vector<4x137xf32>
    %884 = tpu.matmul %880, %1, %cst_257 {dimension_numbers = #tpu.dot_dimension_numbers<[1], [0], [0], [1], [0, 0, 1, 1], [], []>, precision = #tpu.contract_precision<fp32>} : vector<4x32xf32>, vector<32x137xf32>, vector<4x137xf32> -> vector<4x137xf32>
    %885 = vector.extract_strided_slice %884 {offsets = [0, 128], sizes = [4, 9], strides = [1, 1]} : vector<4x137xf32> to vector<4x9xf32>
    %886 = arith.addf %885, %5 : vector<4x9xf32>
    %887 = vector.extract_strided_slice %886 {offsets = [0, 0], sizes = [4, 8], strides = [1, 1]} : vector<4x9xf32> to vector<4x8xf32>
    %888 = vector.extract_strided_slice %886 {offsets = [0, 8], sizes = [4, 1], strides = [1, 1]} : vector<4x9xf32> to vector<4x1xf32>
    %889 = arith.negf %888 : vector<4x1xf32>
    %890 = math.exp %889 : vector<4x1xf32>
    %cst_258 = arith.constant 1.000000e+00 : f32
    %891 = vector.broadcast %cst_258 : f32 to vector<4x1xf32>
    %892 = arith.addf %891, %890 : vector<4x1xf32>
    %893 = arith.divf %891, %892 : vector<4x1xf32>
    %894 = arith.addf %836, %893 : vector<4x1xf32>
    %cst_259 = arith.constant 1.000000e+00 : f32
    %895 = vector.broadcast %cst_259 : f32 to vector<4x1xf32>
    %896 = arith.minimumf %895, %894 : vector<4x1xf32>
    %897 = arith.subf %896, %838 : vector<4x1xf32>
    %898 = vector.broadcast %897 : vector<4x1xf32> to vector<4x32xf32>
    %899 = arith.mulf %898, %880 : vector<4x32xf32>
    %900 = arith.addf %842, %899 : vector<4x32xf32>
    %901 = vector.broadcast %897 : vector<4x1xf32> to vector<4x32xf32>
    %902 = arith.mulf %901, %878 : vector<4x32xf32>
    %903 = arith.addf %845, %902 : vector<4x32xf32>
    %904 = vector.broadcast %897 : vector<4x1xf32> to vector<4x8xf32>
    %905 = arith.mulf %904, %887 : vector<4x8xf32>
    %906 = arith.addf %848, %905 : vector<4x8xf32>
    %cst_260 = arith.constant 1.000000e+00 : f32
    %907 = vector.broadcast %cst_260 : f32 to vector<4x1xf32>
    %908 = arith.cmpf olt, %896, %907 : vector<4x1xf32>
    %909 = arith.extui %908 : vector<4x1xi1> to vector<4x1xi32>
    %910 = arith.sitofp %909 : vector<4x1xi32> to vector<4x1xf32>
    %911 = arith.addf %853, %910 : vector<4x1xf32>
    %cst_261 = arith.constant 1.000000e+00 : f32
    %912 = vector.broadcast %cst_261 : f32 to vector<4x1xf32>
    %913 = arith.cmpf olt, %896, %912 : vector<4x1xf32>
    %914 = arith.select %913, %896, %856 : vector<4x1xi1>, vector<4x1xf32>
    %915 = vector.extract_strided_slice %884 {offsets = [0, 0], sizes = [4, 128], strides = [1, 1]} : vector<4x137xf32> to vector<4x128xf32>
    %916 = arith.addf %732, %915 : vector<4x128xf32>
    %917 = math.tanh %916 : vector<4x128xf32>
    %918 = vector.extract_strided_slice %917 {offsets = [0, 0], sizes = [4, 32], strides = [1, 1]} : vector<4x128xf32> to vector<4x32xf32>
    %cst_262 = arith.constant 5.000000e-01 : f32
    %919 = vector.broadcast %cst_262 : f32 to vector<4x32xf32>
    %920 = arith.mulf %919, %918 : vector<4x32xf32>
    %cst_263 = arith.constant 5.000000e-01 : f32
    %921 = vector.broadcast %cst_263 : f32 to vector<4x32xf32>
    %922 = arith.addf %920, %921 : vector<4x32xf32>
    %923 = vector.extract_strided_slice %917 {offsets = [0, 32], sizes = [4, 32], strides = [1, 1]} : vector<4x128xf32> to vector<4x32xf32>
    %cst_264 = arith.constant 5.000000e-01 : f32
    %924 = vector.broadcast %cst_264 : f32 to vector<4x32xf32>
    %925 = arith.mulf %924, %923 : vector<4x32xf32>
    %cst_265 = arith.constant 5.000000e-01 : f32
    %926 = vector.broadcast %cst_265 : f32 to vector<4x32xf32>
    %927 = arith.addf %925, %926 : vector<4x32xf32>
    %928 = vector.extract_strided_slice %917 {offsets = [0, 64], sizes = [4, 32], strides = [1, 1]} : vector<4x128xf32> to vector<4x32xf32>
    %929 = vector.extract_strided_slice %917 {offsets = [0, 96], sizes = [4, 32], strides = [1, 1]} : vector<4x128xf32> to vector<4x32xf32>
    %cst_266 = arith.constant 5.000000e-01 : f32
    %930 = vector.broadcast %cst_266 : f32 to vector<4x32xf32>
    %931 = arith.mulf %930, %929 : vector<4x32xf32>
    %cst_267 = arith.constant 5.000000e-01 : f32
    %932 = vector.broadcast %cst_267 : f32 to vector<4x32xf32>
    %933 = arith.addf %931, %932 : vector<4x32xf32>
    %934 = arith.mulf %927, %878 : vector<4x32xf32>
    %935 = arith.mulf %922, %928 : vector<4x32xf32>
    %936 = arith.addf %934, %935 : vector<4x32xf32>
    %937 = math.tanh %936 : vector<4x32xf32>
    %938 = arith.mulf %933, %937 : vector<4x32xf32>
    %c2_268 = arith.constant 2 : index
    %c3_269 = arith.constant 3 : index
    %c0_270 = arith.constant 0 : index
    %c0_271 = arith.constant 0 : index
    %939 = vector.load %arg4[%c2_268, %c3_269, %c0_270, %c0_271] : memref<5x6x4x32xf32, #tpu.memory_space<vmem>>, vector<1x1x4x32xf32>
    %940 = vector.shape_cast %939 : vector<1x1x4x32xf32> to vector<4x32xf32>
    %941 = vector.shape_cast %938 : vector<4x32xf32> to vector<1x1x4x32xf32>
    tpu.vector_store %arg4[%c2_268, %c3_269, %c0_270, %c0_271], %941 {strides = array<i32>} : memref<5x6x4x32xf32, #tpu.memory_space<vmem>>, vector<1x1x4x32xf32>,
    %cst_272 = arith.constant dense<0.000000e+00> : vector<4x137xf32>
    %942 = tpu.matmul %938, %1, %cst_272 {dimension_numbers = #tpu.dot_dimension_numbers<[1], [0], [0], [1], [0, 0, 1, 1], [], []>, precision = #tpu.contract_precision<fp32>} : vector<4x32xf32>, vector<32x137xf32>, vector<4x137xf32> -> vector<4x137xf32>
    %943 = vector.extract_strided_slice %942 {offsets = [0, 128], sizes = [4, 9], strides = [1, 1]} : vector<4x137xf32> to vector<4x9xf32>
    %944 = arith.addf %943, %5 : vector<4x9xf32>
    %945 = vector.extract_strided_slice %944 {offsets = [0, 0], sizes = [4, 8], strides = [1, 1]} : vector<4x9xf32> to vector<4x8xf32>
    %946 = vector.extract_strided_slice %944 {offsets = [0, 8], sizes = [4, 1], strides = [1, 1]} : vector<4x9xf32> to vector<4x1xf32>
    %947 = arith.negf %946 : vector<4x1xf32>
    %948 = math.exp %947 : vector<4x1xf32>
    %cst_273 = arith.constant 1.000000e+00 : f32
    %949 = vector.broadcast %cst_273 : f32 to vector<4x1xf32>
    %950 = arith.addf %949, %948 : vector<4x1xf32>
    %951 = arith.divf %949, %950 : vector<4x1xf32>
    %952 = arith.addf %894, %951 : vector<4x1xf32>
    %cst_274 = arith.constant 1.000000e+00 : f32
    %953 = vector.broadcast %cst_274 : f32 to vector<4x1xf32>
    %954 = arith.minimumf %953, %952 : vector<4x1xf32>
    %955 = arith.subf %954, %896 : vector<4x1xf32>
    %956 = vector.broadcast %955 : vector<4x1xf32> to vector<4x32xf32>
    %957 = arith.mulf %956, %938 : vector<4x32xf32>
    %958 = arith.addf %900, %957 : vector<4x32xf32>
    %959 = vector.broadcast %955 : vector<4x1xf32> to vector<4x32xf32>
    %960 = arith.mulf %959, %936 : vector<4x32xf32>
    %961 = arith.addf %903, %960 : vector<4x32xf32>
    %962 = vector.broadcast %955 : vector<4x1xf32> to vector<4x8xf32>
    %963 = arith.mulf %962, %945 : vector<4x8xf32>
    %964 = arith.addf %906, %963 : vector<4x8xf32>
    %cst_275 = arith.constant 1.000000e+00 : f32
    %965 = vector.broadcast %cst_275 : f32 to vector<4x1xf32>
    %966 = arith.cmpf olt, %954, %965 : vector<4x1xf32>
    %967 = arith.extui %966 : vector<4x1xi1> to vector<4x1xi32>
    %968 = arith.sitofp %967 : vector<4x1xi32> to vector<4x1xf32>
    %969 = arith.addf %911, %968 : vector<4x1xf32>
    %cst_276 = arith.constant 1.000000e+00 : f32
    %970 = vector.broadcast %cst_276 : f32 to vector<4x1xf32>
    %971 = arith.cmpf olt, %954, %970 : vector<4x1xf32>
    %972 = arith.select %971, %954, %914 : vector<4x1xi1>, vector<4x1xf32>
    %973 = vector.extract_strided_slice %942 {offsets = [0, 0], sizes = [4, 128], strides = [1, 1]} : vector<4x137xf32> to vector<4x128xf32>
    %974 = arith.addf %732, %973 : vector<4x128xf32>
    %975 = math.tanh %974 : vector<4x128xf32>
    %976 = vector.extract_strided_slice %975 {offsets = [0, 0], sizes = [4, 32], strides = [1, 1]} : vector<4x128xf32> to vector<4x32xf32>
    %cst_277 = arith.constant 5.000000e-01 : f32
    %977 = vector.broadcast %cst_277 : f32 to vector<4x32xf32>
    %978 = arith.mulf %977, %976 : vector<4x32xf32>
    %cst_278 = arith.constant 5.000000e-01 : f32
    %979 = vector.broadcast %cst_278 : f32 to vector<4x32xf32>
    %980 = arith.addf %978, %979 : vector<4x32xf32>
    %981 = vector.extract_strided_slice %975 {offsets = [0, 32], sizes = [4, 32], strides = [1, 1]} : vector<4x128xf32> to vector<4x32xf32>
    %cst_279 = arith.constant 5.000000e-01 : f32
    %982 = vector.broadcast %cst_279 : f32 to vector<4x32xf32>
    %983 = arith.mulf %982, %981 : vector<4x32xf32>
    %cst_280 = arith.constant 5.000000e-01 : f32
    %984 = vector.broadcast %cst_280 : f32 to vector<4x32xf32>
    %985 = arith.addf %983, %984 : vector<4x32xf32>
    %986 = vector.extract_strided_slice %975 {offsets = [0, 64], sizes = [4, 32], strides = [1, 1]} : vector<4x128xf32> to vector<4x32xf32>
    %987 = vector.extract_strided_slice %975 {offsets = [0, 96], sizes = [4, 32], strides = [1, 1]} : vector<4x128xf32> to vector<4x32xf32>
    %cst_281 = arith.constant 5.000000e-01 : f32
    %988 = vector.broadcast %cst_281 : f32 to vector<4x32xf32>
    %989 = arith.mulf %988, %987 : vector<4x32xf32>
    %cst_282 = arith.constant 5.000000e-01 : f32
    %990 = vector.broadcast %cst_282 : f32 to vector<4x32xf32>
    %991 = arith.addf %989, %990 : vector<4x32xf32>
    %992 = arith.mulf %985, %936 : vector<4x32xf32>
    %993 = arith.mulf %980, %986 : vector<4x32xf32>
    %994 = arith.addf %992, %993 : vector<4x32xf32>
    %995 = math.tanh %994 : vector<4x32xf32>
    %996 = arith.mulf %991, %995 : vector<4x32xf32>
    %c2_283 = arith.constant 2 : index
    %c4_284 = arith.constant 4 : index
    %c0_285 = arith.constant 0 : index
    %c0_286 = arith.constant 0 : index
    %997 = vector.load %arg4[%c2_283, %c4_284, %c0_285, %c0_286] : memref<5x6x4x32xf32, #tpu.memory_space<vmem>>, vector<1x1x4x32xf32>
    %998 = vector.shape_cast %997 : vector<1x1x4x32xf32> to vector<4x32xf32>
    %999 = vector.shape_cast %996 : vector<4x32xf32> to vector<1x1x4x32xf32>
    tpu.vector_store %arg4[%c2_283, %c4_284, %c0_285, %c0_286], %999 {strides = array<i32>} : memref<5x6x4x32xf32, #tpu.memory_space<vmem>>, vector<1x1x4x32xf32>,
    %cst_287 = arith.constant dense<0.000000e+00> : vector<4x137xf32>
    %1000 = tpu.matmul %996, %1, %cst_287 {dimension_numbers = #tpu.dot_dimension_numbers<[1], [0], [0], [1], [0, 0, 1, 1], [], []>, precision = #tpu.contract_precision<fp32>} : vector<4x32xf32>, vector<32x137xf32>, vector<4x137xf32> -> vector<4x137xf32>
    %1001 = vector.extract_strided_slice %1000 {offsets = [0, 128], sizes = [4, 9], strides = [1, 1]} : vector<4x137xf32> to vector<4x9xf32>
    %1002 = arith.addf %1001, %5 : vector<4x9xf32>
    %1003 = vector.extract_strided_slice %1002 {offsets = [0, 0], sizes = [4, 8], strides = [1, 1]} : vector<4x9xf32> to vector<4x8xf32>
    %1004 = vector.extract_strided_slice %1002 {offsets = [0, 8], sizes = [4, 1], strides = [1, 1]} : vector<4x9xf32> to vector<4x1xf32>
    %1005 = arith.negf %1004 : vector<4x1xf32>
    %1006 = math.exp %1005 : vector<4x1xf32>
    %cst_288 = arith.constant 1.000000e+00 : f32
    %1007 = vector.broadcast %cst_288 : f32 to vector<4x1xf32>
    %1008 = arith.addf %1007, %1006 : vector<4x1xf32>
    %1009 = arith.divf %1007, %1008 : vector<4x1xf32>
    %1010 = arith.addf %952, %1009 : vector<4x1xf32>
    %cst_289 = arith.constant 1.000000e+00 : f32
    %1011 = vector.broadcast %cst_289 : f32 to vector<4x1xf32>
    %1012 = arith.minimumf %1011, %1010 : vector<4x1xf32>
    %1013 = arith.subf %1012, %954 : vector<4x1xf32>
    %1014 = vector.broadcast %1013 : vector<4x1xf32> to vector<4x32xf32>
    %1015 = arith.mulf %1014, %996 : vector<4x32xf32>
    %1016 = arith.addf %958, %1015 : vector<4x32xf32>
    %1017 = vector.broadcast %1013 : vector<4x1xf32> to vector<4x32xf32>
    %1018 = arith.mulf %1017, %994 : vector<4x32xf32>
    %1019 = arith.addf %961, %1018 : vector<4x32xf32>
    %1020 = vector.broadcast %1013 : vector<4x1xf32> to vector<4x8xf32>
    %1021 = arith.mulf %1020, %1003 : vector<4x8xf32>
    %1022 = arith.addf %964, %1021 : vector<4x8xf32>
    %cst_290 = arith.constant 1.000000e+00 : f32
    %1023 = vector.broadcast %cst_290 : f32 to vector<4x1xf32>
    %1024 = arith.cmpf olt, %1012, %1023 : vector<4x1xf32>
    %1025 = arith.extui %1024 : vector<4x1xi1> to vector<4x1xi32>
    %1026 = arith.sitofp %1025 : vector<4x1xi32> to vector<4x1xf32>
    %1027 = arith.addf %969, %1026 : vector<4x1xf32>
    %cst_291 = arith.constant 1.000000e+00 : f32
    %1028 = vector.broadcast %cst_291 : f32 to vector<4x1xf32>
    %1029 = arith.cmpf olt, %1012, %1028 : vector<4x1xf32>
    %1030 = arith.select %1029, %1012, %972 : vector<4x1xi1>, vector<4x1xf32>
    %1031 = vector.extract_strided_slice %1000 {offsets = [0, 0], sizes = [4, 128], strides = [1, 1]} : vector<4x137xf32> to vector<4x128xf32>
    %1032 = arith.addf %732, %1031 : vector<4x128xf32>
    %1033 = math.tanh %1032 : vector<4x128xf32>
    %1034 = vector.extract_strided_slice %1033 {offsets = [0, 0], sizes = [4, 32], strides = [1, 1]} : vector<4x128xf32> to vector<4x32xf32>
    %cst_292 = arith.constant 5.000000e-01 : f32
    %1035 = vector.broadcast %cst_292 : f32 to vector<4x32xf32>
    %1036 = arith.mulf %1035, %1034 : vector<4x32xf32>
    %cst_293 = arith.constant 5.000000e-01 : f32
    %1037 = vector.broadcast %cst_293 : f32 to vector<4x32xf32>
    %1038 = arith.addf %1036, %1037 : vector<4x32xf32>
    %1039 = vector.extract_strided_slice %1033 {offsets = [0, 32], sizes = [4, 32], strides = [1, 1]} : vector<4x128xf32> to vector<4x32xf32>
    %cst_294 = arith.constant 5.000000e-01 : f32
    %1040 = vector.broadcast %cst_294 : f32 to vector<4x32xf32>
    %1041 = arith.mulf %1040, %1039 : vector<4x32xf32>
    %cst_295 = arith.constant 5.000000e-01 : f32
    %1042 = vector.broadcast %cst_295 : f32 to vector<4x32xf32>
    %1043 = arith.addf %1041, %1042 : vector<4x32xf32>
    %1044 = vector.extract_strided_slice %1033 {offsets = [0, 64], sizes = [4, 32], strides = [1, 1]} : vector<4x128xf32> to vector<4x32xf32>
    %1045 = vector.extract_strided_slice %1033 {offsets = [0, 96], sizes = [4, 32], strides = [1, 1]} : vector<4x128xf32> to vector<4x32xf32>
    %cst_296 = arith.constant 5.000000e-01 : f32
    %1046 = vector.broadcast %cst_296 : f32 to vector<4x32xf32>
    %1047 = arith.mulf %1046, %1045 : vector<4x32xf32>
    %cst_297 = arith.constant 5.000000e-01 : f32
    %1048 = vector.broadcast %cst_297 : f32 to vector<4x32xf32>
    %1049 = arith.addf %1047, %1048 : vector<4x32xf32>
    %1050 = arith.mulf %1043, %994 : vector<4x32xf32>
    %1051 = arith.mulf %1038, %1044 : vector<4x32xf32>
    %1052 = arith.addf %1050, %1051 : vector<4x32xf32>
    %1053 = math.tanh %1052 : vector<4x32xf32>
    %1054 = arith.mulf %1049, %1053 : vector<4x32xf32>
    %c2_298 = arith.constant 2 : index
    %c5_299 = arith.constant 5 : index
    %c0_300 = arith.constant 0 : index
    %c0_301 = arith.constant 0 : index
    %1055 = vector.load %arg4[%c2_298, %c5_299, %c0_300, %c0_301] : memref<5x6x4x32xf32, #tpu.memory_space<vmem>>, vector<1x1x4x32xf32>
    %1056 = vector.shape_cast %1055 : vector<1x1x4x32xf32> to vector<4x32xf32>
    %1057 = vector.shape_cast %1054 : vector<4x32xf32> to vector<1x1x4x32xf32>
    tpu.vector_store %arg4[%c2_298, %c5_299, %c0_300, %c0_301], %1057 {strides = array<i32>} : memref<5x6x4x32xf32, #tpu.memory_space<vmem>>, vector<1x1x4x32xf32>,
    %cst_302 = arith.constant dense<0.000000e+00> : vector<4x137xf32>
    %1058 = tpu.matmul %1054, %1, %cst_302 {dimension_numbers = #tpu.dot_dimension_numbers<[1], [0], [0], [1], [0, 0, 1, 1], [], []>, precision = #tpu.contract_precision<fp32>} : vector<4x32xf32>, vector<32x137xf32>, vector<4x137xf32> -> vector<4x137xf32>
    %1059 = vector.extract_strided_slice %1058 {offsets = [0, 128], sizes = [4, 9], strides = [1, 1]} : vector<4x137xf32> to vector<4x9xf32>
    %1060 = arith.addf %1059, %5 : vector<4x9xf32>
    %1061 = vector.extract_strided_slice %1060 {offsets = [0, 0], sizes = [4, 8], strides = [1, 1]} : vector<4x9xf32> to vector<4x8xf32>
    %cst_303 = arith.constant 1.000000e+00 : f32
    %1062 = vector.broadcast %cst_303 : f32 to vector<4x1xf32>
    %1063 = arith.subf %1062, %1012 : vector<4x1xf32>
    %1064 = vector.broadcast %1063 : vector<4x1xf32> to vector<4x32xf32>
    %1065 = arith.mulf %1064, %1054 : vector<4x32xf32>
    %1066 = arith.addf %1016, %1065 : vector<4x32xf32>
    %1067 = vector.broadcast %1063 : vector<4x1xf32> to vector<4x32xf32>
    %1068 = arith.mulf %1067, %1052 : vector<4x32xf32>
    %1069 = arith.addf %1019, %1068 : vector<4x32xf32>
    %1070 = vector.broadcast %1063 : vector<4x1xf32> to vector<4x8xf32>
    %1071 = arith.mulf %1070, %1061 : vector<4x8xf32>
    %1072 = arith.addf %1022, %1071 : vector<4x8xf32>
    %cst_304 = arith.constant 1.000000e+00 : f32
    %1073 = vector.broadcast %cst_304 : f32 to vector<4x1xf32>
    %1074 = arith.cmpf olt, %1062, %1073 : vector<4x1xf32>
    %1075 = arith.extui %1074 : vector<4x1xi1> to vector<4x1xi32>
    %1076 = arith.sitofp %1075 : vector<4x1xi32> to vector<4x1xf32>
    %1077 = arith.addf %1027, %1076 : vector<4x1xf32>
    %cst_305 = arith.constant 1.000000e+00 : f32
    %1078 = vector.broadcast %cst_305 : f32 to vector<4x1xf32>
    %1079 = arith.cmpf olt, %1062, %1078 : vector<4x1xf32>
    %1080 = arith.select %1079, %1062, %1030 : vector<4x1xi1>, vector<4x1xf32>
    %cst_306 = arith.constant 0.000000e+00 : f32
    %1081 = vector.broadcast %cst_306 : f32 to vector<4x1xf32>
    %1082 = arith.cmpf ogt, %1077, %1081 : vector<4x1xf32>
    %cst_307 = arith.constant 1.000000e+00 : f32
    %1083 = vector.broadcast %cst_307 : f32 to vector<4x1xf32>
    %1084 = arith.subf %1083, %1080 : vector<4x1xf32>
    %cst_308 = arith.constant 0.000000e+00 : f32
    %1085 = vector.broadcast %cst_308 : f32 to vector<4x1xf32>
    %1086 = arith.select %1082, %1084, %1085 : vector<4x1xi1>, vector<4x1xf32>
    %1087 = arith.addf %1077, %1086 : vector<4x1xf32>
    %1088 = tpu.concatenate %1072, %1087, %1077 in 1 : vector<4x8xf32>, vector<4x1xf32>, vector<4x1xf32> -> vector<4x10xf32>
    %c2_309 = arith.constant 2 : index
    %c0_310 = arith.constant 0 : index
    %c0_311 = arith.constant 0 : index
    %1089 = vector.load %arg3[%c2_309, %c0_310, %c0_311] : memref<5x4x10xf32, #tpu.memory_space<vmem>>, vector<1x4x10xf32>
    %1090 = vector.shape_cast %1089 : vector<1x4x10xf32> to vector<4x10xf32>
    %1091 = vector.shape_cast %1088 : vector<4x10xf32> to vector<1x4x10xf32>
    tpu.vector_store %arg3[%c2_309, %c0_310, %c0_311], %1091 {strides = array<i32>} : memref<5x4x10xf32, #tpu.memory_space<vmem>>, vector<1x4x10xf32>,
    %1092 = vector.extract_strided_slice %9 {offsets = [12, 0], sizes = [4, 128], strides = [1, 1]} : vector<20x128xf32> to vector<4x128xf32>
    %cst_312 = arith.constant dense<0.000000e+00> : vector<4x137xf32>
    %1093 = tpu.matmul %1066, %1, %cst_312 {dimension_numbers = #tpu.dot_dimension_numbers<[1], [0], [0], [1], [0, 0, 1, 1], [], []>, precision = #tpu.contract_precision<fp32>} : vector<4x32xf32>, vector<32x137xf32>, vector<4x137xf32> -> vector<4x137xf32>
    %cst_313 = arith.constant 0.000000e+00 : f32
    %1094 = vector.broadcast %cst_313 : f32 to vector<4x32xf32>
    %cst_314 = arith.constant 0.000000e+00 : f32
    %1095 = vector.broadcast %cst_314 : f32 to vector<4x32xf32>
    %cst_315 = arith.constant 0.000000e+00 : f32
    %1096 = vector.broadcast %cst_315 : f32 to vector<4x8xf32>
    %cst_316 = arith.constant 0.000000e+00 : f32
    %1097 = vector.broadcast %cst_316 : f32 to vector<4x1xf32>
    %cst_317 = arith.constant 0.000000e+00 : f32
    %1098 = vector.broadcast %cst_317 : f32 to vector<4x1xf32>
    %cst_318 = arith.constant 0.000000e+00 : f32
    %1099 = vector.broadcast %cst_318 : f32 to vector<4x1xf32>
    %cst_319 = arith.constant 0.000000e+00 : f32
    %1100 = vector.broadcast %cst_319 : f32 to vector<4x1xf32>
    %1101 = vector.extract_strided_slice %1093 {offsets = [0, 0], sizes = [4, 128], strides = [1, 1]} : vector<4x137xf32> to vector<4x128xf32>
    %1102 = arith.addf %1092, %1101 : vector<4x128xf32>
    %1103 = math.tanh %1102 : vector<4x128xf32>
    %1104 = vector.extract_strided_slice %1103 {offsets = [0, 0], sizes = [4, 32], strides = [1, 1]} : vector<4x128xf32> to vector<4x32xf32>
    %cst_320 = arith.constant 5.000000e-01 : f32
    %1105 = vector.broadcast %cst_320 : f32 to vector<4x32xf32>
    %1106 = arith.mulf %1105, %1104 : vector<4x32xf32>
    %cst_321 = arith.constant 5.000000e-01 : f32
    %1107 = vector.broadcast %cst_321 : f32 to vector<4x32xf32>
    %1108 = arith.addf %1106, %1107 : vector<4x32xf32>
    %1109 = vector.extract_strided_slice %1103 {offsets = [0, 32], sizes = [4, 32], strides = [1, 1]} : vector<4x128xf32> to vector<4x32xf32>
    %cst_322 = arith.constant 5.000000e-01 : f32
    %1110 = vector.broadcast %cst_322 : f32 to vector<4x32xf32>
    %1111 = arith.mulf %1110, %1109 : vector<4x32xf32>
    %cst_323 = arith.constant 5.000000e-01 : f32
    %1112 = vector.broadcast %cst_323 : f32 to vector<4x32xf32>
    %1113 = arith.addf %1111, %1112 : vector<4x32xf32>
    %1114 = vector.extract_strided_slice %1103 {offsets = [0, 64], sizes = [4, 32], strides = [1, 1]} : vector<4x128xf32> to vector<4x32xf32>
    %1115 = vector.extract_strided_slice %1103 {offsets = [0, 96], sizes = [4, 32], strides = [1, 1]} : vector<4x128xf32> to vector<4x32xf32>
    %cst_324 = arith.constant 5.000000e-01 : f32
    %1116 = vector.broadcast %cst_324 : f32 to vector<4x32xf32>
    %1117 = arith.mulf %1116, %1115 : vector<4x32xf32>
    %cst_325 = arith.constant 5.000000e-01 : f32
    %1118 = vector.broadcast %cst_325 : f32 to vector<4x32xf32>
    %1119 = arith.addf %1117, %1118 : vector<4x32xf32>
    %1120 = arith.mulf %1113, %1069 : vector<4x32xf32>
    %1121 = arith.mulf %1108, %1114 : vector<4x32xf32>
    %1122 = arith.addf %1120, %1121 : vector<4x32xf32>
    %1123 = math.tanh %1122 : vector<4x32xf32>
    %1124 = arith.mulf %1119, %1123 : vector<4x32xf32>
    %c3_326 = arith.constant 3 : index
    %c0_327 = arith.constant 0 : index
    %c0_328 = arith.constant 0 : index
    %c0_329 = arith.constant 0 : index
    %1125 = vector.load %arg4[%c3_326, %c0_327, %c0_328, %c0_329] : memref<5x6x4x32xf32, #tpu.memory_space<vmem>>, vector<1x1x4x32xf32>
    %1126 = vector.shape_cast %1125 : vector<1x1x4x32xf32> to vector<4x32xf32>
    %1127 = vector.shape_cast %1124 : vector<4x32xf32> to vector<1x1x4x32xf32>
    tpu.vector_store %arg4[%c3_326, %c0_327, %c0_328, %c0_329], %1127 {strides = array<i32>} : memref<5x6x4x32xf32, #tpu.memory_space<vmem>>, vector<1x1x4x32xf32>,
    %cst_330 = arith.constant dense<0.000000e+00> : vector<4x137xf32>
    %1128 = tpu.matmul %1124, %1, %cst_330 {dimension_numbers = #tpu.dot_dimension_numbers<[1], [0], [0], [1], [0, 0, 1, 1], [], []>, precision = #tpu.contract_precision<fp32>} : vector<4x32xf32>, vector<32x137xf32>, vector<4x137xf32> -> vector<4x137xf32>
    %1129 = vector.extract_strided_slice %1128 {offsets = [0, 128], sizes = [4, 9], strides = [1, 1]} : vector<4x137xf32> to vector<4x9xf32>
    %1130 = arith.addf %1129, %5 : vector<4x9xf32>
    %1131 = vector.extract_strided_slice %1130 {offsets = [0, 0], sizes = [4, 8], strides = [1, 1]} : vector<4x9xf32> to vector<4x8xf32>
    %1132 = vector.extract_strided_slice %1130 {offsets = [0, 8], sizes = [4, 1], strides = [1, 1]} : vector<4x9xf32> to vector<4x1xf32>
    %1133 = arith.negf %1132 : vector<4x1xf32>
    %1134 = math.exp %1133 : vector<4x1xf32>
    %cst_331 = arith.constant 1.000000e+00 : f32
    %1135 = vector.broadcast %cst_331 : f32 to vector<4x1xf32>
    %1136 = arith.addf %1135, %1134 : vector<4x1xf32>
    %1137 = arith.divf %1135, %1136 : vector<4x1xf32>
    %1138 = arith.addf %1097, %1137 : vector<4x1xf32>
    %cst_332 = arith.constant 1.000000e+00 : f32
    %1139 = vector.broadcast %cst_332 : f32 to vector<4x1xf32>
    %1140 = arith.minimumf %1139, %1138 : vector<4x1xf32>
    %1141 = arith.subf %1140, %1098 : vector<4x1xf32>
    %1142 = vector.broadcast %1141 : vector<4x1xf32> to vector<4x32xf32>
    %1143 = arith.mulf %1142, %1124 : vector<4x32xf32>
    %1144 = arith.addf %1094, %1143 : vector<4x32xf32>
    %1145 = vector.broadcast %1141 : vector<4x1xf32> to vector<4x32xf32>
    %1146 = arith.mulf %1145, %1122 : vector<4x32xf32>
    %1147 = arith.addf %1095, %1146 : vector<4x32xf32>
    %1148 = vector.broadcast %1141 : vector<4x1xf32> to vector<4x8xf32>
    %1149 = arith.mulf %1148, %1131 : vector<4x8xf32>
    %1150 = arith.addf %1096, %1149 : vector<4x8xf32>
    %cst_333 = arith.constant 1.000000e+00 : f32
    %1151 = vector.broadcast %cst_333 : f32 to vector<4x1xf32>
    %1152 = arith.cmpf olt, %1140, %1151 : vector<4x1xf32>
    %1153 = arith.extui %1152 : vector<4x1xi1> to vector<4x1xi32>
    %1154 = arith.sitofp %1153 : vector<4x1xi32> to vector<4x1xf32>
    %1155 = arith.addf %1099, %1154 : vector<4x1xf32>
    %cst_334 = arith.constant 1.000000e+00 : f32
    %1156 = vector.broadcast %cst_334 : f32 to vector<4x1xf32>
    %1157 = arith.cmpf olt, %1140, %1156 : vector<4x1xf32>
    %1158 = arith.select %1157, %1140, %1100 : vector<4x1xi1>, vector<4x1xf32>
    %1159 = vector.extract_strided_slice %1128 {offsets = [0, 0], sizes = [4, 128], strides = [1, 1]} : vector<4x137xf32> to vector<4x128xf32>
    %1160 = arith.addf %1092, %1159 : vector<4x128xf32>
    %1161 = math.tanh %1160 : vector<4x128xf32>
    %1162 = vector.extract_strided_slice %1161 {offsets = [0, 0], sizes = [4, 32], strides = [1, 1]} : vector<4x128xf32> to vector<4x32xf32>
    %cst_335 = arith.constant 5.000000e-01 : f32
    %1163 = vector.broadcast %cst_335 : f32 to vector<4x32xf32>
    %1164 = arith.mulf %1163, %1162 : vector<4x32xf32>
    %cst_336 = arith.constant 5.000000e-01 : f32
    %1165 = vector.broadcast %cst_336 : f32 to vector<4x32xf32>
    %1166 = arith.addf %1164, %1165 : vector<4x32xf32>
    %1167 = vector.extract_strided_slice %1161 {offsets = [0, 32], sizes = [4, 32], strides = [1, 1]} : vector<4x128xf32> to vector<4x32xf32>
    %cst_337 = arith.constant 5.000000e-01 : f32
    %1168 = vector.broadcast %cst_337 : f32 to vector<4x32xf32>
    %1169 = arith.mulf %1168, %1167 : vector<4x32xf32>
    %cst_338 = arith.constant 5.000000e-01 : f32
    %1170 = vector.broadcast %cst_338 : f32 to vector<4x32xf32>
    %1171 = arith.addf %1169, %1170 : vector<4x32xf32>
    %1172 = vector.extract_strided_slice %1161 {offsets = [0, 64], sizes = [4, 32], strides = [1, 1]} : vector<4x128xf32> to vector<4x32xf32>
    %1173 = vector.extract_strided_slice %1161 {offsets = [0, 96], sizes = [4, 32], strides = [1, 1]} : vector<4x128xf32> to vector<4x32xf32>
    %cst_339 = arith.constant 5.000000e-01 : f32
    %1174 = vector.broadcast %cst_339 : f32 to vector<4x32xf32>
    %1175 = arith.mulf %1174, %1173 : vector<4x32xf32>
    %cst_340 = arith.constant 5.000000e-01 : f32
    %1176 = vector.broadcast %cst_340 : f32 to vector<4x32xf32>
    %1177 = arith.addf %1175, %1176 : vector<4x32xf32>
    %1178 = arith.mulf %1171, %1122 : vector<4x32xf32>
    %1179 = arith.mulf %1166, %1172 : vector<4x32xf32>
    %1180 = arith.addf %1178, %1179 : vector<4x32xf32>
    %1181 = math.tanh %1180 : vector<4x32xf32>
    %1182 = arith.mulf %1177, %1181 : vector<4x32xf32>
    %c3_341 = arith.constant 3 : index
    %c1_342 = arith.constant 1 : index
    %c0_343 = arith.constant 0 : index
    %c0_344 = arith.constant 0 : index
    %1183 = vector.load %arg4[%c3_341, %c1_342, %c0_343, %c0_344] : memref<5x6x4x32xf32, #tpu.memory_space<vmem>>, vector<1x1x4x32xf32>
    %1184 = vector.shape_cast %1183 : vector<1x1x4x32xf32> to vector<4x32xf32>
    %1185 = vector.shape_cast %1182 : vector<4x32xf32> to vector<1x1x4x32xf32>
    tpu.vector_store %arg4[%c3_341, %c1_342, %c0_343, %c0_344], %1185 {strides = array<i32>} : memref<5x6x4x32xf32, #tpu.memory_space<vmem>>, vector<1x1x4x32xf32>,
    %cst_345 = arith.constant dense<0.000000e+00> : vector<4x137xf32>
    %1186 = tpu.matmul %1182, %1, %cst_345 {dimension_numbers = #tpu.dot_dimension_numbers<[1], [0], [0], [1], [0, 0, 1, 1], [], []>, precision = #tpu.contract_precision<fp32>} : vector<4x32xf32>, vector<32x137xf32>, vector<4x137xf32> -> vector<4x137xf32>
    %1187 = vector.extract_strided_slice %1186 {offsets = [0, 128], sizes = [4, 9], strides = [1, 1]} : vector<4x137xf32> to vector<4x9xf32>
    %1188 = arith.addf %1187, %5 : vector<4x9xf32>
    %1189 = vector.extract_strided_slice %1188 {offsets = [0, 0], sizes = [4, 8], strides = [1, 1]} : vector<4x9xf32> to vector<4x8xf32>
    %1190 = vector.extract_strided_slice %1188 {offsets = [0, 8], sizes = [4, 1], strides = [1, 1]} : vector<4x9xf32> to vector<4x1xf32>
    %1191 = arith.negf %1190 : vector<4x1xf32>
    %1192 = math.exp %1191 : vector<4x1xf32>
    %cst_346 = arith.constant 1.000000e+00 : f32
    %1193 = vector.broadcast %cst_346 : f32 to vector<4x1xf32>
    %1194 = arith.addf %1193, %1192 : vector<4x1xf32>
    %1195 = arith.divf %1193, %1194 : vector<4x1xf32>
    %1196 = arith.addf %1138, %1195 : vector<4x1xf32>
    %cst_347 = arith.constant 1.000000e+00 : f32
    %1197 = vector.broadcast %cst_347 : f32 to vector<4x1xf32>
    %1198 = arith.minimumf %1197, %1196 : vector<4x1xf32>
    %1199 = arith.subf %1198, %1140 : vector<4x1xf32>
    %1200 = vector.broadcast %1199 : vector<4x1xf32> to vector<4x32xf32>
    %1201 = arith.mulf %1200, %1182 : vector<4x32xf32>
    %1202 = arith.addf %1144, %1201 : vector<4x32xf32>
    %1203 = vector.broadcast %1199 : vector<4x1xf32> to vector<4x32xf32>
    %1204 = arith.mulf %1203, %1180 : vector<4x32xf32>
    %1205 = arith.addf %1147, %1204 : vector<4x32xf32>
    %1206 = vector.broadcast %1199 : vector<4x1xf32> to vector<4x8xf32>
    %1207 = arith.mulf %1206, %1189 : vector<4x8xf32>
    %1208 = arith.addf %1150, %1207 : vector<4x8xf32>
    %cst_348 = arith.constant 1.000000e+00 : f32
    %1209 = vector.broadcast %cst_348 : f32 to vector<4x1xf32>
    %1210 = arith.cmpf olt, %1198, %1209 : vector<4x1xf32>
    %1211 = arith.extui %1210 : vector<4x1xi1> to vector<4x1xi32>
    %1212 = arith.sitofp %1211 : vector<4x1xi32> to vector<4x1xf32>
    %1213 = arith.addf %1155, %1212 : vector<4x1xf32>
    %cst_349 = arith.constant 1.000000e+00 : f32
    %1214 = vector.broadcast %cst_349 : f32 to vector<4x1xf32>
    %1215 = arith.cmpf olt, %1198, %1214 : vector<4x1xf32>
    %1216 = arith.select %1215, %1198, %1158 : vector<4x1xi1>, vector<4x1xf32>
    %1217 = vector.extract_strided_slice %1186 {offsets = [0, 0], sizes = [4, 128], strides = [1, 1]} : vector<4x137xf32> to vector<4x128xf32>
    %1218 = arith.addf %1092, %1217 : vector<4x128xf32>
    %1219 = math.tanh %1218 : vector<4x128xf32>
    %1220 = vector.extract_strided_slice %1219 {offsets = [0, 0], sizes = [4, 32], strides = [1, 1]} : vector<4x128xf32> to vector<4x32xf32>
    %cst_350 = arith.constant 5.000000e-01 : f32
    %1221 = vector.broadcast %cst_350 : f32 to vector<4x32xf32>
    %1222 = arith.mulf %1221, %1220 : vector<4x32xf32>
    %cst_351 = arith.constant 5.000000e-01 : f32
    %1223 = vector.broadcast %cst_351 : f32 to vector<4x32xf32>
    %1224 = arith.addf %1222, %1223 : vector<4x32xf32>
    %1225 = vector.extract_strided_slice %1219 {offsets = [0, 32], sizes = [4, 32], strides = [1, 1]} : vector<4x128xf32> to vector<4x32xf32>
    %cst_352 = arith.constant 5.000000e-01 : f32
    %1226 = vector.broadcast %cst_352 : f32 to vector<4x32xf32>
    %1227 = arith.mulf %1226, %1225 : vector<4x32xf32>
    %cst_353 = arith.constant 5.000000e-01 : f32
    %1228 = vector.broadcast %cst_353 : f32 to vector<4x32xf32>
    %1229 = arith.addf %1227, %1228 : vector<4x32xf32>
    %1230 = vector.extract_strided_slice %1219 {offsets = [0, 64], sizes = [4, 32], strides = [1, 1]} : vector<4x128xf32> to vector<4x32xf32>
    %1231 = vector.extract_strided_slice %1219 {offsets = [0, 96], sizes = [4, 32], strides = [1, 1]} : vector<4x128xf32> to vector<4x32xf32>
    %cst_354 = arith.constant 5.000000e-01 : f32
    %1232 = vector.broadcast %cst_354 : f32 to vector<4x32xf32>
    %1233 = arith.mulf %1232, %1231 : vector<4x32xf32>
    %cst_355 = arith.constant 5.000000e-01 : f32
    %1234 = vector.broadcast %cst_355 : f32 to vector<4x32xf32>
    %1235 = arith.addf %1233, %1234 : vector<4x32xf32>
    %1236 = arith.mulf %1229, %1180 : vector<4x32xf32>
    %1237 = arith.mulf %1224, %1230 : vector<4x32xf32>
    %1238 = arith.addf %1236, %1237 : vector<4x32xf32>
    %1239 = math.tanh %1238 : vector<4x32xf32>
    %1240 = arith.mulf %1235, %1239 : vector<4x32xf32>
    %c3_356 = arith.constant 3 : index
    %c2_357 = arith.constant 2 : index
    %c0_358 = arith.constant 0 : index
    %c0_359 = arith.constant 0 : index
    %1241 = vector.load %arg4[%c3_356, %c2_357, %c0_358, %c0_359] : memref<5x6x4x32xf32, #tpu.memory_space<vmem>>, vector<1x1x4x32xf32>
    %1242 = vector.shape_cast %1241 : vector<1x1x4x32xf32> to vector<4x32xf32>
    %1243 = vector.shape_cast %1240 : vector<4x32xf32> to vector<1x1x4x32xf32>
    tpu.vector_store %arg4[%c3_356, %c2_357, %c0_358, %c0_359], %1243 {strides = array<i32>} : memref<5x6x4x32xf32, #tpu.memory_space<vmem>>, vector<1x1x4x32xf32>,
    %cst_360 = arith.constant dense<0.000000e+00> : vector<4x137xf32>
    %1244 = tpu.matmul %1240, %1, %cst_360 {dimension_numbers = #tpu.dot_dimension_numbers<[1], [0], [0], [1], [0, 0, 1, 1], [], []>, precision = #tpu.contract_precision<fp32>} : vector<4x32xf32>, vector<32x137xf32>, vector<4x137xf32> -> vector<4x137xf32>
    %1245 = vector.extract_strided_slice %1244 {offsets = [0, 128], sizes = [4, 9], strides = [1, 1]} : vector<4x137xf32> to vector<4x9xf32>
    %1246 = arith.addf %1245, %5 : vector<4x9xf32>
    %1247 = vector.extract_strided_slice %1246 {offsets = [0, 0], sizes = [4, 8], strides = [1, 1]} : vector<4x9xf32> to vector<4x8xf32>
    %1248 = vector.extract_strided_slice %1246 {offsets = [0, 8], sizes = [4, 1], strides = [1, 1]} : vector<4x9xf32> to vector<4x1xf32>
    %1249 = arith.negf %1248 : vector<4x1xf32>
    %1250 = math.exp %1249 : vector<4x1xf32>
    %cst_361 = arith.constant 1.000000e+00 : f32
    %1251 = vector.broadcast %cst_361 : f32 to vector<4x1xf32>
    %1252 = arith.addf %1251, %1250 : vector<4x1xf32>
    %1253 = arith.divf %1251, %1252 : vector<4x1xf32>
    %1254 = arith.addf %1196, %1253 : vector<4x1xf32>
    %cst_362 = arith.constant 1.000000e+00 : f32
    %1255 = vector.broadcast %cst_362 : f32 to vector<4x1xf32>
    %1256 = arith.minimumf %1255, %1254 : vector<4x1xf32>
    %1257 = arith.subf %1256, %1198 : vector<4x1xf32>
    %1258 = vector.broadcast %1257 : vector<4x1xf32> to vector<4x32xf32>
    %1259 = arith.mulf %1258, %1240 : vector<4x32xf32>
    %1260 = arith.addf %1202, %1259 : vector<4x32xf32>
    %1261 = vector.broadcast %1257 : vector<4x1xf32> to vector<4x32xf32>
    %1262 = arith.mulf %1261, %1238 : vector<4x32xf32>
    %1263 = arith.addf %1205, %1262 : vector<4x32xf32>
    %1264 = vector.broadcast %1257 : vector<4x1xf32> to vector<4x8xf32>
    %1265 = arith.mulf %1264, %1247 : vector<4x8xf32>
    %1266 = arith.addf %1208, %1265 : vector<4x8xf32>
    %cst_363 = arith.constant 1.000000e+00 : f32
    %1267 = vector.broadcast %cst_363 : f32 to vector<4x1xf32>
    %1268 = arith.cmpf olt, %1256, %1267 : vector<4x1xf32>
    %1269 = arith.extui %1268 : vector<4x1xi1> to vector<4x1xi32>
    %1270 = arith.sitofp %1269 : vector<4x1xi32> to vector<4x1xf32>
    %1271 = arith.addf %1213, %1270 : vector<4x1xf32>
    %cst_364 = arith.constant 1.000000e+00 : f32
    %1272 = vector.broadcast %cst_364 : f32 to vector<4x1xf32>
    %1273 = arith.cmpf olt, %1256, %1272 : vector<4x1xf32>
    %1274 = arith.select %1273, %1256, %1216 : vector<4x1xi1>, vector<4x1xf32>
    %1275 = vector.extract_strided_slice %1244 {offsets = [0, 0], sizes = [4, 128], strides = [1, 1]} : vector<4x137xf32> to vector<4x128xf32>
    %1276 = arith.addf %1092, %1275 : vector<4x128xf32>
    %1277 = math.tanh %1276 : vector<4x128xf32>
    %1278 = vector.extract_strided_slice %1277 {offsets = [0, 0], sizes = [4, 32], strides = [1, 1]} : vector<4x128xf32> to vector<4x32xf32>
    %cst_365 = arith.constant 5.000000e-01 : f32
    %1279 = vector.broadcast %cst_365 : f32 to vector<4x32xf32>
    %1280 = arith.mulf %1279, %1278 : vector<4x32xf32>
    %cst_366 = arith.constant 5.000000e-01 : f32
    %1281 = vector.broadcast %cst_366 : f32 to vector<4x32xf32>
    %1282 = arith.addf %1280, %1281 : vector<4x32xf32>
    %1283 = vector.extract_strided_slice %1277 {offsets = [0, 32], sizes = [4, 32], strides = [1, 1]} : vector<4x128xf32> to vector<4x32xf32>
    %cst_367 = arith.constant 5.000000e-01 : f32
    %1284 = vector.broadcast %cst_367 : f32 to vector<4x32xf32>
    %1285 = arith.mulf %1284, %1283 : vector<4x32xf32>
    %cst_368 = arith.constant 5.000000e-01 : f32
    %1286 = vector.broadcast %cst_368 : f32 to vector<4x32xf32>
    %1287 = arith.addf %1285, %1286 : vector<4x32xf32>
    %1288 = vector.extract_strided_slice %1277 {offsets = [0, 64], sizes = [4, 32], strides = [1, 1]} : vector<4x128xf32> to vector<4x32xf32>
    %1289 = vector.extract_strided_slice %1277 {offsets = [0, 96], sizes = [4, 32], strides = [1, 1]} : vector<4x128xf32> to vector<4x32xf32>
    %cst_369 = arith.constant 5.000000e-01 : f32
    %1290 = vector.broadcast %cst_369 : f32 to vector<4x32xf32>
    %1291 = arith.mulf %1290, %1289 : vector<4x32xf32>
    %cst_370 = arith.constant 5.000000e-01 : f32
    %1292 = vector.broadcast %cst_370 : f32 to vector<4x32xf32>
    %1293 = arith.addf %1291, %1292 : vector<4x32xf32>
    %1294 = arith.mulf %1287, %1238 : vector<4x32xf32>
    %1295 = arith.mulf %1282, %1288 : vector<4x32xf32>
    %1296 = arith.addf %1294, %1295 : vector<4x32xf32>
    %1297 = math.tanh %1296 : vector<4x32xf32>
    %1298 = arith.mulf %1293, %1297 : vector<4x32xf32>
    %c3_371 = arith.constant 3 : index
    %c3_372 = arith.constant 3 : index
    %c0_373 = arith.constant 0 : index
    %c0_374 = arith.constant 0 : index
    %1299 = vector.load %arg4[%c3_371, %c3_372, %c0_373, %c0_374] : memref<5x6x4x32xf32, #tpu.memory_space<vmem>>, vector<1x1x4x32xf32>
    %1300 = vector.shape_cast %1299 : vector<1x1x4x32xf32> to vector<4x32xf32>
    %1301 = vector.shape_cast %1298 : vector<4x32xf32> to vector<1x1x4x32xf32>
    tpu.vector_store %arg4[%c3_371, %c3_372, %c0_373, %c0_374], %1301 {strides = array<i32>} : memref<5x6x4x32xf32, #tpu.memory_space<vmem>>, vector<1x1x4x32xf32>,
    %cst_375 = arith.constant dense<0.000000e+00> : vector<4x137xf32>
    %1302 = tpu.matmul %1298, %1, %cst_375 {dimension_numbers = #tpu.dot_dimension_numbers<[1], [0], [0], [1], [0, 0, 1, 1], [], []>, precision = #tpu.contract_precision<fp32>} : vector<4x32xf32>, vector<32x137xf32>, vector<4x137xf32> -> vector<4x137xf32>
    %1303 = vector.extract_strided_slice %1302 {offsets = [0, 128], sizes = [4, 9], strides = [1, 1]} : vector<4x137xf32> to vector<4x9xf32>
    %1304 = arith.addf %1303, %5 : vector<4x9xf32>
    %1305 = vector.extract_strided_slice %1304 {offsets = [0, 0], sizes = [4, 8], strides = [1, 1]} : vector<4x9xf32> to vector<4x8xf32>
    %1306 = vector.extract_strided_slice %1304 {offsets = [0, 8], sizes = [4, 1], strides = [1, 1]} : vector<4x9xf32> to vector<4x1xf32>
    %1307 = arith.negf %1306 : vector<4x1xf32>
    %1308 = math.exp %1307 : vector<4x1xf32>
    %cst_376 = arith.constant 1.000000e+00 : f32
    %1309 = vector.broadcast %cst_376 : f32 to vector<4x1xf32>
    %1310 = arith.addf %1309, %1308 : vector<4x1xf32>
    %1311 = arith.divf %1309, %1310 : vector<4x1xf32>
    %1312 = arith.addf %1254, %1311 : vector<4x1xf32>
    %cst_377 = arith.constant 1.000000e+00 : f32
    %1313 = vector.broadcast %cst_377 : f32 to vector<4x1xf32>
    %1314 = arith.minimumf %1313, %1312 : vector<4x1xf32>
    %1315 = arith.subf %1314, %1256 : vector<4x1xf32>
    %1316 = vector.broadcast %1315 : vector<4x1xf32> to vector<4x32xf32>
    %1317 = arith.mulf %1316, %1298 : vector<4x32xf32>
    %1318 = arith.addf %1260, %1317 : vector<4x32xf32>
    %1319 = vector.broadcast %1315 : vector<4x1xf32> to vector<4x32xf32>
    %1320 = arith.mulf %1319, %1296 : vector<4x32xf32>
    %1321 = arith.addf %1263, %1320 : vector<4x32xf32>
    %1322 = vector.broadcast %1315 : vector<4x1xf32> to vector<4x8xf32>
    %1323 = arith.mulf %1322, %1305 : vector<4x8xf32>
    %1324 = arith.addf %1266, %1323 : vector<4x8xf32>
    %cst_378 = arith.constant 1.000000e+00 : f32
    %1325 = vector.broadcast %cst_378 : f32 to vector<4x1xf32>
    %1326 = arith.cmpf olt, %1314, %1325 : vector<4x1xf32>
    %1327 = arith.extui %1326 : vector<4x1xi1> to vector<4x1xi32>
    %1328 = arith.sitofp %1327 : vector<4x1xi32> to vector<4x1xf32>
    %1329 = arith.addf %1271, %1328 : vector<4x1xf32>
    %cst_379 = arith.constant 1.000000e+00 : f32
    %1330 = vector.broadcast %cst_379 : f32 to vector<4x1xf32>
    %1331 = arith.cmpf olt, %1314, %1330 : vector<4x1xf32>
    %1332 = arith.select %1331, %1314, %1274 : vector<4x1xi1>, vector<4x1xf32>
    %1333 = vector.extract_strided_slice %1302 {offsets = [0, 0], sizes = [4, 128], strides = [1, 1]} : vector<4x137xf32> to vector<4x128xf32>
    %1334 = arith.addf %1092, %1333 : vector<4x128xf32>
    %1335 = math.tanh %1334 : vector<4x128xf32>
    %1336 = vector.extract_strided_slice %1335 {offsets = [0, 0], sizes = [4, 32], strides = [1, 1]} : vector<4x128xf32> to vector<4x32xf32>
    %cst_380 = arith.constant 5.000000e-01 : f32
    %1337 = vector.broadcast %cst_380 : f32 to vector<4x32xf32>
    %1338 = arith.mulf %1337, %1336 : vector<4x32xf32>
    %cst_381 = arith.constant 5.000000e-01 : f32
    %1339 = vector.broadcast %cst_381 : f32 to vector<4x32xf32>
    %1340 = arith.addf %1338, %1339 : vector<4x32xf32>
    %1341 = vector.extract_strided_slice %1335 {offsets = [0, 32], sizes = [4, 32], strides = [1, 1]} : vector<4x128xf32> to vector<4x32xf32>
    %cst_382 = arith.constant 5.000000e-01 : f32
    %1342 = vector.broadcast %cst_382 : f32 to vector<4x32xf32>
    %1343 = arith.mulf %1342, %1341 : vector<4x32xf32>
    %cst_383 = arith.constant 5.000000e-01 : f32
    %1344 = vector.broadcast %cst_383 : f32 to vector<4x32xf32>
    %1345 = arith.addf %1343, %1344 : vector<4x32xf32>
    %1346 = vector.extract_strided_slice %1335 {offsets = [0, 64], sizes = [4, 32], strides = [1, 1]} : vector<4x128xf32> to vector<4x32xf32>
    %1347 = vector.extract_strided_slice %1335 {offsets = [0, 96], sizes = [4, 32], strides = [1, 1]} : vector<4x128xf32> to vector<4x32xf32>
    %cst_384 = arith.constant 5.000000e-01 : f32
    %1348 = vector.broadcast %cst_384 : f32 to vector<4x32xf32>
    %1349 = arith.mulf %1348, %1347 : vector<4x32xf32>
    %cst_385 = arith.constant 5.000000e-01 : f32
    %1350 = vector.broadcast %cst_385 : f32 to vector<4x32xf32>
    %1351 = arith.addf %1349, %1350 : vector<4x32xf32>
    %1352 = arith.mulf %1345, %1296 : vector<4x32xf32>
    %1353 = arith.mulf %1340, %1346 : vector<4x32xf32>
    %1354 = arith.addf %1352, %1353 : vector<4x32xf32>
    %1355 = math.tanh %1354 : vector<4x32xf32>
    %1356 = arith.mulf %1351, %1355 : vector<4x32xf32>
    %c3_386 = arith.constant 3 : index
    %c4_387 = arith.constant 4 : index
    %c0_388 = arith.constant 0 : index
    %c0_389 = arith.constant 0 : index
    %1357 = vector.load %arg4[%c3_386, %c4_387, %c0_388, %c0_389] : memref<5x6x4x32xf32, #tpu.memory_space<vmem>>, vector<1x1x4x32xf32>
    %1358 = vector.shape_cast %1357 : vector<1x1x4x32xf32> to vector<4x32xf32>
    %1359 = vector.shape_cast %1356 : vector<4x32xf32> to vector<1x1x4x32xf32>
    tpu.vector_store %arg4[%c3_386, %c4_387, %c0_388, %c0_389], %1359 {strides = array<i32>} : memref<5x6x4x32xf32, #tpu.memory_space<vmem>>, vector<1x1x4x32xf32>,
    %cst_390 = arith.constant dense<0.000000e+00> : vector<4x137xf32>
    %1360 = tpu.matmul %1356, %1, %cst_390 {dimension_numbers = #tpu.dot_dimension_numbers<[1], [0], [0], [1], [0, 0, 1, 1], [], []>, precision = #tpu.contract_precision<fp32>} : vector<4x32xf32>, vector<32x137xf32>, vector<4x137xf32> -> vector<4x137xf32>
    %1361 = vector.extract_strided_slice %1360 {offsets = [0, 128], sizes = [4, 9], strides = [1, 1]} : vector<4x137xf32> to vector<4x9xf32>
    %1362 = arith.addf %1361, %5 : vector<4x9xf32>
    %1363 = vector.extract_strided_slice %1362 {offsets = [0, 0], sizes = [4, 8], strides = [1, 1]} : vector<4x9xf32> to vector<4x8xf32>
    %1364 = vector.extract_strided_slice %1362 {offsets = [0, 8], sizes = [4, 1], strides = [1, 1]} : vector<4x9xf32> to vector<4x1xf32>
    %1365 = arith.negf %1364 : vector<4x1xf32>
    %1366 = math.exp %1365 : vector<4x1xf32>
    %cst_391 = arith.constant 1.000000e+00 : f32
    %1367 = vector.broadcast %cst_391 : f32 to vector<4x1xf32>
    %1368 = arith.addf %1367, %1366 : vector<4x1xf32>
    %1369 = arith.divf %1367, %1368 : vector<4x1xf32>
    %1370 = arith.addf %1312, %1369 : vector<4x1xf32>
    %cst_392 = arith.constant 1.000000e+00 : f32
    %1371 = vector.broadcast %cst_392 : f32 to vector<4x1xf32>
    %1372 = arith.minimumf %1371, %1370 : vector<4x1xf32>
    %1373 = arith.subf %1372, %1314 : vector<4x1xf32>
    %1374 = vector.broadcast %1373 : vector<4x1xf32> to vector<4x32xf32>
    %1375 = arith.mulf %1374, %1356 : vector<4x32xf32>
    %1376 = arith.addf %1318, %1375 : vector<4x32xf32>
    %1377 = vector.broadcast %1373 : vector<4x1xf32> to vector<4x32xf32>
    %1378 = arith.mulf %1377, %1354 : vector<4x32xf32>
    %1379 = arith.addf %1321, %1378 : vector<4x32xf32>
    %1380 = vector.broadcast %1373 : vector<4x1xf32> to vector<4x8xf32>
    %1381 = arith.mulf %1380, %1363 : vector<4x8xf32>
    %1382 = arith.addf %1324, %1381 : vector<4x8xf32>
    %cst_393 = arith.constant 1.000000e+00 : f32
    %1383 = vector.broadcast %cst_393 : f32 to vector<4x1xf32>
    %1384 = arith.cmpf olt, %1372, %1383 : vector<4x1xf32>
    %1385 = arith.extui %1384 : vector<4x1xi1> to vector<4x1xi32>
    %1386 = arith.sitofp %1385 : vector<4x1xi32> to vector<4x1xf32>
    %1387 = arith.addf %1329, %1386 : vector<4x1xf32>
    %cst_394 = arith.constant 1.000000e+00 : f32
    %1388 = vector.broadcast %cst_394 : f32 to vector<4x1xf32>
    %1389 = arith.cmpf olt, %1372, %1388 : vector<4x1xf32>
    %1390 = arith.select %1389, %1372, %1332 : vector<4x1xi1>, vector<4x1xf32>
    %1391 = vector.extract_strided_slice %1360 {offsets = [0, 0], sizes = [4, 128], strides = [1, 1]} : vector<4x137xf32> to vector<4x128xf32>
    %1392 = arith.addf %1092, %1391 : vector<4x128xf32>
    %1393 = math.tanh %1392 : vector<4x128xf32>
    %1394 = vector.extract_strided_slice %1393 {offsets = [0, 0], sizes = [4, 32], strides = [1, 1]} : vector<4x128xf32> to vector<4x32xf32>
    %cst_395 = arith.constant 5.000000e-01 : f32
    %1395 = vector.broadcast %cst_395 : f32 to vector<4x32xf32>
    %1396 = arith.mulf %1395, %1394 : vector<4x32xf32>
    %cst_396 = arith.constant 5.000000e-01 : f32
    %1397 = vector.broadcast %cst_396 : f32 to vector<4x32xf32>
    %1398 = arith.addf %1396, %1397 : vector<4x32xf32>
    %1399 = vector.extract_strided_slice %1393 {offsets = [0, 32], sizes = [4, 32], strides = [1, 1]} : vector<4x128xf32> to vector<4x32xf32>
    %cst_397 = arith.constant 5.000000e-01 : f32
    %1400 = vector.broadcast %cst_397 : f32 to vector<4x32xf32>
    %1401 = arith.mulf %1400, %1399 : vector<4x32xf32>
    %cst_398 = arith.constant 5.000000e-01 : f32
    %1402 = vector.broadcast %cst_398 : f32 to vector<4x32xf32>
    %1403 = arith.addf %1401, %1402 : vector<4x32xf32>
    %1404 = vector.extract_strided_slice %1393 {offsets = [0, 64], sizes = [4, 32], strides = [1, 1]} : vector<4x128xf32> to vector<4x32xf32>
    %1405 = vector.extract_strided_slice %1393 {offsets = [0, 96], sizes = [4, 32], strides = [1, 1]} : vector<4x128xf32> to vector<4x32xf32>
    %cst_399 = arith.constant 5.000000e-01 : f32
    %1406 = vector.broadcast %cst_399 : f32 to vector<4x32xf32>
    %1407 = arith.mulf %1406, %1405 : vector<4x32xf32>
    %cst_400 = arith.constant 5.000000e-01 : f32
    %1408 = vector.broadcast %cst_400 : f32 to vector<4x32xf32>
    %1409 = arith.addf %1407, %1408 : vector<4x32xf32>
    %1410 = arith.mulf %1403, %1354 : vector<4x32xf32>
    %1411 = arith.mulf %1398, %1404 : vector<4x32xf32>
    %1412 = arith.addf %1410, %1411 : vector<4x32xf32>
    %1413 = math.tanh %1412 : vector<4x32xf32>
    %1414 = arith.mulf %1409, %1413 : vector<4x32xf32>
    %c3_401 = arith.constant 3 : index
    %c5_402 = arith.constant 5 : index
    %c0_403 = arith.constant 0 : index
    %c0_404 = arith.constant 0 : index
    %1415 = vector.load %arg4[%c3_401, %c5_402, %c0_403, %c0_404] : memref<5x6x4x32xf32, #tpu.memory_space<vmem>>, vector<1x1x4x32xf32>
    %1416 = vector.shape_cast %1415 : vector<1x1x4x32xf32> to vector<4x32xf32>
    %1417 = vector.shape_cast %1414 : vector<4x32xf32> to vector<1x1x4x32xf32>
    tpu.vector_store %arg4[%c3_401, %c5_402, %c0_403, %c0_404], %1417 {strides = array<i32>} : memref<5x6x4x32xf32, #tpu.memory_space<vmem>>, vector<1x1x4x32xf32>,
    %cst_405 = arith.constant dense<0.000000e+00> : vector<4x137xf32>
    %1418 = tpu.matmul %1414, %1, %cst_405 {dimension_numbers = #tpu.dot_dimension_numbers<[1], [0], [0], [1], [0, 0, 1, 1], [], []>, precision = #tpu.contract_precision<fp32>} : vector<4x32xf32>, vector<32x137xf32>, vector<4x137xf32> -> vector<4x137xf32>
    %1419 = vector.extract_strided_slice %1418 {offsets = [0, 128], sizes = [4, 9], strides = [1, 1]} : vector<4x137xf32> to vector<4x9xf32>
    %1420 = arith.addf %1419, %5 : vector<4x9xf32>
    %1421 = vector.extract_strided_slice %1420 {offsets = [0, 0], sizes = [4, 8], strides = [1, 1]} : vector<4x9xf32> to vector<4x8xf32>
    %cst_406 = arith.constant 1.000000e+00 : f32
    %1422 = vector.broadcast %cst_406 : f32 to vector<4x1xf32>
    %1423 = arith.subf %1422, %1372 : vector<4x1xf32>
    %1424 = vector.broadcast %1423 : vector<4x1xf32> to vector<4x32xf32>
    %1425 = arith.mulf %1424, %1414 : vector<4x32xf32>
    %1426 = arith.addf %1376, %1425 : vector<4x32xf32>
    %1427 = vector.broadcast %1423 : vector<4x1xf32> to vector<4x32xf32>
    %1428 = arith.mulf %1427, %1412 : vector<4x32xf32>
    %1429 = arith.addf %1379, %1428 : vector<4x32xf32>
    %1430 = vector.broadcast %1423 : vector<4x1xf32> to vector<4x8xf32>
    %1431 = arith.mulf %1430, %1421 : vector<4x8xf32>
    %1432 = arith.addf %1382, %1431 : vector<4x8xf32>
    %cst_407 = arith.constant 1.000000e+00 : f32
    %1433 = vector.broadcast %cst_407 : f32 to vector<4x1xf32>
    %1434 = arith.cmpf olt, %1422, %1433 : vector<4x1xf32>
    %1435 = arith.extui %1434 : vector<4x1xi1> to vector<4x1xi32>
    %1436 = arith.sitofp %1435 : vector<4x1xi32> to vector<4x1xf32>
    %1437 = arith.addf %1387, %1436 : vector<4x1xf32>
    %cst_408 = arith.constant 1.000000e+00 : f32
    %1438 = vector.broadcast %cst_408 : f32 to vector<4x1xf32>
    %1439 = arith.cmpf olt, %1422, %1438 : vector<4x1xf32>
    %1440 = arith.select %1439, %1422, %1390 : vector<4x1xi1>, vector<4x1xf32>
    %cst_409 = arith.constant 0.000000e+00 : f32
    %1441 = vector.broadcast %cst_409 : f32 to vector<4x1xf32>
    %1442 = arith.cmpf ogt, %1437, %1441 : vector<4x1xf32>
    %cst_410 = arith.constant 1.000000e+00 : f32
    %1443 = vector.broadcast %cst_410 : f32 to vector<4x1xf32>
    %1444 = arith.subf %1443, %1440 : vector<4x1xf32>
    %cst_411 = arith.constant 0.000000e+00 : f32
    %1445 = vector.broadcast %cst_411 : f32 to vector<4x1xf32>
    %1446 = arith.select %1442, %1444, %1445 : vector<4x1xi1>, vector<4x1xf32>
    %1447 = arith.addf %1437, %1446 : vector<4x1xf32>
    %1448 = tpu.concatenate %1432, %1447, %1437 in 1 : vector<4x8xf32>, vector<4x1xf32>, vector<4x1xf32> -> vector<4x10xf32>
    %c3_412 = arith.constant 3 : index
    %c0_413 = arith.constant 0 : index
    %c0_414 = arith.constant 0 : index
    %1449 = vector.load %arg3[%c3_412, %c0_413, %c0_414] : memref<5x4x10xf32, #tpu.memory_space<vmem>>, vector<1x4x10xf32>
    %1450 = vector.shape_cast %1449 : vector<1x4x10xf32> to vector<4x10xf32>
    %1451 = vector.shape_cast %1448 : vector<4x10xf32> to vector<1x4x10xf32>
    tpu.vector_store %arg3[%c3_412, %c0_413, %c0_414], %1451 {strides = array<i32>} : memref<5x4x10xf32, #tpu.memory_space<vmem>>, vector<1x4x10xf32>,
    %1452 = vector.extract_strided_slice %9 {offsets = [16, 0], sizes = [4, 128], strides = [1, 1]} : vector<20x128xf32> to vector<4x128xf32>
    %cst_415 = arith.constant dense<0.000000e+00> : vector<4x137xf32>
    %1453 = tpu.matmul %1426, %1, %cst_415 {dimension_numbers = #tpu.dot_dimension_numbers<[1], [0], [0], [1], [0, 0, 1, 1], [], []>, precision = #tpu.contract_precision<fp32>} : vector<4x32xf32>, vector<32x137xf32>, vector<4x137xf32> -> vector<4x137xf32>
    %cst_416 = arith.constant 0.000000e+00 : f32
    %1454 = vector.broadcast %cst_416 : f32 to vector<4x8xf32>
    %cst_417 = arith.constant 0.000000e+00 : f32
    %1455 = vector.broadcast %cst_417 : f32 to vector<4x1xf32>
    %cst_418 = arith.constant 0.000000e+00 : f32
    %1456 = vector.broadcast %cst_418 : f32 to vector<4x1xf32>
    %cst_419 = arith.constant 0.000000e+00 : f32
    %1457 = vector.broadcast %cst_419 : f32 to vector<4x1xf32>
    %cst_420 = arith.constant 0.000000e+00 : f32
    %1458 = vector.broadcast %cst_420 : f32 to vector<4x1xf32>
    %1459 = vector.extract_strided_slice %1453 {offsets = [0, 0], sizes = [4, 128], strides = [1, 1]} : vector<4x137xf32> to vector<4x128xf32>
    %1460 = arith.addf %1452, %1459 : vector<4x128xf32>
    %1461 = math.tanh %1460 : vector<4x128xf32>
    %1462 = vector.extract_strided_slice %1461 {offsets = [0, 0], sizes = [4, 32], strides = [1, 1]} : vector<4x128xf32> to vector<4x32xf32>
    %cst_421 = arith.constant 5.000000e-01 : f32
    %1463 = vector.broadcast %cst_421 : f32 to vector<4x32xf32>
    %1464 = arith.mulf %1463, %1462 : vector<4x32xf32>
    %cst_422 = arith.constant 5.000000e-01 : f32
    %1465 = vector.broadcast %cst_422 : f32 to vector<4x32xf32>
    %1466 = arith.addf %1464, %1465 : vector<4x32xf32>
    %1467 = vector.extract_strided_slice %1461 {offsets = [0, 32], sizes = [4, 32], strides = [1, 1]} : vector<4x128xf32> to vector<4x32xf32>
    %cst_423 = arith.constant 5.000000e-01 : f32
    %1468 = vector.broadcast %cst_423 : f32 to vector<4x32xf32>
    %1469 = arith.mulf %1468, %1467 : vector<4x32xf32>
    %cst_424 = arith.constant 5.000000e-01 : f32
    %1470 = vector.broadcast %cst_424 : f32 to vector<4x32xf32>
    %1471 = arith.addf %1469, %1470 : vector<4x32xf32>
    %1472 = vector.extract_strided_slice %1461 {offsets = [0, 64], sizes = [4, 32], strides = [1, 1]} : vector<4x128xf32> to vector<4x32xf32>
    %1473 = vector.extract_strided_slice %1461 {offsets = [0, 96], sizes = [4, 32], strides = [1, 1]} : vector<4x128xf32> to vector<4x32xf32>
    %cst_425 = arith.constant 5.000000e-01 : f32
    %1474 = vector.broadcast %cst_425 : f32 to vector<4x32xf32>
    %1475 = arith.mulf %1474, %1473 : vector<4x32xf32>
    %cst_426 = arith.constant 5.000000e-01 : f32
    %1476 = vector.broadcast %cst_426 : f32 to vector<4x32xf32>
    %1477 = arith.addf %1475, %1476 : vector<4x32xf32>
    %1478 = arith.mulf %1471, %1429 : vector<4x32xf32>
    %1479 = arith.mulf %1466, %1472 : vector<4x32xf32>
    %1480 = arith.addf %1478, %1479 : vector<4x32xf32>
    %1481 = math.tanh %1480 : vector<4x32xf32>
    %1482 = arith.mulf %1477, %1481 : vector<4x32xf32>
    %c4_427 = arith.constant 4 : index
    %c0_428 = arith.constant 0 : index
    %c0_429 = arith.constant 0 : index
    %c0_430 = arith.constant 0 : index
    %1483 = vector.load %arg4[%c4_427, %c0_428, %c0_429, %c0_430] : memref<5x6x4x32xf32, #tpu.memory_space<vmem>>, vector<1x1x4x32xf32>
    %1484 = vector.shape_cast %1483 : vector<1x1x4x32xf32> to vector<4x32xf32>
    %1485 = vector.shape_cast %1482 : vector<4x32xf32> to vector<1x1x4x32xf32>
    tpu.vector_store %arg4[%c4_427, %c0_428, %c0_429, %c0_430], %1485 {strides = array<i32>} : memref<5x6x4x32xf32, #tpu.memory_space<vmem>>, vector<1x1x4x32xf32>,
    %cst_431 = arith.constant dense<0.000000e+00> : vector<4x137xf32>
    %1486 = tpu.matmul %1482, %1, %cst_431 {dimension_numbers = #tpu.dot_dimension_numbers<[1], [0], [0], [1], [0, 0, 1, 1], [], []>, precision = #tpu.contract_precision<fp32>} : vector<4x32xf32>, vector<32x137xf32>, vector<4x137xf32> -> vector<4x137xf32>
    %1487 = vector.extract_strided_slice %1486 {offsets = [0, 128], sizes = [4, 9], strides = [1, 1]} : vector<4x137xf32> to vector<4x9xf32>
    %1488 = arith.addf %1487, %5 : vector<4x9xf32>
    %1489 = vector.extract_strided_slice %1488 {offsets = [0, 0], sizes = [4, 8], strides = [1, 1]} : vector<4x9xf32> to vector<4x8xf32>
    %1490 = vector.extract_strided_slice %1488 {offsets = [0, 8], sizes = [4, 1], strides = [1, 1]} : vector<4x9xf32> to vector<4x1xf32>
    %1491 = arith.negf %1490 : vector<4x1xf32>
    %1492 = math.exp %1491 : vector<4x1xf32>
    %cst_432 = arith.constant 1.000000e+00 : f32
    %1493 = vector.broadcast %cst_432 : f32 to vector<4x1xf32>
    %1494 = arith.addf %1493, %1492 : vector<4x1xf32>
    %1495 = arith.divf %1493, %1494 : vector<4x1xf32>
    %1496 = arith.addf %1455, %1495 : vector<4x1xf32>
    %cst_433 = arith.constant 1.000000e+00 : f32
    %1497 = vector.broadcast %cst_433 : f32 to vector<4x1xf32>
    %1498 = arith.minimumf %1497, %1496 : vector<4x1xf32>
    %1499 = arith.subf %1498, %1456 : vector<4x1xf32>
    %1500 = vector.broadcast %1499 : vector<4x1xf32> to vector<4x8xf32>
    %1501 = arith.mulf %1500, %1489 : vector<4x8xf32>
    %1502 = arith.addf %1454, %1501 : vector<4x8xf32>
    %cst_434 = arith.constant 1.000000e+00 : f32
    %1503 = vector.broadcast %cst_434 : f32 to vector<4x1xf32>
    %1504 = arith.cmpf olt, %1498, %1503 : vector<4x1xf32>
    %1505 = arith.extui %1504 : vector<4x1xi1> to vector<4x1xi32>
    %1506 = arith.sitofp %1505 : vector<4x1xi32> to vector<4x1xf32>
    %1507 = arith.addf %1457, %1506 : vector<4x1xf32>
    %cst_435 = arith.constant 1.000000e+00 : f32
    %1508 = vector.broadcast %cst_435 : f32 to vector<4x1xf32>
    %1509 = arith.cmpf olt, %1498, %1508 : vector<4x1xf32>
    %1510 = arith.select %1509, %1498, %1458 : vector<4x1xi1>, vector<4x1xf32>
    %1511 = vector.extract_strided_slice %1486 {offsets = [0, 0], sizes = [4, 128], strides = [1, 1]} : vector<4x137xf32> to vector<4x128xf32>
    %1512 = arith.addf %1452, %1511 : vector<4x128xf32>
    %1513 = math.tanh %1512 : vector<4x128xf32>
    %1514 = vector.extract_strided_slice %1513 {offsets = [0, 0], sizes = [4, 32], strides = [1, 1]} : vector<4x128xf32> to vector<4x32xf32>
    %cst_436 = arith.constant 5.000000e-01 : f32
    %1515 = vector.broadcast %cst_436 : f32 to vector<4x32xf32>
    %1516 = arith.mulf %1515, %1514 : vector<4x32xf32>
    %cst_437 = arith.constant 5.000000e-01 : f32
    %1517 = vector.broadcast %cst_437 : f32 to vector<4x32xf32>
    %1518 = arith.addf %1516, %1517 : vector<4x32xf32>
    %1519 = vector.extract_strided_slice %1513 {offsets = [0, 32], sizes = [4, 32], strides = [1, 1]} : vector<4x128xf32> to vector<4x32xf32>
    %cst_438 = arith.constant 5.000000e-01 : f32
    %1520 = vector.broadcast %cst_438 : f32 to vector<4x32xf32>
    %1521 = arith.mulf %1520, %1519 : vector<4x32xf32>
    %cst_439 = arith.constant 5.000000e-01 : f32
    %1522 = vector.broadcast %cst_439 : f32 to vector<4x32xf32>
    %1523 = arith.addf %1521, %1522 : vector<4x32xf32>
    %1524 = vector.extract_strided_slice %1513 {offsets = [0, 64], sizes = [4, 32], strides = [1, 1]} : vector<4x128xf32> to vector<4x32xf32>
    %1525 = vector.extract_strided_slice %1513 {offsets = [0, 96], sizes = [4, 32], strides = [1, 1]} : vector<4x128xf32> to vector<4x32xf32>
    %cst_440 = arith.constant 5.000000e-01 : f32
    %1526 = vector.broadcast %cst_440 : f32 to vector<4x32xf32>
    %1527 = arith.mulf %1526, %1525 : vector<4x32xf32>
    %cst_441 = arith.constant 5.000000e-01 : f32
    %1528 = vector.broadcast %cst_441 : f32 to vector<4x32xf32>
    %1529 = arith.addf %1527, %1528 : vector<4x32xf32>
    %1530 = arith.mulf %1523, %1480 : vector<4x32xf32>
    %1531 = arith.mulf %1518, %1524 : vector<4x32xf32>
    %1532 = arith.addf %1530, %1531 : vector<4x32xf32>
    %1533 = math.tanh %1532 : vector<4x32xf32>
    %1534 = arith.mulf %1529, %1533 : vector<4x32xf32>
    %c4_442 = arith.constant 4 : index
    %c1_443 = arith.constant 1 : index
    %c0_444 = arith.constant 0 : index
    %c0_445 = arith.constant 0 : index
    %1535 = vector.load %arg4[%c4_442, %c1_443, %c0_444, %c0_445] : memref<5x6x4x32xf32, #tpu.memory_space<vmem>>, vector<1x1x4x32xf32>
    %1536 = vector.shape_cast %1535 : vector<1x1x4x32xf32> to vector<4x32xf32>
    %1537 = vector.shape_cast %1534 : vector<4x32xf32> to vector<1x1x4x32xf32>
    tpu.vector_store %arg4[%c4_442, %c1_443, %c0_444, %c0_445], %1537 {strides = array<i32>} : memref<5x6x4x32xf32, #tpu.memory_space<vmem>>, vector<1x1x4x32xf32>,
    %cst_446 = arith.constant dense<0.000000e+00> : vector<4x137xf32>
    %1538 = tpu.matmul %1534, %1, %cst_446 {dimension_numbers = #tpu.dot_dimension_numbers<[1], [0], [0], [1], [0, 0, 1, 1], [], []>, precision = #tpu.contract_precision<fp32>} : vector<4x32xf32>, vector<32x137xf32>, vector<4x137xf32> -> vector<4x137xf32>
    %1539 = vector.extract_strided_slice %1538 {offsets = [0, 128], sizes = [4, 9], strides = [1, 1]} : vector<4x137xf32> to vector<4x9xf32>
    %1540 = arith.addf %1539, %5 : vector<4x9xf32>
    %1541 = vector.extract_strided_slice %1540 {offsets = [0, 0], sizes = [4, 8], strides = [1, 1]} : vector<4x9xf32> to vector<4x8xf32>
    %1542 = vector.extract_strided_slice %1540 {offsets = [0, 8], sizes = [4, 1], strides = [1, 1]} : vector<4x9xf32> to vector<4x1xf32>
    %1543 = arith.negf %1542 : vector<4x1xf32>
    %1544 = math.exp %1543 : vector<4x1xf32>
    %cst_447 = arith.constant 1.000000e+00 : f32
    %1545 = vector.broadcast %cst_447 : f32 to vector<4x1xf32>
    %1546 = arith.addf %1545, %1544 : vector<4x1xf32>
    %1547 = arith.divf %1545, %1546 : vector<4x1xf32>
    %1548 = arith.addf %1496, %1547 : vector<4x1xf32>
    %cst_448 = arith.constant 1.000000e+00 : f32
    %1549 = vector.broadcast %cst_448 : f32 to vector<4x1xf32>
    %1550 = arith.minimumf %1549, %1548 : vector<4x1xf32>
    %1551 = arith.subf %1550, %1498 : vector<4x1xf32>
    %1552 = vector.broadcast %1551 : vector<4x1xf32> to vector<4x8xf32>
    %1553 = arith.mulf %1552, %1541 : vector<4x8xf32>
    %1554 = arith.addf %1502, %1553 : vector<4x8xf32>
    %cst_449 = arith.constant 1.000000e+00 : f32
    %1555 = vector.broadcast %cst_449 : f32 to vector<4x1xf32>
    %1556 = arith.cmpf olt, %1550, %1555 : vector<4x1xf32>
    %1557 = arith.extui %1556 : vector<4x1xi1> to vector<4x1xi32>
    %1558 = arith.sitofp %1557 : vector<4x1xi32> to vector<4x1xf32>
    %1559 = arith.addf %1507, %1558 : vector<4x1xf32>
    %cst_450 = arith.constant 1.000000e+00 : f32
    %1560 = vector.broadcast %cst_450 : f32 to vector<4x1xf32>
    %1561 = arith.cmpf olt, %1550, %1560 : vector<4x1xf32>
    %1562 = arith.select %1561, %1550, %1510 : vector<4x1xi1>, vector<4x1xf32>
    %1563 = vector.extract_strided_slice %1538 {offsets = [0, 0], sizes = [4, 128], strides = [1, 1]} : vector<4x137xf32> to vector<4x128xf32>
    %1564 = arith.addf %1452, %1563 : vector<4x128xf32>
    %1565 = math.tanh %1564 : vector<4x128xf32>
    %1566 = vector.extract_strided_slice %1565 {offsets = [0, 0], sizes = [4, 32], strides = [1, 1]} : vector<4x128xf32> to vector<4x32xf32>
    %cst_451 = arith.constant 5.000000e-01 : f32
    %1567 = vector.broadcast %cst_451 : f32 to vector<4x32xf32>
    %1568 = arith.mulf %1567, %1566 : vector<4x32xf32>
    %cst_452 = arith.constant 5.000000e-01 : f32
    %1569 = vector.broadcast %cst_452 : f32 to vector<4x32xf32>
    %1570 = arith.addf %1568, %1569 : vector<4x32xf32>
    %1571 = vector.extract_strided_slice %1565 {offsets = [0, 32], sizes = [4, 32], strides = [1, 1]} : vector<4x128xf32> to vector<4x32xf32>
    %cst_453 = arith.constant 5.000000e-01 : f32
    %1572 = vector.broadcast %cst_453 : f32 to vector<4x32xf32>
    %1573 = arith.mulf %1572, %1571 : vector<4x32xf32>
    %cst_454 = arith.constant 5.000000e-01 : f32
    %1574 = vector.broadcast %cst_454 : f32 to vector<4x32xf32>
    %1575 = arith.addf %1573, %1574 : vector<4x32xf32>
    %1576 = vector.extract_strided_slice %1565 {offsets = [0, 64], sizes = [4, 32], strides = [1, 1]} : vector<4x128xf32> to vector<4x32xf32>
    %1577 = vector.extract_strided_slice %1565 {offsets = [0, 96], sizes = [4, 32], strides = [1, 1]} : vector<4x128xf32> to vector<4x32xf32>
    %cst_455 = arith.constant 5.000000e-01 : f32
    %1578 = vector.broadcast %cst_455 : f32 to vector<4x32xf32>
    %1579 = arith.mulf %1578, %1577 : vector<4x32xf32>
    %cst_456 = arith.constant 5.000000e-01 : f32
    %1580 = vector.broadcast %cst_456 : f32 to vector<4x32xf32>
    %1581 = arith.addf %1579, %1580 : vector<4x32xf32>
    %1582 = arith.mulf %1575, %1532 : vector<4x32xf32>
    %1583 = arith.mulf %1570, %1576 : vector<4x32xf32>
    %1584 = arith.addf %1582, %1583 : vector<4x32xf32>
    %1585 = math.tanh %1584 : vector<4x32xf32>
    %1586 = arith.mulf %1581, %1585 : vector<4x32xf32>
    %c4_457 = arith.constant 4 : index
    %c2_458 = arith.constant 2 : index
    %c0_459 = arith.constant 0 : index
    %c0_460 = arith.constant 0 : index
    %1587 = vector.load %arg4[%c4_457, %c2_458, %c0_459, %c0_460] : memref<5x6x4x32xf32, #tpu.memory_space<vmem>>, vector<1x1x4x32xf32>
    %1588 = vector.shape_cast %1587 : vector<1x1x4x32xf32> to vector<4x32xf32>
    %1589 = vector.shape_cast %1586 : vector<4x32xf32> to vector<1x1x4x32xf32>
    tpu.vector_store %arg4[%c4_457, %c2_458, %c0_459, %c0_460], %1589 {strides = array<i32>} : memref<5x6x4x32xf32, #tpu.memory_space<vmem>>, vector<1x1x4x32xf32>,
    %cst_461 = arith.constant dense<0.000000e+00> : vector<4x137xf32>
    %1590 = tpu.matmul %1586, %1, %cst_461 {dimension_numbers = #tpu.dot_dimension_numbers<[1], [0], [0], [1], [0, 0, 1, 1], [], []>, precision = #tpu.contract_precision<fp32>} : vector<4x32xf32>, vector<32x137xf32>, vector<4x137xf32> -> vector<4x137xf32>
    %1591 = vector.extract_strided_slice %1590 {offsets = [0, 128], sizes = [4, 9], strides = [1, 1]} : vector<4x137xf32> to vector<4x9xf32>
    %1592 = arith.addf %1591, %5 : vector<4x9xf32>
    %1593 = vector.extract_strided_slice %1592 {offsets = [0, 0], sizes = [4, 8], strides = [1, 1]} : vector<4x9xf32> to vector<4x8xf32>
    %1594 = vector.extract_strided_slice %1592 {offsets = [0, 8], sizes = [4, 1], strides = [1, 1]} : vector<4x9xf32> to vector<4x1xf32>
    %1595 = arith.negf %1594 : vector<4x1xf32>
    %1596 = math.exp %1595 : vector<4x1xf32>
    %cst_462 = arith.constant 1.000000e+00 : f32
    %1597 = vector.broadcast %cst_462 : f32 to vector<4x1xf32>
    %1598 = arith.addf %1597, %1596 : vector<4x1xf32>
    %1599 = arith.divf %1597, %1598 : vector<4x1xf32>
    %1600 = arith.addf %1548, %1599 : vector<4x1xf32>
    %cst_463 = arith.constant 1.000000e+00 : f32
    %1601 = vector.broadcast %cst_463 : f32 to vector<4x1xf32>
    %1602 = arith.minimumf %1601, %1600 : vector<4x1xf32>
    %1603 = arith.subf %1602, %1550 : vector<4x1xf32>
    %1604 = vector.broadcast %1603 : vector<4x1xf32> to vector<4x8xf32>
    %1605 = arith.mulf %1604, %1593 : vector<4x8xf32>
    %1606 = arith.addf %1554, %1605 : vector<4x8xf32>
    %cst_464 = arith.constant 1.000000e+00 : f32
    %1607 = vector.broadcast %cst_464 : f32 to vector<4x1xf32>
    %1608 = arith.cmpf olt, %1602, %1607 : vector<4x1xf32>
    %1609 = arith.extui %1608 : vector<4x1xi1> to vector<4x1xi32>
    %1610 = arith.sitofp %1609 : vector<4x1xi32> to vector<4x1xf32>
    %1611 = arith.addf %1559, %1610 : vector<4x1xf32>
    %cst_465 = arith.constant 1.000000e+00 : f32
    %1612 = vector.broadcast %cst_465 : f32 to vector<4x1xf32>
    %1613 = arith.cmpf olt, %1602, %1612 : vector<4x1xf32>
    %1614 = arith.select %1613, %1602, %1562 : vector<4x1xi1>, vector<4x1xf32>
    %1615 = vector.extract_strided_slice %1590 {offsets = [0, 0], sizes = [4, 128], strides = [1, 1]} : vector<4x137xf32> to vector<4x128xf32>
    %1616 = arith.addf %1452, %1615 : vector<4x128xf32>
    %1617 = math.tanh %1616 : vector<4x128xf32>
    %1618 = vector.extract_strided_slice %1617 {offsets = [0, 0], sizes = [4, 32], strides = [1, 1]} : vector<4x128xf32> to vector<4x32xf32>
    %cst_466 = arith.constant 5.000000e-01 : f32
    %1619 = vector.broadcast %cst_466 : f32 to vector<4x32xf32>
    %1620 = arith.mulf %1619, %1618 : vector<4x32xf32>
    %cst_467 = arith.constant 5.000000e-01 : f32
    %1621 = vector.broadcast %cst_467 : f32 to vector<4x32xf32>
    %1622 = arith.addf %1620, %1621 : vector<4x32xf32>
    %1623 = vector.extract_strided_slice %1617 {offsets = [0, 32], sizes = [4, 32], strides = [1, 1]} : vector<4x128xf32> to vector<4x32xf32>
    %cst_468 = arith.constant 5.000000e-01 : f32
    %1624 = vector.broadcast %cst_468 : f32 to vector<4x32xf32>
    %1625 = arith.mulf %1624, %1623 : vector<4x32xf32>
    %cst_469 = arith.constant 5.000000e-01 : f32
    %1626 = vector.broadcast %cst_469 : f32 to vector<4x32xf32>
    %1627 = arith.addf %1625, %1626 : vector<4x32xf32>
    %1628 = vector.extract_strided_slice %1617 {offsets = [0, 64], sizes = [4, 32], strides = [1, 1]} : vector<4x128xf32> to vector<4x32xf32>
    %1629 = vector.extract_strided_slice %1617 {offsets = [0, 96], sizes = [4, 32], strides = [1, 1]} : vector<4x128xf32> to vector<4x32xf32>
    %cst_470 = arith.constant 5.000000e-01 : f32
    %1630 = vector.broadcast %cst_470 : f32 to vector<4x32xf32>
    %1631 = arith.mulf %1630, %1629 : vector<4x32xf32>
    %cst_471 = arith.constant 5.000000e-01 : f32
    %1632 = vector.broadcast %cst_471 : f32 to vector<4x32xf32>
    %1633 = arith.addf %1631, %1632 : vector<4x32xf32>
    %1634 = arith.mulf %1627, %1584 : vector<4x32xf32>
    %1635 = arith.mulf %1622, %1628 : vector<4x32xf32>
    %1636 = arith.addf %1634, %1635 : vector<4x32xf32>
    %1637 = math.tanh %1636 : vector<4x32xf32>
    %1638 = arith.mulf %1633, %1637 : vector<4x32xf32>
    %c4_472 = arith.constant 4 : index
    %c3_473 = arith.constant 3 : index
    %c0_474 = arith.constant 0 : index
    %c0_475 = arith.constant 0 : index
    %1639 = vector.load %arg4[%c4_472, %c3_473, %c0_474, %c0_475] : memref<5x6x4x32xf32, #tpu.memory_space<vmem>>, vector<1x1x4x32xf32>
    %1640 = vector.shape_cast %1639 : vector<1x1x4x32xf32> to vector<4x32xf32>
    %1641 = vector.shape_cast %1638 : vector<4x32xf32> to vector<1x1x4x32xf32>
    tpu.vector_store %arg4[%c4_472, %c3_473, %c0_474, %c0_475], %1641 {strides = array<i32>} : memref<5x6x4x32xf32, #tpu.memory_space<vmem>>, vector<1x1x4x32xf32>,
    %cst_476 = arith.constant dense<0.000000e+00> : vector<4x137xf32>
    %1642 = tpu.matmul %1638, %1, %cst_476 {dimension_numbers = #tpu.dot_dimension_numbers<[1], [0], [0], [1], [0, 0, 1, 1], [], []>, precision = #tpu.contract_precision<fp32>} : vector<4x32xf32>, vector<32x137xf32>, vector<4x137xf32> -> vector<4x137xf32>
    %1643 = vector.extract_strided_slice %1642 {offsets = [0, 128], sizes = [4, 9], strides = [1, 1]} : vector<4x137xf32> to vector<4x9xf32>
    %1644 = arith.addf %1643, %5 : vector<4x9xf32>
    %1645 = vector.extract_strided_slice %1644 {offsets = [0, 0], sizes = [4, 8], strides = [1, 1]} : vector<4x9xf32> to vector<4x8xf32>
    %1646 = vector.extract_strided_slice %1644 {offsets = [0, 8], sizes = [4, 1], strides = [1, 1]} : vector<4x9xf32> to vector<4x1xf32>
    %1647 = arith.negf %1646 : vector<4x1xf32>
    %1648 = math.exp %1647 : vector<4x1xf32>
    %cst_477 = arith.constant 1.000000e+00 : f32
    %1649 = vector.broadcast %cst_477 : f32 to vector<4x1xf32>
    %1650 = arith.addf %1649, %1648 : vector<4x1xf32>
    %1651 = arith.divf %1649, %1650 : vector<4x1xf32>
    %1652 = arith.addf %1600, %1651 : vector<4x1xf32>
    %cst_478 = arith.constant 1.000000e+00 : f32
    %1653 = vector.broadcast %cst_478 : f32 to vector<4x1xf32>
    %1654 = arith.minimumf %1653, %1652 : vector<4x1xf32>
    %1655 = arith.subf %1654, %1602 : vector<4x1xf32>
    %1656 = vector.broadcast %1655 : vector<4x1xf32> to vector<4x8xf32>
    %1657 = arith.mulf %1656, %1645 : vector<4x8xf32>
    %1658 = arith.addf %1606, %1657 : vector<4x8xf32>
    %cst_479 = arith.constant 1.000000e+00 : f32
    %1659 = vector.broadcast %cst_479 : f32 to vector<4x1xf32>
    %1660 = arith.cmpf olt, %1654, %1659 : vector<4x1xf32>
    %1661 = arith.extui %1660 : vector<4x1xi1> to vector<4x1xi32>
    %1662 = arith.sitofp %1661 : vector<4x1xi32> to vector<4x1xf32>
    %1663 = arith.addf %1611, %1662 : vector<4x1xf32>
    %cst_480 = arith.constant 1.000000e+00 : f32
    %1664 = vector.broadcast %cst_480 : f32 to vector<4x1xf32>
    %1665 = arith.cmpf olt, %1654, %1664 : vector<4x1xf32>
    %1666 = arith.select %1665, %1654, %1614 : vector<4x1xi1>, vector<4x1xf32>
    %1667 = vector.extract_strided_slice %1642 {offsets = [0, 0], sizes = [4, 128], strides = [1, 1]} : vector<4x137xf32> to vector<4x128xf32>
    %1668 = arith.addf %1452, %1667 : vector<4x128xf32>
    %1669 = math.tanh %1668 : vector<4x128xf32>
    %1670 = vector.extract_strided_slice %1669 {offsets = [0, 0], sizes = [4, 32], strides = [1, 1]} : vector<4x128xf32> to vector<4x32xf32>
    %cst_481 = arith.constant 5.000000e-01 : f32
    %1671 = vector.broadcast %cst_481 : f32 to vector<4x32xf32>
    %1672 = arith.mulf %1671, %1670 : vector<4x32xf32>
    %cst_482 = arith.constant 5.000000e-01 : f32
    %1673 = vector.broadcast %cst_482 : f32 to vector<4x32xf32>
    %1674 = arith.addf %1672, %1673 : vector<4x32xf32>
    %1675 = vector.extract_strided_slice %1669 {offsets = [0, 32], sizes = [4, 32], strides = [1, 1]} : vector<4x128xf32> to vector<4x32xf32>
    %cst_483 = arith.constant 5.000000e-01 : f32
    %1676 = vector.broadcast %cst_483 : f32 to vector<4x32xf32>
    %1677 = arith.mulf %1676, %1675 : vector<4x32xf32>
    %cst_484 = arith.constant 5.000000e-01 : f32
    %1678 = vector.broadcast %cst_484 : f32 to vector<4x32xf32>
    %1679 = arith.addf %1677, %1678 : vector<4x32xf32>
    %1680 = vector.extract_strided_slice %1669 {offsets = [0, 64], sizes = [4, 32], strides = [1, 1]} : vector<4x128xf32> to vector<4x32xf32>
    %1681 = vector.extract_strided_slice %1669 {offsets = [0, 96], sizes = [4, 32], strides = [1, 1]} : vector<4x128xf32> to vector<4x32xf32>
    %cst_485 = arith.constant 5.000000e-01 : f32
    %1682 = vector.broadcast %cst_485 : f32 to vector<4x32xf32>
    %1683 = arith.mulf %1682, %1681 : vector<4x32xf32>
    %cst_486 = arith.constant 5.000000e-01 : f32
    %1684 = vector.broadcast %cst_486 : f32 to vector<4x32xf32>
    %1685 = arith.addf %1683, %1684 : vector<4x32xf32>
    %1686 = arith.mulf %1679, %1636 : vector<4x32xf32>
    %1687 = arith.mulf %1674, %1680 : vector<4x32xf32>
    %1688 = arith.addf %1686, %1687 : vector<4x32xf32>
    %1689 = math.tanh %1688 : vector<4x32xf32>
    %1690 = arith.mulf %1685, %1689 : vector<4x32xf32>
    %c4_487 = arith.constant 4 : index
    %c4_488 = arith.constant 4 : index
    %c0_489 = arith.constant 0 : index
    %c0_490 = arith.constant 0 : index
    %1691 = vector.load %arg4[%c4_487, %c4_488, %c0_489, %c0_490] : memref<5x6x4x32xf32, #tpu.memory_space<vmem>>, vector<1x1x4x32xf32>
    %1692 = vector.shape_cast %1691 : vector<1x1x4x32xf32> to vector<4x32xf32>
    %1693 = vector.shape_cast %1690 : vector<4x32xf32> to vector<1x1x4x32xf32>
    tpu.vector_store %arg4[%c4_487, %c4_488, %c0_489, %c0_490], %1693 {strides = array<i32>} : memref<5x6x4x32xf32, #tpu.memory_space<vmem>>, vector<1x1x4x32xf32>,
    %cst_491 = arith.constant dense<0.000000e+00> : vector<4x137xf32>
    %1694 = tpu.matmul %1690, %1, %cst_491 {dimension_numbers = #tpu.dot_dimension_numbers<[1], [0], [0], [1], [0, 0, 1, 1], [], []>, precision = #tpu.contract_precision<fp32>} : vector<4x32xf32>, vector<32x137xf32>, vector<4x137xf32> -> vector<4x137xf32>
    %1695 = vector.extract_strided_slice %1694 {offsets = [0, 128], sizes = [4, 9], strides = [1, 1]} : vector<4x137xf32> to vector<4x9xf32>
    %1696 = arith.addf %1695, %5 : vector<4x9xf32>
    %1697 = vector.extract_strided_slice %1696 {offsets = [0, 0], sizes = [4, 8], strides = [1, 1]} : vector<4x9xf32> to vector<4x8xf32>
    %1698 = vector.extract_strided_slice %1696 {offsets = [0, 8], sizes = [4, 1], strides = [1, 1]} : vector<4x9xf32> to vector<4x1xf32>
    %1699 = arith.negf %1698 : vector<4x1xf32>
    %1700 = math.exp %1699 : vector<4x1xf32>
    %cst_492 = arith.constant 1.000000e+00 : f32
    %1701 = vector.broadcast %cst_492 : f32 to vector<4x1xf32>
    %1702 = arith.addf %1701, %1700 : vector<4x1xf32>
    %1703 = arith.divf %1701, %1702 : vector<4x1xf32>
    %1704 = arith.addf %1652, %1703 : vector<4x1xf32>
    %cst_493 = arith.constant 1.000000e+00 : f32
    %1705 = vector.broadcast %cst_493 : f32 to vector<4x1xf32>
    %1706 = arith.minimumf %1705, %1704 : vector<4x1xf32>
    %1707 = arith.subf %1706, %1654 : vector<4x1xf32>
    %1708 = vector.broadcast %1707 : vector<4x1xf32> to vector<4x8xf32>
    %1709 = arith.mulf %1708, %1697 : vector<4x8xf32>
    %1710 = arith.addf %1658, %1709 : vector<4x8xf32>
    %cst_494 = arith.constant 1.000000e+00 : f32
    %1711 = vector.broadcast %cst_494 : f32 to vector<4x1xf32>
    %1712 = arith.cmpf olt, %1706, %1711 : vector<4x1xf32>
    %1713 = arith.extui %1712 : vector<4x1xi1> to vector<4x1xi32>
    %1714 = arith.sitofp %1713 : vector<4x1xi32> to vector<4x1xf32>
    %1715 = arith.addf %1663, %1714 : vector<4x1xf32>
    %cst_495 = arith.constant 1.000000e+00 : f32
    %1716 = vector.broadcast %cst_495 : f32 to vector<4x1xf32>
    %1717 = arith.cmpf olt, %1706, %1716 : vector<4x1xf32>
    %1718 = arith.select %1717, %1706, %1666 : vector<4x1xi1>, vector<4x1xf32>
    %1719 = vector.extract_strided_slice %1694 {offsets = [0, 0], sizes = [4, 128], strides = [1, 1]} : vector<4x137xf32> to vector<4x128xf32>
    %1720 = arith.addf %1452, %1719 : vector<4x128xf32>
    %1721 = math.tanh %1720 : vector<4x128xf32>
    %1722 = vector.extract_strided_slice %1721 {offsets = [0, 0], sizes = [4, 32], strides = [1, 1]} : vector<4x128xf32> to vector<4x32xf32>
    %cst_496 = arith.constant 5.000000e-01 : f32
    %1723 = vector.broadcast %cst_496 : f32 to vector<4x32xf32>
    %1724 = arith.mulf %1723, %1722 : vector<4x32xf32>
    %cst_497 = arith.constant 5.000000e-01 : f32
    %1725 = vector.broadcast %cst_497 : f32 to vector<4x32xf32>
    %1726 = arith.addf %1724, %1725 : vector<4x32xf32>
    %1727 = vector.extract_strided_slice %1721 {offsets = [0, 32], sizes = [4, 32], strides = [1, 1]} : vector<4x128xf32> to vector<4x32xf32>
    %cst_498 = arith.constant 5.000000e-01 : f32
    %1728 = vector.broadcast %cst_498 : f32 to vector<4x32xf32>
    %1729 = arith.mulf %1728, %1727 : vector<4x32xf32>
    %cst_499 = arith.constant 5.000000e-01 : f32
    %1730 = vector.broadcast %cst_499 : f32 to vector<4x32xf32>
    %1731 = arith.addf %1729, %1730 : vector<4x32xf32>
    %1732 = vector.extract_strided_slice %1721 {offsets = [0, 64], sizes = [4, 32], strides = [1, 1]} : vector<4x128xf32> to vector<4x32xf32>
    %1733 = vector.extract_strided_slice %1721 {offsets = [0, 96], sizes = [4, 32], strides = [1, 1]} : vector<4x128xf32> to vector<4x32xf32>
    %cst_500 = arith.constant 5.000000e-01 : f32
    %1734 = vector.broadcast %cst_500 : f32 to vector<4x32xf32>
    %1735 = arith.mulf %1734, %1733 : vector<4x32xf32>
    %cst_501 = arith.constant 5.000000e-01 : f32
    %1736 = vector.broadcast %cst_501 : f32 to vector<4x32xf32>
    %1737 = arith.addf %1735, %1736 : vector<4x32xf32>
    %1738 = arith.mulf %1731, %1688 : vector<4x32xf32>
    %1739 = arith.mulf %1726, %1732 : vector<4x32xf32>
    %1740 = arith.addf %1738, %1739 : vector<4x32xf32>
    %1741 = math.tanh %1740 : vector<4x32xf32>
    %1742 = arith.mulf %1737, %1741 : vector<4x32xf32>
    %c4_502 = arith.constant 4 : index
    %c5_503 = arith.constant 5 : index
    %c0_504 = arith.constant 0 : index
    %c0_505 = arith.constant 0 : index
    %1743 = vector.load %arg4[%c4_502, %c5_503, %c0_504, %c0_505] : memref<5x6x4x32xf32, #tpu.memory_space<vmem>>, vector<1x1x4x32xf32>
    %1744 = vector.shape_cast %1743 : vector<1x1x4x32xf32> to vector<4x32xf32>
    %1745 = vector.shape_cast %1742 : vector<4x32xf32> to vector<1x1x4x32xf32>
    tpu.vector_store %arg4[%c4_502, %c5_503, %c0_504, %c0_505], %1745 {strides = array<i32>} : memref<5x6x4x32xf32, #tpu.memory_space<vmem>>, vector<1x1x4x32xf32>,
    %cst_506 = arith.constant dense<0.000000e+00> : vector<4x137xf32>
    %1746 = tpu.matmul %1742, %1, %cst_506 {dimension_numbers = #tpu.dot_dimension_numbers<[1], [0], [0], [1], [0, 0, 1, 1], [], []>, precision = #tpu.contract_precision<fp32>} : vector<4x32xf32>, vector<32x137xf32>, vector<4x137xf32> -> vector<4x137xf32>
    %1747 = vector.extract_strided_slice %1746 {offsets = [0, 128], sizes = [4, 9], strides = [1, 1]} : vector<4x137xf32> to vector<4x9xf32>
    %1748 = arith.addf %1747, %5 : vector<4x9xf32>
    %1749 = vector.extract_strided_slice %1748 {offsets = [0, 0], sizes = [4, 8], strides = [1, 1]} : vector<4x9xf32> to vector<4x8xf32>
    %cst_507 = arith.constant 1.000000e+00 : f32
    %1750 = vector.broadcast %cst_507 : f32 to vector<4x1xf32>
    %1751 = arith.subf %1750, %1706 : vector<4x1xf32>
    %1752 = vector.broadcast %1751 : vector<4x1xf32> to vector<4x8xf32>
    %1753 = arith.mulf %1752, %1749 : vector<4x8xf32>
    %1754 = arith.addf %1710, %1753 : vector<4x8xf32>
    %cst_508 = arith.constant 1.000000e+00 : f32
    %1755 = vector.broadcast %cst_508 : f32 to vector<4x1xf32>
    %1756 = arith.cmpf olt, %1750, %1755 : vector<4x1xf32>
    %1757 = arith.extui %1756 : vector<4x1xi1> to vector<4x1xi32>
    %1758 = arith.sitofp %1757 : vector<4x1xi32> to vector<4x1xf32>
    %1759 = arith.addf %1715, %1758 : vector<4x1xf32>
    %cst_509 = arith.constant 1.000000e+00 : f32
    %1760 = vector.broadcast %cst_509 : f32 to vector<4x1xf32>
    %1761 = arith.cmpf olt, %1750, %1760 : vector<4x1xf32>
    %1762 = arith.select %1761, %1750, %1718 : vector<4x1xi1>, vector<4x1xf32>
    %cst_510 = arith.constant 0.000000e+00 : f32
    %1763 = vector.broadcast %cst_510 : f32 to vector<4x1xf32>
    %1764 = arith.cmpf ogt, %1759, %1763 : vector<4x1xf32>
    %cst_511 = arith.constant 1.000000e+00 : f32
    %1765 = vector.broadcast %cst_511 : f32 to vector<4x1xf32>
    %1766 = arith.subf %1765, %1762 : vector<4x1xf32>
    %cst_512 = arith.constant 0.000000e+00 : f32
    %1767 = vector.broadcast %cst_512 : f32 to vector<4x1xf32>
    %1768 = arith.select %1764, %1766, %1767 : vector<4x1xi1>, vector<4x1xf32>
    %1769 = arith.addf %1759, %1768 : vector<4x1xf32>
    %1770 = tpu.concatenate %1754, %1769, %1759 in 1 : vector<4x8xf32>, vector<4x1xf32>, vector<4x1xf32> -> vector<4x10xf32>
    %c4_513 = arith.constant 4 : index
    %c0_514 = arith.constant 0 : index
    %c0_515 = arith.constant 0 : index
    %1771 = vector.load %arg3[%c4_513, %c0_514, %c0_515] : memref<5x4x10xf32, #tpu.memory_space<vmem>>, vector<1x4x10xf32>
    %1772 = vector.shape_cast %1771 : vector<1x4x10xf32> to vector<4x10xf32>
    %1773 = vector.shape_cast %1770 : vector<4x10xf32> to vector<1x4x10xf32>
    tpu.vector_store %arg3[%c4_513, %c0_514, %c0_515], %1773 {strides = array<i32>} : memref<5x4x10xf32, #tpu.memory_space<vmem>>, vector<1x4x10xf32>,
    return
  }
  func.func @transform_0(%arg0: i32) -> (i32, i32) {
    %c0_i32 = arith.constant 0 : i32
    %c0_i32_0 = arith.constant 0 : i32
    %c0_i32_1 = arith.constant 0 : i32
    return %c0_i32, %c0_i32_0 : i32, i32
  }
  func.func @transform_1(%arg0: i32) -> (i32, i32) {
    %c0_i32 = arith.constant 0 : i32
    %c0_i32_0 = arith.constant 0 : i32
    %c0_i32_1 = arith.constant 0 : i32
    return %c0_i32, %c0_i32_0 : i32, i32
  }
  func.func @transform_2(%arg0: i32) -> (i32, i32, i32) {
    %c0_i32 = arith.constant 0 : i32
    %c0_i32_0 = arith.constant 0 : i32
    %c0_i32_1 = arith.constant 0 : i32
    %c0_i32_2 = arith.constant 0 : i32
    return %c0_i32, %c0_i32_0, %c0_i32_1 : i32, i32, i32
  }
  func.func @transform_3(%arg0: i32) -> (i32, i32, i32, i32) {
    %c0_i32 = arith.constant 0 : i32
    %c0_i32_0 = arith.constant 0 : i32
    %c0_i32_1 = arith.constant 0 : i32
    %c0_i32_2 = arith.constant 0 : i32
    %c0_i32_3 = arith.constant 0 : i32
    return %c0_i32, %c0_i32_0, %c0_i32_1, %c0_i32_2 : i32, i32, i32, i32
  }
}

</mosaic_0001>

<bundles_post_ra>
// kernel: tpu_custom_call.1
= control target key start
LH: loop header
LB: loop body
LE: loop exit
PB: predicated region body
PF: predicated region fallthrough
CT: control target
= control target key end

     0   :  { %9 = vsyncpa [#allocation3], 0  ;;  %s26436_s0 = inlined_call_operand.vmem [shape: f32[20,16], index: 0, kind: input, shape index: {}]   ;;  %s26437_s1 = inlined_call_operand.hbm [shape: f32[49,137], index: 1, kind: input, shape index: {}]   ;;  %s26438_s2 = inlined_call_operand.hbm [shape: f32[5,4,10], index: 2, kind: output, shape index: {0}]   ;;  %s26439_s3 = inlined_call_operand.hbm [shape: f32[5,6,4,32], index: 3, kind: output, shape index: {1}]  }
   0x1   :  { %10 = vsyncpa [#allocation4], 0 }
   0x2   :  { %11 = vsyncpa [#allocation7], 0  ;;  %s23858_s12 = smov [#allocation2]   ;;  %s23786_s16 = scalar_lea.hbm %s26437_s1, 1792 }
   0x3   :  { %s19_s13 = sshll.u32 %s23858_s12, 4  ;;  %p23787_p0 = scmp.ne.s32.totalorder %s26437_s1, %s23786_s16  ;;  %s20_s13 = int_to_ptr.vmem [resolvable:$true] %s19_s13 }
   0x4   :  { %p23790_p1 = scmp.lt.u32.totalorder %s23786_s16, %s26437_s1 }
   0x6   :  { %p23792_p2 = pnand %p23790_p1, %p23787_p0 }
   0x8   :  { %23795 = shalt.err (!%p23792_p2)
}
   0x9   :  { %s23796_s21 = scalar_lea.vmem %s20_s13, 1792  ;;  %p23801_p4 = scmp.lt.s32.totalorder %s20_s13, %s20_s13 }
   0xa   :  { %p23797_p3 = scmp.ne.s32.totalorder %s20_s13, %s23796_s21  ;;  %p23802_p5 = scmp.lt.s32.totalorder %s23796_s21, %s23796_s21 }
   0xc   :  { %p23803_p6 = por %p23802_p5, %p23801_p4 }
   0xe   :  { %p23804_p7 = pnand %p23803_p6, %p23797_p3 }
  0x10   :  { %23807 = shalt.err (!%p23804_p7)
}
  0x11   :  { %s23859_s22 = smov 256   ;;  %s23860_s23 = smov 16  }
  0x12   :  { %25 = dma.hbm_to_vmem [thread:$0]  %s26437_s1, 1792, %s20_s13, [#allocation3], %s23859_s22, %s23859_s22, %s23860_s23  }
  0x13   :  { %23852 = dma.done.wait [#allocation3], 1792  }
  0x14   :  { %23853 = vsyncadd [#allocation3], 4294965504  ;;  %v23861_v0 = vmov 0.0|0.0   ;;  %vm23862_vm0 = vmmov 0   ;;  %v26440_v1 = vmov 0.0   ;;  %v31_v2 = vld [vmem:[#allocation2 + $0x20] sm:$0xff] }
  0x15   :  { %21545 = vmatprep.subr.bf16.mxu0 %v23861_v0  ;;  %21471 = vmatprep.mubr.msk.f32.mxu0 %vm23862_vm0, %v26440_v1  ;;  %v32_v3 = vld [vmem:[#allocation2 + $0x28] sm:$0xff]  ;;  %v33_v4 = vld [vmem:[#allocation2 + $0x30] sm:$0xff]  ;;  %vm44_vm1 = vcmask 130048   ;;  %v34_v5 = vld [vmem:[#allocation2 + $0x38] sm:$0xff]  ;;  %v605_v9 = vand.u32 4294901760, %v31_v2  ;;  %s23865_s4 = smov 32  }
  0x16   :  { %675 = vmatprep.mubr.f32.mxu1 %v26440_v1  ;;  %v23908_v6 = vld [vmem:[#allocation2 + $0x40] sm:$0xff]  ;;  %v36_v7 = vld [vmem:[#allocation2 + $0x48] sm:$0xff]  ;;  %v603_v8 = vand.u32 4294901760, %v32_v3  ;;  %v609_v10 = vand.u32 4294901760, %v33_v4  ;;  %v23910_v11 = vld [vmem:[#allocation2 + $0x50] sm:$0xff]  ;;  %v607_v13 = vand.u32 4294901760, %v34_v5 }
  0x17   :  { %v38_v12 = vld [vmem:[#allocation2 + $0x58] sm:$0xff]  ;;  %v611_v14 = vand.u32 4294901760, %v36_v7  ;;  %v613_v15 = vand.u32 4294901760, %v23908_v6  ;;  %v29_v16 = vld [vmem:[#allocation2] sm:$0xff]  ;;  %v617_v19 = vand.u32 4294901760, %v23910_v11  ;;  %v30_v20 = vld [vmem:[#allocation2 + $0x10] sm:$0xff]  ;;  %v23950_v38 = vsub.f32 %v31_v2, %v605_v9 }
  0x18   :  { %v23913_v17 = vpack.c.bf16 %v609_v10, %v605_v9  ;;  %v615_v18 = vand.u32 4294901760, %v38_v12  ;;  %v55_v21 = vand.u32 4294901760, %v29_v16  ;;  %v41_v22 = vld [vmem:[%s26436_s0] sm:$0xff]  ;;  %v23919_v23 = vpack.c.bf16 %v607_v13, %v603_v8  ;;  %v42_v31 = vld [vmem:[%s26436_s0 + $0x8] sm:$0xff]  ;;  %v43_v2 = vld [vmem:[%s26436_s0 + $0x10] sm:$0xf] }
  0x19   :  { %v58_v24 = vand.u32 4294901760, %v30_v20  ;;  %v46_v25 = vsel %vm44_vm1, %v41_v22, 0  ;;  %v23922_v26 = vsub.f32 %v32_v3, %v603_v8  ;;  %v23928_v28 = vpack.c.bf16 %v617_v19, %v613_v15  ;;  %s23864_s0 = smov 64   ;;  %s23867_s5 = smov 96  }
  0x1a   :  { %v23924_v27 = vpack.c.bf16 %v615_v18, %v611_v14  ;;  %v23930_v29 = vsub.f32 %v29_v16, %v55_v21  ;;  %v23932_v30 = vand.u32 4294901760, %v46_v25  ;;  %21564 = vmatprep.subr.bf16.mxu1 %v23919_v23  ;;  %v23943_v35 = vsub.f32 %v34_v5, %v607_v13  ;;  %s23868_s6 = smov 1   ;;  %s23869_s7 = smov [#allocation6]  }
  0x1b   :  { %v23938_v32 = vpack.c.bf16 %v58_v24, %v55_v21  ;;  %v23940_v33 = vsub.f32 %v30_v20, %v58_v24  ;;  %v688_v34 = vand.u32 4294901760, %v23922_v26  ;;  %21566 = vmatpush1.bf16.msra.mxu1 %v23913_v17  ;;  %v23952_v39 = vsub.f32 %v33_v4, %v609_v10  ;;  %s21371_s8 = sshll.u32 %s23869_s7, 4  ;;  %s21372_s8 = int_to_ptr.vmem [resolvable:$true] %s21371_s8 }
  0x1c   :  { %v23947_v36 = vsub.f32 %v46_v25, %v23932_v30  ;;  %v154_v37 = vand.u32 4294901760, %v23930_v29  ;;  %21568 = vmatprep.subr.bf16.mxu1 %v23924_v27  ;;  %v700_v42 = vand.u32 4294901760, %v23943_v35  ;;  %v49_v43 = vsel %vm44_vm1, %v42_v31, 0  ;;  %s23808_s9 = scalar_lea.vmem %s21372_s8, 1920  ;;  %p23813_p9 = scmp.lt.s32.totalorder %s21372_s8, %s21372_s8 }
  0x1d   :  { %21547 = vmatpush3.bf16.msra.mxu0 %v23938_v32  ;;  %v161_v40 = vand.u32 4294901760, %v23940_v33  ;;  %v689_v41 = vsub.f32 %v23922_v26, %v688_v34  ;;  %v694_v46 = vand.u32 4294901760, %v23950_v38  ;;  %v706_v47 = vand.u32 4294901760, %v23952_v39  ;;  %p23809_p8 = scmp.ne.s32.totalorder %s21372_s8, %s23808_s9  ;;  %p23814_p10 = scmp.lt.s32.totalorder %s23808_s9, %s23808_s9 }
  0x1e   :  { %v123_v44 = vand.u32 4294901760, %v23947_v36  ;;  %21548 = vmatprep.subr.bf16.mxu0 %v23861_v0  ;;  %v155_v45 = vsub.f32 %v23930_v29, %v154_v37  ;;  %v701_v50 = vsub.f32 %v23943_v35, %v700_v42  ;;  %v23975_v51 = vand.u32 4294901760, %v49_v43 }
  0x1f   :  { %v162_v48 = vsub.f32 %v23940_v33, %v161_v40  ;;  %v690_v49 = vand.u32 4294901760, %v689_v41  ;;  %21570 = vmatpush1.bf16.msra.mxu1 %v23928_v28  ;;  %v695_v54 = vsub.f32 %v23950_v38, %v694_v46  ;;  %v707_v55 = vsub.f32 %v23952_v39, %v706_v47  ;;  %p23815_p11 = por %p23814_p10, %p23813_p9 }
  0x20   :  { %v124_v52 = vsub.f32 %v23947_v36, %v123_v44  ;;  %v156_v53 = vand.u32 4294901760, %v155_v45  ;;  %v702_v57 = vand.u32 4294901760, %v701_v50  ;;  %v23988_v58 = vsub.f32 %v49_v43, %v23975_v51 }
  0x21   :  { %v163_v56 = vand.u32 4294901760, %v162_v48  ;;  %v23990_v59 = vsub.f32 %v36_v7, %v611_v14  ;;  %v696_v61 = vand.u32 4294901760, %v695_v54  ;;  %v708_v62 = vand.u32 4294901760, %v707_v55  ;;  %p23816_p12 = pnand %p23815_p11, %p23809_p8 }
  0x22   :  { %v125_v60 = vand.u32 4294901760, %v124_v52  ;;  %v23992_v63 = vsub.f32 %v38_v12, %v615_v18  ;;  %v23997_v4 = vpack.c.bf16 %v702_v57, %v690_v49  ;;  %681 = vmatmul.mubr.f32.vlgmr.msra.gmra.mrb[0].mxu1 %v26440_v1  ;;  %v133_v5 = vand.u32 4294901760, %v23988_v58 }
  0x23   :  { %v21549_v3 = vpack.c.bf16 %v163_v56, %v156_v53  ;;  %v712_v8 = vand.u32 4294901760, %v23990_v59  ;;  %v24002_v7 = vpack.c.bf16 %v708_v62, %v696_v61  ;;  %v24008_v10 = vsub.f32 %v23908_v6, %v613_v15  ;;  %790 = vmatprep.mubr.f32.mxu1 %v26440_v1  ;;  %v39_v61 = vld [vmem:[#allocation2 + $0x60] ss:$0 sm:$0xff] }
  0x24   :  { %21472 = vmatmul.mubr.f32.vlgmr.msra.gmra.mrb[0].mxu0 %v125_v60  ;;  %v724_v9 = vand.u32 4294901760, %v23992_v63  ;;  %v24011_v12 = vsub.f32 %v23910_v11, %v617_v19  ;;  %21572 = vmatprep.subr.bf16.mxu1 %v23997_v4  ;;  %v134_v13 = vsub.f32 %v23988_v58, %v133_v5  ;;  %v52_v16 = vsel %vm44_vm1, %v43_v2, 0 }
  0x25   :  { %21550 = vmatpush3.bf16.msra.mxu0 %v21549_v3  ;;  %v713_v14 = vsub.f32 %v23990_v59, %v712_v8  ;;  %21574 = vmatpush1.bf16.msra.mxu1 %v24002_v7  ;;  %v718_v11 = vand.u32 4294901760, %v24008_v10  ;;  %v24030_v18 = vand.u32 4294901760, %v52_v16  ;;  %v24045_v48 = vpack.c.bf16 %v23943_v35, %v23922_v26 }
  0x26   :  { %21474 = vmatprep.mubr.msk.f32.mxu0 %vm23862_vm0, %v26440_v1  ;;  %v725_v6 = vsub.f32 %v23992_v63, %v724_v9  ;;  %v730_v15 = vand.u32 4294901760, %v24011_v12  ;;  %v135_v19 = vand.u32 4294901760, %v134_v13  ;;  %21551 = vmatprep.subr.bf16.mxu0 %v23861_v0  ;;  %v24056_v53 = vpack.c.bf16 %v23952_v39, %v23950_v38 }
  0x27   :  { %v714_v20 = vand.u32 4294901760, %v713_v14  ;;  %v719_v22 = vsub.f32 %v24008_v10, %v718_v11  ;;  %v24036_v25 = vsub.f32 %v52_v16, %v24030_v18  ;;  %v24061_v54 = vpack.c.bf16 %v23992_v63, %v23990_v59 }
  0x28   :  { %v726_v21 = vand.u32 4294901760, %v725_v6  ;;  %v731_v24 = vsub.f32 %v24011_v12, %v730_v15  ;;  %21475 = vmatmul.mubr.f32.gmra.mrb[2].mxu0 %v135_v19  ;;  %v21552_v55 = vpack.c.bf16 %v23940_v33, %v23930_v29  ;;  %v24071_v56 = vpack.c.bf16 %v24011_v12, %v24008_v10 }
  0x29   :  { %v720_v41 = vand.u32 4294901760, %v719_v22  ;;  %21477 = vmatprep.mubr.msk.f32.mxu0 %vm23862_vm0, %v26440_v1  ;;  %v143_v45 = vand.u32 4294901760, %v24036_v25  ;;  %v24092_v57 = vpack.c.bf16 %v700_v42, %v688_v34  ;;  %v24102_v60 = vpack.c.bf16 %v706_v47, %v694_v46 }
  0x2a   :  { %v24038_v31 = vpack.c.bf16 %v726_v21, %v714_v20  ;;  %v732_v43 = vand.u32 4294901760, %v731_v24  ;;  %v24109_v26 = vpack.c.bf16 %v724_v9, %v712_v8  ;;  %v24117_v34 = vpack.c.bf16 %v730_v15, %v718_v11 }
  0x2b   :  { %v144_v50 = vsub.f32 %v24036_v25, %v143_v45  ;;  %v21558_v35 = vpack.c.bf16 %v161_v40, %v154_v37  ;;  %vm599_vm2 = vcmask 261120   ;;  %vm1165_vm3 = vcmask 257024  }
  0x2c   :  { %21576 = vmatprep.subr.bf16.mxu1 %v24038_v31  ;;  %v24048_v49 = vpack.c.bf16 %v732_v43, %v720_v41  ;;  %vm4721_vm10 = vcmask 64512  }
  0x2d   :  { %v145_v52 = vand.u32 4294901760, %v144_v50 }
  0x2e   :  { %21578 = vmatpush1.bf16.msra.mxu1 %v24048_v49 }
  0x2f   :  { %21580 = vmatprep.subr.bf16.mxu1 %v24045_v48  ;;  %21478 = vmatmul.mubr.f32.gmra.mrb[4].mxu0 %v145_v52 }
  0x30   :  { %21484 = vmatprep.mubr.msk.f32.mxu0 %vm23862_vm0, %v26440_v1 }
  0x31   :  { %792 = vmatmul.mubr.f32.vlgmr.msra.gmra.mrb[2].mxu1 %v26440_v1 }
  0x32   :  { %21582 = vmatpush1.bf16.msra.mxu1 %v24056_v53  ;;  %877 = vmatprep.mubr.f32.mxu1 %v26440_v1 }
  0x33   :  { %21584 = vmatprep.subr.bf16.mxu1 %v24061_v54  ;;  %21485 = vmatmul.mubr.f32.vlgmr.msra.gmra.mrb[0].mxu0 %v23932_v30 }
  0x34   :  { %21553 = vmatpush3.bf16.msra.mxu0 %v21552_v55  ;;  %21487 = vmatprep.mubr.msk.f32.mxu0 %vm23862_vm0, %v26440_v1 }
  0x35   :  { %21554 = vmatprep.subr.bf16.mxu0 %v23861_v0 }
  0x36   :  { %21586 = vmatpush1.bf16.msra.mxu1 %v24071_v56 }
  0x37   :  { %21588 = vmatprep.subr.bf16.mxu1 %v23919_v23  ;;  %21488 = vmatmul.mubr.f32.gmra.mrb[2].mxu0 %v23975_v51 }
  0x38   :  { %21490 = vmatprep.mubr.msk.f32.mxu0 %vm23862_vm0, %v26440_v1 }
  0x39   :  { %880 = vmatmul.mubr.f32.vlgmr.msra.gmra.mrb[4].mxu1 %v26440_v1 }
  0x3a   :  { %21590 = vmatpush1.bf16.msra.mxu1 %v23913_v17  ;;  %957 = vmatprep.mubr.f32.mxu1 %v26440_v1 }
  0x3b   :  { %21592 = vmatprep.subr.bf16.mxu1 %v23924_v27  ;;  %21491 = vmatmul.mubr.f32.gmra.mrb[4].mxu0 %v24030_v18 }
  0x3c   :  { %21497 = vmatprep.mubr.msk.f32.mxu0 %vm23862_vm0, %v26440_v1 }
  0x3e   :  { %21594 = vmatpush1.bf16.msra.mxu1 %v23928_v28 }
  0x3f   :  { %21596 = vmatprep.subr.bf16.mxu1 %v24092_v57  ;;  %21498 = vmatmul.mubr.f32.vlgmr.msra.gmra.mrb[0].mxu0 %v23947_v36 }
  0x40   :  { %21556 = vmatpush3.bf16.msra.mxu0 %v23938_v32  ;;  %21500 = vmatprep.mubr.msk.f32.mxu0 %vm23862_vm0, %v26440_v1 }
  0x41   :  { %961 = vmatmul.mubr.f32.vlgmr.msra.gmra.mrb[6].mxu1 %v26440_v1  ;;  %21557 = vmatprep.subr.bf16.mxu0 %v23861_v0 }
  0x42   :  { %21598 = vmatpush1.bf16.msra.mxu1 %v24102_v60  ;;  %1054 = vmatprep.mubr.f32.mxu1 %v26440_v1 }
  0x43   :  { %21600 = vmatprep.subr.bf16.mxu1 %v24109_v26  ;;  %21501 = vmatmul.mubr.f32.gmra.mrb[2].mxu0 %v23988_v58 }
  0x44   :  { %21503 = vmatprep.mubr.msk.f32.mxu0 %vm23862_vm0, %v26440_v1 }
  0x46   :  { %21602 = vmatpush1.bf16.msra.mxu1 %v24117_v34 }
  0x47   :  { %21604 = vmatprep.subr.bf16.mxu1 %v23919_v23  ;;  %21504 = vmatmul.mubr.f32.gmra.mrb[4].mxu0 %v24036_v25 }
  0x48   :  { %21510 = vmatprep.mubr.msk.f32.mxu0 %vm23862_vm0, %v26440_v1 }
  0x49   :  { %1056 = vmatmul.mubr.f32.vlgmr.msra.gmra.mrb[8].mxu1 %v26440_v1 }
  0x4a   :  { %21606 = vmatpush1.bf16.msra.mxu1 %v23913_v17  ;;  %1133 = vmatprep.mubr.f32.mxu1 %v26440_v1 }
  0x4b   :  { %21608 = vmatprep.subr.bf16.mxu1 %v23924_v27  ;;  %21511 = vmatmul.mubr.f32.vlgmr.msra.gmra.mrb[0].mxu0 %v123_v44 }
  0x4c   :  { %21559 = vmatpush3.bf16.msra.mxu0 %v21558_v35  ;;  %21513 = vmatprep.mubr.msk.f32.mxu0 %vm23862_vm0, %v26440_v1 }
  0x4d   :  { %21560 = vmatprep.subr.bf16.mxu0 %v23861_v0 }
  0x4e   :  { %21610 = vmatpush1.bf16.msra.mxu1 %v23928_v28 }
  0x4f   :  { %21612 = vmatprep.subr.bf16.mxu1 %v23919_v23  ;;  %21514 = vmatmul.mubr.f32.gmra.mrb[2].mxu0 %v133_v5 }
  0x50   :  { %21516 = vmatprep.mubr.msk.f32.mxu0 %vm23862_vm0, %v26440_v1 }
  0x51   :  { %1135 = vmatmul.mubr.f32.vlgmr.msra.gmra.mrb[10].mxu1 %v26440_v1 }
  0x52   :  { %21614 = vmatpush1.bf16.msra.mxu1 %v23913_v17  ;;  %1241 = vmatprep.mubr.f32.mxu1 %v26440_v1 }
  0x53   :  { %21616 = vmatprep.subr.bf16.mxu1 %v23924_v27  ;;  %21517 = vmatmul.mubr.f32.gmra.mrb[4].mxu0 %v143_v45 }
  0x54   :  { %21523 = vmatprep.mubr.msk.f32.mxu0 %vm23862_vm0, %v26440_v1 }
  0x56   :  { %21618 = vmatpush1.bf16.msra.mxu1 %v23928_v28 }
  0x57   :  { %21620 = vmatprep.subr.bf16.mxu1 %v23997_v4  ;;  %21524 = vmatmul.mubr.f32.vlgmr.msra.gmra.mrb[0].mxu0 %v23932_v30 }
  0x58   :  { %21562 = vmatpush3.bf16.msra.mxu0 %v23938_v32  ;;  %21526 = vmatprep.mubr.msk.f32.mxu0 %vm23862_vm0, %v26440_v1 }
  0x59   :  { %21660 = vmatprep.subr.bf16.mxu0 %v23919_v23 }
  0x5b   :  { %21527 = vmatmul.mubr.f32.gmra.mrb[2].mxu0 %v23975_v51 }
  0x5c   :  { %21529 = vmatprep.mubr.msk.f32.mxu0 %vm23862_vm0, %v26440_v1 }
  0x5f   :  { %21530 = vmatmul.mubr.f32.gmra.mrb[4].mxu0 %v24030_v18 }
  0x60   :  { %21536 = vmatprep.mubr.msk.f32.mxu0 %vm23862_vm0, %v26440_v1 }
  0x63   :  { %21537 = vmatmul.mubr.f32.vlgmr.msra.gmra.mrb[0].mxu0 %v23932_v30 }
  0x64   :  { %21539 = vmatprep.mubr.msk.f32.mxu0 %vm23862_vm0, %v26440_v1  ;;  %21662 = vmatpush1.bf16.msra.mxu0 %v23913_v17 }
  0x65   :  { %21664 = vmatprep.subr.bf16.mxu0 %v23924_v27 }
  0x67   :  { %21540 = vmatmul.mubr.f32.gmra.mrb[2].mxu0 %v23975_v51 }
  0x68   :  { %21542 = vmatprep.mubr.msk.f32.mxu0 %vm23862_vm0, %v26440_v1  ;;  %21666 = vmatpush1.bf16.msra.mxu0 %v23928_v28 }
  0x69   :  { %21668 = vmatprep.subr.bf16.mxu0 %v23997_v4 }
  0x6b   :  { %21543 = vmatmul.mubr.f32.gmra.mrb[4].mxu0 %v24030_v18 }
  0x6c   :  { %1838 = vmatprep.mubr.f32.mxu0 %v26440_v1 }
  0xf5   :  { %v682_v0 = vpop.f32.mrb[0].mxu1 }
  0xf6   :  { %v684_v29 = vpop.f32.mrb[1].mxu1 }
 0x104   :  { %v793_v30 = vpop.f32.mrb[2].mxu1 }
 0x105   :  { %v794_v32 = vadd.f32 %v793_v30, %v682_v0  ;;  %v795_v33 = vpop.f32.mrb[3].mxu1 }
 0x10c   :  { %v881_v36 = vpop.f32.mrb[4].mxu1 }
 0x10d   :  { %v882_v37 = vadd.f32 %v881_v36, %v794_v32  ;;  %v883_v38 = vpop.f32.mrb[5].mxu1 }
 0x114   :  { %v962_v39 = vpop.f32.mrb[6].mxu1 }
 0x115   :  { %v963_v40 = vadd.f32 %v962_v39, %v882_v37  ;;  %v964_v42 = vpop.f32.mrb[7].mxu1 }
 0x11c   :  { %v1057_v44 = vpop.f32.mrb[8].mxu1 }
 0x11d   :  { %v1058_v46 = vadd.f32 %v1057_v44, %v963_v40  ;;  %v1059_v47 = vpop.f32.mrb[9].mxu1 }
 0x124   :  { %v1136_v51 = vpop.f32.mrb[10].mxu1 }
 0x125   :  { %v1137_v58 = vadd.f32 %v1136_v51, %v1058_v46  ;;  %v1138_v59 = vpop.f32.mrb[11].mxu1 }
 0x136   :  { %v583_v62 = vpop.f32.mrb[0].mxu0 }
 0x137   :  { %v24182_v63 = vadd.f32 %v583_v62, %v39_v61  ;;  %v21538_v2 = vpop.f32.mrb[1].mxu0 }
 0x139   :  { %v1140_v3 = vadd.f32 %v24182_v63, %v1137_v58 }
 0x13a   :  { %v589_v5 = vpop.f32.mrb[2].mxu0 }
 0x13b   :  { %v24185_v8 = vadd.f32 %v589_v5, %v39_v61  ;;  %v21541_v9 = vpop.f32.mrb[3].mxu0  ;;  %23562 = vtanh.f32 %v1140_v3  ;;  %v24277_v3 = vld [vmem:[#allocation2 + $0x68] ss:$0 sm:$0xff] }
 0x13e   :  { %v595_v10 = vpop.f32.mrb[4].mxu0 }
 0x13f   :  { %v24187_v12 = vadd.f32 %v595_v10, %v39_v61  ;;  %v21544_v13 = vpop.f32.mrb[5].mxu0 }
 0x145   :  { %v23563_v14 = vpop.eup %23562 }
 0x146   :  { %1146 = vrot.lane.b32.xlu0 %v23563_v14, %s23864_s0  ;;  %v1142_v16 = vmul.f32 0.5, %v23563_v14 }
 0x148   :  { %v1143_v6 = vadd.f32 0.5, %v1142_v16 }
 0x14a   :  { %v1144_v18 = vmul.f32 0.0, %v1143_v6 }
 0x1b8   :  { %v1147_v11 = vpop.permute.xlu0 %1146 }
 0x1b9   :  { %v1149_v15 = vmul.f32 %v1147_v11, %v1143_v6 }
 0x1bb   :  { %1151 = vrot.lane.b32.xlu0 %v1149_v15, %s23865_s4 }
 0x22d   :  { %v1152_v19 = vpop.permute.xlu0 %1151 }
 0x22e   :  { %v24191_v20 = vadd.f32 %v1152_v19, %v1144_v18 }
 0x230   :  { %23564 = vtanh.f32 %v24191_v20 }
 0x23a   :  { %v23565_v21 = vpop.eup %23564 }
 0x23b   :  { %1157 = vrot.lane.b32.xlu1 %v23565_v21, %s23864_s0 }
 0x2ad   :  { %v1158_v22 = vpop.permute.xlu1 %1157 }
 0x2ae   :  { %v24195_v24 = vmul.f32 %v1158_v22, %v1143_v6 }
 0x2b0   :  { %1162 = vrot.lane.b32.xlu1 %v24195_v24, %s23865_s4 }
 0x322   :  { %v1163_v25 = vpop.permute.xlu1 %1162 }
 0x323   :  { %1166 = vst.msk [vmem:[#allocation6] sm:$0xf] %vm1165_vm3, %v1163_v25  ;;  %v1167_v41 = vsel %vm599_vm2, %v1163_v25, 0 }
 0x324   :  { %v1242_v43 = vand.u32 4294901760, %v1167_v41 }
 0x326   :  { %v1243_v45 = vsub.f32 %v1167_v41, %v1242_v43 }
 0x328   :  { %v1244_v50 = vand.u32 4294901760, %v1243_v45 }
 0x32a   :  { %v1245_v52 = vsub.f32 %v1243_v45, %v1244_v50 }
 0x32c   :  { %v1246_v55 = vand.u32 4294901760, %v1245_v52 }
 0x32e   :  { %1247 = vmatmul.mubr.f32.vlgmr.msra.gmra.mrb[12].mxu1 %v1246_v55 }
 0x32f   :  { %21622 = vmatpush1.bf16.msra.mxu1 %v24002_v7  ;;  %1357 = vmatprep.mubr.f32.mxu1 %v26440_v1 }
 0x330   :  { %21624 = vmatprep.subr.bf16.mxu1 %v24038_v31 }
 0x333   :  { %21626 = vmatpush1.bf16.msra.mxu1 %v24048_v49 }
 0x334   :  { %21628 = vmatprep.subr.bf16.mxu1 %v24045_v48 }
 0x336   :  { %1359 = vmatmul.mubr.f32.vlgmr.msra.gmra.mrb[12].mxu1 %v1242_v43 }
 0x337   :  { %21630 = vmatpush1.bf16.msra.mxu1 %v24056_v53  ;;  %1445 = vmatprep.mubr.f32.mxu1 %v26440_v1 }
 0x338   :  { %21632 = vmatprep.subr.bf16.mxu1 %v24061_v54 }
 0x33b   :  { %21634 = vmatpush1.bf16.msra.mxu1 %v24071_v56 }
 0x33c   :  { %21636 = vmatprep.subr.bf16.mxu1 %v23919_v23 }
 0x33e   :  { %1448 = vmatmul.mubr.f32.vlgmr.msra.gmra.mrb[12].mxu1 %v1243_v45 }
 0x33f   :  { %21638 = vmatpush1.bf16.msra.mxu1 %v23913_v17  ;;  %1526 = vmatprep.mubr.f32.mxu1 %v26440_v1 }
 0x340   :  { %21640 = vmatprep.subr.bf16.mxu1 %v23924_v27 }
 0x343   :  { %21642 = vmatpush1.bf16.msra.mxu1 %v23928_v28 }
 0x344   :  { %21644 = vmatprep.subr.bf16.mxu1 %v24092_v57 }
 0x346   :  { %1530 = vmatmul.mubr.f32.vlgmr.msra.gmra.mrb[12].mxu1 %v1244_v50 }
 0x347   :  { %21646 = vmatpush1.bf16.msra.mxu1 %v24102_v60  ;;  %1624 = vmatprep.mubr.f32.mxu1 %v26440_v1 }
 0x348   :  { %21648 = vmatprep.subr.bf16.mxu1 %v24109_v26 }
 0x34b   :  { %21650 = vmatpush1.bf16.msra.mxu1 %v24117_v34 }
 0x34c   :  { %21652 = vmatprep.subr.bf16.mxu1 %v23919_v23 }
 0x34e   :  { %1626 = vmatmul.mubr.f32.vlgmr.msra.gmra.mrb[12].mxu1 %v1242_v43 }
 0x34f   :  { %21654 = vmatpush1.bf16.msra.mxu1 %v23913_v17  ;;  %1704 = vmatprep.mubr.f32.mxu1 %v26440_v1 }
 0x350   :  { %21656 = vmatprep.subr.bf16.mxu1 %v23924_v27 }
 0x353   :  { %21658 = vmatpush1.bf16.msra.mxu1 %v23928_v28 }
 0x354   :  { %21708 = vmatprep.subr.bf16.mxu1 %v23919_v23 }
 0x356   :  { %1706 = vmatmul.mubr.f32.vlgmr.msra.gmra.mrb[12].mxu1 %v1242_v43 }
 0x357   :  { %21710 = vmatpush1.bf16.msra.mxu1 %v23913_v17  ;;  %2436 = vmatprep.mubr.f32.mxu1 %v26440_v1 }
 0x358   :  { %21712 = vmatprep.subr.bf16.mxu1 %v23924_v27 }
 0x35b   :  { %21714 = vmatpush1.bf16.msra.mxu1 %v23928_v28 }
 0x35c   :  { %21716 = vmatprep.subr.bf16.mxu1 %v23997_v4 }
 0x429   :  { %v1707_v35 = vpop.f32.mrb[12].mxu1 }
 0x42a   :  { %v1737_v0 = vadd.f32 %v24182_v63, %v1707_v35  ;;  %v24232_v29 = vpop.f32.mrb[13].mxu1 }
 0x42b   :  { %v24281_v5 = vadd.f32 %v24232_v29, %v24277_v3 }
 0x42c   :  { %23566 = vtanh.f32 %v1737_v0 }
 0x42d   :  { %v21387_v9 = vmul.f32 -1.442695, %v24281_v5 }
 0x436   :  { %v23567_v30 = vpop.eup %23566 }
 0x437   :  { %1743 = vrot.lane.b32.xlu0 %v23567_v30, %s23864_s0  ;;  %v1739_v32 = vmul.f32 0.5, %v23567_v30 }
 0x439   :  { %v1740_v33 = vadd.f32 0.5, %v1739_v32 }
 0x43b   :  { %v1741_v38 = vmul.f32 %v1740_v33, %v24191_v20 }
 0x4a9   :  { %v1744_v36 = vpop.permute.xlu0 %1743 }
 0x4aa   :  { %v1746_v37 = vmul.f32 %v1744_v36, %v1740_v33 }
 0x4ac   :  { %1748 = vrot.lane.b32.xlu1 %v1746_v37, %s23865_s4 }
 0x51e   :  { %v1749_v39 = vpop.permute.xlu1 %1748 }
 0x51f   :  { %v24237_v40 = vadd.f32 %v1749_v39, %v1741_v38 }
 0x521   :  { %23568 = vtanh.f32 %v24237_v40 }
 0x522   :  { %23570 = vpow2.f32 %v21387_v9 }
 0x52b   :  { %v23569_v42 = vpop.eup %23568 }
 0x52c   :  { %1754 = vrot.lane.b32.xlu0 %v23569_v42, %s23864_s0  ;;  %v23571_v11 = vpop.eup %23570 }
 0x52d   :  { %v1716_v15 = vadd.f32 1.0, %v23571_v11 }
 0x59e   :  { %v1755_v44 = vpop.permute.xlu0 %1754 }
 0x59f   :  { %v24241_v46 = vmul.f32 %v1755_v44, %v1740_v33 }
 0x5a1   :  { %1759 = vrot.lane.b32.xlu1 %v24241_v46, %s23865_s4 }
 0x613   :  { %v1760_v47 = vpop.permute.xlu1 %1759 }
 0x614   :  { %1763 = vst.msk [vmem:[#allocation6 + $0x4] sm:$0xf] %vm1165_vm3, %v1760_v47  ;;  %v1764_v51 = vsel %vm599_vm2, %v1760_v47, 0 }
 0x615   :  { %v1839_v58 = vand.u32 4294901760, %v1764_v51 }
 0x617   :  { %v1840_v59 = vsub.f32 %v1764_v51, %v1839_v58 }
 0x619   :  { %v1841_v61 = vand.u32 4294901760, %v1840_v59 }
 0x61b   :  { %v1842_v62 = vsub.f32 %v1840_v59, %v1841_v61 }
 0x61d   :  { %v1843_v2 = vand.u32 4294901760, %v1842_v62 }
 0x61f   :  { %1844 = vmatmul.mubr.f32.vlgmr.msra.gmra.mrb[6].mxu0 %v1843_v2 }
 0x620   :  { %21670 = vmatpush1.bf16.msra.mxu0 %v24002_v7  ;;  %1954 = vmatprep.mubr.f32.mxu0 %v26440_v1 }
 0x621   :  { %21672 = vmatprep.subr.bf16.mxu0 %v24038_v31 }
 0x624   :  { %21674 = vmatpush1.bf16.msra.mxu0 %v24048_v49 }
 0x625   :  { %21676 = vmatprep.subr.bf16.mxu0 %v24045_v48 }
 0x627   :  { %1956 = vmatmul.mubr.f32.vlgmr.msra.gmra.mrb[6].mxu0 %v1839_v58 }
 0x628   :  { %21678 = vmatpush1.bf16.msra.mxu0 %v24056_v53  ;;  %2042 = vmatprep.mubr.f32.mxu0 %v26440_v1 }
 0x629   :  { %21680 = vmatprep.subr.bf16.mxu0 %v24061_v54 }
 0x62c   :  { %21682 = vmatpush1.bf16.msra.mxu0 %v24071_v56 }
 0x62d   :  { %21684 = vmatprep.subr.bf16.mxu0 %v23919_v23 }
 0x62f   :  { %2045 = vmatmul.mubr.f32.vlgmr.msra.gmra.mrb[6].mxu0 %v1840_v59 }
 0x630   :  { %21686 = vmatpush1.bf16.msra.mxu0 %v23913_v17  ;;  %2123 = vmatprep.mubr.f32.mxu0 %v26440_v1 }
 0x631   :  { %21688 = vmatprep.subr.bf16.mxu0 %v23924_v27 }
 0x634   :  { %21690 = vmatpush1.bf16.msra.mxu0 %v23928_v28 }
 0x635   :  { %21692 = vmatprep.subr.bf16.mxu0 %v24092_v57 }
 0x637   :  { %2127 = vmatmul.mubr.f32.vlgmr.msra.gmra.mrb[6].mxu0 %v1841_v61 }
 0x638   :  { %21694 = vmatpush1.bf16.msra.mxu0 %v24102_v60  ;;  %2221 = vmatprep.mubr.f32.mxu0 %v26440_v1 }
 0x639   :  { %21696 = vmatprep.subr.bf16.mxu0 %v24109_v26 }
 0x63c   :  { %21698 = vmatpush1.bf16.msra.mxu0 %v24117_v34 }
 0x63d   :  { %21700 = vmatprep.subr.bf16.mxu0 %v23919_v23 }
 0x63f   :  { %2223 = vmatmul.mubr.f32.vlgmr.msra.gmra.mrb[6].mxu0 %v1839_v58 }
 0x640   :  { %21702 = vmatpush1.bf16.msra.mxu0 %v23913_v17  ;;  %2301 = vmatprep.mubr.f32.mxu0 %v26440_v1 }
 0x641   :  { %21704 = vmatprep.subr.bf16.mxu0 %v23924_v27 }
 0x644   :  { %21706 = vmatpush1.bf16.msra.mxu0 %v23928_v28 }
 0x645   :  { %21756 = vmatprep.subr.bf16.mxu0 %v23919_v23 }
 0x647   :  { %2303 = vmatmul.mubr.f32.vlgmr.msra.gmra.mrb[6].mxu0 %v1839_v58 }
 0x648   :  { %21758 = vmatpush1.bf16.msra.mxu0 %v23913_v17  ;;  %3034 = vmatprep.mubr.f32.mxu0 %v26440_v1 }
 0x649   :  { %21760 = vmatprep.subr.bf16.mxu0 %v23924_v27 }
 0x64c   :  { %21762 = vmatpush1.bf16.msra.mxu0 %v23928_v28 }
 0x64d   :  { %21764 = vmatprep.subr.bf16.mxu0 %v23997_v4 }
 0x71a   :  { %v2304_v10 = vpop.f32.mrb[6].mxu0 }
 0x71b   :  { %v2335_v13 = vadd.f32 %v24182_v63, %v2304_v10  ;;  %v2306_v14 = vpop.f32.mrb[7].mxu0 }
 0x71c   :  { %v24286_v16 = vadd.f32 %v2306_v14, %v24277_v3 }
 0x71d   :  { %23572 = vtanh.f32 %v2335_v13 }
 0x71e   :  { %v21389_v6 = vmul.f32 -1.442695, %v24286_v16 }
 0x720   :  { %23574 = vpow2.f32 %v21389_v6 }
 0x721   :  { %23576 = vrcp.f32 %v1716_v15 }
 0x727   :  { %v23573_v18 = vpop.eup %23572 }
 0x728   :  { %2341 = vrot.lane.b32.xlu0 %v23573_v18, %s23864_s0  ;;  %v2337_v55 = vmul.f32 0.5, %v23573_v18 }
 0x72a   :  { %v23575_v19 = vpop.eup %23574  ;;  %v2338_v35 = vadd.f32 0.5, %v2337_v55 }
 0x72b   :  { %v2313_v21 = vadd.f32 1.0, %v23575_v19  ;;  %v23577_v22 = vpop.eup %23576 }
 0x72c   :  { %v24290_v25 = vmin.f32 %v23577_v22, 1.0  ;;  %v2339_v30 = vmul.f32 %v2338_v35, %v24237_v40 }
 0x72d   :  { %23578 = vrcp.f32 %v2313_v21 }
 0x72e   :  { %vm1732_vm4 = vcmp.lt.f32.partialorder %v24290_v25, 1.0 }
 0x72f   :  { %v1736_v50 = vsel %vm1732_vm4, %v24290_v25, 0.0 }
 0x737   :  { %v23579_v41 = vpop.eup %23578 }
 0x738   :  { %v24292_v43 = vadd.f32 %v23579_v41, %v23577_v22 }
 0x73a   :  { %v24296_v45 = vmin.f32 %v24292_v43, 1.0 }
 0x73c   :  { %vm2330_vm5 = vcmp.lt.f32.partialorder %v24296_v45, 1.0 }
 0x73d   :  { %v24305_v52 = vsel %vm2330_vm5, %v24296_v45, %v1736_v50 }
 0x79a   :  { %v2342_v0 = vpop.permute.xlu0 %2341 }
 0x79b   :  { %v2344_v29 = vmul.f32 %v2342_v0, %v2338_v35 }
 0x79d   :  { %2346 = vrot.lane.b32.xlu1 %v2344_v29, %s23865_s4 }
 0x80f   :  { %v2347_v32 = vpop.permute.xlu1 %2346 }
 0x810   :  { %v24309_v33 = vadd.f32 %v2347_v32, %v2339_v30 }
 0x812   :  { %23580 = vtanh.f32 %v24309_v33 }
 0x81c   :  { %v23581_v36 = vpop.eup %23580 }
 0x81d   :  { %2352 = vrot.lane.b32.xlu0 %v23581_v36, %s23864_s0 }
 0x88f   :  { %v2353_v37 = vpop.permute.xlu0 %2352 }
 0x890   :  { %v24313_v38 = vmul.f32 %v2353_v37, %v2338_v35 }
 0x892   :  { %2357 = vrot.lane.b32.xlu1 %v24313_v38, %s23865_s4 }
 0x904   :  { %v2358_v39 = vpop.permute.xlu1 %2357 }
 0x905   :  { %2361 = vst.msk [vmem:[#allocation6 + $0x8] sm:$0xf] %vm1165_vm3, %v2358_v39  ;;  %v2362_v42 = vsel %vm599_vm2, %v2358_v39, 0 }
 0x906   :  { %v2437_v44 = vand.u32 4294901760, %v2362_v42 }
 0x908   :  { %v2438_v47 = vsub.f32 %v2362_v42, %v2437_v44 }
 0x90a   :  { %v2439_v51 = vand.u32 4294901760, %v2438_v47 }
 0x90c   :  { %v2440_v58 = vsub.f32 %v2438_v47, %v2439_v51 }
 0x90e   :  { %v2441_v59 = vand.u32 4294901760, %v2440_v58 }
 0x910   :  { %2442 = vmatmul.mubr.f32.vlgmr.msra.gmra.mrb[14].mxu1 %v2441_v59 }
 0x911   :  { %21718 = vmatpush1.bf16.msra.mxu1 %v24002_v7  ;;  %2552 = vmatprep.mubr.f32.mxu1 %v26440_v1 }
 0x912   :  { %21720 = vmatprep.subr.bf16.mxu1 %v24038_v31 }
 0x915   :  { %21722 = vmatpush1.bf16.msra.mxu1 %v24048_v49 }
 0x916   :  { %21724 = vmatprep.subr.bf16.mxu1 %v24045_v48 }
 0x918   :  { %2554 = vmatmul.mubr.f32.vlgmr.msra.gmra.mrb[14].mxu1 %v2437_v44 }
 0x919   :  { %21726 = vmatpush1.bf16.msra.mxu1 %v24056_v53  ;;  %2640 = vmatprep.mubr.f32.mxu1 %v26440_v1 }
 0x91a   :  { %21728 = vmatprep.subr.bf16.mxu1 %v24061_v54 }
 0x91d   :  { %21730 = vmatpush1.bf16.msra.mxu1 %v24071_v56 }
 0x91e   :  { %21732 = vmatprep.subr.bf16.mxu1 %v23919_v23 }
 0x920   :  { %2643 = vmatmul.mubr.f32.vlgmr.msra.gmra.mrb[14].mxu1 %v2438_v47 }
 0x921   :  { %21734 = vmatpush1.bf16.msra.mxu1 %v23913_v17  ;;  %2721 = vmatprep.mubr.f32.mxu1 %v26440_v1 }
 0x922   :  { %21736 = vmatprep.subr.bf16.mxu1 %v23924_v27 }
 0x925   :  { %21738 = vmatpush1.bf16.msra.mxu1 %v23928_v28 }
 0x926   :  { %21740 = vmatprep.subr.bf16.mxu1 %v24092_v57 }
 0x928   :  { %2725 = vmatmul.mubr.f32.vlgmr.msra.gmra.mrb[14].mxu1 %v2439_v51 }
 0x929   :  { %21742 = vmatpush1.bf16.msra.mxu1 %v24102_v60  ;;  %2819 = vmatprep.mubr.f32.mxu1 %v26440_v1 }
 0x92a   :  { %21744 = vmatprep.subr.bf16.mxu1 %v24109_v26 }
 0x92d   :  { %21746 = vmatpush1.bf16.msra.mxu1 %v24117_v34 }
 0x92e   :  { %21748 = vmatprep.subr.bf16.mxu1 %v23919_v23 }
 0x930   :  { %2821 = vmatmul.mubr.f32.vlgmr.msra.gmra.mrb[14].mxu1 %v2437_v44 }
 0x931   :  { %21750 = vmatpush1.bf16.msra.mxu1 %v23913_v17  ;;  %2899 = vmatprep.mubr.f32.mxu1 %v26440_v1 }
 0x932   :  { %21752 = vmatprep.subr.bf16.mxu1 %v23924_v27 }
 0x935   :  { %21754 = vmatpush1.bf16.msra.mxu1 %v23928_v28 }
 0x936   :  { %21804 = vmatprep.subr.bf16.mxu1 %v23919_v23 }
 0x938   :  { %2901 = vmatmul.mubr.f32.vlgmr.msra.gmra.mrb[14].mxu1 %v2437_v44 }
 0x939   :  { %21806 = vmatpush1.bf16.msra.mxu1 %v23913_v17  ;;  %3632 = vmatprep.mubr.f32.mxu1 %v26440_v1 }
 0x93a   :  { %21808 = vmatprep.subr.bf16.mxu1 %v23924_v27 }
 0x93d   :  { %21810 = vmatpush1.bf16.msra.mxu1 %v23928_v28 }
 0x93e   :  { %21812 = vmatprep.subr.bf16.mxu1 %v23997_v4 }
 0xa0b   :  { %v2902_v61 = vpop.f32.mrb[14].mxu1 }
 0xa0c   :  { %v2933_v62 = vadd.f32 %v24182_v63, %v2902_v61  ;;  %v2904_v2 = vpop.f32.mrb[15].mxu1 }
 0xa0d   :  { %v24351_v9 = vadd.f32 %v2904_v2, %v24277_v3 }
 0xa0e   :  { %23582 = vtanh.f32 %v2933_v62 }
 0xa0f   :  { %v21391_v10 = vmul.f32 -1.442695, %v24351_v9 }
 0xa11   :  { %23584 = vpow2.f32 %v21391_v10 }
 0xa18   :  { %v23583_v13 = vpop.eup %23582 }
 0xa19   :  { %2939 = vrot.lane.b32.xlu0 %v23583_v13, %s23864_s0  ;;  %v2935_v21 = vmul.f32 0.5, %v23583_v13 }
 0xa1b   :  { %v23585_v14 = vpop.eup %23584  ;;  %v2936_v22 = vadd.f32 0.5, %v2935_v21 }
 0xa1c   :  { %v2911_v6 = vadd.f32 1.0, %v23585_v14 }
 0xa1e   :  { %23586 = vrcp.f32 %v2911_v6 }
 0xa28   :  { %v23587_v11 = vpop.eup %23586 }
 0xa29   :  { %v24356_v15 = vadd.f32 %v23587_v11, %v24292_v43  ;;  %v2937_v43 = vmul.f32 %v2936_v22, %v24309_v33 }
 0xa2b   :  { %v24359_v18 = vmin.f32 %v24356_v15, 1.0 }
 0xa2d   :  { %vm2928_vm6 = vcmp.lt.f32.partialorder %v24359_v18, 1.0 }
 0xa2e   :  { %v24366_v19 = vsel %vm2928_vm6, %v24359_v18, %v24305_v52 }
 0xa8b   :  { %v2940_v41 = vpop.permute.xlu0 %2939 }
 0xa8c   :  { %v2942_v50 = vmul.f32 %v2940_v41, %v2936_v22 }
 0xa8e   :  { %2944 = vrot.lane.b32.xlu1 %v2942_v50, %s23865_s4 }
 0xb00   :  { %v2945_v55 = vpop.permute.xlu1 %2944 }
 0xb01   :  { %v24370_v35 = vadd.f32 %v2945_v55, %v2937_v43 }
 0xb03   :  { %23588 = vtanh.f32 %v24370_v35 }
 0xb0d   :  { %v23589_v0 = vpop.eup %23588 }
 0xb0e   :  { %2950 = vrot.lane.b32.xlu0 %v23589_v0, %s23864_s0 }
 0xb80   :  { %v2951_v29 = vpop.permute.xlu0 %2950 }
 0xb81   :  { %v24374_v30 = vmul.f32 %v2951_v29, %v2936_v22 }
 0xb83   :  { %2955 = vrot.lane.b32.xlu1 %v24374_v30, %s23865_s4 }
 0xbf5   :  { %v2956_v52 = vpop.permute.xlu1 %2955 }
 0xbf6   :  { %2959 = vst.msk [vmem:[#allocation6 + $0xc] sm:$0xf] %vm1165_vm3, %v2956_v52  ;;  %v2960_v32 = vsel %vm599_vm2, %v2956_v52, 0 }
 0xbf7   :  { %v3035_v36 = vand.u32 4294901760, %v2960_v32 }
 0xbf9   :  { %v3036_v37 = vsub.f32 %v2960_v32, %v3035_v36 }
 0xbfb   :  { %v3037_v39 = vand.u32 4294901760, %v3036_v37 }
 0xbfd   :  { %v3038_v42 = vsub.f32 %v3036_v37, %v3037_v39 }
 0xbff   :  { %v3039_v44 = vand.u32 4294901760, %v3038_v42 }
 0xc01   :  { %3040 = vmatmul.mubr.f32.vlgmr.msra.gmra.mrb[8].mxu0 %v3039_v44 }
 0xc02   :  { %21766 = vmatpush1.bf16.msra.mxu0 %v24002_v7  ;;  %3150 = vmatprep.mubr.f32.mxu0 %v26440_v1 }
 0xc03   :  { %21768 = vmatprep.subr.bf16.mxu0 %v24038_v31 }
 0xc06   :  { %21770 = vmatpush1.bf16.msra.mxu0 %v24048_v49 }
 0xc07   :  { %21772 = vmatprep.subr.bf16.mxu0 %v24045_v48 }
 0xc09   :  { %3152 = vmatmul.mubr.f32.vlgmr.msra.gmra.mrb[8].mxu0 %v3035_v36 }
 0xc0a   :  { %21774 = vmatpush1.bf16.msra.mxu0 %v24056_v53  ;;  %3238 = vmatprep.mubr.f32.mxu0 %v26440_v1 }
 0xc0b   :  { %21776 = vmatprep.subr.bf16.mxu0 %v24061_v54 }
 0xc0e   :  { %21778 = vmatpush1.bf16.msra.mxu0 %v24071_v56 }
 0xc0f   :  { %21780 = vmatprep.subr.bf16.mxu0 %v23919_v23 }
 0xc11   :  { %3241 = vmatmul.mubr.f32.vlgmr.msra.gmra.mrb[8].mxu0 %v3036_v37 }
 0xc12   :  { %21782 = vmatpush1.bf16.msra.mxu0 %v23913_v17  ;;  %3319 = vmatprep.mubr.f32.mxu0 %v26440_v1 }
 0xc13   :  { %21784 = vmatprep.subr.bf16.mxu0 %v23924_v27 }
 0xc16   :  { %21786 = vmatpush1.bf16.msra.mxu0 %v23928_v28 }
 0xc17   :  { %21788 = vmatprep.subr.bf16.mxu0 %v24092_v57 }
 0xc19   :  { %3323 = vmatmul.mubr.f32.vlgmr.msra.gmra.mrb[8].mxu0 %v3037_v39 }
 0xc1a   :  { %21790 = vmatpush1.bf16.msra.mxu0 %v24102_v60  ;;  %3417 = vmatprep.mubr.f32.mxu0 %v26440_v1 }
 0xc1b   :  { %21792 = vmatprep.subr.bf16.mxu0 %v24109_v26 }
 0xc1e   :  { %21794 = vmatpush1.bf16.msra.mxu0 %v24117_v34 }
 0xc1f   :  { %21796 = vmatprep.subr.bf16.mxu0 %v23919_v23 }
 0xc21   :  { %3419 = vmatmul.mubr.f32.vlgmr.msra.gmra.mrb[8].mxu0 %v3035_v36 }
 0xc22   :  { %21798 = vmatpush1.bf16.msra.mxu0 %v23913_v17  ;;  %3497 = vmatprep.mubr.f32.mxu0 %v26440_v1 }
 0xc23   :  { %21800 = vmatprep.subr.bf16.mxu0 %v23924_v27 }
 0xc26   :  { %21802 = vmatpush1.bf16.msra.mxu0 %v23928_v28 }
 0xc27   :  { %21852 = vmatprep.subr.bf16.mxu0 %v23919_v23 }
 0xc29   :  { %3499 = vmatmul.mubr.f32.vlgmr.msra.gmra.mrb[8].mxu0 %v3035_v36 }
 0xc2a   :  { %21854 = vmatpush1.bf16.msra.mxu0 %v23913_v17  ;;  %4230 = vmatprep.mubr.f32.mxu0 %v26440_v1 }
 0xc2b   :  { %21856 = vmatprep.subr.bf16.mxu0 %v23924_v27 }
 0xc2e   :  { %21858 = vmatpush1.bf16.msra.mxu0 %v23928_v28 }
 0xc2f   :  { %21860 = vmatprep.subr.bf16.mxu0 %v23997_v4 }
 0xcfc   :  { %v3500_v47 = vpop.f32.mrb[8].mxu0 }
 0xcfd   :  { %v3531_v51 = vadd.f32 %v24182_v63, %v3500_v47  ;;  %v3502_v58 = vpop.f32.mrb[9].mxu0  ;;  %v23866_v47 = vmov 8  }
 0xcfe   :  { %v24412_v59 = vadd.f32 %v3502_v58, %v24277_v3  ;;  %23560 = vset.pattern.permute.xlu0 %v23866_v47  ;;  %23561 = vset.pattern.permute.xlu1 %v23866_v47 }
 0xcff   :  { %23590 = vtanh.f32 %v3531_v51 }
 0xd00   :  { %v21393_v61 = vmul.f32 -1.442695, %v24412_v59 }
 0xd02   :  { %23592 = vpow2.f32 %v21393_v61 }
 0xd09   :  { %v23591_v62 = vpop.eup %23590 }
 0xd0a   :  { %3537 = vrot.lane.b32.xlu0 %v23591_v62, %s23864_s0  ;;  %v3533_v21 = vmul.f32 0.5, %v23591_v62 }
 0xd0c   :  { %v23593_v2 = vpop.eup %23592  ;;  %v3534_v22 = vadd.f32 0.5, %v3533_v21 }
 0xd0d   :  { %v3509_v10 = vadd.f32 1.0, %v23593_v2 }
 0xd0f   :  { %23594 = vrcp.f32 %v3509_v10 }
 0xd19   :  { %v23595_v13 = vpop.eup %23594 }
 0xd1a   :  { %v24417_v14 = vadd.f32 %v23595_v13, %v24356_v15  ;;  %v3535_v15 = vmul.f32 %v3534_v22, %v24370_v35 }
 0xd1c   :  { %v24420_v6 = vmin.f32 %v24417_v14, 1.0 }
 0xd1e   :  { %vm3526_vm7 = vcmp.lt.f32.partialorder %v24420_v6, 1.0 }
 0xd1f   :  { %v24427_v11 = vsel %vm3526_vm7, %v24420_v6, %v24366_v19 }
 0xd7c   :  { %v3538_v41 = vpop.permute.xlu0 %3537 }
 0xd7d   :  { %v3540_v50 = vmul.f32 %v3538_v41, %v3534_v22 }
 0xd7f   :  { %3542 = vrot.lane.b32.xlu1 %v3540_v50, %s23865_s4 }
 0xdf1   :  { %v3543_v43 = vpop.permute.xlu1 %3542 }
 0xdf2   :  { %v24431_v55 = vadd.f32 %v3543_v43, %v3535_v15 }
 0xdf4   :  { %23596 = vtanh.f32 %v24431_v55 }
 0xdfe   :  { %v23597_v0 = vpop.eup %23596 }
 0xdff   :  { %3548 = vrot.lane.b32.xlu0 %v23597_v0, %s23864_s0 }
 0xe71   :  { %v3549_v29 = vpop.permute.xlu0 %3548 }
 0xe72   :  { %v24435_v52 = vmul.f32 %v3549_v29, %v3534_v22  ;;  %v3514_v22 = vsub.f32 %v24420_v6, %v24359_v18 }
 0xe74   :  { %3553 = vrot.lane.b32.xlu1 %v24435_v52, %s23865_s4 }
 0xee6   :  { %v3554_v19 = vpop.permute.xlu1 %3553 }
 0xee7   :  { %3557 = vst.msk [vmem:[#allocation6 + $0x10] sm:$0xf] %vm1165_vm3, %v3554_v19  ;;  %v3558_v32 = vsel %vm599_vm2, %v3554_v19, 0 }
 0xee8   :  { %v3633_v36 = vand.u32 4294901760, %v3558_v32 }
 0xeea   :  { %v3634_v37 = vsub.f32 %v3558_v32, %v3633_v36 }
 0xeec   :  { %v3635_v39 = vand.u32 4294901760, %v3634_v37 }
 0xeee   :  { %v3636_v42 = vsub.f32 %v3634_v37, %v3635_v39 }
 0xef0   :  { %v3637_v44 = vand.u32 4294901760, %v3636_v42 }
 0xef2   :  { %3638 = vmatmul.mubr.f32.vlgmr.msra.gmra.mrb[16].mxu1 %v3637_v44 }
 0xef3   :  { %21814 = vmatpush1.bf16.msra.mxu1 %v24002_v7  ;;  %3748 = vmatprep.mubr.f32.mxu1 %v26440_v1 }
 0xef4   :  { %21816 = vmatprep.subr.bf16.mxu1 %v24038_v31 }
 0xef7   :  { %21818 = vmatpush1.bf16.msra.mxu1 %v24048_v49 }
 0xef8   :  { %21820 = vmatprep.subr.bf16.mxu1 %v24045_v48 }
 0xefa   :  { %3750 = vmatmul.mubr.f32.vlgmr.msra.gmra.mrb[16].mxu1 %v3633_v36 }
 0xefb   :  { %21822 = vmatpush1.bf16.msra.mxu1 %v24056_v53  ;;  %3836 = vmatprep.mubr.f32.mxu1 %v26440_v1 }
 0xefc   :  { %21824 = vmatprep.subr.bf16.mxu1 %v24061_v54 }
 0xeff   :  { %21826 = vmatpush1.bf16.msra.mxu1 %v24071_v56 }
 0xf00   :  { %21828 = vmatprep.subr.bf16.mxu1 %v23919_v23 }
 0xf02   :  { %3839 = vmatmul.mubr.f32.vlgmr.msra.gmra.mrb[16].mxu1 %v3634_v37  ;;  %v2916_v37 = vsub.f32 %v24359_v18, %v24296_v45 }
 0xf03   :  { %21830 = vmatpush1.bf16.msra.mxu1 %v23913_v17  ;;  %3917 = vmatprep.mubr.f32.mxu1 %v26440_v1 }
 0xf04   :  { %21832 = vmatprep.subr.bf16.mxu1 %v23924_v27 }
 0xf07   :  { %21834 = vmatpush1.bf16.msra.mxu1 %v23928_v28 }
 0xf08   :  { %21836 = vmatprep.subr.bf16.mxu1 %v24092_v57 }
 0xf0a   :  { %3921 = vmatmul.mubr.f32.vlgmr.msra.gmra.mrb[16].mxu1 %v3635_v39 }
 0xf0b   :  { %21838 = vmatpush1.bf16.msra.mxu1 %v24102_v60  ;;  %4015 = vmatprep.mubr.f32.mxu1 %v26440_v1 }
 0xf0c   :  { %21840 = vmatprep.subr.bf16.mxu1 %v24109_v26 }
 0xf0f   :  { %21842 = vmatpush1.bf16.msra.mxu1 %v24117_v34 }
 0xf10   :  { %21844 = vmatprep.subr.bf16.mxu1 %v23919_v23 }
 0xf12   :  { %4017 = vmatmul.mubr.f32.vlgmr.msra.gmra.mrb[16].mxu1 %v3633_v36 }
 0xf13   :  { %21846 = vmatpush1.bf16.msra.mxu1 %v23913_v17  ;;  %4095 = vmatprep.mubr.f32.mxu1 %v26440_v1 }
 0xf14   :  { %21848 = vmatprep.subr.bf16.mxu1 %v23924_v27 }
 0xf17   :  { %21850 = vmatpush1.bf16.msra.mxu1 %v23928_v28 }
 0xf18   :  { %21884 = vmatprep.subr.bf16.mxu1 %v24092_v57 }
 0xf1a   :  { %4097 = vmatmul.mubr.f32.vlgmr.msra.gmra.mrb[16].mxu1 %v3633_v36 }
 0xf1b   :  { %21886 = vmatpush1.bf16.msra.mxu1 %v24102_v60  ;;  %4609 = vmatprep.mubr.f32.mxu1 %v26440_v1 }
 0xf1c   :  { %21888 = vmatprep.subr.bf16.mxu1 %v24109_v26 }
 0xf1f   :  { %21890 = vmatpush1.bf16.msra.mxu1 %v24117_v34 }
 0xf20   :  { %21900 = vmatprep.subr.bf16.mxu1 %v23919_v23 }
 0xfed   :  { %v4098_v51 = vpop.f32.mrb[16].mxu1 }
 0xfee   :  { %v4129_v58 = vadd.f32 %v24182_v63, %v4098_v51  ;;  %v4100_v61 = vpop.f32.mrb[17].mxu1 }
 0xfef   :  { %v24473_v62 = vadd.f32 %v4100_v61, %v24277_v3 }
 0xff0   :  { %23598 = vtanh.f32 %v4129_v58 }
 0xff1   :  { %v21395_v2 = vmul.f32 -1.442695, %v24473_v62 }
 0xff3   :  { %23600 = vpow2.f32 %v21395_v2 }
 0xffa   :  { %v23599_v10 = vpop.eup %23598 }
 0xffb   :  { %4135 = vrot.lane.b32.xlu0 %v23599_v10, %s23864_s0  ;;  %v4131_v29 = vmul.f32 0.5, %v23599_v10 }
 0xffd   :  { %v23601_v13 = vpop.eup %23600  ;;  %v4132_v19 = vadd.f32 0.5, %v4131_v29 }
 0xffe   :  { %v4107_v21 = vadd.f32 1.0, %v23601_v13 }
 0xfff   :  { %1723 = vperm.xlu0 %23560, %v24290_v25  }
0x1000   :  { %23602 = vrcp.f32 %v4107_v21 }
0x1003   :  { %3517 = vperm.xlu0 %23560, %v3514_v22  }
0x100a   :  { %v23603_v41 = vpop.eup %23602 }
0x100b   :  { %v4110_v50 = vadd.f32 %v23603_v41, %v24417_v14  ;;  %v2318_v14 = vsub.f32 %v24296_v45, %v24290_v25 }
0x100d   :  { %v24481_v15 = vmin.f32 %v4110_v50, 1.0 }
0x100f   :  { %v4696_v43 = vsub.f32 1.0, %v24481_v15  ;;  %vm4124_vm8 = vcmp.lt.f32.partialorder %v24481_v15, 1.0  ;;  %v4112_v39 = vsub.f32 %v24481_v15, %v24420_v6 }
0x1010   :  { %v24489_v0 = vsel %vm4124_vm8, %v24481_v15, %v24427_v11  ;;  %v4133_v11 = vmul.f32 %v4132_v19, %v24431_v55  ;;  %v21396_v18 = vsel %vm4124_vm8, 1.0, %v26440_v1 }
0x1011   :  { %4699 = vperm.xlu0 %23560, %v4696_v43  }
0x106d   :  { %v4136_v32 = vpop.permute.xlu0 %4135 }
0x106e   :  { %v4138_v36 = vmul.f32 %v4136_v32, %v4132_v19 }
0x1070   :  { %4140 = vrot.lane.b32.xlu1 %v4138_v36, %s23865_s4 }
0x1074   :  { %2321 = vperm.xlu1 %23561, %v2318_v14  }
0x1078   :  { %2919 = vperm.xlu1 %23561, %v2916_v37  }
0x107c   :  { %4115 = vperm.xlu1 %23561, %v4112_v39  }
0x107e   :  { %v24505_v58 = vpop.permute.xlu0 %1723 }
0x107f   :  { %v1726_v10 = vmul.f32 %v24505_v58, %v24195_v24  ;;  %v1730_v45 = vmul.f32 %v24505_v58, %v24281_v5 }
0x1082   :  { %v24515_v22 = vpop.permute.xlu0 %3517 }
0x1083   :  { %v3520_v43 = vmul.f32 %v24515_v22, %v24374_v30  ;;  %v3524_v6 = vmul.f32 %v24515_v22, %v24412_v59 }
0x1090   :  { %v24523_v14 = vpop.permute.xlu0 %4699 }
0x10e2   :  { %v4141_v42 = vpop.permute.xlu1 %4140 }
0x10e3   :  { %v24499_v44 = vadd.f32 %v4141_v42, %v4133_v11 }
0x10e5   :  { %23604 = vtanh.f32 %v24499_v44 }
0x10ef   :  { %v23605_v47 = vpop.eup %23604 }
0x10f0   :  { %4146 = vrot.lane.b32.xlu1 %v23605_v47, %s23864_s0 }
0x10f3   :  { %v24503_v51 = vpop.permute.xlu1 %2321 }
0x10f4   :  { %v2324_v2 = vmul.f32 %v24503_v51, %v24241_v46 }
0x10f6   :  { %v2325_v21 = vadd.f32 %v2324_v2, %v1726_v10 }
0x10f7   :  { %v24507_v61 = vpop.permute.xlu1 %2919 }
0x10f8   :  { %v2922_v13 = vmul.f32 %v24507_v61, %v24313_v38  ;;  %v2926_v25 = vmul.f32 %v24507_v61, %v24351_v9 }
0x10fa   :  { %v2923_v41 = vadd.f32 %v2922_v13, %v2325_v21 }
0x10fb   :  { %v24517_v50 = vpop.permute.xlu1 %4115 }
0x10fc   :  { %v4118_v29 = vmul.f32 %v24517_v50, %v24435_v52  ;;  %v3521_v32 = vadd.f32 %v3520_v43, %v2923_v41 }
0x10fe   :  { %v4119_v38 = vadd.f32 %v4118_v29, %v3521_v32 }
0x1162   :  { %v4147_v46 = vpop.permute.xlu1 %4146 }
0x1163   :  { %v4149_v36 = vmul.f32 %v4147_v46, %v4132_v19 }
0x1165   :  { %v4702_v24 = vmul.f32 %v24523_v14, %v4149_v36  ;;  %4151 = vrot.lane.b32.xlu1 %v4149_v36, %s23865_s4 }
0x1167   :  { %v4703_v37 = vadd.f32 %v4702_v24, %v4119_v38 }
0x1169   :  { %4728 = vrot.lane.b32.xlu0 %v4703_v37, %s23865_s4 }
0x11d7   :  { %v4152_v39 = vpop.permute.xlu1 %4151 }
0x11d8   :  { %4155 = vst.msk [vmem:[#allocation6 + $0x14] sm:$0xf] %vm1165_vm3, %v4152_v39  ;;  %v4156_v30 = vsel %vm599_vm2, %v4152_v39, 0 }
0x11d9   :  { %v24530_v11 = vand.u32 4294901760, %v4156_v30 }
0x11db   :  { %v4232_v52 = vsub.f32 %v4156_v30, %v24530_v11  ;;  %4611 = vmatmul.mubr.f32.vlgmr.msra.gmra.mrb[18].mxu1 %v24530_v11  ;;  %v4729_v19 = vpop.permute.xlu0 %4728 }
0x11dc   :  { %v4730_v42 = vsel %vm599_vm2, %v4729_v19, 0  ;;  %21902 = vmatpush1.bf16.msra.mxu1 %v23913_v17  ;;  %4804 = vmatprep.mubr.f32.mxu1 %v26440_v1  ;;  %v21390_v19 = vsel %vm2330_vm5, 1.0, %v26440_v1 }
0x11dd   :  { %v4233_v47 = vand.u32 4294901760, %v4232_v52  ;;  %v24537_v2 = vand.u32 4294901760, %v4730_v42  ;;  %21904 = vmatprep.subr.bf16.mxu1 %v23924_v27 }
0x11df   :  { %v4806_v10 = vsub.f32 %v4730_v42, %v24537_v2  ;;  %v4234_v13 = vsub.f32 %v4232_v52, %v4233_v47  ;;  %v21388_v42 = vsel %vm1732_vm4, 1.0, %v26440_v1 }
0x11e0   :  { %21906 = vmatpush1.bf16.msra.mxu1 %v23928_v28 }
0x11e1   :  { %v4807_v21 = vand.u32 4294901760, %v4806_v10  ;;  %v4235_v41 = vand.u32 4294901760, %v4234_v13  ;;  %21908 = vmatprep.subr.bf16.mxu1 %v23997_v4  ;;  %v2333_v13 = vadd.f32 %v21390_v19, %v21388_v42 }
0x11e3   :  { %v4808_v43 = vsub.f32 %v4806_v10, %v4807_v21  ;;  %4236 = vmatmul.mubr.f32.vlgmr.msra.gmra.mrb[10].mxu0 %v4235_v41  ;;  %v21394_v41 = vsel %vm3526_vm7, 1.0, %v26440_v1 }
0x11e4   :  { %21862 = vmatpush1.bf16.msra.mxu0 %v24002_v7  ;;  %4345 = vmatprep.mubr.f32.mxu0 %v26440_v1 }
0x11e5   :  { %21864 = vmatprep.subr.bf16.mxu0 %v24038_v31  ;;  %v4809_v29 = vand.u32 4294901760, %v4808_v43 }
0x11e7   :  { %4810 = vmatmul.mubr.f32.vlgmr.msra.gmra.mrb[20].mxu1 %v4809_v29 }
0x11e8   :  { %21866 = vmatpush1.bf16.msra.mxu0 %v24048_v49  ;;  %21910 = vmatpush1.bf16.msra.mxu1 %v24002_v7 }
0x11e9   :  { %21868 = vmatprep.subr.bf16.mxu0 %v24045_v48  ;;  %21912 = vmatprep.subr.bf16.mxu1 %v24038_v31 }
0x11ea   :  { %4919 = vmatprep.mubr.f32.mxu1 %v26440_v1 }
0x11eb   :  { %4347 = vmatmul.mubr.f32.vlgmr.msra.gmra.mrb[12].mxu0 %v24530_v11 }
0x11ec   :  { %21870 = vmatpush1.bf16.msra.mxu0 %v24056_v53  ;;  %21914 = vmatpush1.bf16.msra.mxu1 %v24048_v49 }
0x11ed   :  { %21872 = vmatprep.subr.bf16.mxu0 %v24061_v54  ;;  %21916 = vmatprep.subr.bf16.mxu1 %v24045_v48 }
0x11ee   :  { %4432 = vmatprep.mubr.f32.mxu0 %v26440_v1 }
0x11ef   :  { %4921 = vmatmul.mubr.f32.vlgmr.msra.gmra.mrb[20].mxu1 %v24537_v2 }
0x11f0   :  { %21874 = vmatpush1.bf16.msra.mxu0 %v24071_v56  ;;  %21918 = vmatpush1.bf16.msra.mxu1 %v24056_v53 }
0x11f1   :  { %21876 = vmatprep.subr.bf16.mxu0 %v23919_v23  ;;  %21920 = vmatprep.subr.bf16.mxu1 %v24061_v54 }
0x11f2   :  { %5006 = vmatprep.mubr.f32.mxu1 %v26440_v1 }
0x11f3   :  { %4435 = vmatmul.mubr.f32.vlgmr.msra.gmra.mrb[14].mxu0 %v4232_v52 }
0x11f4   :  { %21878 = vmatpush1.bf16.msra.mxu0 %v23913_v17  ;;  %21922 = vmatpush1.bf16.msra.mxu1 %v24071_v56 }
0x11f5   :  { %21880 = vmatprep.subr.bf16.mxu0 %v23924_v27  ;;  %21924 = vmatprep.subr.bf16.mxu1 %v23919_v23 }
0x11f6   :  { %4512 = vmatprep.mubr.f32.mxu0 %v26440_v1 }
0x11f7   :  { %5009 = vmatmul.mubr.f32.vlgmr.msra.gmra.mrb[20].mxu1 %v4806_v10 }
0x11f8   :  { %21882 = vmatpush1.bf16.msra.mxu0 %v23928_v28  ;;  %21926 = vmatpush1.bf16.msra.mxu1 %v23913_v17 }
0x11f9   :  { %21892 = vmatprep.subr.bf16.mxu0 %v23919_v23  ;;  %21928 = vmatprep.subr.bf16.mxu1 %v23924_v27 }
0x11fa   :  { %5086 = vmatprep.mubr.f32.mxu1 %v26440_v1 }
0x11fb   :  { %4516 = vmatmul.mubr.f32.vlgmr.msra.gmra.mrb[16].mxu0 %v4233_v47  ;;  %v21392_v47 = vsel %vm2928_vm6, 1.0, %v26440_v1 }
0x11fc   :  { %21894 = vmatpush1.bf16.msra.mxu0 %v23913_v17  ;;  %21930 = vmatpush1.bf16.msra.mxu1 %v23928_v28  ;;  %v2931_v29 = vadd.f32 %v21392_v47, %v2333_v13 }
0x11fd   :  { %21896 = vmatprep.subr.bf16.mxu0 %v23924_v27  ;;  %21932 = vmatprep.subr.bf16.mxu1 %v24092_v57 }
0x11fe   :  { %4688 = vmatprep.mubr.f32.mxu0 %v26440_v1 }
0x11ff   :  { %5090 = vmatmul.mubr.f32.vlgmr.msra.gmra.mrb[20].mxu1 %v4807_v21 }
0x1200   :  { %21898 = vmatpush1.bf16.msra.mxu0 %v23928_v28  ;;  %21934 = vmatpush1.bf16.msra.mxu1 %v24102_v60 }
0x1201   :  { %21936 = vmatprep.subr.bf16.mxu1 %v24109_v26  ;;  %5183 = vmatprep.mubr.f32.mxu1 %v26440_v1 }
0x1202   :  { %21948 = vmatprep.subr.bf16.mxu0 %v23919_v23 }
0x1203   :  { %4690 = vmatmul.mubr.f32.vlgmr.msra.gmra.mrb[18].mxu0 %v24530_v11 }
0x1204   :  { %21938 = vmatpush1.bf16.msra.mxu1 %v24117_v34  ;;  %21950 = vmatpush1.bf16.msra.mxu0 %v23913_v17 }
0x1205   :  { %21940 = vmatprep.subr.bf16.mxu1 %v23919_v23  ;;  %21952 = vmatprep.subr.bf16.mxu0 %v23924_v27 }
0x1206   :  { %5380 = vmatprep.mubr.f32.mxu0 %v26440_v1 }
0x1207   :  { %5185 = vmatmul.mubr.f32.vlgmr.msra.gmra.mrb[20].mxu1 %v24537_v2 }
0x1208   :  { %21942 = vmatpush1.bf16.msra.mxu1 %v23913_v17  ;;  %5262 = vmatprep.mubr.f32.mxu1 %v26440_v1 }
0x1209   :  { %21944 = vmatprep.subr.bf16.mxu1 %v23924_v27  ;;  %21954 = vmatpush1.bf16.msra.mxu0 %v23928_v28 }
0x120a   :  { %21956 = vmatprep.subr.bf16.mxu0 %v23997_v4 }
0x120c   :  { %21946 = vmatpush1.bf16.msra.mxu1 %v23928_v28 }
0x120d   :  { %21996 = vmatprep.subr.bf16.mxu1 %v23919_v23 }
0x120f   :  { %5264 = vmatmul.mubr.f32.vlgmr.msra.gmra.mrb[20].mxu1 %v24537_v2  ;;  %v2328_v2 = vmul.f32 %v24503_v51, %v24286_v16 }
0x1210   :  { %21998 = vmatpush1.bf16.msra.mxu1 %v23913_v17  ;;  %5989 = vmatprep.mubr.f32.mxu1 %v26440_v1 }
0x1211   :  { %22000 = vmatprep.subr.bf16.mxu1 %v23924_v27  ;;  %v2329_v16 = vadd.f32 %v2328_v2, %v1730_v45 }
0x1214   :  { %22002 = vmatpush1.bf16.msra.mxu1 %v23928_v28 }
0x1215   :  { %22004 = vmatprep.subr.bf16.mxu1 %v23997_v4 }
0x12ae   :  { %v4612_v32 = vpop.f32.mrb[18].mxu1 }
0x12af   :  { %v4613_v46 = vpop.f32.mrb[19].mxu1 }
0x12b6   :  { %v4237_v36 = vpop.f32.mrb[10].mxu0 }
0x12b7   :  { %v4238_v24 = vpop.f32.mrb[11].mxu0  ;;  %v3529_v36 = vadd.f32 %v21394_v41, %v2931_v29  ;;  %v2924_v29 = vmul.f32 %v24507_v61, %v24309_v33 }
0x12be   :  { %v4348_v38 = vpop.f32.mrb[12].mxu0 }
0x12bf   :  { %v4349_v37 = vpop.f32.mrb[13].mxu0  ;;  %v24624_v38 = vadd.f32 %v21396_v18, %v3529_v36 }
0x12c0   :  { %v4350_v39 = vadd.f32 %v4349_v37, %v4238_v24  ;;  %v2927_v24 = vadd.f32 %v2926_v25, %v2329_v16  ;;  %v2326_v25 = vmul.f32 %v24503_v51, %v24237_v40 }
0x12c1   :  { %vm4713_vm9 = vcmp.gt.f32.partialorder %v24624_v38, 0.0 }
0x12c2   :  { %v3525_v9 = vadd.f32 %v3524_v6, %v2927_v24  ;;  %v4120_v24 = vmul.f32 %v24517_v50, %v24431_v55 }
0x12c6   :  { %v4436_v30 = vpop.f32.mrb[14].mxu0 }
0x12c7   :  { %v4437_v11 = vpop.f32.mrb[15].mxu0  ;;  %v4122_v30 = vmul.f32 %v24517_v50, %v24473_v62 }
0x12c8   :  { %v4438_v52 = vadd.f32 %v4437_v11, %v4350_v39  ;;  %v4714_v39 = vsub.f32 1.0, %v24489_v0 }
0x12ce   :  { %v4517_v10 = vpop.f32.mrb[16].mxu0 }
0x12cf   :  { %v4518_v21 = vpop.f32.mrb[17].mxu0 }
0x12d0   :  { %v4519_v43 = vadd.f32 %v4518_v21, %v4438_v52  ;;  %v4123_v52 = vadd.f32 %v4122_v30, %v3525_v9 }
0x12d2   :  { %v4614_v32 = vadd.f32 %v4613_v46, %v4519_v43  ;;  %v4715_v46 = vsel %vm4713_vm9, %v4714_v39, 0.0  ;;  %v1728_v43 = vmul.f32 %v24505_v58, %v24191_v20 }
0x12d3   :  { %v4716_v59 = vadd.f32 %v4715_v46, %v24624_v38 }
0x12d4   :  { %v2327_v18 = vadd.f32 %v2326_v25, %v1728_v43 }
0x12d6   :  { %v4691_v37 = vpop.f32.mrb[18].mxu0  ;;  %v2925_v16 = vadd.f32 %v2924_v29, %v2327_v18 }
0x12d7   :  { %v4692_v5 = vpop.f32.mrb[19].mxu0  ;;  %v4704_v37 = vmul.f32 %v24523_v14, %v24499_v44 }
0x12d8   :  { %v4693_v11 = vadd.f32 %v4692_v5, %v4614_v32  ;;  %v3522_v32 = vmul.f32 %v24515_v22, %v24370_v35 }
0x12da   :  { %v4695_v15 = vadd.f32 %v4693_v11, %v24277_v3  ;;  %v3523_v36 = vadd.f32 %v3522_v32, %v2925_v16 }
0x12dc   :  { %v4706_v19 = vmul.f32 %v24523_v14, %v4695_v15  ;;  %v4121_v6 = vadd.f32 %v4120_v24, %v3523_v36  ;;  %v24743_v24 = vld [vmem:[#allocation2 + $0x68] ss:$0 sm:$0xff] }
0x12de   :  { %v4707_v42 = vadd.f32 %v4706_v19, %v4123_v52  ;;  %v4705_v40 = vadd.f32 %v4704_v37, %v4121_v6 }
0x12e0   :  { %v24636_v47 = vsel %vm4721_vm10, %v4707_v42, %v4716_v59  ;;  %v5277_v51 = vrot.slane %v4705_v40, 4 }
0x12e1   :  { %26445 = vst [vmem:[#allocation11_spill] sm:$0xff] %v24636_v47 }
0x12e2   :  { %v5265_v0 = vpop.f32.mrb[20].mxu1 }
0x12e3   :  { %v5270_v2 = vrot.slane %v5265_v0, 4  ;;  %v5267_v10 = vpop.f32.mrb[21].mxu1 }
0x12e5   :  { %v5272_v62 = vadd.f32 %v24182_v63, %v5270_v2 }
0x12e7   :  { %23606 = vtanh.f32 %v5272_v62 }
0x12f1   :  { %v23607_v13 = vpop.eup %23606 }
0x12f2   :  { %5281 = vrot.lane.b32.xlu0 %v23607_v13, %s23864_s0  ;;  %v5274_v3 = vmul.f32 0.5, %v23607_v13 }
0x12f4   :  { %v5275_v21 = vadd.f32 0.5, %v5274_v3 }
0x12f6   :  { %v5279_v5 = vmul.f32 %v5277_v51, %v5275_v21 }
0x1364   :  { %v5282_v41 = vpop.permute.xlu0 %5281 }
0x1365   :  { %v5284_v45 = vmul.f32 %v5282_v41, %v5275_v21 }
0x1367   :  { %5286 = vrot.lane.b32.xlu1 %v5284_v45, %s23865_s4 }
0x13d9   :  { %v5287_v20 = vpop.permute.xlu1 %5286 }
0x13da   :  { %v24653_v58 = vadd.f32 %v5287_v20, %v5279_v5 }
0x13dc   :  { %23608 = vtanh.f32 %v24653_v58 }
0x13e6   :  { %v23609_v33 = vpop.eup %23608 }
0x13e7   :  { %5292 = vrot.lane.b32.xlu0 %v23609_v33, %s23864_s0 }
0x1459   :  { %v5293_v35 = vpop.permute.xlu0 %5292 }
0x145a   :  { %v24657_v61 = vmul.f32 %v5293_v35, %v5275_v21 }
0x145c   :  { %v5303_v55 = vrot.slane %v24657_v61, 4 }
0x145e   :  { %5304 = vrot.lane.b32.xlu1 %v5303_v55, %s23865_s4 }
0x14d0   :  { %v24661_v22 = vpop.permute.xlu1 %5304 }
0x14d1   :  { %v5306_v44 = vsel %vm599_vm2, %v24661_v22, 0 }
0x14d2   :  { %v5381_v50 = vand.u32 4294901760, %v5306_v44 }
0x14d4   :  { %v5382_v14 = vsub.f32 %v5306_v44, %v5381_v50 }
0x14d6   :  { %v5383_v39 = vand.u32 4294901760, %v5382_v14 }
0x14d8   :  { %v5384_v9 = vsub.f32 %v5382_v14, %v5383_v39 }
0x14da   :  { %v5385_v30 = vand.u32 4294901760, %v5384_v9 }
0x14dc   :  { %5386 = vmatmul.mubr.f32.vlgmr.msra.gmra.mrb[20].mxu0 %v5385_v30 }
0x14dd   :  { %21958 = vmatpush1.bf16.msra.mxu0 %v24002_v7  ;;  %5496 = vmatprep.mubr.f32.mxu0 %v26440_v1 }
0x14de   :  { %21960 = vmatprep.subr.bf16.mxu0 %v24038_v31 }
0x14e1   :  { %21962 = vmatpush1.bf16.msra.mxu0 %v24048_v49 }
0x14e2   :  { %21964 = vmatprep.subr.bf16.mxu0 %v24045_v48 }
0x14e4   :  { %5498 = vmatmul.mubr.f32.vlgmr.msra.gmra.mrb[20].mxu0 %v5381_v50 }
0x14e5   :  { %21966 = vmatpush1.bf16.msra.mxu0 %v24056_v53  ;;  %5584 = vmatprep.mubr.f32.mxu0 %v26440_v1 }
0x14e6   :  { %21968 = vmatprep.subr.bf16.mxu0 %v24061_v54 }
0x14e9   :  { %21970 = vmatpush1.bf16.msra.mxu0 %v24071_v56 }
0x14ea   :  { %21972 = vmatprep.subr.bf16.mxu0 %v23919_v23 }
0x14ec   :  { %5587 = vmatmul.mubr.f32.vlgmr.msra.gmra.mrb[20].mxu0 %v5382_v14 }
0x14ed   :  { %21974 = vmatpush1.bf16.msra.mxu0 %v23913_v17  ;;  %5665 = vmatprep.mubr.f32.mxu0 %v26440_v1 }
0x14ee   :  { %21976 = vmatprep.subr.bf16.mxu0 %v23924_v27 }
0x14f1   :  { %21978 = vmatpush1.bf16.msra.mxu0 %v23928_v28 }
0x14f2   :  { %21980 = vmatprep.subr.bf16.mxu0 %v24092_v57 }
0x14f4   :  { %5669 = vmatmul.mubr.f32.vlgmr.msra.gmra.mrb[20].mxu0 %v5383_v39 }
0x14f5   :  { %21982 = vmatpush1.bf16.msra.mxu0 %v24102_v60  ;;  %5763 = vmatprep.mubr.f32.mxu0 %v26440_v1 }
0x14f6   :  { %21984 = vmatprep.subr.bf16.mxu0 %v24109_v26 }
0x14f9   :  { %21986 = vmatpush1.bf16.msra.mxu0 %v24117_v34 }
0x14fa   :  { %21988 = vmatprep.subr.bf16.mxu0 %v23919_v23 }
0x14fc   :  { %5765 = vmatmul.mubr.f32.vlgmr.msra.gmra.mrb[20].mxu0 %v5381_v50 }
0x14fd   :  { %21990 = vmatpush1.bf16.msra.mxu0 %v23913_v17  ;;  %5843 = vmatprep.mubr.f32.mxu0 %v26440_v1 }
0x14fe   :  { %21992 = vmatprep.subr.bf16.mxu0 %v23924_v27 }
0x1501   :  { %21994 = vmatpush1.bf16.msra.mxu0 %v23928_v28 }
0x1502   :  { %22044 = vmatprep.subr.bf16.mxu0 %v23919_v23 }
0x1504   :  { %5845 = vmatmul.mubr.f32.vlgmr.msra.gmra.mrb[20].mxu0 %v5381_v50 }
0x1505   :  { %22046 = vmatpush1.bf16.msra.mxu0 %v23913_v17  ;;  %6599 = vmatprep.mubr.f32.mxu0 %v26440_v1 }
0x1506   :  { %22048 = vmatprep.subr.bf16.mxu0 %v23924_v27 }
0x1509   :  { %22050 = vmatpush1.bf16.msra.mxu0 %v23928_v28 }
0x150a   :  { %22052 = vmatprep.subr.bf16.mxu0 %v23997_v4 }
0x15d7   :  { %v5846_v11 = vpop.f32.mrb[20].mxu0 }
0x15d8   :  { %v5883_v15 = vrot.slane %v5846_v11, 4  ;;  %v24695_v46 = vpop.f32.mrb[21].mxu0 }
0x15d9   :  { %v24747_v6 = vadd.f32 %v24743_v24, %v24695_v46 }
0x15da   :  { %v5885_v52 = vadd.f32 %v24182_v63, %v5883_v15 }
0x15db   :  { %v21397_v37 = vmul.f32 -1.442695, %v24747_v6 }
0x15dc   :  { %23610 = vtanh.f32 %v5885_v52 }
0x15e6   :  { %v23611_v19 = vpop.eup %23610 }
0x15e7   :  { %5891 = vrot.lane.b32.xlu0 %v23611_v19, %s23864_s0  ;;  %v5887_v42 = vmul.f32 0.5, %v23611_v19 }
0x15e9   :  { %v5888_v59 = vadd.f32 0.5, %v5887_v42 }
0x15eb   :  { %v5889_v10 = vmul.f32 %v5888_v59, %v24653_v58 }
0x1659   :  { %v5892_v0 = vpop.permute.xlu0 %5891 }
0x165a   :  { %v5894_v2 = vmul.f32 %v5892_v0, %v5888_v59 }
0x165c   :  { %5896 = vrot.lane.b32.xlu1 %v5894_v2, %s23865_s4 }
0x16ce   :  { %v5897_v62 = vpop.permute.xlu1 %5896 }
0x16cf   :  { %v24701_v13 = vadd.f32 %v5897_v62, %v5889_v10 }
0x16d1   :  { %23612 = vtanh.f32 %v24701_v13 }
0x16d2   :  { %23614 = vpow2.f32 %v21397_v37 }
0x16db   :  { %v23613_v3 = vpop.eup %23612 }
0x16dc   :  { %5902 = vrot.lane.b32.xlu0 %v23613_v3, %s23864_s0  ;;  %v23615_v55 = vpop.eup %23614 }
0x16dd   :  { %v5855_v44 = vadd.f32 1.0, %v23615_v55 }
0x174e   :  { %v5903_v21 = vpop.permute.xlu0 %5902 }
0x174f   :  { %v24705_v41 = vmul.f32 %v5903_v21, %v5888_v59 }
0x1751   :  { %v5912_v45 = vrot.slane %v24705_v41, 4 }
0x1753   :  { %5913 = vrot.lane.b32.xlu1 %v5912_v45, %s23865_s4 }
0x17c5   :  { %v24709_v25 = vpop.permute.xlu1 %5913 }
0x17c6   :  { %v5915_v43 = vsel %vm599_vm2, %v24709_v25, 0 }
0x17c7   :  { %v5990_v29 = vand.u32 4294901760, %v5915_v43 }
0x17c9   :  { %v5991_v18 = vsub.f32 %v5915_v43, %v5990_v29 }
0x17cb   :  { %v5992_v16 = vand.u32 4294901760, %v5991_v18 }
0x17cd   :  { %v5993_v32 = vsub.f32 %v5991_v18, %v5992_v16 }
0x17cf   :  { %v5994_v36 = vand.u32 4294901760, %v5993_v32 }
0x17d1   :  { %5995 = vmatmul.mubr.f32.vlgmr.msra.gmra.mrb[22].mxu1 %v5994_v36 }
0x17d2   :  { %22006 = vmatpush1.bf16.msra.mxu1 %v24002_v7  ;;  %6105 = vmatprep.mubr.f32.mxu1 %v26440_v1 }
0x17d3   :  { %22008 = vmatprep.subr.bf16.mxu1 %v24038_v31 }
0x17d6   :  { %22010 = vmatpush1.bf16.msra.mxu1 %v24048_v49 }
0x17d7   :  { %22012 = vmatprep.subr.bf16.mxu1 %v24045_v48 }
0x17d9   :  { %6107 = vmatmul.mubr.f32.vlgmr.msra.gmra.mrb[22].mxu1 %v5990_v29 }
0x17da   :  { %22014 = vmatpush1.bf16.msra.mxu1 %v24056_v53  ;;  %6193 = vmatprep.mubr.f32.mxu1 %v26440_v1 }
0x17db   :  { %22016 = vmatprep.subr.bf16.mxu1 %v24061_v54 }
0x17de   :  { %22018 = vmatpush1.bf16.msra.mxu1 %v24071_v56 }
0x17df   :  { %22020 = vmatprep.subr.bf16.mxu1 %v23919_v23 }
0x17e1   :  { %6196 = vmatmul.mubr.f32.vlgmr.msra.gmra.mrb[22].mxu1 %v5991_v18 }
0x17e2   :  { %22022 = vmatpush1.bf16.msra.mxu1 %v23913_v17  ;;  %6274 = vmatprep.mubr.f32.mxu1 %v26440_v1 }
0x17e3   :  { %22024 = vmatprep.subr.bf16.mxu1 %v23924_v27 }
0x17e6   :  { %22026 = vmatpush1.bf16.msra.mxu1 %v23928_v28 }
0x17e7   :  { %22028 = vmatprep.subr.bf16.mxu1 %v24092_v57 }
0x17e9   :  { %6278 = vmatmul.mubr.f32.vlgmr.msra.gmra.mrb[22].mxu1 %v5992_v16 }
0x17ea   :  { %22030 = vmatpush1.bf16.msra.mxu1 %v24102_v60  ;;  %6372 = vmatprep.mubr.f32.mxu1 %v26440_v1 }
0x17eb   :  { %22032 = vmatprep.subr.bf16.mxu1 %v24109_v26 }
0x17ee   :  { %22034 = vmatpush1.bf16.msra.mxu1 %v24117_v34 }
0x17ef   :  { %22036 = vmatprep.subr.bf16.mxu1 %v23919_v23 }
0x17f1   :  { %6374 = vmatmul.mubr.f32.vlgmr.msra.gmra.mrb[22].mxu1 %v5990_v29 }
0x17f2   :  { %22038 = vmatpush1.bf16.msra.mxu1 %v23913_v17  ;;  %6452 = vmatprep.mubr.f32.mxu1 %v26440_v1 }
0x17f3   :  { %22040 = vmatprep.subr.bf16.mxu1 %v23924_v27 }
0x17f6   :  { %22042 = vmatpush1.bf16.msra.mxu1 %v23928_v28 }
0x17f7   :  { %22092 = vmatprep.subr.bf16.mxu1 %v23919_v23 }
0x17f9   :  { %6454 = vmatmul.mubr.f32.vlgmr.msra.gmra.mrb[22].mxu1 %v5990_v29 }
0x17fa   :  { %22094 = vmatpush1.bf16.msra.mxu1 %v23913_v17  ;;  %7209 = vmatprep.mubr.f32.mxu1 %v26440_v1 }
0x17fb   :  { %22096 = vmatprep.subr.bf16.mxu1 %v23924_v27 }
0x17fe   :  { %22098 = vmatpush1.bf16.msra.mxu1 %v23928_v28 }
0x17ff   :  { %22100 = vmatprep.subr.bf16.mxu1 %v23997_v4 }
0x18cc   :  { %v6455_v40 = vpop.f32.mrb[22].mxu1 }
0x18cd   :  { %v6493_v51 = vrot.slane %v6455_v40, 4  ;;  %v6457_v5 = vpop.f32.mrb[23].mxu1 }
0x18ce   :  { %v24751_v20 = vadd.f32 %v24743_v24, %v6457_v5 }
0x18cf   :  { %v6495_v33 = vadd.f32 %v24182_v63, %v6493_v51 }
0x18d0   :  { %v21399_v35 = vmul.f32 -1.442695, %v24751_v20 }
0x18d1   :  { %23616 = vtanh.f32 %v6495_v33 }
0x18d2   :  { %23618 = vpow2.f32 %v21399_v35 }
0x18d3   :  { %23620 = vrcp.f32 %v5855_v44 }
0x18db   :  { %v23617_v50 = vpop.eup %23616 }
0x18dc   :  { %v23619_v14 = vpop.eup %23618  ;;  %6501 = vrot.lane.b32.xlu0 %v23617_v50, %s23864_s0  ;;  %v6497_v42 = vmul.f32 0.5, %v23617_v50 }
0x18dd   :  { %v6464_v39 = vadd.f32 1.0, %v23619_v14  ;;  %v23621_v9 = vpop.eup %23620 }
0x18de   :  { %v24756_v30 = vmin.f32 %v23621_v9, 1.0  ;;  %v6498_v59 = vadd.f32 0.5, %v6497_v42 }
0x18df   :  { %23622 = vrcp.f32 %v6464_v39 }
0x18e0   :  { %vm5877_vm11 = vcmp.lt.f32.partialorder %v24756_v30, 1.0  ;;  %v6499_v10 = vmul.f32 %v6498_v59, %v24701_v13 }
0x18e1   :  { %v5881_v52 = vsel %vm5877_vm11, %v24756_v30, 0.0 }
0x18e9   :  { %v23623_v11 = vpop.eup %23622 }
0x18ea   :  { %v24758_v15 = vadd.f32 %v23623_v11, %v23621_v9 }
0x18ec   :  { %v24762_v46 = vmin.f32 %v24758_v15, 1.0 }
0x18ee   :  { %vm6487_vm12 = vcmp.lt.f32.partialorder %v24762_v46, 1.0 }
0x18ef   :  { %v24771_v19 = vsel %vm6487_vm12, %v24762_v46, %v5881_v52 }
0x194e   :  { %v6502_v0 = vpop.permute.xlu0 %6501 }
0x194f   :  { %v6504_v2 = vmul.f32 %v6502_v0, %v6498_v59 }
0x1951   :  { %6506 = vrot.lane.b32.xlu1 %v6504_v2, %s23865_s4 }
0x19c3   :  { %v6507_v62 = vpop.permute.xlu1 %6506 }
0x19c4   :  { %v24775_v3 = vadd.f32 %v6507_v62, %v6499_v10 }
0x19c6   :  { %23624 = vtanh.f32 %v24775_v3 }
0x19d0   :  { %v23625_v21 = vpop.eup %23624 }
0x19d1   :  { %6512 = vrot.lane.b32.xlu0 %v23625_v21, %s23864_s0 }
0x1a43   :  { %v6513_v45 = vpop.permute.xlu0 %6512 }
0x1a44   :  { %v24779_v43 = vmul.f32 %v6513_v45, %v6498_v59 }
0x1a46   :  { %26446 = vst [vmem:[#allocation12_spill] sm:$0xff] %v24779_v43  ;;  %v6522_v29 = vrot.slane %v24779_v43, 4 }
0x1a48   :  { %6523 = vrot.lane.b32.xlu1 %v6522_v29, %s23865_s4 }
0x1aba   :  { %v24783_v18 = vpop.permute.xlu1 %6523 }
0x1abb   :  { %v6525_v16 = vsel %vm599_vm2, %v24783_v18, 0 }
0x1abc   :  { %v6600_v32 = vand.u32 4294901760, %v6525_v16 }
0x1abe   :  { %v6601_v36 = vsub.f32 %v6525_v16, %v6600_v32 }
0x1ac0   :  { %v6602_v37 = vand.u32 4294901760, %v6601_v36 }
0x1ac2   :  { %v6603_v40 = vsub.f32 %v6601_v36, %v6602_v37 }
0x1ac4   :  { %v6604_v51 = vand.u32 4294901760, %v6603_v40 }
0x1ac6   :  { %6605 = vmatmul.mubr.f32.vlgmr.msra.gmra.mrb[22].mxu0 %v6604_v51 }
0x1ac7   :  { %22054 = vmatpush1.bf16.msra.mxu0 %v24002_v7  ;;  %6715 = vmatprep.mubr.f32.mxu0 %v26440_v1 }
0x1ac8   :  { %22056 = vmatprep.subr.bf16.mxu0 %v24038_v31 }
0x1acb   :  { %22058 = vmatpush1.bf16.msra.mxu0 %v24048_v49 }
0x1acc   :  { %22060 = vmatprep.subr.bf16.mxu0 %v24045_v48 }
0x1ace   :  { %6717 = vmatmul.mubr.f32.vlgmr.msra.gmra.mrb[22].mxu0 %v6600_v32 }
0x1acf   :  { %22062 = vmatpush1.bf16.msra.mxu0 %v24056_v53  ;;  %6803 = vmatprep.mubr.f32.mxu0 %v26440_v1 }
0x1ad0   :  { %22064 = vmatprep.subr.bf16.mxu0 %v24061_v54 }
0x1ad3   :  { %22066 = vmatpush1.bf16.msra.mxu0 %v24071_v56 }
0x1ad4   :  { %22068 = vmatprep.subr.bf16.mxu0 %v23919_v23 }
0x1ad6   :  { %6806 = vmatmul.mubr.f32.vlgmr.msra.gmra.mrb[22].mxu0 %v6601_v36 }
0x1ad7   :  { %22070 = vmatpush1.bf16.msra.mxu0 %v23913_v17  ;;  %6884 = vmatprep.mubr.f32.mxu0 %v26440_v1 }
0x1ad8   :  { %22072 = vmatprep.subr.bf16.mxu0 %v23924_v27 }
0x1adb   :  { %22074 = vmatpush1.bf16.msra.mxu0 %v23928_v28 }
0x1adc   :  { %22076 = vmatprep.subr.bf16.mxu0 %v24092_v57 }
0x1ade   :  { %6888 = vmatmul.mubr.f32.vlgmr.msra.gmra.mrb[22].mxu0 %v6602_v37 }
0x1adf   :  { %22078 = vmatpush1.bf16.msra.mxu0 %v24102_v60  ;;  %6982 = vmatprep.mubr.f32.mxu0 %v26440_v1 }
0x1ae0   :  { %22080 = vmatprep.subr.bf16.mxu0 %v24109_v26 }
0x1ae3   :  { %22082 = vmatpush1.bf16.msra.mxu0 %v24117_v34 }
0x1ae4   :  { %22084 = vmatprep.subr.bf16.mxu0 %v23919_v23 }
0x1ae6   :  { %6984 = vmatmul.mubr.f32.vlgmr.msra.gmra.mrb[22].mxu0 %v6600_v32 }
0x1ae7   :  { %22086 = vmatpush1.bf16.msra.mxu0 %v23913_v17  ;;  %7062 = vmatprep.mubr.f32.mxu0 %v26440_v1 }
0x1ae8   :  { %22088 = vmatprep.subr.bf16.mxu0 %v23924_v27 }
0x1aeb   :  { %22090 = vmatpush1.bf16.msra.mxu0 %v23928_v28 }
0x1aec   :  { %22140 = vmatprep.subr.bf16.mxu0 %v23919_v23 }
0x1aee   :  { %7064 = vmatmul.mubr.f32.vlgmr.msra.gmra.mrb[22].mxu0 %v6600_v32 }
0x1aef   :  { %22142 = vmatpush1.bf16.msra.mxu0 %v23913_v17  ;;  %7819 = vmatprep.mubr.f32.mxu0 %v26440_v1 }
0x1af0   :  { %22144 = vmatprep.subr.bf16.mxu0 %v23924_v27 }
0x1af3   :  { %22146 = vmatpush1.bf16.msra.mxu0 %v23928_v28 }
0x1af4   :  { %22148 = vmatprep.subr.bf16.mxu0 %v23997_v4 }
0x1bc1   :  { %v7065_v5 = vpop.f32.mrb[22].mxu0 }
0x1bc2   :  { %v7103_v33 = vrot.slane %v7065_v5, 4  ;;  %v7067_v35 = vpop.f32.mrb[23].mxu0 }
0x1bc3   :  { %v24818_v55 = vadd.f32 %v24743_v24, %v7067_v35 }
0x1bc4   :  { %v7105_v44 = vadd.f32 %v24182_v63, %v7103_v33 }
0x1bc5   :  { %v21401_v50 = vmul.f32 -1.442695, %v24818_v55 }
0x1bc6   :  { %23626 = vtanh.f32 %v7105_v44 }
0x1bc7   :  { %23628 = vpow2.f32 %v21401_v50 }
0x1bd0   :  { %v23627_v14 = vpop.eup %23626 }
0x1bd1   :  { %v23629_v39 = vpop.eup %23628  ;;  %7111 = vrot.lane.b32.xlu0 %v23627_v14, %s23864_s0  ;;  %v7107_v0 = vmul.f32 0.5, %v23627_v14 }
0x1bd2   :  { %v7074_v9 = vadd.f32 1.0, %v23629_v39 }
0x1bd3   :  { %v7108_v2 = vadd.f32 0.5, %v7107_v0 }
0x1bd4   :  { %23630 = vrcp.f32 %v7074_v9 }
0x1bde   :  { %v23631_v11 = vpop.eup %23630 }
0x1bdf   :  { %v24824_v52 = vadd.f32 %v23631_v11, %v24758_v15  ;;  %v7109_v15 = vmul.f32 %v7108_v2, %v24775_v3 }
0x1be1   :  { %v24827_v42 = vmin.f32 %v24824_v52, 1.0 }
0x1be3   :  { %vm7097_vm13 = vcmp.lt.f32.partialorder %v24827_v42, 1.0 }
0x1be4   :  { %v24834_v59 = vsel %vm7097_vm13, %v24827_v42, %v24771_v19 }
0x1c43   :  { %v7112_v10 = vpop.permute.xlu0 %7111 }
0x1c44   :  { %v7114_v62 = vmul.f32 %v7112_v10, %v7108_v2 }
0x1c46   :  { %7116 = vrot.lane.b32.xlu1 %v7114_v62, %s23865_s4 }
0x1cb8   :  { %v7117_v21 = vpop.permute.xlu1 %7116 }
0x1cb9   :  { %v24838_v45 = vadd.f32 %v7117_v21, %v7109_v15 }
0x1cbb   :  { %23632 = vtanh.f32 %v24838_v45 }
0x1cc5   :  { %v23633_v29 = vpop.eup %23632 }
0x1cc6   :  { %7122 = vrot.lane.b32.xlu0 %v23633_v29, %s23864_s0 }
0x1d38   :  { %v7123_v16 = vpop.permute.xlu0 %7122 }
0x1d39   :  { %v24842_v32 = vmul.f32 %v7123_v16, %v7108_v2 }
0x1d3b   :  { %v7132_v19 = vrot.slane %v24842_v32, 4 }
0x1d3d   :  { %7133 = vrot.lane.b32.xlu1 %v7132_v19, %s23865_s4 }
0x1daf   :  { %v24846_v36 = vpop.permute.xlu1 %7133 }
0x1db0   :  { %v7135_v37 = vsel %vm599_vm2, %v24846_v36, 0 }
0x1db1   :  { %v7210_v40 = vand.u32 4294901760, %v7135_v37 }
0x1db3   :  { %v7211_v51 = vsub.f32 %v7135_v37, %v7210_v40 }
0x1db5   :  { %v7212_v5 = vand.u32 4294901760, %v7211_v51 }
0x1db7   :  { %v7213_v33 = vsub.f32 %v7211_v51, %v7212_v5 }
0x1db9   :  { %v7214_v35 = vand.u32 4294901760, %v7213_v33 }
0x1dbb   :  { %7215 = vmatmul.mubr.f32.vlgmr.msra.gmra.mrb[24].mxu1 %v7214_v35 }
0x1dbc   :  { %22102 = vmatpush1.bf16.msra.mxu1 %v24002_v7  ;;  %7325 = vmatprep.mubr.f32.mxu1 %v26440_v1 }
0x1dbd   :  { %22104 = vmatprep.subr.bf16.mxu1 %v24038_v31 }
0x1dc0   :  { %22106 = vmatpush1.bf16.msra.mxu1 %v24048_v49 }
0x1dc1   :  { %22108 = vmatprep.subr.bf16.mxu1 %v24045_v48 }
0x1dc3   :  { %7327 = vmatmul.mubr.f32.vlgmr.msra.gmra.mrb[24].mxu1 %v7210_v40 }
0x1dc4   :  { %22110 = vmatpush1.bf16.msra.mxu1 %v24056_v53  ;;  %7413 = vmatprep.mubr.f32.mxu1 %v26440_v1 }
0x1dc5   :  { %22112 = vmatprep.subr.bf16.mxu1 %v24061_v54 }
0x1dc8   :  { %22114 = vmatpush1.bf16.msra.mxu1 %v24071_v56 }
0x1dc9   :  { %22116 = vmatprep.subr.bf16.mxu1 %v23919_v23 }
0x1dcb   :  { %7416 = vmatmul.mubr.f32.vlgmr.msra.gmra.mrb[24].mxu1 %v7211_v51 }
0x1dcc   :  { %22118 = vmatpush1.bf16.msra.mxu1 %v23913_v17  ;;  %7494 = vmatprep.mubr.f32.mxu1 %v26440_v1 }
0x1dcd   :  { %22120 = vmatprep.subr.bf16.mxu1 %v23924_v27 }
0x1dd0   :  { %22122 = vmatpush1.bf16.msra.mxu1 %v23928_v28 }
0x1dd1   :  { %22124 = vmatprep.subr.bf16.mxu1 %v24092_v57 }
0x1dd3   :  { %7498 = vmatmul.mubr.f32.vlgmr.msra.gmra.mrb[24].mxu1 %v7212_v5 }
0x1dd4   :  { %22126 = vmatpush1.bf16.msra.mxu1 %v24102_v60  ;;  %7592 = vmatprep.mubr.f32.mxu1 %v26440_v1 }
0x1dd5   :  { %22128 = vmatprep.subr.bf16.mxu1 %v24109_v26 }
0x1dd8   :  { %22130 = vmatpush1.bf16.msra.mxu1 %v24117_v34 }
0x1dd9   :  { %22132 = vmatprep.subr.bf16.mxu1 %v23919_v23 }
0x1ddb   :  { %7594 = vmatmul.mubr.f32.vlgmr.msra.gmra.mrb[24].mxu1 %v7210_v40 }
0x1ddc   :  { %22134 = vmatpush1.bf16.msra.mxu1 %v23913_v17  ;;  %7672 = vmatprep.mubr.f32.mxu1 %v26440_v1 }
0x1ddd   :  { %22136 = vmatprep.subr.bf16.mxu1 %v23924_v27 }
0x1de0   :  { %22138 = vmatpush1.bf16.msra.mxu1 %v23928_v28 }
0x1de1   :  { %22188 = vmatprep.subr.bf16.mxu1 %v23919_v23 }
0x1de3   :  { %7674 = vmatmul.mubr.f32.vlgmr.msra.gmra.mrb[24].mxu1 %v7210_v40 }
0x1de4   :  { %22190 = vmatpush1.bf16.msra.mxu1 %v23913_v17  ;;  %8429 = vmatprep.mubr.f32.mxu1 %v26440_v1 }
0x1de5   :  { %22192 = vmatprep.subr.bf16.mxu1 %v23924_v27 }
0x1de8   :  { %22194 = vmatpush1.bf16.msra.mxu1 %v23928_v28 }
0x1de9   :  { %22204 = vmatprep.subr.bf16.mxu1 %v24045_v48 }
0x1eb6   :  { %v7675_v44 = vpop.f32.mrb[24].mxu1 }
0x1eb7   :  { %v7713_v50 = vrot.slane %v7675_v44, 4  ;;  %v7677_v14 = vpop.f32.mrb[25].mxu1 }
0x1eb8   :  { %v24881_v39 = vadd.f32 %v24743_v24, %v7677_v14 }
0x1eb9   :  { %v7715_v9 = vadd.f32 %v24182_v63, %v7713_v50 }
0x1eba   :  { %v21403_v11 = vmul.f32 -1.442695, %v24881_v39 }
0x1ebb   :  { %23634 = vtanh.f32 %v7715_v9 }
0x1ebc   :  { %23636 = vpow2.f32 %v21403_v11 }
0x1ec5   :  { %v23635_v0 = vpop.eup %23634 }
0x1ec6   :  { %v23637_v2 = vpop.eup %23636  ;;  %7721 = vrot.lane.b32.xlu0 %v23635_v0, %s23864_s0  ;;  %v7717_v16 = vmul.f32 0.5, %v23635_v0 }
0x1ec7   :  { %v7684_v10 = vadd.f32 1.0, %v23637_v2 }
0x1ec8   :  { %v7718_v19 = vadd.f32 0.5, %v7717_v16 }
0x1ec9   :  { %23638 = vrcp.f32 %v7684_v10 }
0x1ed3   :  { %v23639_v62 = vpop.eup %23638 }
0x1ed4   :  { %v24887_v15 = vadd.f32 %v23639_v62, %v24824_v52  ;;  %v7719_v52 = vmul.f32 %v7718_v19, %v24838_v45 }
0x1ed6   :  { %v24890_v21 = vmin.f32 %v24887_v15, 1.0 }
0x1ed8   :  { %vm7707_vm14 = vcmp.lt.f32.partialorder %v24890_v21, 1.0 }
0x1ed9   :  { %v24897_v29 = vsel %vm7707_vm14, %v24890_v21, %v24834_v59 }
0x1f38   :  { %v7722_v37 = vpop.permute.xlu0 %7721 }
0x1f39   :  { %v7724_v40 = vmul.f32 %v7722_v37, %v7718_v19 }
0x1f3b   :  { %7726 = vrot.lane.b32.xlu1 %v7724_v40, %s23865_s4 }
0x1fad   :  { %v7727_v51 = vpop.permute.xlu1 %7726 }
0x1fae   :  { %v24901_v5 = vadd.f32 %v7727_v51, %v7719_v52 }
0x1fb0   :  { %23640 = vtanh.f32 %v24901_v5 }
0x1fba   :  { %v23641_v33 = vpop.eup %23640 }
0x1fbb   :  { %7732 = vrot.lane.b32.xlu0 %v23641_v33, %s23864_s0 }
0x202d   :  { %v7733_v35 = vpop.permute.xlu0 %7732 }
0x202e   :  { %v24905_v44 = vmul.f32 %v7733_v35, %v7718_v19 }
0x2030   :  { %26447 = vst [vmem:[#allocation13_spill] sm:$0xff] %v24905_v44  ;;  %v7742_v59 = vrot.slane %v24905_v44, 4 }
0x2032   :  { %7743 = vrot.lane.b32.xlu1 %v7742_v59, %s23865_s4 }
0x20a4   :  { %v24909_v50 = vpop.permute.xlu1 %7743 }
0x20a5   :  { %v7745_v14 = vsel %vm599_vm2, %v24909_v50, 0 }
0x20a6   :  { %v7820_v9 = vand.u32 4294901760, %v7745_v14 }
0x20a8   :  { %v7821_v11 = vsub.f32 %v7745_v14, %v7820_v9 }
0x20aa   :  { %v7822_v0 = vand.u32 4294901760, %v7821_v11 }
0x20ac   :  { %v7823_v2 = vsub.f32 %v7821_v11, %v7822_v0 }
0x20ae   :  { %v7824_v10 = vand.u32 4294901760, %v7823_v2 }
0x20b0   :  { %7825 = vmatmul.mubr.f32.vlgmr.msra.gmra.mrb[24].mxu0 %v7824_v10 }
0x20b1   :  { %22150 = vmatpush1.bf16.msra.mxu0 %v24002_v7  ;;  %7935 = vmatprep.mubr.f32.mxu0 %v26440_v1 }
0x20b2   :  { %22152 = vmatprep.subr.bf16.mxu0 %v24038_v31 }
0x20b5   :  { %22154 = vmatpush1.bf16.msra.mxu0 %v24048_v49 }
0x20b6   :  { %22156 = vmatprep.subr.bf16.mxu0 %v24045_v48 }
0x20b8   :  { %7937 = vmatmul.mubr.f32.vlgmr.msra.gmra.mrb[24].mxu0 %v7820_v9 }
0x20b9   :  { %22158 = vmatpush1.bf16.msra.mxu0 %v24056_v53  ;;  %8023 = vmatprep.mubr.f32.mxu0 %v26440_v1 }
0x20ba   :  { %22160 = vmatprep.subr.bf16.mxu0 %v24061_v54 }
0x20bd   :  { %22162 = vmatpush1.bf16.msra.mxu0 %v24071_v56 }
0x20be   :  { %22164 = vmatprep.subr.bf16.mxu0 %v23919_v23 }
0x20c0   :  { %8026 = vmatmul.mubr.f32.vlgmr.msra.gmra.mrb[24].mxu0 %v7821_v11 }
0x20c1   :  { %22166 = vmatpush1.bf16.msra.mxu0 %v23913_v17  ;;  %8104 = vmatprep.mubr.f32.mxu0 %v26440_v1 }
0x20c2   :  { %22168 = vmatprep.subr.bf16.mxu0 %v23924_v27 }
0x20c5   :  { %22170 = vmatpush1.bf16.msra.mxu0 %v23928_v28 }
0x20c6   :  { %22172 = vmatprep.subr.bf16.mxu0 %v24092_v57 }
0x20c8   :  { %8108 = vmatmul.mubr.f32.vlgmr.msra.gmra.mrb[24].mxu0 %v7822_v0 }
0x20c9   :  { %22174 = vmatpush1.bf16.msra.mxu0 %v24102_v60  ;;  %8202 = vmatprep.mubr.f32.mxu0 %v26440_v1 }
0x20ca   :  { %22176 = vmatprep.subr.bf16.mxu0 %v24109_v26 }
0x20cd   :  { %22178 = vmatpush1.bf16.msra.mxu0 %v24117_v34 }
0x20ce   :  { %22180 = vmatprep.subr.bf16.mxu0 %v23919_v23 }
0x20d0   :  { %8204 = vmatmul.mubr.f32.vlgmr.msra.gmra.mrb[24].mxu0 %v7820_v9 }
0x20d1   :  { %22182 = vmatpush1.bf16.msra.mxu0 %v23913_v17  ;;  %8282 = vmatprep.mubr.f32.mxu0 %v26440_v1 }
0x20d2   :  { %22184 = vmatprep.subr.bf16.mxu0 %v23924_v27 }
0x20d5   :  { %22186 = vmatpush1.bf16.msra.mxu0 %v23928_v28 }
0x20d6   :  { %22196 = vmatprep.subr.bf16.mxu0 %v23997_v4 }
0x20d8   :  { %8284 = vmatmul.mubr.f32.vlgmr.msra.gmra.mrb[24].mxu0 %v7820_v9 }
0x20d9   :  { %22198 = vmatpush1.bf16.msra.mxu0 %v24002_v7  ;;  %8544 = vmatprep.mubr.f32.mxu0 %v26440_v1 }
0x20da   :  { %22200 = vmatprep.subr.bf16.mxu0 %v24038_v31 }
0x20dd   :  { %22202 = vmatpush1.bf16.msra.mxu0 %v24048_v49 }
0x20de   :  { %22212 = vmatprep.subr.bf16.mxu0 %v23919_v23 }
0x21ab   :  { %v8285_v62 = vpop.f32.mrb[24].mxu0 }
0x21ac   :  { %v8323_v16 = vrot.slane %v8285_v62, 4  ;;  %v8287_v19 = vpop.f32.mrb[25].mxu0 }
0x21ad   :  { %v24944_v37 = vadd.f32 %v24743_v24, %v8287_v19 }
0x21ae   :  { %v8325_v40 = vadd.f32 %v24182_v63, %v8323_v16 }
0x21af   :  { %v21405_v52 = vmul.f32 -1.442695, %v24944_v37 }
0x21b0   :  { %23642 = vtanh.f32 %v8325_v40 }
0x21b1   :  { %23644 = vpow2.f32 %v21405_v52  ;;  %v5869_v52 = vrot.slane %v24653_v58, 4  ;;  %v6469_v58 = vsub.f32 %v24762_v46, %v24756_v30 }
0x21ba   :  { %v23643_v51 = vpop.eup %23642 }
0x21bb   :  { %v23645_v33 = vpop.eup %23644  ;;  %8331 = vrot.lane.b32.xlu0 %v23643_v51, %s23864_s0  ;;  %v8327_v11 = vmul.f32 0.5, %v23643_v51  ;;  %v7089_v51 = vrot.slane %v24775_v3, 4  ;;  %v7689_v3 = vsub.f32 %v24890_v21, %v24827_v42 }
0x21bc   :  { %v8294_v35 = vadd.f32 1.0, %v23645_v33  ;;  %v8309_v33 = vrot.slane %v24901_v5, 4 }
0x21bd   :  { %v8328_v0 = vadd.f32 0.5, %v8327_v11 }
0x21be   :  { %23646 = vrcp.f32 %v8294_v35 }
0x21bf   :  { %v8329_v62 = vmul.f32 %v8328_v0, %v24901_v5  ;;  %v6479_v5 = vrot.slane %v24701_v13, 4 }
0x21c8   :  { %v23647_v59 = vpop.eup %23646 }
0x21c9   :  { %v8297_v14 = vadd.f32 %v23647_v59, %v24887_v15 }
0x21cb   :  { %v24950_v9 = vmin.f32 %v8297_v14, 1.0 }
0x21cd   :  { %vm8317_vm15 = vcmp.lt.f32.partialorder %v24950_v9, 1.0  ;;  %v8299_v40 = vsub.f32 %v24950_v9, %v24890_v21  ;;  %v8895_v11 = vsub.f32 1.0, %v24950_v9 }
0x21ce   :  { %v24957_v63 = vsel %vm8317_vm15, %v24950_v9, %v24897_v29  ;;  %v7079_v29 = vsub.f32 %v24827_v42, %v24762_v46 }
0x222d   :  { %v8332_v2 = vpop.permute.xlu0 %8331 }
0x222e   :  { %v8334_v10 = vmul.f32 %v8332_v2, %v8328_v0 }
0x2230   :  { %8336 = vrot.lane.b32.xlu1 %v8334_v10, %s23865_s4 }
0x22a2   :  { %v8337_v16 = vpop.permute.xlu1 %8336 }
0x22a3   :  { %v8339_v15 = vadd.f32 %v8337_v16, %v8329_v62 }
0x22a5   :  { %23648 = vtanh.f32 %v8339_v15  ;;  %v8905_v2 = vrot.slane %v8339_v15, 4 }
0x22af   :  { %v23649_v19 = vpop.eup %23648 }
0x22b0   :  { %8342 = vrot.lane.b32.xlu0 %v23649_v19, %s23864_s0 }
0x22b4   :  { %5862 = vperm.xlu0 %23560, %v24756_v30   ;;  %v21406_v30 = vsel %vm8317_vm15, 1.0, %v26440_v1 }
0x22b8   :  { %7082 = vperm.xlu0 %23560, %v7079_v29  }
0x22bc   :  { %8302 = vperm.xlu0 %23560, %v8299_v40  }
0x22c0   :  { %5870 = vrot.lane.b32.xlu0 %v5869_v52, %s23867_s5 }
0x22c4   :  { %7090 = vrot.lane.b32.xlu0 %v7089_v51, %s23867_s5 }
0x22c8   :  { %8310 = vrot.lane.b32.xlu0 %v8309_v33, %s23867_s5 }
0x2322   :  { %v8343_v35 = vpop.permute.xlu0 %8342 }
0x2323   :  { %v24973_v59 = vmul.f32 %v8343_v35, %v8328_v0  ;;  %v7699_v0 = vrot.slane %v24838_v45, 4 }
0x2325   :  { %v8352_v14 = vrot.slane %v24973_v59, 4 }
0x2327   :  { %8353 = vrot.lane.b32.xlu1 %v8352_v14, %s23865_s4 }
0x232b   :  { %6472 = vperm.xlu1 %23561, %v6469_v58  }
0x232f   :  { %7692 = vperm.xlu1 %23561, %v7689_v3  }
0x2333   :  { %8898 = vperm.xlu1 %23561, %v8895_v11   ;;  %v24988_v19 = vpop.permute.xlu0 %5862 }
0x2334   :  { %v5866_v33 = vmul.f32 %v24988_v19, %v24661_v22 }
0x2337   :  { %6480 = vrot.lane.b32.xlu1 %v6479_v5, %s23867_s5  ;;  %v24993_v40 = vpop.permute.xlu0 %7082 }
0x2338   :  { %v7086_v14 = vmul.f32 %v24993_v40, %v24783_v18  ;;  %v7095_v42 = vmul.f32 %v24993_v40, %v24818_v55 }
0x233b   :  { %7700 = vrot.lane.b32.xlu1 %v7699_v0, %s23867_s5  ;;  %v25001_v52 = vpop.permute.xlu0 %8302 }
0x233c   :  { %v8306_v18 = vmul.f32 %v25001_v52, %v24909_v50  ;;  %v8315_v55 = vmul.f32 %v25001_v52, %v24944_v37 }
0x233f   :  { %8906 = vrot.lane.b32.xlu1 %v8905_v2, %s23867_s5  ;;  %v5871_v3 = vpop.permute.xlu0 %5870 }
0x2399   :  { %v8354_v10 = vpop.permute.xlu1 %8353 }
0x239a   :  { %v8355_v62 = vsel %vm599_vm2, %v8354_v10, 0 }
0x239b   :  { %v8430_v16 = vand.u32 4294901760, %v8355_v62 }
0x239d   :  { %v8431_v29 = vsub.f32 %v8355_v62, %v8430_v16  ;;  %8546 = vmatmul.mubr.f32.vlgmr.msra.gmra.mrb[26].mxu0 %v8430_v16  ;;  %v7091_v62 = vpop.permute.xlu0 %7090 }
0x239e   :  { %22214 = vmatpush1.bf16.msra.mxu0 %v23913_v17  ;;  %8711 = vmatprep.mubr.f32.mxu0 %v26440_v1 }
0x239f   :  { %22216 = vmatprep.subr.bf16.mxu0 %v23924_v27  ;;  %v8432_v13 = vand.u32 4294901760, %v8431_v29 }
0x23a1   :  { %v8433_v45 = vsub.f32 %v8431_v29, %v8432_v13 }
0x23a2   :  { %22218 = vmatpush1.bf16.msra.mxu0 %v23928_v28 }
0x23a3   :  { %22228 = vmatprep.subr.bf16.mxu0 %v23919_v23  ;;  %v8434_v15 = vand.u32 4294901760, %v8433_v45 }
0x23a5   :  { %8715 = vmatmul.mubr.f32.vlgmr.msra.gmra.mrb[28].mxu0 %v8432_v13  ;;  %8435 = vmatmul.mubr.f32.vlgmr.msra.gmra.mrb[26].mxu1 %v8434_v15  ;;  %v5873_v13 = vmul.f32 %v5871_v3, %v24988_v19 }
0x23a6   :  { %22206 = vmatpush1.bf16.msra.mxu1 %v24056_v53  ;;  %22230 = vmatpush1.bf16.msra.mxu0 %v23913_v17 }
0x23a7   :  { %22208 = vmatprep.subr.bf16.mxu1 %v24061_v54  ;;  %22232 = vmatprep.subr.bf16.mxu0 %v23924_v27 }
0x23a8   :  { %8631 = vmatprep.mubr.f32.mxu1 %v26440_v1  ;;  %8887 = vmatprep.mubr.f32.mxu0 %v26440_v1 }
0x23aa   :  { %22210 = vmatpush1.bf16.msra.mxu1 %v24071_v56  ;;  %22234 = vmatpush1.bf16.msra.mxu0 %v23928_v28  ;;  %v25007_v51 = vpop.permute.xlu1 %6472 }
0x23ab   :  { %v6476_v35 = vmul.f32 %v25007_v51, %v24709_v25  ;;  %22220 = vmatprep.subr.bf16.mxu1 %v24092_v57  ;;  %22244 = vmatprep.subr.bf16.mxu0 %v23997_v4 }
0x23ad   :  { %v6477_v58 = vadd.f32 %v6476_v35, %v5866_v33  ;;  %8634 = vmatmul.mubr.f32.vlgmr.msra.gmra.mrb[28].mxu1 %v8431_v29  ;;  %8889 = vmatmul.mubr.f32.vlgmr.msra.gmra.mrb[30].mxu0 %v8430_v16  ;;  %v7093_v33 = vmul.f32 %v7091_v62, %v24993_v40 }
0x23ae   :  { %22222 = vmatpush1.bf16.msra.mxu1 %v24102_v60  ;;  %v25018_v11 = vpop.permute.xlu1 %7692  ;;  %22246 = vmatpush1.bf16.msra.mxu0 %v24002_v7 }
0x23af   :  { %v7087_v22 = vadd.f32 %v7086_v14, %v6477_v58  ;;  %v7696_v25 = vmul.f32 %v25018_v11, %v24846_v36  ;;  %22224 = vmatprep.subr.bf16.mxu1 %v24109_v26  ;;  %8808 = vmatprep.mubr.f32.mxu1 %v26440_v1  ;;  %v8311_v14 = vpop.permute.xlu0 %8310 }
0x23b0   :  { %22248 = vmatprep.subr.bf16.mxu0 %v24038_v31  ;;  %9117 = vmatprep.mubr.f32.mxu0 %v26440_v1 }
0x23b1   :  { %v7697_v5 = vadd.f32 %v7696_v25, %v7087_v22 }
0x23b2   :  { %22226 = vmatpush1.bf16.msra.mxu1 %v24117_v34  ;;  %v25030_v0 = vpop.permute.xlu1 %8898  ;;  %22250 = vmatpush1.bf16.msra.mxu0 %v24048_v49 }
0x23b3   :  { %v8307_v2 = vadd.f32 %v8306_v18, %v7697_v5  ;;  %v8902_v36 = vmul.f32 %v25030_v0, %v8354_v10  ;;  %22236 = vmatprep.subr.bf16.mxu1 %v23919_v23  ;;  %22260 = vmatprep.subr.bf16.mxu0 %v23919_v23  ;;  %v8313_v18 = vmul.f32 %v8311_v14, %v25001_v52 }
0x23b5   :  { %v8903_v29 = vadd.f32 %v8902_v36, %v8307_v2  ;;  %8810 = vmatmul.mubr.f32.vlgmr.msra.gmra.mrb[30].mxu1 %v8430_v16 }
0x23b6   :  { %v6481_v50 = vpop.permute.xlu1 %6480  ;;  %22238 = vmatpush1.bf16.msra.mxu1 %v23913_v17  ;;  %9002 = vmatprep.mubr.f32.mxu1 %v26440_v1 }
0x23b7   :  { %v6483_v45 = vmul.f32 %v6481_v50, %v25007_v51  ;;  %v8928_v15 = vsel %vm599_vm2, %v8903_v29, 0  ;;  %22240 = vmatprep.subr.bf16.mxu1 %v23924_v27 }
0x23b8   :  { %v9003_v10 = vand.u32 4294901760, %v8928_v15 }
0x23b9   :  { %v6484_v35 = vadd.f32 %v6483_v45, %v5873_v13 }
0x23ba   :  { %v9004_v58 = vsub.f32 %v8928_v15, %v9003_v10  ;;  %9119 = vmatmul.mubr.f32.vlgmr.msra.gmra.mrb[32].mxu0 %v9003_v10  ;;  %v7701_v16 = vpop.permute.xlu1 %7700  ;;  %22242 = vmatpush1.bf16.msra.mxu1 %v23928_v28 }
0x23bb   :  { %22262 = vmatpush1.bf16.msra.mxu0 %v23913_v17  ;;  %v7094_v22 = vadd.f32 %v7093_v33, %v6484_v35  ;;  %v7703_v3 = vmul.f32 %v7701_v16, %v25018_v11  ;;  %9284 = vmatprep.mubr.f32.mxu0 %v26440_v1 }
0x23bc   :  { %22264 = vmatprep.subr.bf16.mxu0 %v23924_v27  ;;  %22252 = vmatprep.subr.bf16.mxu1 %v24045_v48  ;;  %v9005_v25 = vand.u32 4294901760, %v9004_v58 }
0x23bd   :  { %v7704_v5 = vadd.f32 %v7703_v3, %v7094_v22  ;;  %v6485_v22 = vmul.f32 %v25007_v51, %v24751_v20  ;;  %v21404_v20 = vsel %vm7707_vm14, 1.0, %v26440_v1 }
0x23be   :  { %v8907_v2 = vpop.permute.xlu1 %8906  ;;  %v9006_v36 = vsub.f32 %v9004_v58, %v9005_v25 }
0x23bf   :  { %22266 = vmatpush1.bf16.msra.mxu0 %v23928_v28  ;;  %v8314_v62 = vadd.f32 %v8313_v18, %v7704_v5  ;;  %v8909_v29 = vmul.f32 %v8907_v2, %v25030_v0  ;;  %v21398_v2 = vsel %vm5877_vm11, 1.0, %v26440_v1 }
0x23c0   :  { %22276 = vmatprep.subr.bf16.mxu0 %v23919_v23  ;;  %v9007_v50 = vand.u32 4294901760, %v9006_v36  ;;  %v21402_v36 = vsel %vm7097_vm13, 1.0, %v26440_v1 }
0x23c1   :  { %v8910_v13 = vadd.f32 %v8909_v29, %v8314_v62  ;;  %v5875_v62 = vmul.f32 %v24988_v19, %v24747_v6  ;;  %v7705_v6 = vmul.f32 %v25018_v11, %v24881_v39 }
0x23c2   :  { %9288 = vmatmul.mubr.f32.vlgmr.msra.gmra.mrb[34].mxu0 %v9005_v25  ;;  %9008 = vmatmul.mubr.f32.vlgmr.msra.gmra.mrb[32].mxu1 %v9007_v50 }
0x23c3   :  { %22254 = vmatpush1.bf16.msra.mxu1 %v24056_v53  ;;  %22278 = vmatpush1.bf16.msra.mxu0 %v23913_v17  ;;  %v6486_v51 = vadd.f32 %v6485_v22, %v5875_v62 }
0x23c4   :  { %9472 = vrot.lane.b32.xlu1 %v8910_v13, %s23865_s4  ;;  %22256 = vmatprep.subr.bf16.mxu1 %v24061_v54 }
0x23c5   :  { %22280 = vmatprep.subr.bf16.mxu0 %v23924_v27  ;;  %9204 = vmatprep.mubr.f32.mxu1 %v26440_v1 }
0x23c6   :  { %9460 = vmatprep.mubr.f32.mxu0 %v26440_v1 }
0x23c7   :  { %22258 = vmatpush1.bf16.msra.mxu1 %v24071_v56  ;;  %22282 = vmatpush1.bf16.msra.mxu0 %v23928_v28 }
0x23c8   :  { %22268 = vmatprep.subr.bf16.mxu1 %v24092_v57  ;;  %22332 = vmatprep.subr.bf16.mxu0 %v23919_v23 }
0x23ca   :  { %9207 = vmatmul.mubr.f32.vlgmr.msra.gmra.mrb[34].mxu1 %v9004_v58  ;;  %9462 = vmatmul.mubr.f32.vlgmr.msra.gmra.mrb[36].mxu0 %v9003_v10 }
0x23cb   :  { %22270 = vmatpush1.bf16.msra.mxu1 %v24102_v60  ;;  %9381 = vmatprep.mubr.f32.mxu1 %v26440_v1 }
0x23cc   :  { %22272 = vmatprep.subr.bf16.mxu1 %v24109_v26  ;;  %22334 = vmatpush1.bf16.msra.mxu0 %v23913_v17 }
0x23cd   :  { %22336 = vmatprep.subr.bf16.mxu0 %v23924_v27  ;;  %10169 = vmatprep.mubr.f32.mxu0 %v26440_v1 }
0x23cf   :  { %22274 = vmatpush1.bf16.msra.mxu1 %v24117_v34 }
0x23d0   :  { %22284 = vmatprep.subr.bf16.mxu1 %v23919_v23  ;;  %22338 = vmatpush1.bf16.msra.mxu0 %v23928_v28 }
0x23d1   :  { %22340 = vmatprep.subr.bf16.mxu0 %v23997_v4 }
0x23d2   :  { %9383 = vmatmul.mubr.f32.vlgmr.msra.gmra.mrb[36].mxu1 %v9003_v10  ;;  %v21400_v10 = vsel %vm6487_vm12, 1.0, %v26440_v1 }
0x23d3   :  { %22286 = vmatpush1.bf16.msra.mxu1 %v23913_v17  ;;  %9572 = vmatprep.mubr.f32.mxu1 %v26440_v1  ;;  %v6490_v29 = vadd.f32 %v21400_v10, %v21398_v2 }
0x23d4   :  { %22288 = vmatprep.subr.bf16.mxu1 %v23924_v27 }
0x23d5   :  { %v7100_v13 = vadd.f32 %v21402_v36, %v6490_v29 }
0x23d7   :  { %22290 = vmatpush1.bf16.msra.mxu1 %v23928_v28 }
0x23d8   :  { %22292 = vmatprep.subr.bf16.mxu1 %v23997_v4 }
0x2470   :  { %v8547_v45 = vpop.f32.mrb[26].mxu0 }
0x2471   :  { %v8548_v15 = vpop.f32.mrb[27].mxu0  ;;  %v7710_v45 = vadd.f32 %v21404_v20, %v7100_v13 }
0x2478   :  { %v8716_v33 = vpop.f32.mrb[28].mxu0  ;;  %v8436_v35 = vpop.f32.mrb[26].mxu1 }
0x2479   :  { %v8717_v14 = vpop.f32.mrb[29].mxu0  ;;  %v8437_v58 = vpop.f32.mrb[27].mxu1  ;;  %v25102_v33 = vadd.f32 %v21406_v30, %v7710_v45 }
0x247a   :  { %v8549_v16 = vadd.f32 %v8548_v15, %v8437_v58  ;;  %v7096_v15 = vadd.f32 %v7095_v42, %v6486_v51 }
0x247b   :  { %vm8915_vm0 = vcmp.gt.f32.partialorder %v25102_v33, 0.0 }
0x247c   :  { %v7706_v58 = vadd.f32 %v7705_v6, %v7096_v15 }
0x247e   :  { %v8316_v39 = vadd.f32 %v8315_v55, %v7706_v58 }
0x2480   :  { %v8635_v3 = vpop.f32.mrb[28].mxu1  ;;  %v8890_v25 = vpop.f32.mrb[30].mxu0 }
0x2481   :  { %v8636_v18 = vpop.f32.mrb[29].mxu1  ;;  %v8891_v5 = vpop.f32.mrb[31].mxu0 }
0x2482   :  { %v8637_v46 = vadd.f32 %v8636_v18, %v8549_v16 }
0x2484   :  { %v8718_v50 = vadd.f32 %v8717_v14, %v8637_v46  ;;  %v8916_v14 = vsub.f32 1.0, %v24957_v63 }
0x2486   :  { %v8917_v22 = vsel %vm8915_vm0, %v8916_v14, 0.0 }
0x2487   :  { %v8918_v25 = vadd.f32 %v8917_v22, %v25102_v33 }
0x2488   :  { %v8811_v19 = vpop.f32.mrb[30].mxu1 }
0x2489   :  { %v8812_v21 = vpop.f32.mrb[31].mxu1 }
0x248a   :  { %v8813_v35 = vadd.f32 %v8812_v21, %v8718_v50  ;;  %v9473_v21 = vpop.permute.xlu1 %9472 }
0x248c   :  { %v8892_v16 = vadd.f32 %v8891_v5, %v8813_v35 }
0x248d   :  { %v9120_v9 = vpop.f32.mrb[32].mxu0 }
0x248e   :  { %v8894_v40 = vadd.f32 %v24743_v24, %v8892_v16  ;;  %v9122_v10 = vpop.f32.mrb[33].mxu0 }
0x2490   :  { %v8911_v11 = vmul.f32 %v25030_v0, %v8894_v40 }
0x2492   :  { %v8912_v3 = vadd.f32 %v8911_v11, %v8316_v39 }
0x2494   :  { %v25112_v63 = vsel %vm4721_vm10, %v8912_v3, %v8918_v25 }
0x2495   :  { %26448 = vst [vmem:[#allocation14_spill] sm:$0xff] %v25112_v63  ;;  %v9289_v18 = vpop.f32.mrb[34].mxu0  ;;  %v9009_v5 = vpop.f32.mrb[32].mxu1 }
0x2496   :  { %v9121_v2 = vadd.f32 %v9120_v9, %v9009_v5  ;;  %v9291_v36 = vpop.f32.mrb[35].mxu0  ;;  %v9011_v62 = vpop.f32.mrb[33].mxu1 }
0x249d   :  { %v9208_v46 = vpop.f32.mrb[34].mxu1  ;;  %v9463_v37 = vpop.f32.mrb[36].mxu0 }
0x249e   :  { %v9209_v52 = vadd.f32 %v9208_v46, %v9121_v2  ;;  %v9210_v24 = vpop.f32.mrb[35].mxu1  ;;  %v9465_v29 = vpop.f32.mrb[37].mxu0 }
0x24a0   :  { %v9290_v20 = vadd.f32 %v9289_v18, %v9209_v52 }
0x24a5   :  { %v9384_v51 = vpop.f32.mrb[36].mxu1 }
0x24a6   :  { %v9385_v50 = vadd.f32 %v9384_v51, %v9290_v20  ;;  %v9386_v0 = vpop.f32.mrb[37].mxu1 }
0x24a8   :  { %v9464_v13 = vadd.f32 %v9463_v37, %v9385_v50 }
0x24aa   :  { %v9467_v30 = vadd.f32 %v24185_v8, %v9464_v13 }
0x24ac   :  { %23650 = vtanh.f32 %v9467_v30 }
0x24b6   :  { %v23651_v42 = vpop.eup %23650 }
0x24b7   :  { %9477 = vrot.lane.b32.xlu0 %v23651_v42, %s23864_s0  ;;  %v9469_v45 = vmul.f32 0.5, %v23651_v42 }
0x24b9   :  { %v9470_v15 = vadd.f32 0.5, %v9469_v45 }
0x24bb   :  { %v9475_v35 = vmul.f32 %v9473_v21, %v9470_v15  ;;  %v25203_v21 = vld [vmem:[#allocation2 + $0x68] ss:$0 sm:$0xff] }
0x2529   :  { %v9478_v6 = vpop.permute.xlu0 %9477 }
0x252a   :  { %v9480_v19 = vmul.f32 %v9478_v6, %v9470_v15 }
0x252c   :  { %9482 = vrot.lane.b32.xlu0 %v9480_v19, %s23865_s4 }
0x259e   :  { %v9483_v14 = vpop.permute.xlu0 %9482 }
0x259f   :  { %v25117_v58 = vadd.f32 %v9483_v14, %v9475_v35 }
0x25a1   :  { %23652 = vtanh.f32 %v25117_v58 }
0x25ab   :  { %v23653_v16 = vpop.eup %23652 }
0x25ac   :  { %9488 = vrot.lane.b32.xlu1 %v23653_v16, %s23864_s0 }
0x261e   :  { %v9489_v9 = vpop.permute.xlu1 %9488 }
0x261f   :  { %v25121_v55 = vmul.f32 %v9489_v9, %v9470_v15 }
0x2621   :  { %9493 = vrot.lane.b32.xlu0 %v25121_v55, %s23865_s4 }
0x2693   :  { %v9494_v40 = vpop.permute.xlu0 %9493 }
0x2694   :  { %9497 = vst.msk [vmem:[#allocation6 + $0x30] sm:$0xf] %vm1165_vm3, %v9494_v40  ;;  %v9498_v10 = vsel %vm599_vm2, %v9494_v40, 0 }
0x2695   :  { %v9573_v22 = vand.u32 4294901760, %v9498_v10 }
0x2697   :  { %v9574_v39 = vsub.f32 %v9498_v10, %v9573_v22 }
0x2699   :  { %v9575_v11 = vand.u32 4294901760, %v9574_v39 }
0x269b   :  { %v9576_v3 = vsub.f32 %v9574_v39, %v9575_v11 }
0x269d   :  { %v9577_v25 = vand.u32 4294901760, %v9576_v3 }
0x269f   :  { %9578 = vmatmul.mubr.f32.vlgmr.msra.gmra.mrb[38].mxu1 %v9577_v25 }
0x26a0   :  { %22294 = vmatpush1.bf16.msra.mxu1 %v24002_v7  ;;  %9688 = vmatprep.mubr.f32.mxu1 %v26440_v1 }
0x26a1   :  { %22296 = vmatprep.subr.bf16.mxu1 %v24038_v31 }
0x26a4   :  { %22298 = vmatpush1.bf16.msra.mxu1 %v24048_v49 }
0x26a5   :  { %22300 = vmatprep.subr.bf16.mxu1 %v24045_v48 }
0x26a7   :  { %9690 = vmatmul.mubr.f32.vlgmr.msra.gmra.mrb[38].mxu1 %v9573_v22 }
0x26a8   :  { %22302 = vmatpush1.bf16.msra.mxu1 %v24056_v53  ;;  %9776 = vmatprep.mubr.f32.mxu1 %v26440_v1 }
0x26a9   :  { %22304 = vmatprep.subr.bf16.mxu1 %v24061_v54 }
0x26ac   :  { %22306 = vmatpush1.bf16.msra.mxu1 %v24071_v56 }
0x26ad   :  { %22308 = vmatprep.subr.bf16.mxu1 %v23919_v23 }
0x26af   :  { %9779 = vmatmul.mubr.f32.vlgmr.msra.gmra.mrb[38].mxu1 %v9574_v39 }
0x26b0   :  { %22310 = vmatpush1.bf16.msra.mxu1 %v23913_v17  ;;  %9857 = vmatprep.mubr.f32.mxu1 %v26440_v1 }
0x26b1   :  { %22312 = vmatprep.subr.bf16.mxu1 %v23924_v27 }
0x26b4   :  { %22314 = vmatpush1.bf16.msra.mxu1 %v23928_v28 }
0x26b5   :  { %22316 = vmatprep.subr.bf16.mxu1 %v24092_v57 }
0x26b7   :  { %9861 = vmatmul.mubr.f32.vlgmr.msra.gmra.mrb[38].mxu1 %v9575_v11 }
0x26b8   :  { %22318 = vmatpush1.bf16.msra.mxu1 %v24102_v60  ;;  %9955 = vmatprep.mubr.f32.mxu1 %v26440_v1 }
0x26b9   :  { %22320 = vmatprep.subr.bf16.mxu1 %v24109_v26 }
0x26bc   :  { %22322 = vmatpush1.bf16.msra.mxu1 %v24117_v34 }
0x26bd   :  { %22324 = vmatprep.subr.bf16.mxu1 %v23919_v23 }
0x26bf   :  { %9957 = vmatmul.mubr.f32.vlgmr.msra.gmra.mrb[38].mxu1 %v9573_v22 }
0x26c0   :  { %22326 = vmatpush1.bf16.msra.mxu1 %v23913_v17  ;;  %10035 = vmatprep.mubr.f32.mxu1 %v26440_v1 }
0x26c1   :  { %22328 = vmatprep.subr.bf16.mxu1 %v23924_v27 }
0x26c4   :  { %22330 = vmatpush1.bf16.msra.mxu1 %v23928_v28 }
0x26c5   :  { %22380 = vmatprep.subr.bf16.mxu1 %v23919_v23 }
0x26c7   :  { %10037 = vmatmul.mubr.f32.vlgmr.msra.gmra.mrb[38].mxu1 %v9573_v22 }
0x26c8   :  { %22382 = vmatpush1.bf16.msra.mxu1 %v23913_v17  ;;  %10767 = vmatprep.mubr.f32.mxu1 %v26440_v1 }
0x26c9   :  { %22384 = vmatprep.subr.bf16.mxu1 %v23924_v27 }
0x26cc   :  { %22386 = vmatpush1.bf16.msra.mxu1 %v23928_v28 }
0x26cd   :  { %22388 = vmatprep.subr.bf16.mxu1 %v23997_v4 }
0x279a   :  { %v10038_v18 = vpop.f32.mrb[38].mxu1 }
0x279b   :  { %v10068_v5 = vadd.f32 %v24185_v8, %v10038_v18  ;;  %v25158_v2 = vpop.f32.mrb[39].mxu1 }
0x279c   :  { %v25207_v35 = vadd.f32 %v25203_v21, %v25158_v2 }
0x279d   :  { %23654 = vtanh.f32 %v10068_v5 }
0x279e   :  { %v21407_v14 = vmul.f32 -1.442695, %v25207_v35 }
0x27a7   :  { %v23655_v36 = vpop.eup %23654 }
0x27a8   :  { %10074 = vrot.lane.b32.xlu1 %v23655_v36, %s23864_s0  ;;  %v10070_v62 = vmul.f32 0.5, %v23655_v36 }
0x27aa   :  { %v10071_v46 = vadd.f32 0.5, %v10070_v62 }
0x27ac   :  { %v10072_v24 = vmul.f32 %v10071_v46, %v25117_v58 }
0x281a   :  { %v10075_v37 = vpop.permute.xlu1 %10074 }
0x281b   :  { %v10077_v52 = vmul.f32 %v10075_v37, %v10071_v46 }
0x281d   :  { %10079 = vrot.lane.b32.xlu0 %v10077_v52, %s23865_s4 }
0x288f   :  { %v10080_v29 = vpop.permute.xlu0 %10079 }
0x2890   :  { %v25163_v20 = vadd.f32 %v10080_v29, %v10072_v24 }
0x2892   :  { %23656 = vtanh.f32 %v25163_v20 }
0x2893   :  { %23658 = vpow2.f32 %v21407_v14 }
0x289c   :  { %v23657_v51 = vpop.eup %23656 }
0x289d   :  { %10085 = vrot.lane.b32.xlu1 %v23657_v51, %s23864_s0  ;;  %v23659_v39 = vpop.eup %23658 }
0x289e   :  { %v10047_v11 = vadd.f32 1.0, %v23659_v39 }
0x290f   :  { %v10086_v50 = vpop.permute.xlu1 %10085 }
0x2910   :  { %v25167_v0 = vmul.f32 %v10086_v50, %v10071_v46 }
0x2912   :  { %10090 = vrot.lane.b32.xlu0 %v25167_v0, %s23865_s4 }
0x2984   :  { %v10091_v13 = vpop.permute.xlu0 %10090 }
0x2985   :  { %10094 = vst.msk [vmem:[#allocation6 + $0x34] sm:$0xf] %vm1165_vm3, %v10091_v13  ;;  %v10095_v30 = vsel %vm599_vm2, %v10091_v13, 0 }
0x2986   :  { %v10170_v42 = vand.u32 4294901760, %v10095_v30 }
0x2988   :  { %v10171_v45 = vsub.f32 %v10095_v30, %v10170_v42 }
0x298a   :  { %v10172_v15 = vand.u32 4294901760, %v10171_v45 }
0x298c   :  { %v10173_v6 = vsub.f32 %v10171_v45, %v10172_v15 }
0x298e   :  { %v10174_v19 = vand.u32 4294901760, %v10173_v6 }
0x2990   :  { %10175 = vmatmul.mubr.f32.vlgmr.msra.gmra.mrb[38].mxu0 %v10174_v19 }
0x2991   :  { %22342 = vmatpush1.bf16.msra.mxu0 %v24002_v7  ;;  %10285 = vmatprep.mubr.f32.mxu0 %v26440_v1 }
0x2992   :  { %22344 = vmatprep.subr.bf16.mxu0 %v24038_v31 }
0x2995   :  { %22346 = vmatpush1.bf16.msra.mxu0 %v24048_v49 }
0x2996   :  { %22348 = vmatprep.subr.bf16.mxu0 %v24045_v48 }
0x2998   :  { %10287 = vmatmul.mubr.f32.vlgmr.msra.gmra.mrb[38].mxu0 %v10170_v42 }
0x2999   :  { %22350 = vmatpush1.bf16.msra.mxu0 %v24056_v53  ;;  %10373 = vmatprep.mubr.f32.mxu0 %v26440_v1 }
0x299a   :  { %22352 = vmatprep.subr.bf16.mxu0 %v24061_v54 }
0x299d   :  { %22354 = vmatpush1.bf16.msra.mxu0 %v24071_v56 }
0x299e   :  { %22356 = vmatprep.subr.bf16.mxu0 %v23919_v23 }
0x29a0   :  { %10376 = vmatmul.mubr.f32.vlgmr.msra.gmra.mrb[38].mxu0 %v10171_v45 }
0x29a1   :  { %22358 = vmatpush1.bf16.msra.mxu0 %v23913_v17  ;;  %10454 = vmatprep.mubr.f32.mxu0 %v26440_v1 }
0x29a2   :  { %22360 = vmatprep.subr.bf16.mxu0 %v23924_v27 }
0x29a5   :  { %22362 = vmatpush1.bf16.msra.mxu0 %v23928_v28 }
0x29a6   :  { %22364 = vmatprep.subr.bf16.mxu0 %v24092_v57 }
0x29a8   :  { %10458 = vmatmul.mubr.f32.vlgmr.msra.gmra.mrb[38].mxu0 %v10172_v15 }
0x29a9   :  { %22366 = vmatpush1.bf16.msra.mxu0 %v24102_v60  ;;  %10552 = vmatprep.mubr.f32.mxu0 %v26440_v1 }
0x29aa   :  { %22368 = vmatprep.subr.bf16.mxu0 %v24109_v26 }
0x29ad   :  { %22370 = vmatpush1.bf16.msra.mxu0 %v24117_v34 }
0x29ae   :  { %22372 = vmatprep.subr.bf16.mxu0 %v23919_v23 }
0x29b0   :  { %10554 = vmatmul.mubr.f32.vlgmr.msra.gmra.mrb[38].mxu0 %v10170_v42 }
0x29b1   :  { %22374 = vmatpush1.bf16.msra.mxu0 %v23913_v17  ;;  %10632 = vmatprep.mubr.f32.mxu0 %v26440_v1 }
0x29b2   :  { %22376 = vmatprep.subr.bf16.mxu0 %v23924_v27 }
0x29b5   :  { %22378 = vmatpush1.bf16.msra.mxu0 %v23928_v28 }
0x29b6   :  { %22428 = vmatprep.subr.bf16.mxu0 %v23919_v23 }
0x29b8   :  { %10634 = vmatmul.mubr.f32.vlgmr.msra.gmra.mrb[38].mxu0 %v10170_v42 }
0x29b9   :  { %22430 = vmatpush1.bf16.msra.mxu0 %v23913_v17  ;;  %11365 = vmatprep.mubr.f32.mxu0 %v26440_v1 }
0x29ba   :  { %22432 = vmatprep.subr.bf16.mxu0 %v23924_v27 }
0x29bd   :  { %22434 = vmatpush1.bf16.msra.mxu0 %v23928_v28 }
0x29be   :  { %22436 = vmatprep.subr.bf16.mxu0 %v23997_v4 }
0x2a8b   :  { %v10635_v16 = vpop.f32.mrb[38].mxu0 }
0x2a8c   :  { %v10666_v9 = vadd.f32 %v24185_v8, %v10635_v16  ;;  %v10637_v40 = vpop.f32.mrb[39].mxu0 }
0x2a8d   :  { %v25212_v10 = vadd.f32 %v25203_v21, %v10637_v40 }
0x2a8e   :  { %23660 = vtanh.f32 %v10666_v9 }
0x2a8f   :  { %v21409_v22 = vmul.f32 -1.442695, %v25212_v10 }
0x2a91   :  { %23662 = vpow2.f32 %v21409_v22 }
0x2a92   :  { %23664 = vrcp.f32 %v10047_v11 }
0x2a98   :  { %v23661_v3 = vpop.eup %23660 }
0x2a99   :  { %10672 = vrot.lane.b32.xlu1 %v23661_v3, %s23864_s0  ;;  %v10668_v24 = vmul.f32 0.5, %v23661_v3 }
0x2a9b   :  { %v23663_v25 = vpop.eup %23662  ;;  %v10669_v29 = vadd.f32 0.5, %v10668_v24 }
0x2a9c   :  { %v10644_v18 = vadd.f32 1.0, %v23663_v25  ;;  %v23665_v5 = vpop.eup %23664 }
0x2a9d   :  { %v25216_v2 = vmin.f32 %v23665_v5, 1.0  ;;  %v10670_v13 = vmul.f32 %v10669_v29, %v25163_v20 }
0x2a9e   :  { %23666 = vrcp.f32 %v10644_v18 }
0x2a9f   :  { %vm10063_vm1 = vcmp.lt.f32.partialorder %v25216_v2, 1.0 }
0x2aa0   :  { %v10067_v37 = vsel %vm10063_vm1, %v25216_v2, 0.0 }
0x2aa8   :  { %v23667_v36 = vpop.eup %23666 }
0x2aa9   :  { %v25218_v62 = vadd.f32 %v23667_v36, %v23665_v5 }
0x2aab   :  { %v25222_v46 = vmin.f32 %v25218_v62, 1.0 }
0x2aad   :  { %vm10661_vm4 = vcmp.lt.f32.partialorder %v25222_v46, 1.0 }
0x2aae   :  { %v25231_v52 = vsel %vm10661_vm4, %v25222_v46, %v10067_v37 }
0x2b0b   :  { %v10673_v51 = vpop.permute.xlu1 %10672 }
0x2b0c   :  { %v10675_v50 = vmul.f32 %v10673_v51, %v10669_v29 }
0x2b0e   :  { %10677 = vrot.lane.b32.xlu0 %v10675_v50, %s23865_s4 }
0x2b80   :  { %v10678_v30 = vpop.permute.xlu0 %10677 }
0x2b81   :  { %v25235_v42 = vadd.f32 %v10678_v30, %v10670_v13 }
0x2b83   :  { %23668 = vtanh.f32 %v25235_v42 }
0x2b8d   :  { %v23669_v45 = vpop.eup %23668 }
0x2b8e   :  { %10683 = vrot.lane.b32.xlu1 %v23669_v45, %s23864_s0 }
0x2c00   :  { %v10684_v15 = vpop.permute.xlu1 %10683 }
0x2c01   :  { %v25239_v6 = vmul.f32 %v10684_v15, %v10669_v29 }
0x2c03   :  { %10688 = vrot.lane.b32.xlu0 %v25239_v6, %s23865_s4 }
0x2c75   :  { %v10689_v19 = vpop.permute.xlu0 %10688 }
0x2c76   :  { %10692 = vst.msk [vmem:[#allocation6 + $0x38] sm:$0xf] %vm1165_vm3, %v10689_v19  ;;  %v10693_v14 = vsel %vm599_vm2, %v10689_v19, 0 }
0x2c77   :  { %v10768_v16 = vand.u32 4294901760, %v10693_v14 }
0x2c79   :  { %v10769_v9 = vsub.f32 %v10693_v14, %v10768_v16 }
0x2c7b   :  { %v10770_v40 = vand.u32 4294901760, %v10769_v9 }
0x2c7d   :  { %v10771_v22 = vsub.f32 %v10769_v9, %v10770_v40 }
0x2c7f   :  { %v10772_v39 = vand.u32 4294901760, %v10771_v22 }
0x2c81   :  { %10773 = vmatmul.mubr.f32.vlgmr.msra.gmra.mrb[40].mxu1 %v10772_v39 }
0x2c82   :  { %22390 = vmatpush1.bf16.msra.mxu1 %v24002_v7  ;;  %10883 = vmatprep.mubr.f32.mxu1 %v26440_v1 }
0x2c83   :  { %22392 = vmatprep.subr.bf16.mxu1 %v24038_v31 }
0x2c86   :  { %22394 = vmatpush1.bf16.msra.mxu1 %v24048_v49 }
0x2c87   :  { %22396 = vmatprep.subr.bf16.mxu1 %v24045_v48 }
0x2c89   :  { %10885 = vmatmul.mubr.f32.vlgmr.msra.gmra.mrb[40].mxu1 %v10768_v16 }
0x2c8a   :  { %22398 = vmatpush1.bf16.msra.mxu1 %v24056_v53  ;;  %10971 = vmatprep.mubr.f32.mxu1 %v26440_v1 }
0x2c8b   :  { %22400 = vmatprep.subr.bf16.mxu1 %v24061_v54 }
0x2c8e   :  { %22402 = vmatpush1.bf16.msra.mxu1 %v24071_v56 }
0x2c8f   :  { %22404 = vmatprep.subr.bf16.mxu1 %v23919_v23 }
0x2c91   :  { %10974 = vmatmul.mubr.f32.vlgmr.msra.gmra.mrb[40].mxu1 %v10769_v9 }
0x2c92   :  { %22406 = vmatpush1.bf16.msra.mxu1 %v23913_v17  ;;  %11052 = vmatprep.mubr.f32.mxu1 %v26440_v1 }
0x2c93   :  { %22408 = vmatprep.subr.bf16.mxu1 %v23924_v27 }
0x2c96   :  { %22410 = vmatpush1.bf16.msra.mxu1 %v23928_v28 }
0x2c97   :  { %22412 = vmatprep.subr.bf16.mxu1 %v24092_v57 }
0x2c99   :  { %11056 = vmatmul.mubr.f32.vlgmr.msra.gmra.mrb[40].mxu1 %v10770_v40 }
0x2c9a   :  { %22414 = vmatpush1.bf16.msra.mxu1 %v24102_v60  ;;  %11150 = vmatprep.mubr.f32.mxu1 %v26440_v1 }
0x2c9b   :  { %22416 = vmatprep.subr.bf16.mxu1 %v24109_v26 }
0x2c9e   :  { %22418 = vmatpush1.bf16.msra.mxu1 %v24117_v34 }
0x2c9f   :  { %22420 = vmatprep.subr.bf16.mxu1 %v23919_v23 }
0x2ca1   :  { %11152 = vmatmul.mubr.f32.vlgmr.msra.gmra.mrb[40].mxu1 %v10768_v16 }
0x2ca2   :  { %22422 = vmatpush1.bf16.msra.mxu1 %v23913_v17  ;;  %11230 = vmatprep.mubr.f32.mxu1 %v26440_v1 }
0x2ca3   :  { %22424 = vmatprep.subr.bf16.mxu1 %v23924_v27 }
0x2ca6   :  { %22426 = vmatpush1.bf16.msra.mxu1 %v23928_v28 }
0x2ca7   :  { %22476 = vmatprep.subr.bf16.mxu1 %v23919_v23 }
0x2ca9   :  { %11232 = vmatmul.mubr.f32.vlgmr.msra.gmra.mrb[40].mxu1 %v10768_v16 }
0x2caa   :  { %22478 = vmatpush1.bf16.msra.mxu1 %v23913_v17  ;;  %11963 = vmatprep.mubr.f32.mxu1 %v26440_v1 }
0x2cab   :  { %22480 = vmatprep.subr.bf16.mxu1 %v23924_v27 }
0x2cae   :  { %22482 = vmatpush1.bf16.msra.mxu1 %v23928_v28 }
0x2caf   :  { %22484 = vmatprep.subr.bf16.mxu1 %v23997_v4 }
0x2d7c   :  { %v11233_v11 = vpop.f32.mrb[40].mxu1 }
0x2d7d   :  { %v11264_v3 = vadd.f32 %v24185_v8, %v11233_v11  ;;  %v11235_v25 = vpop.f32.mrb[41].mxu1 }
0x2d7e   :  { %v25277_v18 = vadd.f32 %v25203_v21, %v11235_v25 }
0x2d7f   :  { %23670 = vtanh.f32 %v11264_v3 }
0x2d80   :  { %v21411_v5 = vmul.f32 -1.442695, %v25277_v18 }
0x2d82   :  { %23672 = vpow2.f32 %v21411_v5 }
0x2d89   :  { %v23671_v36 = vpop.eup %23670 }
0x2d8a   :  { %11270 = vrot.lane.b32.xlu1 %v23671_v36, %s23864_s0  ;;  %v11266_v30 = vmul.f32 0.5, %v23671_v36 }
0x2d8c   :  { %v23673_v37 = vpop.eup %23672  ;;  %v11267_v45 = vadd.f32 0.5, %v11266_v30 }
0x2d8d   :  { %v11242_v24 = vadd.f32 1.0, %v23673_v37 }
0x2d8f   :  { %23674 = vrcp.f32 %v11242_v24 }
0x2d99   :  { %v23675_v29 = vpop.eup %23674 }
0x2d9a   :  { %v25282_v51 = vadd.f32 %v23675_v29, %v25218_v62  ;;  %v11268_v62 = vmul.f32 %v11267_v45, %v25235_v42 }
0x2d9c   :  { %v25285_v50 = vmin.f32 %v25282_v51, 1.0 }
0x2d9e   :  { %vm11259_vm5 = vcmp.lt.f32.partialorder %v25285_v50, 1.0 }
0x2d9f   :  { %v25292_v13 = vsel %vm11259_vm5, %v25285_v50, %v25231_v52 }
0x2dfc   :  { %v11271_v15 = vpop.permute.xlu1 %11270 }
0x2dfd   :  { %v11273_v19 = vmul.f32 %v11271_v15, %v11267_v45 }
0x2dff   :  { %11275 = vrot.lane.b32.xlu0 %v11273_v19, %s23865_s4 }
0x2e71   :  { %v11276_v14 = vpop.permute.xlu0 %11275 }
0x2e72   :  { %v25296_v16 = vadd.f32 %v11276_v14, %v11268_v62 }
0x2e74   :  { %23676 = vtanh.f32 %v25296_v16 }
0x2e7e   :  { %v23677_v9 = vpop.eup %23676 }
0x2e7f   :  { %11281 = vrot.lane.b32.xlu1 %v23677_v9, %s23864_s0 }
0x2ef1   :  { %v11282_v40 = vpop.permute.xlu1 %11281 }
0x2ef2   :  { %v25300_v22 = vmul.f32 %v11282_v40, %v11267_v45 }
0x2ef4   :  { %11286 = vrot.lane.b32.xlu0 %v25300_v22, %s23865_s4 }
0x2f66   :  { %v11287_v52 = vpop.permute.xlu0 %11286 }
0x2f67   :  { %11290 = vst.msk [vmem:[#allocation6 + $0x3c] sm:$0xf] %vm1165_vm3, %v11287_v52  ;;  %v11291_v39 = vsel %vm599_vm2, %v11287_v52, 0 }
0x2f68   :  { %v11366_v11 = vand.u32 4294901760, %v11291_v39 }
0x2f6a   :  { %v11367_v3 = vsub.f32 %v11291_v39, %v11366_v11 }
0x2f6c   :  { %v11368_v25 = vand.u32 4294901760, %v11367_v3 }
0x2f6e   :  { %v11369_v5 = vsub.f32 %v11367_v3, %v11368_v25 }
0x2f70   :  { %v11370_v36 = vand.u32 4294901760, %v11369_v5 }
0x2f72   :  { %11371 = vmatmul.mubr.f32.vlgmr.msra.gmra.mrb[40].mxu0 %v11370_v36 }
0x2f73   :  { %22438 = vmatpush1.bf16.msra.mxu0 %v24002_v7  ;;  %11481 = vmatprep.mubr.f32.mxu0 %v26440_v1 }
0x2f74   :  { %22440 = vmatprep.subr.bf16.mxu0 %v24038_v31 }
0x2f77   :  { %22442 = vmatpush1.bf16.msra.mxu0 %v24048_v49 }
0x2f78   :  { %22444 = vmatprep.subr.bf16.mxu0 %v24045_v48 }
0x2f7a   :  { %11483 = vmatmul.mubr.f32.vlgmr.msra.gmra.mrb[40].mxu0 %v11366_v11 }
0x2f7b   :  { %22446 = vmatpush1.bf16.msra.mxu0 %v24056_v53  ;;  %11569 = vmatprep.mubr.f32.mxu0 %v26440_v1 }
0x2f7c   :  { %22448 = vmatprep.subr.bf16.mxu0 %v24061_v54 }
0x2f7f   :  { %22450 = vmatpush1.bf16.msra.mxu0 %v24071_v56 }
0x2f80   :  { %22452 = vmatprep.subr.bf16.mxu0 %v23919_v23 }
0x2f82   :  { %11572 = vmatmul.mubr.f32.vlgmr.msra.gmra.mrb[40].mxu0 %v11367_v3 }
0x2f83   :  { %22454 = vmatpush1.bf16.msra.mxu0 %v23913_v17  ;;  %11650 = vmatprep.mubr.f32.mxu0 %v26440_v1 }
0x2f84   :  { %22456 = vmatprep.subr.bf16.mxu0 %v23924_v27 }
0x2f87   :  { %22458 = vmatpush1.bf16.msra.mxu0 %v23928_v28 }
0x2f88   :  { %22460 = vmatprep.subr.bf16.mxu0 %v24092_v57 }
0x2f8a   :  { %11654 = vmatmul.mubr.f32.vlgmr.msra.gmra.mrb[40].mxu0 %v11368_v25 }
0x2f8b   :  { %22462 = vmatpush1.bf16.msra.mxu0 %v24102_v60  ;;  %11748 = vmatprep.mubr.f32.mxu0 %v26440_v1 }
0x2f8c   :  { %22464 = vmatprep.subr.bf16.mxu0 %v24109_v26 }
0x2f8f   :  { %22466 = vmatpush1.bf16.msra.mxu0 %v24117_v34 }
0x2f90   :  { %22468 = vmatprep.subr.bf16.mxu0 %v23919_v23 }
0x2f92   :  { %11750 = vmatmul.mubr.f32.vlgmr.msra.gmra.mrb[40].mxu0 %v11366_v11 }
0x2f93   :  { %22470 = vmatpush1.bf16.msra.mxu0 %v23913_v17  ;;  %11828 = vmatprep.mubr.f32.mxu0 %v26440_v1 }
0x2f94   :  { %22472 = vmatprep.subr.bf16.mxu0 %v23924_v27 }
0x2f97   :  { %22474 = vmatpush1.bf16.msra.mxu0 %v23928_v28 }
0x2f98   :  { %22524 = vmatprep.subr.bf16.mxu0 %v23919_v23 }
0x2f9a   :  { %11830 = vmatmul.mubr.f32.vlgmr.msra.gmra.mrb[40].mxu0 %v11366_v11 }
0x2f9b   :  { %22526 = vmatpush1.bf16.msra.mxu0 %v23913_v17  ;;  %12561 = vmatprep.mubr.f32.mxu0 %v26440_v1 }
0x2f9c   :  { %22528 = vmatprep.subr.bf16.mxu0 %v23924_v27 }
0x2f9f   :  { %22530 = vmatpush1.bf16.msra.mxu0 %v23928_v28 }
0x2fa0   :  { %22532 = vmatprep.subr.bf16.mxu0 %v23997_v4 }
0x306d   :  { %v11831_v37 = vpop.f32.mrb[40].mxu0 }
0x306e   :  { %v11862_v24 = vadd.f32 %v24185_v8, %v11831_v37  ;;  %v11833_v29 = vpop.f32.mrb[41].mxu0 }
0x306f   :  { %v25338_v30 = vadd.f32 %v25203_v21, %v11833_v29 }
0x3070   :  { %23678 = vtanh.f32 %v11862_v24 }
0x3071   :  { %v21413_v45 = vmul.f32 -1.442695, %v25338_v30 }
0x3073   :  { %23680 = vpow2.f32 %v21413_v45 }
0x307a   :  { %v23679_v15 = vpop.eup %23678 }
0x307b   :  { %11868 = vrot.lane.b32.xlu1 %v23679_v15, %s23864_s0  ;;  %v11864_v39 = vmul.f32 0.5, %v23679_v15 }
0x307d   :  { %v23681_v19 = vpop.eup %23680  ;;  %v11865_v11 = vadd.f32 0.5, %v11864_v39 }
0x307e   :  { %v11840_v62 = vadd.f32 1.0, %v23681_v19 }
0x3080   :  { %23682 = vrcp.f32 %v11840_v62 }
0x308a   :  { %v23683_v14 = vpop.eup %23682 }
0x308b   :  { %v25343_v9 = vadd.f32 %v23683_v14, %v25282_v51  ;;  %v11866_v51 = vmul.f32 %v11865_v11, %v25296_v16 }
0x308d   :  { %v25346_v40 = vmin.f32 %v25343_v9, 1.0 }
0x308f   :  { %vm11857_vm6 = vcmp.lt.f32.partialorder %v25346_v40, 1.0 }
0x3090   :  { %v25353_v52 = vsel %vm11857_vm6, %v25346_v40, %v25292_v13 }
0x30ed   :  { %v11869_v3 = vpop.permute.xlu1 %11868 }
0x30ee   :  { %v11871_v25 = vmul.f32 %v11869_v3, %v11865_v11 }
0x30f0   :  { %11873 = vrot.lane.b32.xlu0 %v11871_v25, %s23865_s4 }
0x3162   :  { %v11874_v5 = vpop.permute.xlu0 %11873 }
0x3163   :  { %v25357_v36 = vadd.f32 %v11874_v5, %v11866_v51 }
0x3165   :  { %23684 = vtanh.f32 %v25357_v36 }
0x316f   :  { %v23685_v37 = vpop.eup %23684 }
0x3170   :  { %11879 = vrot.lane.b32.xlu1 %v23685_v37, %s23864_s0 }
0x31e2   :  { %v11880_v24 = vpop.permute.xlu1 %11879 }
0x31e3   :  { %v25361_v29 = vmul.f32 %v11880_v24, %v11865_v11 }
0x31e5   :  { %11884 = vrot.lane.b32.xlu0 %v25361_v29, %s23865_s4 }
0x3257   :  { %v11885_v13 = vpop.permute.xlu0 %11884 }
0x3258   :  { %11888 = vst.msk [vmem:[#allocation6 + $0x40] sm:$0xf] %vm1165_vm3, %v11885_v13  ;;  %v11889_v45 = vsel %vm599_vm2, %v11885_v13, 0 }
0x3259   :  { %v11964_v15 = vand.u32 4294901760, %v11889_v45 }
0x325b   :  { %v11965_v19 = vsub.f32 %v11889_v45, %v11964_v15  ;;  %v11247_v45 = vsub.f32 %v25285_v50, %v25222_v46 }
0x325d   :  { %v11966_v62 = vand.u32 4294901760, %v11965_v19 }
0x325f   :  { %v11967_v14 = vsub.f32 %v11965_v19, %v11966_v62 }
0x3261   :  { %v11968_v39 = vand.u32 4294901760, %v11967_v14 }
0x3263   :  { %11969 = vmatmul.mubr.f32.vlgmr.msra.gmra.mrb[42].mxu1 %v11968_v39 }
0x3264   :  { %22486 = vmatpush1.bf16.msra.mxu1 %v24002_v7  ;;  %12079 = vmatprep.mubr.f32.mxu1 %v26440_v1 }
0x3265   :  { %22488 = vmatprep.subr.bf16.mxu1 %v24038_v31 }
0x3268   :  { %22490 = vmatpush1.bf16.msra.mxu1 %v24048_v49 }
0x3269   :  { %22492 = vmatprep.subr.bf16.mxu1 %v24045_v48 }
0x326b   :  { %12081 = vmatmul.mubr.f32.vlgmr.msra.gmra.mrb[42].mxu1 %v11964_v15 }
0x326c   :  { %22494 = vmatpush1.bf16.msra.mxu1 %v24056_v53  ;;  %12167 = vmatprep.mubr.f32.mxu1 %v26440_v1 }
0x326d   :  { %22496 = vmatprep.subr.bf16.mxu1 %v24061_v54 }
0x3270   :  { %22498 = vmatpush1.bf16.msra.mxu1 %v24071_v56 }
0x3271   :  { %22500 = vmatprep.subr.bf16.mxu1 %v23919_v23 }
0x3273   :  { %12170 = vmatmul.mubr.f32.vlgmr.msra.gmra.mrb[42].mxu1 %v11965_v19 }
0x3274   :  { %22502 = vmatpush1.bf16.msra.mxu1 %v23913_v17  ;;  %12248 = vmatprep.mubr.f32.mxu1 %v26440_v1 }
0x3275   :  { %22504 = vmatprep.subr.bf16.mxu1 %v23924_v27 }
0x3278   :  { %22506 = vmatpush1.bf16.msra.mxu1 %v23928_v28 }
0x3279   :  { %22508 = vmatprep.subr.bf16.mxu1 %v24092_v57 }
0x327b   :  { %12252 = vmatmul.mubr.f32.vlgmr.msra.gmra.mrb[42].mxu1 %v11966_v62 }
0x327c   :  { %22510 = vmatpush1.bf16.msra.mxu1 %v24102_v60  ;;  %12346 = vmatprep.mubr.f32.mxu1 %v26440_v1 }
0x327d   :  { %22512 = vmatprep.subr.bf16.mxu1 %v24109_v26 }
0x3280   :  { %22514 = vmatpush1.bf16.msra.mxu1 %v24117_v34 }
0x3281   :  { %22516 = vmatprep.subr.bf16.mxu1 %v23919_v23 }
0x3283   :  { %12348 = vmatmul.mubr.f32.vlgmr.msra.gmra.mrb[42].mxu1 %v11964_v15 }
0x3284   :  { %22518 = vmatpush1.bf16.msra.mxu1 %v23913_v17  ;;  %12426 = vmatprep.mubr.f32.mxu1 %v26440_v1 }
0x3285   :  { %22520 = vmatprep.subr.bf16.mxu1 %v23924_v27 }
0x3288   :  { %22522 = vmatpush1.bf16.msra.mxu1 %v23928_v28 }
0x3289   :  { %22572 = vmatprep.subr.bf16.mxu1 %v23919_v23 }
0x328b   :  { %12428 = vmatmul.mubr.f32.vlgmr.msra.gmra.mrb[42].mxu1 %v11964_v15 }
0x328c   :  { %22574 = vmatpush1.bf16.msra.mxu1 %v23913_v17  ;;  %13130 = vmatprep.mubr.f32.mxu1 %v26440_v1 }
0x328d   :  { %22576 = vmatprep.subr.bf16.mxu1 %v23924_v27 }
0x3290   :  { %22578 = vmatpush1.bf16.msra.mxu1 %v23928_v28 }
0x3291   :  { %22580 = vmatprep.subr.bf16.mxu1 %v23997_v4 }
0x335e   :  { %v12429_v11 = vpop.f32.mrb[42].mxu1 }
0x335f   :  { %v12460_v3 = vadd.f32 %v24185_v8, %v12429_v11  ;;  %v12431_v25 = vpop.f32.mrb[43].mxu1 }
0x3360   :  { %v25399_v51 = vadd.f32 %v25203_v21, %v12431_v25 }
0x3361   :  { %23686 = vtanh.f32 %v12460_v3 }
0x3362   :  { %v21415_v5 = vmul.f32 -1.442695, %v25399_v51 }
0x3364   :  { %23688 = vpow2.f32 %v21415_v5 }
0x336b   :  { %v23687_v37 = vpop.eup %23686 }
0x336c   :  { %12466 = vrot.lane.b32.xlu1 %v23687_v37, %s23864_s0  ;;  %v12462_v11 = vmul.f32 0.5, %v23687_v37 }
0x336e   :  { %v23689_v24 = vpop.eup %23688  ;;  %v12463_v3 = vadd.f32 0.5, %v12462_v11 }
0x336f   :  { %v12438_v13 = vadd.f32 1.0, %v23689_v24  ;;  %v11845_v24 = vsub.f32 %v25346_v40, %v25285_v50 }
0x3370   :  { %10054 = vperm.xlu1 %23561, %v25216_v2  }
0x3371   :  { %23690 = vrcp.f32 %v12438_v13 }
0x3374   :  { %11250 = vperm.xlu1 %23561, %v11247_v45  }
0x337b   :  { %v23691_v15 = vpop.eup %23690 }
0x337c   :  { %v12441_v19 = vadd.f32 %v23691_v15, %v25343_v9  ;;  %v10649_v9 = vsub.f32 %v25222_v46, %v25216_v2 }
0x337e   :  { %v25407_v62 = vmin.f32 %v12441_v19, 1.0 }
0x3380   :  { %v12443_v14 = vsub.f32 %v25407_v62, %v25346_v40  ;;  %vm12455_vm7 = vcmp.lt.f32.partialorder %v25407_v62, 1.0  ;;  %v13027_v13 = vsub.f32 1.0, %v25407_v62 }
0x3381   :  { %v25416_v39 = vsel %vm12455_vm7, %v25407_v62, %v25353_v52  ;;  %v12464_v52 = vmul.f32 %v12463_v3, %v25357_v36 }
0x3382   :  { %12446 = vperm.xlu1 %23561, %v12443_v14   ;;  %v13042_v40 = vsub.f32 1.0, %v25416_v39 }
0x33de   :  { %v12467_v25 = vpop.permute.xlu1 %12466 }
0x33df   :  { %v12469_v5 = vmul.f32 %v12467_v25, %v12463_v3 }
0x33e1   :  { %12471 = vrot.lane.b32.xlu0 %v12469_v5, %s23865_s4 }
0x33e5   :  { %10652 = vperm.xlu0 %23560, %v10649_v9  }
0x33e9   :  { %11848 = vperm.xlu0 %23560, %v11845_v24  }
0x33ed   :  { %13030 = vperm.xlu0 %23560, %v13027_v13  }
0x33ef   :  { %v10055_v15 = vpop.permute.xlu1 %10054 }
0x33f0   :  { %v10059_v25 = vmul.f32 %v10055_v15, %v25117_v58  ;;  %v10061_v5 = vmul.f32 %v10055_v15, %v25207_v35 }
0x33f3   :  { %v11251_v14 = vpop.permute.xlu1 %11250 }
0x33f4   :  { %v11255_v13 = vmul.f32 %v11251_v14, %v25235_v42  ;;  %v11257_v1 = vmul.f32 %v11251_v14, %v25277_v18 }
0x3401   :  { %v25432_v44 = vpop.permute.xlu1 %12446 }
0x3402   :  { %v12453_v62 = vmul.f32 %v25432_v44, %v25399_v51 }
0x3453   :  { %v12472_v45 = vpop.permute.xlu0 %12471 }
0x3454   :  { %v12474_v37 = vadd.f32 %v12472_v45, %v12464_v52 }
0x3456   :  { %23692 = vtanh.f32 %v12474_v37 }
0x3460   :  { %v23693_v19 = vpop.eup %23692 }
0x3461   :  { %12477 = vrot.lane.b32.xlu1 %v23693_v19, %s23864_s0 }
0x3464   :  { %v10653_v11 = vpop.permute.xlu0 %10652 }
0x3465   :  { %v10657_v9 = vmul.f32 %v10653_v11, %v25163_v20  ;;  %v10659_v24 = vmul.f32 %v10653_v11, %v25212_v10  ;;  %v12451_v20 = vmul.f32 %v25432_v44, %v25357_v36 }
0x3467   :  { %v10658_v52 = vadd.f32 %v10657_v9, %v10059_v25  ;;  %v10660_v45 = vadd.f32 %v10659_v24, %v10061_v5  ;;  %v10655_v9 = vmul.f32 %v10653_v11, %v25167_v0 }
0x3468   :  { %v11849_v63 = vpop.permute.xlu0 %11848 }
0x3469   :  { %v11256_v19 = vadd.f32 %v11255_v13, %v10658_v52  ;;  %v11258_v43 = vadd.f32 %v11257_v1, %v10660_v45  ;;  %v11853_v47 = vmul.f32 %v11849_v63, %v25296_v16  ;;  %v11855_v58 = vmul.f32 %v11849_v63, %v25338_v30 }
0x346a   :  { %v10057_v1 = vmul.f32 %v10055_v15, %v25121_v55  ;;  %v11253_v30 = vmul.f32 %v11251_v14, %v25239_v6  ;;  %v11851_v36 = vmul.f32 %v11849_v63, %v25300_v22  ;;  %v12449_v13 = vmul.f32 %v25432_v44, %v25361_v29 }
0x346b   :  { %v11854_v35 = vadd.f32 %v11853_v47, %v11256_v19  ;;  %v25438_v10 = vadd.f32 %v11855_v58, %v11258_v43  ;;  %v26449_v22 = vmov 0.0  }
0x346c   :  { %v25440_v42 = vpop.permute.xlu0 %13030  ;;  %v10656_v16 = vadd.f32 %v10655_v9, %v10057_v1  ;;  %v21414_v46 = vsel %vm11857_vm6, 1.0, %v26449_v22  ;;  %v21416_v50 = vsel %vm12455_vm7, 1.0, %v26449_v22  ;;  %vm4723_vm7 = vcmask 72704  }
0x346d   :  { %v13035_v18 = vmul.f32 %v25440_v42, %v12474_v37  ;;  %v12452_v25 = vadd.f32 %v12451_v20, %v11854_v35 }
0x346e   :  { %v11254_v24 = vadd.f32 %v11253_v30, %v10656_v16 }
0x346f   :  { %v25443_v5 = vadd.f32 %v13035_v18, %v12452_v25 }
0x3470   :  { %v11852_v47 = vadd.f32 %v11851_v36, %v11254_v24 }
0x3471   :  { %v13603_v16 = vrot.slane %v25443_v5, 4 }
0x3472   :  { %v12450_v45 = vadd.f32 %v12449_v13, %v11852_v47 }
0x34d3   :  { %v12478_v43 = vpop.permute.xlu1 %12477 }
0x34d4   :  { %v12480_v52 = vmul.f32 %v12478_v43, %v12463_v3 }
0x34d6   :  { %v13033_v37 = vmul.f32 %v25440_v42, %v12480_v52 }
0x34d8   :  { %v13034_v19 = vadd.f32 %v13033_v37, %v12450_v45 }
0x34da   :  { %13054 = vrot.lane.b32.xlu0 %v13034_v19, %s23865_s4 }
0x354c   :  { %v13055_v0 = vpop.permute.xlu0 %13054 }
0x354d   :  { %v13056_v55 = vsel %vm599_vm2, %v13055_v0, 0 }
0x354e   :  { %v13131_v15 = vand.u32 4294901760, %v13056_v55 }
0x3550   :  { %v13132_v6 = vsub.f32 %v13056_v55, %v13131_v15 }
0x3552   :  { %v13133_v14 = vand.u32 4294901760, %v13132_v6 }
0x3554   :  { %v13134_v11 = vsub.f32 %v13132_v6, %v13133_v14 }
0x3556   :  { %v13135_v63 = vand.u32 4294901760, %v13134_v11 }
0x3558   :  { %13136 = vmatmul.mubr.f32.vlgmr.msra.gmra.mrb[44].mxu1 %v13135_v63 }
0x3559   :  { %22582 = vmatpush1.bf16.msra.mxu1 %v24002_v7  ;;  %13245 = vmatprep.mubr.f32.mxu1 %v26449_v22 }
0x355a   :  { %22584 = vmatprep.subr.bf16.mxu1 %v24038_v31 }
0x355d   :  { %22586 = vmatpush1.bf16.msra.mxu1 %v24048_v49 }
0x355e   :  { %22588 = vmatprep.subr.bf16.mxu1 %v24045_v48 }
0x3560   :  { %13247 = vmatmul.mubr.f32.vlgmr.msra.gmra.mrb[44].mxu1 %v13131_v15 }
0x3561   :  { %22590 = vmatpush1.bf16.msra.mxu1 %v24056_v53  ;;  %13332 = vmatprep.mubr.f32.mxu1 %v26449_v22 }
0x3562   :  { %22592 = vmatprep.subr.bf16.mxu1 %v24061_v54 }
0x3565   :  { %22594 = vmatpush1.bf16.msra.mxu1 %v24071_v56 }
0x3566   :  { %22596 = vmatprep.subr.bf16.mxu1 %v23919_v23 }
0x3568   :  { %13335 = vmatmul.mubr.f32.vlgmr.msra.gmra.mrb[44].mxu1 %v13132_v6 }
0x3569   :  { %22598 = vmatpush1.bf16.msra.mxu1 %v23913_v17  ;;  %13412 = vmatprep.mubr.f32.mxu1 %v26449_v22 }
0x356a   :  { %22600 = vmatprep.subr.bf16.mxu1 %v23924_v27 }
0x356d   :  { %22602 = vmatpush1.bf16.msra.mxu1 %v23928_v28 }
0x356e   :  { %22604 = vmatprep.subr.bf16.mxu1 %v24092_v57 }
0x3570   :  { %13416 = vmatmul.mubr.f32.vlgmr.msra.gmra.mrb[44].mxu1 %v13133_v14 }
0x3571   :  { %22606 = vmatpush1.bf16.msra.mxu1 %v24102_v60  ;;  %13509 = vmatprep.mubr.f32.mxu1 %v26449_v22 }
0x3572   :  { %22608 = vmatprep.subr.bf16.mxu1 %v24109_v26 }
0x3575   :  { %22610 = vmatpush1.bf16.msra.mxu1 %v24117_v34 }
0x3576   :  { %22612 = vmatprep.subr.bf16.mxu1 %v23919_v23 }
0x3578   :  { %13511 = vmatmul.mubr.f32.vlgmr.msra.gmra.mrb[44].mxu1 %v13131_v15 }
0x3579   :  { %22614 = vmatpush1.bf16.msra.mxu1 %v23913_v17  ;;  %13588 = vmatprep.mubr.f32.mxu1 %v26449_v22 }
0x357a   :  { %22616 = vmatprep.subr.bf16.mxu1 %v23924_v27 }
0x357d   :  { %22618 = vmatpush1.bf16.msra.mxu1 %v23928_v28 }
0x357e   :  { %22668 = vmatprep.subr.bf16.mxu1 %v23919_v23 }
0x3580   :  { %13590 = vmatmul.mubr.f32.vlgmr.msra.gmra.mrb[44].mxu1 %v13131_v15 }
0x3581   :  { %22670 = vmatpush1.bf16.msra.mxu1 %v23913_v17  ;;  %14314 = vmatprep.mubr.f32.mxu1 %v26449_v22 }
0x3582   :  { %22672 = vmatprep.subr.bf16.mxu1 %v23924_v27 }
0x3585   :  { %22674 = vmatpush1.bf16.msra.mxu1 %v23928_v28 }
0x3586   :  { %22676 = vmatprep.subr.bf16.mxu1 %v23997_v4 }
0x3653   :  { %v13591_v29 = vpop.f32.mrb[44].mxu1 }
0x3654   :  { %v13596_v3 = vrot.slane %v13591_v29, 4  ;;  %v13593_v58 = vpop.f32.mrb[45].mxu1 }
0x3656   :  { %v13598_v20 = vadd.f32 %v24185_v8, %v13596_v3 }
0x3658   :  { %23694 = vtanh.f32 %v13598_v20 }
0x3662   :  { %v23695_v35 = vpop.eup %23694 }
0x3663   :  { %13607 = vrot.lane.b32.xlu1 %v23695_v35, %s23864_s0  ;;  %v13600_v18 = vmul.f32 0.5, %v23695_v35 }
0x3665   :  { %v13601_v25 = vadd.f32 0.5, %v13600_v18 }
0x3667   :  { %v13605_v30 = vmul.f32 %v13603_v16, %v13601_v25 }
0x36d5   :  { %v13608_v9 = vpop.permute.xlu1 %13607 }
0x36d6   :  { %v13610_v1 = vmul.f32 %v13608_v9, %v13601_v25 }
0x36d8   :  { %13612 = vrot.lane.b32.xlu0 %v13610_v1, %s23865_s4 }
0x36dc   :  { %12482 = vrot.lane.b32.xlu0 %v12480_v52, %s23865_s4 }
0x374a   :  { %v13613_v24 = vpop.permute.xlu0 %13612 }
0x374b   :  { %v25489_v36 = vadd.f32 %v13613_v24, %v13605_v30 }
0x374d   :  { %23696 = vtanh.f32 %v25489_v36 }
0x374e   :  { %v12483_v47 = vpop.permute.xlu0 %12482 }
0x374f   :  { %12486 = vst.msk [vmem:[#allocation6 + $0x44] sm:$0xf] %vm1165_vm3, %v12483_v47  ;;  %v12487_v43 = vsel %vm599_vm2, %v12483_v47, 0 }
0x3750   :  { %v12562_v13 = vand.u32 4294901760, %v12487_v43 }
0x3752   :  { %v12563_v37 = vsub.f32 %v12487_v43, %v12562_v13  ;;  %v21410_v43 = vsel %vm10661_vm4, 1.0, %v26449_v22 }
0x3754   :  { %v12564_v45 = vand.u32 4294901760, %v12563_v37 }
0x3756   :  { %v12565_v19 = vsub.f32 %v12563_v37, %v12564_v45 }
0x3757   :  { %v23697_v0 = vpop.eup %23696 }
0x3758   :  { %13618 = vrot.lane.b32.xlu1 %v23697_v0, %s23864_s0  ;;  %v12566_v52 = vand.u32 4294901760, %v12565_v19 }
0x375a   :  { %12567 = vmatmul.mubr.f32.vlgmr.msra.gmra.mrb[42].mxu0 %v12566_v52 }
0x375b   :  { %22534 = vmatpush1.bf16.msra.mxu0 %v24002_v7  ;;  %12676 = vmatprep.mubr.f32.mxu0 %v26449_v22 }
0x375c   :  { %22536 = vmatprep.subr.bf16.mxu0 %v24038_v31 }
0x375f   :  { %22538 = vmatpush1.bf16.msra.mxu0 %v24048_v49 }
0x3760   :  { %22540 = vmatprep.subr.bf16.mxu0 %v24045_v48 }
0x3762   :  { %12678 = vmatmul.mubr.f32.vlgmr.msra.gmra.mrb[44].mxu0 %v12562_v13 }
0x3763   :  { %22542 = vmatpush1.bf16.msra.mxu0 %v24056_v53  ;;  %12763 = vmatprep.mubr.f32.mxu0 %v26449_v22 }
0x3764   :  { %22544 = vmatprep.subr.bf16.mxu0 %v24061_v54 }
0x3767   :  { %22546 = vmatpush1.bf16.msra.mxu0 %v24071_v56 }
0x3768   :  { %22548 = vmatprep.subr.bf16.mxu0 %v23919_v23 }
0x376a   :  { %12766 = vmatmul.mubr.f32.vlgmr.msra.gmra.mrb[46].mxu0 %v12563_v37  ;;  %v21408_v37 = vsel %vm10063_vm1, 1.0, %v26449_v22 }
0x376b   :  { %22550 = vmatpush1.bf16.msra.mxu0 %v23913_v17  ;;  %12843 = vmatprep.mubr.f32.mxu0 %v26449_v22  ;;  %v10664_v0 = vadd.f32 %v21410_v43, %v21408_v37 }
0x376c   :  { %22552 = vmatprep.subr.bf16.mxu0 %v23924_v27 }
0x376f   :  { %22554 = vmatpush1.bf16.msra.mxu0 %v23928_v28 }
0x3770   :  { %22556 = vmatprep.subr.bf16.mxu0 %v24092_v57 }
0x3772   :  { %12847 = vmatmul.mubr.f32.vlgmr.msra.gmra.mrb[48].mxu0 %v12564_v45  ;;  %v21412_v45 = vsel %vm11259_vm5, 1.0, %v26449_v22 }
0x3773   :  { %22558 = vmatpush1.bf16.msra.mxu0 %v24102_v60  ;;  %12940 = vmatprep.mubr.f32.mxu0 %v26449_v22  ;;  %v11262_v2 = vadd.f32 %v21412_v45, %v10664_v0 }
0x3774   :  { %22560 = vmatprep.subr.bf16.mxu0 %v24109_v26 }
0x3777   :  { %22562 = vmatpush1.bf16.msra.mxu0 %v24117_v34 }
0x3778   :  { %22564 = vmatprep.subr.bf16.mxu0 %v23919_v23 }
0x377a   :  { %12942 = vmatmul.mubr.f32.vlgmr.msra.gmra.mrb[50].mxu0 %v12562_v13 }
0x377b   :  { %22566 = vmatpush1.bf16.msra.mxu0 %v23913_v17  ;;  %13019 = vmatprep.mubr.f32.mxu0 %v26449_v22 }
0x377c   :  { %22568 = vmatprep.subr.bf16.mxu0 %v23924_v27 }
0x377f   :  { %22570 = vmatpush1.bf16.msra.mxu0 %v23928_v28 }
0x3780   :  { %22620 = vmatprep.subr.bf16.mxu0 %v23919_v23 }
0x3782   :  { %13021 = vmatmul.mubr.f32.vlgmr.msra.gmra.mrb[52].mxu0 %v12562_v13 }
0x3783   :  { %22622 = vmatpush1.bf16.msra.mxu0 %v23913_v17  ;;  %13705 = vmatprep.mubr.f32.mxu0 %v26449_v22 }
0x3784   :  { %22624 = vmatprep.subr.bf16.mxu0 %v23924_v27 }
0x3787   :  { %22626 = vmatpush1.bf16.msra.mxu0 %v23928_v28 }
0x3788   :  { %22628 = vmatprep.subr.bf16.mxu0 %v23997_v4 }
0x37ca   :  { %v13619_v5 = vpop.permute.xlu1 %13618 }
0x37cb   :  { %v25525_v55 = vmul.f32 %v13619_v5, %v13601_v25 }
0x37cd   :  { %v13628_v15 = vrot.slane %v25525_v55, 4 }
0x37cf   :  { %13629 = vrot.lane.b32.xlu1 %v13628_v15, %s23865_s4  ;;  %v11860_v15 = vadd.f32 %v21414_v46, %v11262_v2 }
0x382d   :  { %v12568_v6 = vpop.f32.mrb[42].mxu0 }
0x382e   :  { %v12569_v14 = vpop.f32.mrb[43].mxu0  ;;  %v25553_v6 = vadd.f32 %v21416_v50, %v11860_v15 }
0x3830   :  { %vm13041_vm8 = vcmp.gt.f32.partialorder %v25553_v6, 0.0 }
0x3835   :  { %v12679_v11 = vpop.f32.mrb[44].mxu0 }
0x3836   :  { %v12680_v63 = vpop.f32.mrb[45].mxu0 }
0x3837   :  { %v12681_v29 = vadd.f32 %v12680_v63, %v12569_v14 }
0x383d   :  { %v12767_v3 = vpop.f32.mrb[46].mxu0 }
0x383e   :  { %v12768_v58 = vpop.f32.mrb[47].mxu0  ;;  %v13043_v3 = vsel %vm13041_vm8, %v13042_v40, 0.0  ;;  %vm4725_vm8 = vcmask 76800  }
0x383f   :  { %v12769_v20 = vadd.f32 %v12768_v58, %v12681_v29  ;;  %v12454_v58 = vadd.f32 %v12453_v62, %v25438_v10 }
0x3841   :  { %v25529_v35 = vpop.permute.xlu1 %13629 }
0x3842   :  { %v13631_v18 = vsel %vm599_vm2, %v25529_v35, 0 }
0x3843   :  { %v13706_v9 = vand.u32 4294901760, %v13631_v18 }
0x3845   :  { %v13707_v25 = vsub.f32 %v13631_v18, %v13706_v9  ;;  %v12848_v1 = vpop.f32.mrb[48].mxu0  ;;  %v13044_v18 = vadd.f32 %v13043_v3, %v25553_v6 }
0x3846   :  { %v12849_v16 = vpop.f32.mrb[49].mxu0 }
0x3847   :  { %v13708_v30 = vand.u32 4294901760, %v13707_v25  ;;  %v12850_v24 = vadd.f32 %v12849_v16, %v12769_v20 }
0x3849   :  { %v13709_v47 = vsub.f32 %v13707_v25, %v13708_v30 }
0x384b   :  { %v13710_v13 = vand.u32 4294901760, %v13709_v47 }
0x384d   :  { %v12943_v19 = vpop.f32.mrb[50].mxu0  ;;  %13711 = vmatmul.mubr.f32.vlgmr.msra.gmra.mrb[54].mxu0 %v13710_v13 }
0x384e   :  { %v12944_v52 = vpop.f32.mrb[51].mxu0  ;;  %22630 = vmatpush1.bf16.msra.mxu0 %v24002_v7  ;;  %13821 = vmatprep.mubr.f32.mxu0 %v26449_v22 }
0x384f   :  { %v12945_v5 = vadd.f32 %v12944_v52, %v12850_v24  ;;  %22632 = vmatprep.subr.bf16.mxu0 %v24038_v31 }
0x3852   :  { %22634 = vmatpush1.bf16.msra.mxu0 %v24048_v49 }
0x3853   :  { %22636 = vmatprep.subr.bf16.mxu0 %v24045_v48 }
0x3855   :  { %v13022_v14 = vpop.f32.mrb[52].mxu0  ;;  %13823 = vmatmul.mubr.f32.vlgmr.msra.gmra.mrb[54].mxu0 %v13706_v9 }
0x3856   :  { %v13023_v11 = vpop.f32.mrb[53].mxu0  ;;  %22638 = vmatpush1.bf16.msra.mxu0 %v24056_v53  ;;  %13909 = vmatprep.mubr.f32.mxu0 %v26449_v22  ;;  %v25639_v14 = vld [vmem:[#allocation2 + $0x68] ss:$0 sm:$0xff] }
0x3857   :  { %v13024_v63 = vadd.f32 %v13023_v11, %v12945_v5  ;;  %22640 = vmatprep.subr.bf16.mxu0 %v24061_v54 }
0x3859   :  { %v13026_v29 = vadd.f32 %v25203_v21, %v13024_v63 }
0x385a   :  { %22642 = vmatpush1.bf16.msra.mxu0 %v24071_v56 }
0x385b   :  { %v13037_v20 = vmul.f32 %v25440_v42, %v13026_v29  ;;  %22644 = vmatprep.subr.bf16.mxu0 %v23919_v23 }
0x385d   :  { %v13038_v39 = vadd.f32 %v13037_v20, %v12454_v58  ;;  %13912 = vmatmul.mubr.f32.vlgmr.msra.gmra.mrb[54].mxu0 %v13707_v25 }
0x385e   :  { %22646 = vmatpush1.bf16.msra.mxu0 %v23913_v17  ;;  %13990 = vmatprep.mubr.f32.mxu0 %v26449_v22 }
0x385f   :  { %22648 = vmatprep.subr.bf16.mxu0 %v23924_v27  ;;  %v25572_v44 = vsel %vm4721_vm10, %v13038_v39, %v13044_v18 }
0x3862   :  { %22650 = vmatpush1.bf16.msra.mxu0 %v23928_v28 }
0x3863   :  { %22652 = vmatprep.subr.bf16.mxu0 %v24092_v57 }
0x3865   :  { %13994 = vmatmul.mubr.f32.vlgmr.msra.gmra.mrb[54].mxu0 %v13708_v30 }
0x3866   :  { %22654 = vmatpush1.bf16.msra.mxu0 %v24102_v60  ;;  %14088 = vmatprep.mubr.f32.mxu0 %v26449_v22 }
0x3867   :  { %22656 = vmatprep.subr.bf16.mxu0 %v24109_v26 }
0x386a   :  { %22658 = vmatpush1.bf16.msra.mxu0 %v24117_v34 }
0x386b   :  { %22660 = vmatprep.subr.bf16.mxu0 %v23919_v23 }
0x386d   :  { %14090 = vmatmul.mubr.f32.vlgmr.msra.gmra.mrb[54].mxu0 %v13706_v9 }
0x386e   :  { %22662 = vmatpush1.bf16.msra.mxu0 %v23913_v17  ;;  %14168 = vmatprep.mubr.f32.mxu0 %v26449_v22 }
0x386f   :  { %22664 = vmatprep.subr.bf16.mxu0 %v23924_v27 }
0x3872   :  { %22666 = vmatpush1.bf16.msra.mxu0 %v23928_v28 }
0x3873   :  { %22716 = vmatprep.subr.bf16.mxu0 %v23919_v23 }
0x3875   :  { %14170 = vmatmul.mubr.f32.vlgmr.msra.gmra.mrb[54].mxu0 %v13706_v9 }
0x3876   :  { %22718 = vmatpush1.bf16.msra.mxu0 %v23913_v17  ;;  %14924 = vmatprep.mubr.f32.mxu0 %v26449_v22 }
0x3877   :  { %22720 = vmatprep.subr.bf16.mxu0 %v23924_v27 }
0x387a   :  { %22722 = vmatpush1.bf16.msra.mxu0 %v23928_v28 }
0x387b   :  { %22724 = vmatprep.subr.bf16.mxu0 %v23997_v4 }
0x3948   :  { %v14171_v21 = vpop.f32.mrb[54].mxu0 }
0x3949   :  { %v14208_v51 = vrot.slane %v14171_v21, 4  ;;  %v25591_v10 = vpop.f32.mrb[55].mxu0 }
0x394a   :  { %v25643_v11 = vadd.f32 %v25639_v14, %v25591_v10 }
0x394b   :  { %v14210_v42 = vadd.f32 %v24185_v8, %v14208_v51 }
0x394c   :  { %v21417_v40 = vmul.f32 -1.442695, %v25643_v11 }
0x394d   :  { %23698 = vtanh.f32 %v14210_v42 }
0x3957   :  { %v23699_v25 = vpop.eup %23698 }
0x3958   :  { %14216 = vrot.lane.b32.xlu0 %v23699_v25, %s23864_s0  ;;  %v14212_v9 = vmul.f32 0.5, %v23699_v25 }
0x395a   :  { %v14213_v1 = vadd.f32 0.5, %v14212_v9 }
0x395c   :  { %v14214_v24 = vmul.f32 %v14213_v1, %v25489_v36 }
0x39ca   :  { %v14217_v16 = vpop.permute.xlu0 %14216 }
0x39cb   :  { %v14219_v30 = vmul.f32 %v14217_v16, %v14213_v1 }
0x39cd   :  { %14221 = vrot.lane.b32.xlu1 %v14219_v30, %s23865_s4 }
0x3a3f   :  { %v14222_v47 = vpop.permute.xlu1 %14221 }
0x3a40   :  { %v25597_v43 = vadd.f32 %v14222_v47, %v14214_v24 }
0x3a42   :  { %23700 = vtanh.f32 %v25597_v43 }
0x3a43   :  { %23702 = vpow2.f32 %v21417_v40 }
0x3a4c   :  { %v23701_v13 = vpop.eup %23700 }
0x3a4d   :  { %14227 = vrot.lane.b32.xlu0 %v23701_v13, %s23864_s0  ;;  %v23703_v39 = vpop.eup %23702 }
0x3a4e   :  { %v14180_v18 = vadd.f32 1.0, %v23703_v39 }
0x3abf   :  { %v14228_v37 = vpop.permute.xlu0 %14227 }
0x3ac0   :  { %v25601_v45 = vmul.f32 %v14228_v37, %v14213_v1 }
0x3ac2   :  { %v14237_v19 = vrot.slane %v25601_v45, 4 }
0x3ac4   :  { %14238 = vrot.lane.b32.xlu1 %v14237_v19, %s23865_s4 }
0x3b36   :  { %v25605_v0 = vpop.permute.xlu1 %14238 }
0x3b37   :  { %v14240_v52 = vsel %vm599_vm2, %v25605_v0, 0 }
0x3b38   :  { %v14315_v46 = vand.u32 4294901760, %v14240_v52 }
0x3b3a   :  { %v14316_v5 = vsub.f32 %v14240_v52, %v14315_v46 }
0x3b3c   :  { %v14317_v2 = vand.u32 4294901760, %v14316_v5 }
0x3b3e   :  { %v14318_v50 = vsub.f32 %v14316_v5, %v14317_v2 }
0x3b40   :  { %v14319_v15 = vand.u32 4294901760, %v14318_v50 }
0x3b42   :  { %14320 = vmatmul.mubr.f32.vlgmr.msra.gmra.mrb[46].mxu1 %v14319_v15 }
0x3b43   :  { %22678 = vmatpush1.bf16.msra.mxu1 %v24002_v7  ;;  %14430 = vmatprep.mubr.f32.mxu1 %v26449_v22 }
0x3b44   :  { %22680 = vmatprep.subr.bf16.mxu1 %v24038_v31 }
0x3b47   :  { %22682 = vmatpush1.bf16.msra.mxu1 %v24048_v49 }
0x3b48   :  { %22684 = vmatprep.subr.bf16.mxu1 %v24045_v48 }
0x3b4a   :  { %14432 = vmatmul.mubr.f32.vlgmr.msra.gmra.mrb[46].mxu1 %v14315_v46 }
0x3b4b   :  { %22686 = vmatpush1.bf16.msra.mxu1 %v24056_v53  ;;  %14518 = vmatprep.mubr.f32.mxu1 %v26449_v22 }
0x3b4c   :  { %22688 = vmatprep.subr.bf16.mxu1 %v24061_v54 }
0x3b4f   :  { %22690 = vmatpush1.bf16.msra.mxu1 %v24071_v56 }
0x3b50   :  { %22692 = vmatprep.subr.bf16.mxu1 %v23919_v23 }
0x3b52   :  { %14521 = vmatmul.mubr.f32.vlgmr.msra.gmra.mrb[46].mxu1 %v14316_v5 }
0x3b53   :  { %22694 = vmatpush1.bf16.msra.mxu1 %v23913_v17  ;;  %14599 = vmatprep.mubr.f32.mxu1 %v26449_v22 }
0x3b54   :  { %22696 = vmatprep.subr.bf16.mxu1 %v23924_v27 }
0x3b57   :  { %22698 = vmatpush1.bf16.msra.mxu1 %v23928_v28 }
0x3b58   :  { %22700 = vmatprep.subr.bf16.mxu1 %v24092_v57 }
0x3b5a   :  { %14603 = vmatmul.mubr.f32.vlgmr.msra.gmra.mrb[46].mxu1 %v14317_v2 }
0x3b5b   :  { %22702 = vmatpush1.bf16.msra.mxu1 %v24102_v60  ;;  %14697 = vmatprep.mubr.f32.mxu1 %v26449_v22 }
0x3b5c   :  { %22704 = vmatprep.subr.bf16.mxu1 %v24109_v26 }
0x3b5f   :  { %22706 = vmatpush1.bf16.msra.mxu1 %v24117_v34 }
0x3b60   :  { %22708 = vmatprep.subr.bf16.mxu1 %v23919_v23 }
0x3b62   :  { %14699 = vmatmul.mubr.f32.vlgmr.msra.gmra.mrb[46].mxu1 %v14315_v46 }
0x3b63   :  { %22710 = vmatpush1.bf16.msra.mxu1 %v23913_v17  ;;  %14777 = vmatprep.mubr.f32.mxu1 %v26449_v22 }
0x3b64   :  { %22712 = vmatprep.subr.bf16.mxu1 %v23924_v27 }
0x3b67   :  { %22714 = vmatpush1.bf16.msra.mxu1 %v23928_v28 }
0x3b68   :  { %22764 = vmatprep.subr.bf16.mxu1 %v23919_v23 }
0x3b6a   :  { %14779 = vmatmul.mubr.f32.vlgmr.msra.gmra.mrb[46].mxu1 %v14315_v46 }
0x3b6b   :  { %22766 = vmatpush1.bf16.msra.mxu1 %v23913_v17  ;;  %15534 = vmatprep.mubr.f32.mxu1 %v26449_v22 }
0x3b6c   :  { %22768 = vmatprep.subr.bf16.mxu1 %v23924_v27 }
0x3b6f   :  { %22770 = vmatpush1.bf16.msra.mxu1 %v23928_v28 }
0x3b70   :  { %22772 = vmatprep.subr.bf16.mxu1 %v23997_v4 }
0x3c3d   :  { %v14780_v63 = vpop.f32.mrb[46].mxu1 }
0x3c3e   :  { %v14818_v62 = vrot.slane %v14780_v63, 4  ;;  %v14782_v29 = vpop.f32.mrb[47].mxu1 }
0x3c3f   :  { %v25647_v3 = vadd.f32 %v25639_v14, %v14782_v29 }
0x3c40   :  { %v14820_v58 = vadd.f32 %v24185_v8, %v14818_v62 }
0x3c41   :  { %v21419_v20 = vmul.f32 -1.442695, %v25647_v3 }
0x3c42   :  { %23704 = vtanh.f32 %v14820_v58 }
0x3c43   :  { %23706 = vpow2.f32 %v21419_v20 }
0x3c44   :  { %23708 = vrcp.f32 %v14180_v18 }
0x3c4c   :  { %v23705_v21 = vpop.eup %23704 }
0x3c4d   :  { %v23707_v51 = vpop.eup %23706  ;;  %14826 = vrot.lane.b32.xlu0 %v23705_v21, %s23864_s0  ;;  %v14822_v47 = vmul.f32 0.5, %v23705_v21 }
0x3c4e   :  { %v14789_v10 = vadd.f32 1.0, %v23707_v51  ;;  %v23709_v42 = vpop.eup %23708 }
0x3c4f   :  { %v25652_v25 = vmin.f32 %v23709_v42, 1.0  ;;  %v14823_v13 = vadd.f32 0.5, %v14822_v47 }
0x3c50   :  { %23710 = vrcp.f32 %v14789_v10 }
0x3c51   :  { %vm14202_vm9 = vcmp.lt.f32.partialorder %v25652_v25, 1.0  ;;  %v14824_v52 = vmul.f32 %v14823_v13, %v25597_v43 }
0x3c52   :  { %v14206_v30 = vsel %vm14202_vm9, %v25652_v25, 0.0 }
0x3c5a   :  { %v23711_v9 = vpop.eup %23710 }
0x3c5b   :  { %v25654_v1 = vadd.f32 %v23711_v9, %v23709_v42 }
0x3c5d   :  { %v25658_v16 = vmin.f32 %v25654_v1, 1.0 }
0x3c5f   :  { %vm14812_vm11 = vcmp.lt.f32.partialorder %v25658_v16, 1.0 }
0x3c60   :  { %v25667_v24 = vsel %vm14812_vm11, %v25658_v16, %v14206_v30 }
0x3cbf   :  { %v14827_v37 = vpop.permute.xlu0 %14826 }
0x3cc0   :  { %v14829_v19 = vmul.f32 %v14827_v37, %v14823_v13 }
0x3cc2   :  { %14831 = vrot.lane.b32.xlu1 %v14829_v19, %s23865_s4 }
0x3d34   :  { %v14832_v46 = vpop.permute.xlu1 %14831 }
0x3d35   :  { %v25671_v5 = vadd.f32 %v14832_v46, %v14824_v52 }
0x3d37   :  { %23712 = vtanh.f32 %v25671_v5 }
0x3d41   :  { %v23713_v2 = vpop.eup %23712 }
0x3d42   :  { %14837 = vrot.lane.b32.xlu0 %v23713_v2, %s23864_s0 }
0x3db4   :  { %v14838_v50 = vpop.permute.xlu0 %14837 }
0x3db5   :  { %v25675_v15 = vmul.f32 %v14838_v50, %v14823_v13 }
0x3db7   :  { %v14847_v40 = vrot.slane %v25675_v15, 4 }
0x3db9   :  { %14848 = vrot.lane.b32.xlu1 %v14847_v40, %s23865_s4 }
0x3e2b   :  { %v25679_v63 = vpop.permute.xlu1 %14848 }
0x3e2c   :  { %v14850_v62 = vsel %vm599_vm2, %v25679_v63, 0 }
0x3e2d   :  { %v14925_v29 = vand.u32 4294901760, %v14850_v62 }
0x3e2f   :  { %v14926_v58 = vsub.f32 %v14850_v62, %v14925_v29 }
0x3e31   :  { %v14927_v20 = vand.u32 4294901760, %v14926_v58 }
0x3e33   :  { %v14928_v39 = vsub.f32 %v14926_v58, %v14927_v20 }
0x3e35   :  { %v14929_v18 = vand.u32 4294901760, %v14928_v39 }
0x3e37   :  { %14930 = vmatmul.mubr.f32.vlgmr.msra.gmra.mrb[56].mxu0 %v14929_v18 }
0x3e38   :  { %22726 = vmatpush1.bf16.msra.mxu0 %v24002_v7  ;;  %15040 = vmatprep.mubr.f32.mxu0 %v26449_v22 }
0x3e39   :  { %22728 = vmatprep.subr.bf16.mxu0 %v24038_v31 }
0x3e3c   :  { %22730 = vmatpush1.bf16.msra.mxu0 %v24048_v49 }
0x3e3d   :  { %22732 = vmatprep.subr.bf16.mxu0 %v24045_v48 }
0x3e3f   :  { %15042 = vmatmul.mubr.f32.vlgmr.msra.gmra.mrb[56].mxu0 %v14925_v29 }
0x3e40   :  { %22734 = vmatpush1.bf16.msra.mxu0 %v24056_v53  ;;  %15128 = vmatprep.mubr.f32.mxu0 %v26449_v22 }
0x3e41   :  { %22736 = vmatprep.subr.bf16.mxu0 %v24061_v54 }
0x3e44   :  { %22738 = vmatpush1.bf16.msra.mxu0 %v24071_v56 }
0x3e45   :  { %22740 = vmatprep.subr.bf16.mxu0 %v23919_v23 }
0x3e47   :  { %15131 = vmatmul.mubr.f32.vlgmr.msra.gmra.mrb[56].mxu0 %v14926_v58 }
0x3e48   :  { %22742 = vmatpush1.bf16.msra.mxu0 %v23913_v17  ;;  %15209 = vmatprep.mubr.f32.mxu0 %v26449_v22 }
0x3e49   :  { %22744 = vmatprep.subr.bf16.mxu0 %v23924_v27 }
0x3e4c   :  { %22746 = vmatpush1.bf16.msra.mxu0 %v23928_v28 }
0x3e4d   :  { %22748 = vmatprep.subr.bf16.mxu0 %v24092_v57 }
0x3e4f   :  { %15213 = vmatmul.mubr.f32.vlgmr.msra.gmra.mrb[56].mxu0 %v14927_v20 }
0x3e50   :  { %22750 = vmatpush1.bf16.msra.mxu0 %v24102_v60  ;;  %15307 = vmatprep.mubr.f32.mxu0 %v26449_v22 }
0x3e51   :  { %22752 = vmatprep.subr.bf16.mxu0 %v24109_v26 }
0x3e54   :  { %22754 = vmatpush1.bf16.msra.mxu0 %v24117_v34 }
0x3e55   :  { %22756 = vmatprep.subr.bf16.mxu0 %v23919_v23 }
0x3e57   :  { %15309 = vmatmul.mubr.f32.vlgmr.msra.gmra.mrb[56].mxu0 %v14925_v29 }
0x3e58   :  { %22758 = vmatpush1.bf16.msra.mxu0 %v23913_v17  ;;  %15387 = vmatprep.mubr.f32.mxu0 %v26449_v22 }
0x3e59   :  { %22760 = vmatprep.subr.bf16.mxu0 %v23924_v27 }
0x3e5c   :  { %22762 = vmatpush1.bf16.msra.mxu0 %v23928_v28 }
0x3e5d   :  { %22812 = vmatprep.subr.bf16.mxu0 %v23919_v23 }
0x3e5f   :  { %15389 = vmatmul.mubr.f32.vlgmr.msra.gmra.mrb[56].mxu0 %v14925_v29 }
0x3e60   :  { %22814 = vmatpush1.bf16.msra.mxu0 %v23913_v17  ;;  %16144 = vmatprep.mubr.f32.mxu0 %v26449_v22 }
0x3e61   :  { %22816 = vmatprep.subr.bf16.mxu0 %v23924_v27 }
0x3e64   :  { %22818 = vmatpush1.bf16.msra.mxu0 %v23928_v28 }
0x3e65   :  { %22820 = vmatprep.subr.bf16.mxu0 %v23997_v4 }
0x3f32   :  { %v15390_v21 = vpop.f32.mrb[56].mxu0 }
0x3f33   :  { %v15428_v51 = vrot.slane %v15390_v21, 4  ;;  %v15392_v10 = vpop.f32.mrb[57].mxu0 }
0x3f34   :  { %v25714_v42 = vadd.f32 %v25639_v14, %v15392_v10 }
0x3f35   :  { %v15430_v9 = vadd.f32 %v24185_v8, %v15428_v51 }
0x3f36   :  { %v21421_v30 = vmul.f32 -1.442695, %v25714_v42 }
0x3f37   :  { %23714 = vtanh.f32 %v15430_v9 }
0x3f38   :  { %23716 = vpow2.f32 %v21421_v30 }
0x3f41   :  { %v23715_v47 = vpop.eup %23714 }
0x3f42   :  { %v23717_v13 = vpop.eup %23716  ;;  %15436 = vrot.lane.b32.xlu0 %v23715_v47, %s23864_s0  ;;  %v15432_v50 = vmul.f32 0.5, %v23715_v47 }
0x3f43   :  { %v15399_v37 = vadd.f32 1.0, %v23717_v13 }
0x3f44   :  { %v15433_v40 = vadd.f32 0.5, %v15432_v50 }
0x3f45   :  { %23718 = vrcp.f32 %v15399_v37 }
0x3f4f   :  { %v23719_v19 = vpop.eup %23718 }
0x3f50   :  { %v25720_v52 = vadd.f32 %v23719_v19, %v25654_v1  ;;  %v15434_v1 = vmul.f32 %v15433_v40, %v25671_v5 }
0x3f52   :  { %v25723_v46 = vmin.f32 %v25720_v52, 1.0 }
0x3f54   :  { %vm15422_vm12 = vcmp.lt.f32.partialorder %v25723_v46, 1.0 }
0x3f55   :  { %v25730_v2 = vsel %vm15422_vm12, %v25723_v46, %v25667_v24 }
0x3fb4   :  { %v15437_v62 = vpop.permute.xlu0 %15436 }
0x3fb5   :  { %v15439_v29 = vmul.f32 %v15437_v62, %v15433_v40 }
0x3fb7   :  { %15441 = vrot.lane.b32.xlu1 %v15439_v29, %s23865_s4 }
0x4029   :  { %v15442_v58 = vpop.permute.xlu1 %15441 }
0x402a   :  { %v25734_v20 = vadd.f32 %v15442_v58, %v15434_v1 }
0x402c   :  { %23720 = vtanh.f32 %v25734_v20 }
0x4036   :  { %v23721_v39 = vpop.eup %23720 }
0x4037   :  { %15447 = vrot.lane.b32.xlu0 %v23721_v39, %s23864_s0 }
0x40a9   :  { %v15448_v18 = vpop.permute.xlu0 %15447 }
0x40aa   :  { %v25738_v21 = vmul.f32 %v15448_v18, %v15433_v40 }
0x40ac   :  { %v15457_v24 = vrot.slane %v25738_v21, 4 }
0x40ae   :  { %15458 = vrot.lane.b32.xlu1 %v15457_v24, %s23865_s4 }
0x4120   :  { %v25742_v51 = vpop.permute.xlu1 %15458 }
0x4121   :  { %v15460_v10 = vsel %vm599_vm2, %v25742_v51, 0 }
0x4122   :  { %v15535_v9 = vand.u32 4294901760, %v15460_v10 }
0x4124   :  { %v15536_v30 = vsub.f32 %v15460_v10, %v15535_v9 }
0x4126   :  { %v15537_v47 = vand.u32 4294901760, %v15536_v30 }
0x4128   :  { %v15538_v13 = vsub.f32 %v15536_v30, %v15537_v47 }
0x412a   :  { %v15539_v37 = vand.u32 4294901760, %v15538_v13 }
0x412c   :  { %15540 = vmatmul.mubr.f32.vlgmr.msra.gmra.mrb[48].mxu1 %v15539_v37 }
0x412d   :  { %22774 = vmatpush1.bf16.msra.mxu1 %v24002_v7  ;;  %15650 = vmatprep.mubr.f32.mxu1 %v26449_v22 }
0x412e   :  { %22776 = vmatprep.subr.bf16.mxu1 %v24038_v31 }
0x4131   :  { %22778 = vmatpush1.bf16.msra.mxu1 %v24048_v49 }
0x4132   :  { %22780 = vmatprep.subr.bf16.mxu1 %v24045_v48 }
0x4134   :  { %15652 = vmatmul.mubr.f32.vlgmr.msra.gmra.mrb[48].mxu1 %v15535_v9 }
0x4135   :  { %22782 = vmatpush1.bf16.msra.mxu1 %v24056_v53  ;;  %15738 = vmatprep.mubr.f32.mxu1 %v26449_v22 }
0x4136   :  { %22784 = vmatprep.subr.bf16.mxu1 %v24061_v54 }
0x4139   :  { %22786 = vmatpush1.bf16.msra.mxu1 %v24071_v56 }
0x413a   :  { %22788 = vmatprep.subr.bf16.mxu1 %v23919_v23 }
0x413c   :  { %15741 = vmatmul.mubr.f32.vlgmr.msra.gmra.mrb[48].mxu1 %v15536_v30 }
0x413d   :  { %22790 = vmatpush1.bf16.msra.mxu1 %v23913_v17  ;;  %15819 = vmatprep.mubr.f32.mxu1 %v26449_v22 }
0x413e   :  { %22792 = vmatprep.subr.bf16.mxu1 %v23924_v27 }
0x4141   :  { %22794 = vmatpush1.bf16.msra.mxu1 %v23928_v28 }
0x4142   :  { %22796 = vmatprep.subr.bf16.mxu1 %v24092_v57 }
0x4144   :  { %15823 = vmatmul.mubr.f32.vlgmr.msra.gmra.mrb[48].mxu1 %v15537_v47 }
0x4145   :  { %22798 = vmatpush1.bf16.msra.mxu1 %v24102_v60  ;;  %15917 = vmatprep.mubr.f32.mxu1 %v26449_v22 }
0x4146   :  { %22800 = vmatprep.subr.bf16.mxu1 %v24109_v26 }
0x4149   :  { %22802 = vmatpush1.bf16.msra.mxu1 %v24117_v34 }
0x414a   :  { %22804 = vmatprep.subr.bf16.mxu1 %v23919_v23 }
0x414c   :  { %15919 = vmatmul.mubr.f32.vlgmr.msra.gmra.mrb[48].mxu1 %v15535_v9 }
0x414d   :  { %22806 = vmatpush1.bf16.msra.mxu1 %v23913_v17  ;;  %15997 = vmatprep.mubr.f32.mxu1 %v26449_v22 }
0x414e   :  { %22808 = vmatprep.subr.bf16.mxu1 %v23924_v27 }
0x4151   :  { %22810 = vmatpush1.bf16.msra.mxu1 %v23928_v28 }
0x4152   :  { %22860 = vmatprep.subr.bf16.mxu1 %v23919_v23 }
0x4154   :  { %15999 = vmatmul.mubr.f32.vlgmr.msra.gmra.mrb[48].mxu1 %v15535_v9 }
0x4155   :  { %22862 = vmatpush1.bf16.msra.mxu1 %v23913_v17  ;;  %16754 = vmatprep.mubr.f32.mxu1 %v26449_v22 }
0x4156   :  { %22864 = vmatprep.subr.bf16.mxu1 %v23924_v27 }
0x4159   :  { %22866 = vmatpush1.bf16.msra.mxu1 %v23928_v28 }
0x415a   :  { %22876 = vmatprep.subr.bf16.mxu1 %v24045_v48 }
0x4227   :  { %v16000_v19 = vpop.f32.mrb[48].mxu1 }
0x4228   :  { %v16038_v50 = vrot.slane %v16000_v19, 4  ;;  %v16002_v40 = vpop.f32.mrb[49].mxu1 }
0x4229   :  { %v25777_v62 = vadd.f32 %v25639_v14, %v16002_v40 }
0x422a   :  { %v16040_v29 = vadd.f32 %v24185_v8, %v16038_v50 }
0x422b   :  { %v21423_v1 = vmul.f32 -1.442695, %v25777_v62 }
0x422c   :  { %23722 = vtanh.f32 %v16040_v29 }
0x422d   :  { %23724 = vpow2.f32 %v21423_v1 }
0x4236   :  { %v23723_v58 = vpop.eup %23722 }
0x4237   :  { %v23725_v39 = vpop.eup %23724  ;;  %16046 = vrot.lane.b32.xlu0 %v23723_v58, %s23864_s0  ;;  %v16042_v47 = vmul.f32 0.5, %v23723_v58 }
0x4238   :  { %v16009_v18 = vadd.f32 1.0, %v23725_v39 }
0x4239   :  { %v16043_v13 = vadd.f32 0.5, %v16042_v47 }
0x423a   :  { %23726 = vrcp.f32 %v16009_v18 }
0x4244   :  { %v23727_v24 = vpop.eup %23726 }
0x4245   :  { %v25783_v10 = vadd.f32 %v23727_v24, %v25720_v52  ;;  %v16044_v52 = vmul.f32 %v16043_v13, %v25734_v20 }
0x4247   :  { %v25786_v9 = vmin.f32 %v25783_v10, 1.0 }
0x4249   :  { %vm16032_vm13 = vcmp.lt.f32.partialorder %v25786_v9, 1.0 }
0x424a   :  { %v25793_v30 = vsel %vm16032_vm13, %v25786_v9, %v25730_v2 }
0x42a9   :  { %v16047_v37 = vpop.permute.xlu0 %16046 }
0x42aa   :  { %v16049_v19 = vmul.f32 %v16047_v37, %v16043_v13 }
0x42ac   :  { %16051 = vrot.lane.b32.xlu1 %v16049_v19, %s23865_s4 }
0x431e   :  { %v16052_v50 = vpop.permute.xlu1 %16051 }
0x431f   :  { %v25797_v40 = vadd.f32 %v16052_v50, %v16044_v52 }
0x4321   :  { %23728 = vtanh.f32 %v25797_v40 }
0x432b   :  { %v23729_v29 = vpop.eup %23728 }
0x432c   :  { %16057 = vrot.lane.b32.xlu0 %v23729_v29, %s23864_s0 }
0x439e   :  { %v16058_v1 = vpop.permute.xlu0 %16057 }
0x439f   :  { %v25801_v39 = vmul.f32 %v16058_v1, %v16043_v13 }
0x43a1   :  { %26450 = vst [vmem:[#allocation15_spill] sm:$0xff] %v25801_v39  ;;  %v16067_v2 = vrot.slane %v25801_v39, 4 }
0x43a3   :  { %16068 = vrot.lane.b32.xlu1 %v16067_v2, %s23865_s4 }
0x4415   :  { %v25805_v58 = vpop.permute.xlu1 %16068 }
0x4416   :  { %v16070_v18 = vsel %vm599_vm2, %v25805_v58, 0 }
0x4417   :  { %v16145_v24 = vand.u32 4294901760, %v16070_v18 }
0x4419   :  { %v16146_v47 = vsub.f32 %v16070_v18, %v16145_v24 }
0x441b   :  { %v16147_v37 = vand.u32 4294901760, %v16146_v47 }
0x441d   :  { %v16148_v19 = vsub.f32 %v16146_v47, %v16147_v37 }
0x441f   :  { %v16149_v52 = vand.u32 4294901760, %v16148_v19 }
0x4421   :  { %16150 = vmatmul.mubr.f32.vlgmr.msra.gmra.mrb[58].mxu0 %v16149_v52 }
0x4422   :  { %22822 = vmatpush1.bf16.msra.mxu0 %v24002_v7  ;;  %16260 = vmatprep.mubr.f32.mxu0 %v26449_v22 }
0x4423   :  { %22824 = vmatprep.subr.bf16.mxu0 %v24038_v31 }
0x4426   :  { %22826 = vmatpush1.bf16.msra.mxu0 %v24048_v49 }
0x4427   :  { %22828 = vmatprep.subr.bf16.mxu0 %v24045_v48 }
0x4429   :  { %16262 = vmatmul.mubr.f32.vlgmr.msra.gmra.mrb[58].mxu0 %v16145_v24 }
0x442a   :  { %22830 = vmatpush1.bf16.msra.mxu0 %v24056_v53  ;;  %16348 = vmatprep.mubr.f32.mxu0 %v26449_v22 }
0x442b   :  { %22832 = vmatprep.subr.bf16.mxu0 %v24061_v54 }
0x442e   :  { %22834 = vmatpush1.bf16.msra.mxu0 %v24071_v56 }
0x442f   :  { %22836 = vmatprep.subr.bf16.mxu0 %v23919_v23 }
0x4431   :  { %16351 = vmatmul.mubr.f32.vlgmr.msra.gmra.mrb[58].mxu0 %v16146_v47 }
0x4432   :  { %22838 = vmatpush1.bf16.msra.mxu0 %v23913_v17  ;;  %16429 = vmatprep.mubr.f32.mxu0 %v26449_v22 }
0x4433   :  { %22840 = vmatprep.subr.bf16.mxu0 %v23924_v27 }
0x4436   :  { %22842 = vmatpush1.bf16.msra.mxu0 %v23928_v28 }
0x4437   :  { %22844 = vmatprep.subr.bf16.mxu0 %v24092_v57 }
0x4439   :  { %16433 = vmatmul.mubr.f32.vlgmr.msra.gmra.mrb[58].mxu0 %v16147_v37 }
0x443a   :  { %22846 = vmatpush1.bf16.msra.mxu0 %v24102_v60  ;;  %16527 = vmatprep.mubr.f32.mxu0 %v26449_v22 }
0x443b   :  { %22848 = vmatprep.subr.bf16.mxu0 %v24109_v26 }
0x443e   :  { %22850 = vmatpush1.bf16.msra.mxu0 %v24117_v34 }
0x443f   :  { %22852 = vmatprep.subr.bf16.mxu0 %v23919_v23 }
0x4441   :  { %16529 = vmatmul.mubr.f32.vlgmr.msra.gmra.mrb[58].mxu0 %v16145_v24 }
0x4442   :  { %22854 = vmatpush1.bf16.msra.mxu0 %v23913_v17  ;;  %16607 = vmatprep.mubr.f32.mxu0 %v26449_v22 }
0x4443   :  { %22856 = vmatprep.subr.bf16.mxu0 %v23924_v27 }
0x4446   :  { %22858 = vmatpush1.bf16.msra.mxu0 %v23928_v28 }
0x4447   :  { %22868 = vmatprep.subr.bf16.mxu0 %v23997_v4 }
0x4449   :  { %16609 = vmatmul.mubr.f32.vlgmr.msra.gmra.mrb[58].mxu0 %v16145_v24 }
0x444a   :  { %22870 = vmatpush1.bf16.msra.mxu0 %v24002_v7  ;;  %16869 = vmatprep.mubr.f32.mxu0 %v26449_v22 }
0x444b   :  { %22872 = vmatprep.subr.bf16.mxu0 %v24038_v31 }
0x444e   :  { %22874 = vmatpush1.bf16.msra.mxu0 %v24048_v49 }
0x444f   :  { %22884 = vmatprep.subr.bf16.mxu0 %v23919_v23 }
0x451c   :  { %v16610_v13 = vpop.f32.mrb[58].mxu0 }
0x451d   :  { %v16648_v50 = vrot.slane %v16610_v13, 4  ;;  %v16612_v29 = vpop.f32.mrb[59].mxu0 }
0x451e   :  { %v25840_v1 = vadd.f32 %v25639_v14, %v16612_v29 }
0x451f   :  { %v16650_v2 = vadd.f32 %v24185_v8, %v16648_v50 }
0x4520   :  { %v21425_v18 = vmul.f32 -1.442695, %v25840_v1 }
0x4521   :  { %23730 = vtanh.f32 %v16650_v2 }
0x4522   :  { %23732 = vpow2.f32 %v21425_v18 }
0x452b   :  { %v23731_v24 = vpop.eup %23730 }
0x452c   :  { %v23733_v47 = vpop.eup %23732  ;;  %16656 = vrot.lane.b32.xlu0 %v23731_v24, %s23864_s0  ;;  %v16652_v50 = vmul.f32 0.5, %v23731_v24 }
0x452d   :  { %v16619_v37 = vadd.f32 1.0, %v23733_v47 }
0x452e   :  { %v16653_v29 = vadd.f32 0.5, %v16652_v50  ;;  %v15414_v50 = vrot.slane %v25671_v5, 4  ;;  %v16014_v5 = vsub.f32 %v25786_v9, %v25723_v46 }
0x452f   :  { %23734 = vrcp.f32 %v16619_v37 }
0x4530   :  { %v16654_v47 = vmul.f32 %v16653_v29, %v25797_v40 }
0x4539   :  { %v23735_v19 = vpop.eup %23734 }
0x453a   :  { %v16622_v52 = vadd.f32 %v23735_v19, %v25783_v10 }
0x453c   :  { %v25846_v13 = vmin.f32 %v16622_v52, 1.0  ;;  %v14194_v52 = vrot.slane %v25489_v36, 4  ;;  %v14794_v36 = vsub.f32 %v25658_v16, %v25652_v25 }
0x453e   :  { %vm16642_vm14 = vcmp.lt.f32.partialorder %v25846_v13, 1.0  ;;  %v16624_v24 = vsub.f32 %v25846_v13, %v25786_v9 }
0x453f   :  { %v25853_v8 = vsel %vm16642_vm14, %v25846_v13, %v25793_v30  ;;  %v15404_v30 = vsub.f32 %v25723_v46, %v25658_v16 }
0x4540   :  { %v17241_v46 = vsub.f32 1.0, %v25853_v8 }
0x459e   :  { %v16657_v2 = vpop.permute.xlu0 %16656 }
0x459f   :  { %v16659_v18 = vmul.f32 %v16657_v2, %v16653_v29  ;;  %v16634_v2 = vrot.slane %v25797_v40, 4  ;;  %v14804_v40 = vrot.slane %v25597_v43, 4 }
0x45a1   :  { %16661 = vrot.lane.b32.xlu1 %v16659_v18, %s23865_s4 }
0x4613   :  { %v16662_v37 = vpop.permute.xlu1 %16661 }
0x4614   :  { %v16664_v10 = vadd.f32 %v16662_v37, %v16654_v47 }
0x4616   :  { %23736 = vtanh.f32 %v16664_v10 }
0x4620   :  { %v23737_v19 = vpop.eup %23736 }
0x4621   :  { %16667 = vrot.lane.b32.xlu0 %v23737_v19, %s23864_s0  ;;  %v17220_v19 = vsub.f32 1.0, %v25846_v13 }
0x4625   :  { %14187 = vperm.xlu0 %23560, %v25652_v25  }
0x4629   :  { %15407 = vperm.xlu0 %23560, %v15404_v30   ;;  %v17230_v30 = vrot.slane %v16664_v10, 4 }
0x462d   :  { %16627 = vperm.xlu0 %23560, %v16624_v24  }
0x4631   :  { %14195 = vrot.lane.b32.xlu0 %v14194_v52, %s23867_s5 }
0x4635   :  { %15415 = vrot.lane.b32.xlu0 %v15414_v50, %s23867_s5 }
0x4639   :  { %16635 = vrot.lane.b32.xlu0 %v16634_v2, %s23867_s5 }
0x4693   :  { %v16668_v18 = vpop.permute.xlu0 %16667 }
0x4694   :  { %v25869_v47 = vmul.f32 %v16668_v18, %v16653_v29  ;;  %v16024_v29 = vrot.slane %v25734_v20, 4 }
0x4696   :  { %v16677_v37 = vrot.slane %v25869_v47, 4 }
0x4698   :  { %16678 = vrot.lane.b32.xlu1 %v16677_v37, %s23865_s4 }
0x469c   :  { %14797 = vperm.xlu1 %23561, %v14794_v36  }
0x46a0   :  { %16017 = vperm.xlu1 %23561, %v16014_v5  }
0x46a4   :  { %17223 = vperm.xlu1 %23561, %v17220_v19   ;;  %v25886_v2 = vpop.permute.xlu0 %14187 }
0x46a5   :  { %v14191_v5 = vmul.f32 %v25886_v2, %v25529_v35 }
0x46a8   :  { %14805 = vrot.lane.b32.xlu1 %v14804_v40, %s23867_s5  ;;  %v25893_v10 = vpop.permute.xlu0 %15407  ;;  %v14200_v40 = vmul.f32 %v25886_v2, %v25643_v11 }
0x46a9   :  { %v15420_v35 = vmul.f32 %v25893_v10, %v25714_v42 }
0x46ac   :  { %16025 = vrot.lane.b32.xlu1 %v16024_v29, %s23867_s5  ;;  %v25901_v36 = vpop.permute.xlu0 %16627 }
0x46ad   :  { %v16631_v42 = vmul.f32 %v25901_v36, %v25805_v58 }
0x46b0   :  { %17231 = vrot.lane.b32.xlu1 %v17230_v30, %s23867_s5  ;;  %v14196_v11 = vpop.permute.xlu0 %14195 }
0x46b4   :  { %v15416_v58 = vpop.permute.xlu0 %15415 }
0x470a   :  { %v16679_v24 = vpop.permute.xlu1 %16678 }
0x470b   :  { %v16680_v52 = vsel %vm599_vm2, %v16679_v24, 0 }
0x470c   :  { %v25884_v50 = vand.u32 4294901760, %v16680_v52 }
0x470e   :  { %v16756_v18 = vsub.f32 %v16680_v52, %v25884_v50  ;;  %16871 = vmatmul.mubr.f32.vlgmr.msra.gmra.mrb[60].mxu0 %v25884_v50  ;;  %v15411_v52 = vmul.f32 %v25893_v10, %v25679_v63 }
0x470f   :  { %22886 = vmatpush1.bf16.msra.mxu0 %v23913_v17  ;;  %17036 = vmatprep.mubr.f32.mxu0 %v26449_v22 }
0x4710   :  { %v16757_v43 = vand.u32 4294901760, %v16756_v18  ;;  %22888 = vmatprep.subr.bf16.mxu0 %v23924_v27 }
0x4712   :  { %v16758_v20 = vsub.f32 %v16756_v18, %v16757_v43 }
0x4713   :  { %22890 = vmatpush1.bf16.msra.mxu0 %v23928_v28 }
0x4714   :  { %22900 = vmatprep.subr.bf16.mxu0 %v23919_v23  ;;  %v16759_v37 = vand.u32 4294901760, %v16758_v20 }
0x4716   :  { %17040 = vmatmul.mubr.f32.vlgmr.msra.gmra.mrb[62].mxu0 %v16757_v43  ;;  %16760 = vmatmul.mubr.f32.vlgmr.msra.gmra.mrb[50].mxu1 %v16759_v37 }
0x4717   :  { %22878 = vmatpush1.bf16.msra.mxu1 %v24056_v53  ;;  %22902 = vmatpush1.bf16.msra.mxu0 %v23913_v17 }
0x4718   :  { %22880 = vmatprep.subr.bf16.mxu1 %v24061_v54  ;;  %22904 = vmatprep.subr.bf16.mxu0 %v23924_v27 }
0x4719   :  { %16956 = vmatprep.mubr.f32.mxu1 %v26449_v22  ;;  %17212 = vmatprep.mubr.f32.mxu0 %v26449_v22 }
0x471b   :  { %22882 = vmatpush1.bf16.msra.mxu1 %v24071_v56  ;;  %22906 = vmatpush1.bf16.msra.mxu0 %v23928_v28  ;;  %v14798_v19 = vpop.permute.xlu1 %14797 }
0x471c   :  { %v14801_v29 = vmul.f32 %v14798_v19, %v25605_v0  ;;  %v14810_v30 = vmul.f32 %v14798_v19, %v25647_v3  ;;  %22892 = vmatprep.subr.bf16.mxu1 %v24092_v57  ;;  %22916 = vmatprep.subr.bf16.mxu0 %v23997_v4 }
0x471e   :  { %v14802_v43 = vadd.f32 %v14801_v29, %v14191_v5  ;;  %v14811_v20 = vadd.f32 %v14810_v30, %v14200_v40  ;;  %16959 = vmatmul.mubr.f32.vlgmr.msra.gmra.mrb[52].mxu1 %v16756_v18  ;;  %17214 = vmatmul.mubr.f32.vlgmr.msra.gmra.mrb[64].mxu0 %v25884_v50  ;;  %v16640_v18 = vmul.f32 %v25901_v36, %v25840_v1 }
0x471f   :  { %22894 = vmatpush1.bf16.msra.mxu1 %v24102_v60  ;;  %v16018_v0 = vpop.permute.xlu1 %16017  ;;  %22918 = vmatpush1.bf16.msra.mxu0 %v24002_v7 }
0x4720   :  { %v15412_v3 = vadd.f32 %v15411_v52, %v14802_v43  ;;  %v15421_v37 = vadd.f32 %v15420_v35, %v14811_v20  ;;  %v16021_v39 = vmul.f32 %v16018_v0, %v25742_v51  ;;  %v16030_v63 = vmul.f32 %v16018_v0, %v25777_v62  ;;  %22896 = vmatprep.subr.bf16.mxu1 %v24109_v26 }
0x4721   :  { %17133 = vmatprep.mubr.f32.mxu1 %v26449_v22  ;;  %22920 = vmatprep.subr.bf16.mxu0 %v24038_v31  ;;  %v14198_v52 = vmul.f32 %v14196_v11, %v25886_v2  ;;  %v15418_v20 = vmul.f32 %v15416_v58, %v25893_v10 }
0x4722   :  { %v16022_v5 = vadd.f32 %v16021_v39, %v15412_v3  ;;  %v16031_v40 = vadd.f32 %v16030_v63, %v15421_v37  ;;  %17442 = vmatprep.mubr.f32.mxu0 %v26449_v22  ;;  %v16636_v37 = vpop.permute.xlu0 %16635 }
0x4723   :  { %22898 = vmatpush1.bf16.msra.mxu1 %v24117_v34  ;;  %v25933_v51 = vpop.permute.xlu1 %17223  ;;  %22922 = vmatpush1.bf16.msra.mxu0 %v24048_v49  ;;  %v16638_v10 = vmul.f32 %v16636_v37, %v25901_v36 }
0x4724   :  { %v25936_v62 = vadd.f32 %v16640_v18, %v16031_v40  ;;  %v16632_v29 = vadd.f32 %v16631_v42, %v16022_v5  ;;  %v17227_v30 = vmul.f32 %v25933_v51, %v16679_v24  ;;  %22908 = vmatprep.subr.bf16.mxu1 %v23919_v23  ;;  %22932 = vmatprep.subr.bf16.mxu0 %v23919_v23 }
0x4726   :  { %v17228_v39 = vadd.f32 %v17227_v30, %v16632_v29  ;;  %17135 = vmatmul.mubr.f32.vlgmr.msra.gmra.mrb[54].mxu1 %v25884_v50 }
0x4727   :  { %v14806_v1 = vpop.permute.xlu1 %14805  ;;  %22910 = vmatpush1.bf16.msra.mxu1 %v23913_v17  ;;  %17327 = vmatprep.mubr.f32.mxu1 %v26449_v22 }
0x4728   :  { %v17253_v35 = vsel %vm599_vm2, %v17228_v39, 0  ;;  %v14808_v43 = vmul.f32 %v14806_v1, %v14798_v19  ;;  %22912 = vmatprep.subr.bf16.mxu1 %v23924_v27 }
0x4729   :  { %v17328_v24 = vand.u32 4294901760, %v17253_v35 }
0x472a   :  { %v14809_v3 = vadd.f32 %v14808_v43, %v14198_v52 }
0x472b   :  { %17444 = vmatmul.mubr.f32.vlgmr.msra.gmra.mrb[66].mxu0 %v17328_v24  ;;  %v16026_v63 = vpop.permute.xlu1 %16025  ;;  %22914 = vmatpush1.bf16.msra.mxu1 %v23928_v28  ;;  %v17329_v50 = vsub.f32 %v17253_v35, %v17328_v24 }
0x472c   :  { %22934 = vmatpush1.bf16.msra.mxu0 %v23913_v17  ;;  %v15419_v42 = vadd.f32 %v15418_v20, %v14809_v3  ;;  %v16028_v18 = vmul.f32 %v16026_v63, %v16018_v0  ;;  %17609 = vmatprep.mubr.f32.mxu0 %v26449_v22 }
0x472d   :  { %22936 = vmatprep.subr.bf16.mxu0 %v23924_v27  ;;  %22924 = vmatprep.subr.bf16.mxu1 %v24045_v48  ;;  %v17330_v2 = vand.u32 4294901760, %v17329_v50 }
0x472e   :  { %v16029_v19 = vadd.f32 %v16028_v18, %v15419_v42  ;;  %v21422_v42 = vsel %vm15422_vm12, 1.0, %v26449_v22 }
0x472f   :  { %v17232_v11 = vpop.permute.xlu1 %17231  ;;  %v17331_v5 = vsub.f32 %v17329_v50, %v17330_v2 }
0x4730   :  { %22938 = vmatpush1.bf16.msra.mxu0 %v23928_v28  ;;  %v16639_v40 = vadd.f32 %v16638_v10, %v16029_v19  ;;  %v17234_v29 = vmul.f32 %v17232_v11, %v25933_v51  ;;  %v21424_v10 = vsel %vm16032_vm13, 1.0, %v26449_v22  ;;  %v21426_v11 = vsel %vm16642_vm14, 1.0, %v26449_v22 }
0x4731   :  { %22948 = vmatprep.subr.bf16.mxu0 %v23919_v23  ;;  %v17332_v0 = vand.u32 4294901760, %v17331_v5 }
0x4732   :  { %v17235_v30 = vadd.f32 %v17234_v29, %v16639_v40 }
0x4733   :  { %17613 = vmatmul.mubr.f32.vlgmr.msra.gmra.mrb[68].mxu0 %v17330_v2  ;;  %17333 = vmatmul.mubr.f32.vlgmr.msra.gmra.mrb[56].mxu1 %v17332_v0 }
0x4734   :  { %22926 = vmatpush1.bf16.msra.mxu1 %v24056_v53  ;;  %22950 = vmatpush1.bf16.msra.mxu0 %v23913_v17 }
0x4735   :  { %17797 = vrot.lane.b32.xlu1 %v17235_v30, %s23865_s4  ;;  %22928 = vmatprep.subr.bf16.mxu1 %v24061_v54 }
0x4736   :  { %22952 = vmatprep.subr.bf16.mxu0 %v23924_v27  ;;  %17529 = vmatprep.mubr.f32.mxu1 %v26449_v22 }
0x4737   :  { %17785 = vmatprep.mubr.f32.mxu0 %v26449_v22 }
0x4738   :  { %22930 = vmatpush1.bf16.msra.mxu1 %v24071_v56  ;;  %22954 = vmatpush1.bf16.msra.mxu0 %v23928_v28 }
0x4739   :  { %22940 = vmatprep.subr.bf16.mxu1 %v24092_v57  ;;  %23004 = vmatprep.subr.bf16.mxu0 %v23919_v23 }
0x473b   :  { %17532 = vmatmul.mubr.f32.vlgmr.msra.gmra.mrb[58].mxu1 %v17329_v50  ;;  %17787 = vmatmul.mubr.f32.vlgmr.msra.gmra.mrb[70].mxu0 %v17328_v24  ;;  %v21418_v50 = vsel %vm14202_vm9, 1.0, %v26449_v22  ;;  %vm5301_vm9 = vcmask 261124  }
0x473c   :  { %22942 = vmatpush1.bf16.msra.mxu1 %v24102_v60  ;;  %17706 = vmatprep.mubr.f32.mxu1 %v26449_v22 }
0x473d   :  { %22944 = vmatprep.subr.bf16.mxu1 %v24109_v26  ;;  %23006 = vmatpush1.bf16.msra.mxu0 %v23913_v17 }
0x473e   :  { %23008 = vmatprep.subr.bf16.mxu0 %v23924_v27  ;;  %18490 = vmatprep.mubr.f32.mxu0 %v26449_v22 }
0x4740   :  { %22946 = vmatpush1.bf16.msra.mxu1 %v24117_v34 }
0x4741   :  { %22956 = vmatprep.subr.bf16.mxu1 %v23919_v23  ;;  %23010 = vmatpush1.bf16.msra.mxu0 %v23928_v28 }
0x4742   :  { %23012 = vmatprep.subr.bf16.mxu0 %v23997_v4 }
0x4743   :  { %17708 = vmatmul.mubr.f32.vlgmr.msra.gmra.mrb[60].mxu1 %v17328_v24  ;;  %v21420_v24 = vsel %vm14812_vm11, 1.0, %v26449_v22 }
0x4744   :  { %22958 = vmatpush1.bf16.msra.mxu1 %v23913_v17  ;;  %17897 = vmatprep.mubr.f32.mxu1 %v26449_v22  ;;  %v14815_v2 = vadd.f32 %v21420_v24, %v21418_v50 }
0x4745   :  { %22960 = vmatprep.subr.bf16.mxu1 %v23924_v27 }
0x4746   :  { %v15425_v19 = vadd.f32 %v21422_v42, %v14815_v2 }
0x4748   :  { %22962 = vmatpush1.bf16.msra.mxu1 %v23928_v28  ;;  %v16035_v5 = vadd.f32 %v21424_v10, %v15425_v19 }
0x4749   :  { %22964 = vmatprep.subr.bf16.mxu1 %v23997_v4 }
0x474a   :  { %v25998_v25 = vadd.f32 %v21426_v11, %v16035_v5 }
0x474c   :  { %vm17240_vm15 = vcmp.gt.f32.partialorder %v25998_v25, 0.0 }
0x47e1   :  { %v16872_v36 = vpop.f32.mrb[60].mxu0 }
0x47e2   :  { %v16873_v58 = vpop.f32.mrb[61].mxu0 }
0x47e9   :  { %v17041_v39 = vpop.f32.mrb[62].mxu0  ;;  %v16761_v1 = vpop.f32.mrb[50].mxu1 }
0x47ea   :  { %v17042_v52 = vpop.f32.mrb[63].mxu0  ;;  %v16762_v35 = vpop.f32.mrb[51].mxu1  ;;  %v17242_v39 = vsel %vm17240_vm15, %v17241_v46, 0.0 }
0x47eb   :  { %v16874_v43 = vadd.f32 %v16873_v58, %v16762_v35 }
0x47f1   :  { %v16960_v20 = vpop.f32.mrb[52].mxu1  ;;  %v17215_v3 = vpop.f32.mrb[64].mxu0 }
0x47f2   :  { %v16961_v37 = vpop.f32.mrb[53].mxu1  ;;  %v17216_v63 = vpop.f32.mrb[65].mxu0 }
0x47f3   :  { %v16962_v18 = vadd.f32 %v16961_v37, %v16874_v43 }
0x47f5   :  { %v17043_v16 = vadd.f32 %v17042_v52, %v16962_v18  ;;  %v17243_v52 = vadd.f32 %v17242_v39, %v25998_v25 }
0x47f9   :  { %v17136_v40 = vpop.f32.mrb[54].mxu1 }
0x47fa   :  { %v17137_v29 = vpop.f32.mrb[55].mxu1 }
0x47fb   :  { %v17138_v0 = vadd.f32 %v17137_v29, %v17043_v16 }
0x47fd   :  { %v17217_v30 = vadd.f32 %v17216_v63, %v17138_v0  ;;  %v17798_v0 = vpop.permute.xlu1 %17797 }
0x47fe   :  { %v17445_v36 = vpop.f32.mrb[66].mxu0 }
0x47ff   :  { %v17219_v9 = vadd.f32 %v25639_v14, %v17217_v30  ;;  %v17447_v58 = vpop.f32.mrb[67].mxu0 }
0x4801   :  { %v17236_v1 = vmul.f32 %v25933_v51, %v17219_v9 }
0x4803   :  { %v17237_v13 = vadd.f32 %v17236_v1, %v25936_v62 }
0x4805   :  { %v26007_v35 = vsel %vm4721_vm10, %v17237_v13, %v17243_v52 }
0x4806   :  { %v17614_v43 = vpop.f32.mrb[68].mxu0  ;;  %v17334_v24 = vpop.f32.mrb[56].mxu1 }
0x4807   :  { %v17446_v8 = vadd.f32 %v17445_v36, %v17334_v24  ;;  %v17616_v20 = vpop.f32.mrb[69].mxu0  ;;  %v17336_v3 = vpop.f32.mrb[57].mxu1 }
0x480e   :  { %v17533_v37 = vpop.f32.mrb[58].mxu1  ;;  %v17788_v63 = vpop.f32.mrb[70].mxu0 }
0x480f   :  { %v17534_v50 = vadd.f32 %v17533_v37, %v17446_v8  ;;  %v17535_v14 = vpop.f32.mrb[59].mxu1  ;;  %v17790_v42 = vpop.f32.mrb[71].mxu0 }
0x4811   :  { %v17615_v18 = vadd.f32 %v17614_v43, %v17534_v50 }
0x4816   :  { %v17709_v2 = vpop.f32.mrb[60].mxu1 }
0x4817   :  { %v17710_v51 = vadd.f32 %v17709_v2, %v17615_v18  ;;  %v17711_v10 = vpop.f32.mrb[61].mxu1 }
0x4819   :  { %v17789_v62 = vadd.f32 %v17788_v63, %v17710_v51 }
0x481b   :  { %v17792_v16 = vadd.f32 %v24187_v12, %v17789_v62 }
0x481d   :  { %23738 = vtanh.f32 %v17792_v16 }
0x4827   :  { %v23739_v19 = vpop.eup %23738 }
0x4828   :  { %17802 = vrot.lane.b32.xlu0 %v23739_v19, %s23864_s0  ;;  %v17794_v11 = vmul.f32 0.5, %v23739_v19 }
0x482a   :  { %v17795_v5 = vadd.f32 0.5, %v17794_v11 }
0x482c   :  { %v17800_v46 = vmul.f32 %v17798_v0, %v17795_v5 }
0x489a   :  { %v17803_v40 = vpop.permute.xlu0 %17802 }
0x489b   :  { %v17805_v29 = vmul.f32 %v17803_v40, %v17795_v5 }
0x489d   :  { %17807 = vrot.lane.b32.xlu0 %v17805_v29, %s23865_s4 }
0x490f   :  { %v17808_v30 = vpop.permute.xlu0 %17807 }
0x4910   :  { %v17810_v36 = vadd.f32 %v17808_v30, %v17800_v46 }
0x4912   :  { %23740 = vtanh.f32 %v17810_v36 }
0x491c   :  { %v23741_v9 = vpop.eup %23740 }
0x491d   :  { %17813 = vrot.lane.b32.xlu1 %v23741_v9, %s23864_s0  ;;  %v26088_v9 = vld [vmem:[#allocation2 + $0x68] ss:$0 sm:$0xff] }
0x498f   :  { %v17814_v58 = vpop.permute.xlu1 %17813 }
0x4990   :  { %v17816_v39 = vmul.f32 %v17814_v58, %v17795_v5 }
0x4992   :  { %17818 = vrot.lane.b32.xlu0 %v17816_v39, %s23865_s4 }
0x4a04   :  { %v17819_v1 = vpop.permute.xlu0 %17818 }
0x4a05   :  { %17822 = vst.msk [vmem:[#allocation6 + $0x60] sm:$0xf] %vm1165_vm3, %v17819_v1  ;;  %v17823_v13 = vsel %vm599_vm2, %v17819_v1, 0 }
0x4a06   :  { %v17898_v52 = vand.u32 4294901760, %v17823_v13 }
0x4a08   :  { %v17899_v43 = vsub.f32 %v17823_v13, %v17898_v52 }
0x4a0a   :  { %v17900_v24 = vand.u32 4294901760, %v17899_v43 }
0x4a0c   :  { %v17901_v8 = vsub.f32 %v17899_v43, %v17900_v24 }
0x4a0e   :  { %v17902_v20 = vand.u32 4294901760, %v17901_v8 }
0x4a10   :  { %17903 = vmatmul.mubr.f32.vlgmr.msra.gmra.mrb[62].mxu1 %v17902_v20 }
0x4a11   :  { %22966 = vmatpush1.bf16.msra.mxu1 %v24002_v7  ;;  %18013 = vmatprep.mubr.f32.mxu1 %v26449_v22 }
0x4a12   :  { %22968 = vmatprep.subr.bf16.mxu1 %v24038_v31 }
0x4a15   :  { %22970 = vmatpush1.bf16.msra.mxu1 %v24048_v49 }
0x4a16   :  { %22972 = vmatprep.subr.bf16.mxu1 %v24045_v48 }
0x4a18   :  { %18015 = vmatmul.mubr.f32.vlgmr.msra.gmra.mrb[62].mxu1 %v17898_v52 }
0x4a19   :  { %22974 = vmatpush1.bf16.msra.mxu1 %v24056_v53  ;;  %18101 = vmatprep.mubr.f32.mxu1 %v26449_v22 }
0x4a1a   :  { %22976 = vmatprep.subr.bf16.mxu1 %v24061_v54 }
0x4a1d   :  { %22978 = vmatpush1.bf16.msra.mxu1 %v24071_v56 }
0x4a1e   :  { %22980 = vmatprep.subr.bf16.mxu1 %v23919_v23 }
0x4a20   :  { %18104 = vmatmul.mubr.f32.vlgmr.msra.gmra.mrb[62].mxu1 %v17899_v43 }
0x4a21   :  { %22982 = vmatpush1.bf16.msra.mxu1 %v23913_v17  ;;  %18182 = vmatprep.mubr.f32.mxu1 %v26449_v22 }
0x4a22   :  { %22984 = vmatprep.subr.bf16.mxu1 %v23924_v27 }
0x4a25   :  { %22986 = vmatpush1.bf16.msra.mxu1 %v23928_v28 }
0x4a26   :  { %22988 = vmatprep.subr.bf16.mxu1 %v24092_v57 }
0x4a28   :  { %18186 = vmatmul.mubr.f32.vlgmr.msra.gmra.mrb[62].mxu1 %v17900_v24 }
0x4a29   :  { %22990 = vmatpush1.bf16.msra.mxu1 %v24102_v60  ;;  %18280 = vmatprep.mubr.f32.mxu1 %v26449_v22 }
0x4a2a   :  { %22992 = vmatprep.subr.bf16.mxu1 %v24109_v26 }
0x4a2d   :  { %22994 = vmatpush1.bf16.msra.mxu1 %v24117_v34 }
0x4a2e   :  { %22996 = vmatprep.subr.bf16.mxu1 %v23919_v23 }
0x4a30   :  { %18282 = vmatmul.mubr.f32.vlgmr.msra.gmra.mrb[62].mxu1 %v17898_v52 }
0x4a31   :  { %22998 = vmatpush1.bf16.msra.mxu1 %v23913_v17  ;;  %18360 = vmatprep.mubr.f32.mxu1 %v26449_v22 }
0x4a32   :  { %23000 = vmatprep.subr.bf16.mxu1 %v23924_v27 }
0x4a35   :  { %23002 = vmatpush1.bf16.msra.mxu1 %v23928_v28 }
0x4a36   :  { %23052 = vmatprep.subr.bf16.mxu1 %v23919_v23 }
0x4a38   :  { %18362 = vmatmul.mubr.f32.vlgmr.msra.gmra.mrb[62].mxu1 %v17898_v52 }
0x4a39   :  { %23054 = vmatpush1.bf16.msra.mxu1 %v23913_v17  ;;  %19084 = vmatprep.mubr.f32.mxu1 %v26449_v22 }
0x4a3a   :  { %23056 = vmatprep.subr.bf16.mxu1 %v23924_v27 }
0x4a3d   :  { %23058 = vmatpush1.bf16.msra.mxu1 %v23928_v28 }
0x4a3e   :  { %23060 = vmatprep.subr.bf16.mxu1 %v23997_v4 }
0x4b0b   :  { %v18363_v3 = vpop.f32.mrb[62].mxu1 }
0x4b0c   :  { %v18389_v37 = vadd.f32 %v24187_v12, %v18363_v3  ;;  %v26047_v63 = vpop.f32.mrb[63].mxu1 }
0x4b0d   :  { %v26092_v58 = vadd.f32 %v26088_v9, %v26047_v63 }
0x4b0e   :  { %23742 = vtanh.f32 %v18389_v37 }
0x4b0f   :  { %v21427_v39 = vmul.f32 -1.442695, %v26092_v58 }
0x4b18   :  { %v23743_v50 = vpop.eup %23742 }
0x4b19   :  { %18395 = vrot.lane.b32.xlu1 %v23743_v50, %s23864_s0  ;;  %v18391_v14 = vmul.f32 0.5, %v23743_v50 }
0x4b1b   :  { %v18392_v42 = vadd.f32 0.5, %v18391_v14 }
0x4b1d   :  { %v18393_v51 = vmul.f32 %v18392_v42, %v17810_v36 }
0x4b8b   :  { %v18396_v18 = vpop.permute.xlu1 %18395 }
0x4b8c   :  { %v18398_v2 = vmul.f32 %v18396_v18, %v18392_v42 }
0x4b8e   :  { %18400 = vrot.lane.b32.xlu0 %v18398_v2, %s23865_s4 }
0x4c00   :  { %v18401_v10 = vpop.permute.xlu0 %18400 }
0x4c01   :  { %v26051_v62 = vadd.f32 %v18401_v10, %v18393_v51 }
0x4c03   :  { %23744 = vtanh.f32 %v26051_v62 }
0x4c04   :  { %23746 = vpow2.f32 %v21427_v39 }
0x4c0d   :  { %v23745_v16 = vpop.eup %23744 }
0x4c0e   :  { %18406 = vrot.lane.b32.xlu1 %v23745_v16, %s23864_s0  ;;  %v23747_v8 = vpop.eup %23746 }
0x4c0f   :  { %v18372_v20 = vadd.f32 1.0, %v23747_v8 }
0x4c80   :  { %v18407_v19 = vpop.permute.xlu1 %18406 }
0x4c81   :  { %v18409_v11 = vmul.f32 %v18407_v19, %v18392_v42 }
0x4c83   :  { %18411 = vrot.lane.b32.xlu0 %v18409_v11, %s23865_s4 }
0x4cf5   :  { %v18412_v5 = vpop.permute.xlu0 %18411 }
0x4cf6   :  { %18415 = vst.msk [vmem:[#allocation6 + $0x64] sm:$0xf] %vm1165_vm3, %v18412_v5  ;;  %v18416_v40 = vsel %vm599_vm2, %v18412_v5, 0 }
0x4cf7   :  { %v18491_v29 = vand.u32 4294901760, %v18416_v40 }
0x4cf9   :  { %v18492_v0 = vsub.f32 %v18416_v40, %v18491_v29 }
0x4cfb   :  { %v18493_v46 = vand.u32 4294901760, %v18492_v0 }
0x4cfd   :  { %v18494_v30 = vsub.f32 %v18492_v0, %v18493_v46 }
0x4cff   :  { %v18495_v36 = vand.u32 4294901760, %v18494_v30 }
0x4d01   :  { %18496 = vmatmul.mubr.f32.vlgmr.msra.gmra.mrb[72].mxu0 %v18495_v36 }
0x4d02   :  { %23014 = vmatpush1.bf16.msra.mxu0 %v24002_v7  ;;  %18606 = vmatprep.mubr.f32.mxu0 %v26449_v22 }
0x4d03   :  { %23016 = vmatprep.subr.bf16.mxu0 %v24038_v31 }
0x4d06   :  { %23018 = vmatpush1.bf16.msra.mxu0 %v24048_v49 }
0x4d07   :  { %23020 = vmatprep.subr.bf16.mxu0 %v24045_v48 }
0x4d09   :  { %18608 = vmatmul.mubr.f32.vlgmr.msra.gmra.mrb[72].mxu0 %v18491_v29 }
0x4d0a   :  { %23022 = vmatpush1.bf16.msra.mxu0 %v24056_v53  ;;  %18694 = vmatprep.mubr.f32.mxu0 %v26449_v22 }
0x4d0b   :  { %23024 = vmatprep.subr.bf16.mxu0 %v24061_v54 }
0x4d0e   :  { %23026 = vmatpush1.bf16.msra.mxu0 %v24071_v56 }
0x4d0f   :  { %23028 = vmatprep.subr.bf16.mxu0 %v23919_v23 }
0x4d11   :  { %18697 = vmatmul.mubr.f32.vlgmr.msra.gmra.mrb[72].mxu0 %v18492_v0 }
0x4d12   :  { %23030 = vmatpush1.bf16.msra.mxu0 %v23913_v17  ;;  %18775 = vmatprep.mubr.f32.mxu0 %v26449_v22 }
0x4d13   :  { %23032 = vmatprep.subr.bf16.mxu0 %v23924_v27 }
0x4d16   :  { %23034 = vmatpush1.bf16.msra.mxu0 %v23928_v28 }
0x4d17   :  { %23036 = vmatprep.subr.bf16.mxu0 %v24092_v57 }
0x4d19   :  { %18779 = vmatmul.mubr.f32.vlgmr.msra.gmra.mrb[72].mxu0 %v18493_v46 }
0x4d1a   :  { %23038 = vmatpush1.bf16.msra.mxu0 %v24102_v60  ;;  %18873 = vmatprep.mubr.f32.mxu0 %v26449_v22 }
0x4d1b   :  { %23040 = vmatprep.subr.bf16.mxu0 %v24109_v26 }
0x4d1e   :  { %23042 = vmatpush1.bf16.msra.mxu0 %v24117_v34 }
0x4d1f   :  { %23044 = vmatprep.subr.bf16.mxu0 %v23919_v23 }
0x4d21   :  { %18875 = vmatmul.mubr.f32.vlgmr.msra.gmra.mrb[72].mxu0 %v18491_v29 }
0x4d22   :  { %23046 = vmatpush1.bf16.msra.mxu0 %v23913_v17  ;;  %18953 = vmatprep.mubr.f32.mxu0 %v26449_v22 }
0x4d23   :  { %23048 = vmatprep.subr.bf16.mxu0 %v23924_v27 }
0x4d26   :  { %23050 = vmatpush1.bf16.msra.mxu0 %v23928_v28 }
0x4d27   :  { %23100 = vmatprep.subr.bf16.mxu0 %v23919_v23 }
0x4d29   :  { %18955 = vmatmul.mubr.f32.vlgmr.msra.gmra.mrb[72].mxu0 %v18491_v29 }
0x4d2a   :  { %23102 = vmatpush1.bf16.msra.mxu0 %v23913_v17  ;;  %19678 = vmatprep.mubr.f32.mxu0 %v26449_v22 }
0x4d2b   :  { %23104 = vmatprep.subr.bf16.mxu0 %v23924_v27 }
0x4d2e   :  { %23106 = vmatpush1.bf16.msra.mxu0 %v23928_v28 }
0x4d2f   :  { %23108 = vmatprep.subr.bf16.mxu0 %v23997_v4 }
0x4dfc   :  { %v18956_v1 = vpop.f32.mrb[72].mxu0 }
0x4dfd   :  { %v18983_v13 = vadd.f32 %v24187_v12, %v18956_v1  ;;  %v18958_v52 = vpop.f32.mrb[73].mxu0 }
0x4dfe   :  { %v26097_v43 = vadd.f32 %v26088_v9, %v18958_v52 }
0x4dff   :  { %23748 = vtanh.f32 %v18983_v13 }
0x4e00   :  { %v21429_v24 = vmul.f32 -1.442695, %v26097_v43 }
0x4e02   :  { %23750 = vpow2.f32 %v21429_v24 }
0x4e03   :  { %23752 = vrcp.f32 %v18372_v20 }
0x4e09   :  { %v23749_v3 = vpop.eup %23748 }
0x4e0a   :  { %18989 = vrot.lane.b32.xlu1 %v23749_v3, %s23864_s0  ;;  %v18985_v16 = vmul.f32 0.5, %v23749_v3 }
0x4e0c   :  { %v23751_v37 = vpop.eup %23750  ;;  %v18986_v19 = vadd.f32 0.5, %v18985_v16 }
0x4e0d   :  { %v18965_v63 = vadd.f32 1.0, %v23751_v37  ;;  %v23753_v50 = vpop.eup %23752 }
0x4e0e   :  { %v26101_v14 = vmin.f32 %v23753_v50, 1.0  ;;  %v18987_v40 = vmul.f32 %v18986_v19, %v26051_v62 }
0x4e0f   :  { %23754 = vrcp.f32 %v18965_v63 }
0x4e10   :  { %vm18384_vm0 = vcmp.lt.f32.partialorder %v26101_v14, 1.0 }
0x4e11   :  { %v18388_v51 = vsel %vm18384_vm0, %v26101_v14, 0.0 }
0x4e19   :  { %v23755_v42 = vpop.eup %23754 }
0x4e1a   :  { %v26103_v18 = vadd.f32 %v23755_v42, %v23753_v50 }
0x4e1c   :  { %v26107_v2 = vmin.f32 %v26103_v18, 1.0 }
0x4e1e   :  { %vm18978_vm1 = vcmp.lt.f32.partialorder %v26107_v2, 1.0 }
0x4e1f   :  { %v26116_v10 = vsel %vm18978_vm1, %v26107_v2, %v18388_v51 }
0x4e7c   :  { %v18990_v11 = vpop.permute.xlu1 %18989 }
0x4e7d   :  { %v18992_v5 = vmul.f32 %v18990_v11, %v18986_v19 }
0x4e7f   :  { %18994 = vrot.lane.b32.xlu0 %v18992_v5, %s23865_s4 }
0x4ef1   :  { %v18995_v29 = vpop.permute.xlu0 %18994 }
0x4ef2   :  { %v26120_v0 = vadd.f32 %v18995_v29, %v18987_v40 }
0x4ef4   :  { %23756 = vtanh.f32 %v26120_v0 }
0x4efe   :  { %v23757_v46 = vpop.eup %23756 }
0x4eff   :  { %19000 = vrot.lane.b32.xlu1 %v23757_v46, %s23864_s0 }
0x4f71   :  { %v19001_v30 = vpop.permute.xlu1 %19000 }
0x4f72   :  { %v19003_v36 = vmul.f32 %v19001_v30, %v18986_v19 }
0x4f74   :  { %19005 = vrot.lane.b32.xlu0 %v19003_v36, %s23865_s4 }
0x4fe6   :  { %v19006_v39 = vpop.permute.xlu0 %19005 }
0x4fe7   :  { %19009 = vst.msk [vmem:[#allocation6 + $0x68] sm:$0xf] %vm1165_vm3, %v19006_v39  ;;  %v19010_v1 = vsel %vm599_vm2, %v19006_v39, 0 }
0x4fe8   :  { %v19085_v13 = vand.u32 4294901760, %v19010_v1 }
0x4fea   :  { %v19086_v52 = vsub.f32 %v19010_v1, %v19085_v13 }
0x4fec   :  { %v19087_v62 = vand.u32 4294901760, %v19086_v52 }
0x4fee   :  { %v19088_v24 = vsub.f32 %v19086_v52, %v19087_v62 }
0x4ff0   :  { %v19089_v8 = vand.u32 4294901760, %v19088_v24 }
0x4ff2   :  { %19090 = vmatmul.mubr.f32.vlgmr.msra.gmra.mrb[64].mxu1 %v19089_v8 }
0x4ff3   :  { %23062 = vmatpush1.bf16.msra.mxu1 %v24002_v7  ;;  %19200 = vmatprep.mubr.f32.mxu1 %v26449_v22 }
0x4ff4   :  { %23064 = vmatprep.subr.bf16.mxu1 %v24038_v31 }
0x4ff7   :  { %23066 = vmatpush1.bf16.msra.mxu1 %v24048_v49 }
0x4ff8   :  { %23068 = vmatprep.subr.bf16.mxu1 %v24045_v48 }
0x4ffa   :  { %19202 = vmatmul.mubr.f32.vlgmr.msra.gmra.mrb[64].mxu1 %v19085_v13 }
0x4ffb   :  { %23070 = vmatpush1.bf16.msra.mxu1 %v24056_v53  ;;  %19288 = vmatprep.mubr.f32.mxu1 %v26449_v22 }
0x4ffc   :  { %23072 = vmatprep.subr.bf16.mxu1 %v24061_v54 }
0x4fff   :  { %23074 = vmatpush1.bf16.msra.mxu1 %v24071_v56 }
0x5000   :  { %23076 = vmatprep.subr.bf16.mxu1 %v23919_v23 }
0x5002   :  { %19291 = vmatmul.mubr.f32.vlgmr.msra.gmra.mrb[64].mxu1 %v19086_v52 }
0x5003   :  { %23078 = vmatpush1.bf16.msra.mxu1 %v23913_v17  ;;  %19369 = vmatprep.mubr.f32.mxu1 %v26449_v22 }
0x5004   :  { %23080 = vmatprep.subr.bf16.mxu1 %v23924_v27 }
0x5007   :  { %23082 = vmatpush1.bf16.msra.mxu1 %v23928_v28 }
0x5008   :  { %23084 = vmatprep.subr.bf16.mxu1 %v24092_v57 }
0x500a   :  { %19373 = vmatmul.mubr.f32.vlgmr.msra.gmra.mrb[64].mxu1 %v19087_v62 }
0x500b   :  { %23086 = vmatpush1.bf16.msra.mxu1 %v24102_v60  ;;  %19467 = vmatprep.mubr.f32.mxu1 %v26449_v22 }
0x500c   :  { %23088 = vmatprep.subr.bf16.mxu1 %v24109_v26 }
0x500f   :  { %23090 = vmatpush1.bf16.msra.mxu1 %v24117_v34 }
0x5010   :  { %23092 = vmatprep.subr.bf16.mxu1 %v23919_v23 }
0x5012   :  { %19469 = vmatmul.mubr.f32.vlgmr.msra.gmra.mrb[64].mxu1 %v19085_v13 }
0x5013   :  { %23094 = vmatpush1.bf16.msra.mxu1 %v23913_v17  ;;  %19547 = vmatprep.mubr.f32.mxu1 %v26449_v22 }
0x5014   :  { %23096 = vmatprep.subr.bf16.mxu1 %v23924_v27 }
0x5017   :  { %23098 = vmatpush1.bf16.msra.mxu1 %v23928_v28 }
0x5018   :  { %23148 = vmatprep.subr.bf16.mxu1 %v23919_v23 }
0x501a   :  { %19549 = vmatmul.mubr.f32.vlgmr.msra.gmra.mrb[64].mxu1 %v19085_v13 }
0x501b   :  { %23150 = vmatpush1.bf16.msra.mxu1 %v23913_v17  ;;  %20272 = vmatprep.mubr.f32.mxu1 %v26449_v22 }
0x501c   :  { %23152 = vmatprep.subr.bf16.mxu1 %v23924_v27 }
0x501f   :  { %23154 = vmatpush1.bf16.msra.mxu1 %v23928_v28 }
0x5020   :  { %23156 = vmatprep.subr.bf16.mxu1 %v23997_v4 }
0x50ed   :  { %v19550_v20 = vpop.f32.mrb[64].mxu1 }
0x50ee   :  { %v19577_v3 = vadd.f32 %v24187_v12, %v19550_v20  ;;  %v19552_v37 = vpop.f32.mrb[65].mxu1 }
0x50ef   :  { %v26159_v63 = vadd.f32 %v26088_v9, %v19552_v37 }
0x50f0   :  { %23758 = vtanh.f32 %v19577_v3 }
0x50f1   :  { %v21431_v50 = vmul.f32 -1.442695, %v26159_v63 }
0x50f3   :  { %23760 = vpow2.f32 %v21431_v50 }
0x50fa   :  { %v23759_v42 = vpop.eup %23758 }
0x50fb   :  { %19583 = vrot.lane.b32.xlu1 %v23759_v42, %s23864_s0  ;;  %v19579_v29 = vmul.f32 0.5, %v23759_v42 }
0x50fd   :  { %v23761_v51 = vpop.eup %23760  ;;  %v19580_v46 = vadd.f32 0.5, %v19579_v29 }
0x50fe   :  { %v19559_v16 = vadd.f32 1.0, %v23761_v51 }
0x5100   :  { %23762 = vrcp.f32 %v19559_v16 }
0x510a   :  { %v23763_v19 = vpop.eup %23762 }
0x510b   :  { %v26164_v11 = vadd.f32 %v23763_v19, %v26103_v18  ;;  %v19581_v18 = vmul.f32 %v19580_v46, %v26120_v0 }
0x510d   :  { %v26167_v5 = vmin.f32 %v26164_v11, 1.0 }
0x510f   :  { %vm19572_vm4 = vcmp.lt.f32.partialorder %v26167_v5, 1.0 }
0x5110   :  { %v26174_v40 = vsel %vm19572_vm4, %v26167_v5, %v26116_v10 }
0x516d   :  { %v19584_v30 = vpop.permute.xlu1 %19583 }
0x516e   :  { %v19586_v36 = vmul.f32 %v19584_v30, %v19580_v46 }
0x5170   :  { %19588 = vrot.lane.b32.xlu0 %v19586_v36, %s23865_s4 }
0x51e2   :  { %v19589_v39 = vpop.permute.xlu0 %19588 }
0x51e3   :  { %v26178_v1 = vadd.f32 %v19589_v39, %v19581_v18 }
0x51e5   :  { %23764 = vtanh.f32 %v26178_v1 }
0x51ef   :  { %v23765_v13 = vpop.eup %23764 }
0x51f0   :  { %19594 = vrot.lane.b32.xlu1 %v23765_v13, %s23864_s0 }
0x5262   :  { %v19595_v52 = vpop.permute.xlu1 %19594 }
0x5263   :  { %v19597_v62 = vmul.f32 %v19595_v52, %v19580_v46 }
0x5265   :  { %19599 = vrot.lane.b32.xlu0 %v19597_v62, %s23865_s4 }
0x52d7   :  { %v19600_v10 = vpop.permute.xlu0 %19599 }
0x52d8   :  { %19603 = vst.msk [vmem:[#allocation6 + $0x6c] sm:$0xf] %vm1165_vm3, %v19600_v10  ;;  %v19604_v24 = vsel %vm599_vm2, %v19600_v10, 0 }
0x52d9   :  { %v19679_v8 = vand.u32 4294901760, %v19604_v24 }
0x52db   :  { %v19680_v20 = vsub.f32 %v19604_v24, %v19679_v8 }
0x52dd   :  { %v19681_v0 = vand.u32 4294901760, %v19680_v20 }
0x52df   :  { %v19682_v3 = vsub.f32 %v19680_v20, %v19681_v0 }
0x52e1   :  { %v19683_v37 = vand.u32 4294901760, %v19682_v3 }
0x52e3   :  { %19684 = vmatmul.mubr.f32.vlgmr.msra.gmra.mrb[74].mxu0 %v19683_v37 }
0x52e4   :  { %23110 = vmatpush1.bf16.msra.mxu0 %v24002_v7  ;;  %19794 = vmatprep.mubr.f32.mxu0 %v26449_v22 }
0x52e5   :  { %23112 = vmatprep.subr.bf16.mxu0 %v24038_v31 }
0x52e8   :  { %23114 = vmatpush1.bf16.msra.mxu0 %v24048_v49 }
0x52e9   :  { %23116 = vmatprep.subr.bf16.mxu0 %v24045_v48 }
0x52eb   :  { %19796 = vmatmul.mubr.f32.vlgmr.msra.gmra.mrb[74].mxu0 %v19679_v8 }
0x52ec   :  { %23118 = vmatpush1.bf16.msra.mxu0 %v24056_v53  ;;  %19882 = vmatprep.mubr.f32.mxu0 %v26449_v22 }
0x52ed   :  { %23120 = vmatprep.subr.bf16.mxu0 %v24061_v54 }
0x52f0   :  { %23122 = vmatpush1.bf16.msra.mxu0 %v24071_v56 }
0x52f1   :  { %23124 = vmatprep.subr.bf16.mxu0 %v23919_v23 }
0x52f3   :  { %19885 = vmatmul.mubr.f32.vlgmr.msra.gmra.mrb[74].mxu0 %v19680_v20 }
0x52f4   :  { %23126 = vmatpush1.bf16.msra.mxu0 %v23913_v17  ;;  %19963 = vmatprep.mubr.f32.mxu0 %v26449_v22 }
0x52f5   :  { %23128 = vmatprep.subr.bf16.mxu0 %v23924_v27 }
0x52f8   :  { %23130 = vmatpush1.bf16.msra.mxu0 %v23928_v28 }
0x52f9   :  { %23132 = vmatprep.subr.bf16.mxu0 %v24092_v57 }
0x52fb   :  { %19967 = vmatmul.mubr.f32.vlgmr.msra.gmra.mrb[74].mxu0 %v19681_v0 }
0x52fc   :  { %23134 = vmatpush1.bf16.msra.mxu0 %v24102_v60  ;;  %20061 = vmatprep.mubr.f32.mxu0 %v26449_v22 }
0x52fd   :  { %23136 = vmatprep.subr.bf16.mxu0 %v24109_v26 }
0x5300   :  { %23138 = vmatpush1.bf16.msra.mxu0 %v24117_v34 }
0x5301   :  { %23140 = vmatprep.subr.bf16.mxu0 %v23919_v23 }
0x5303   :  { %20063 = vmatmul.mubr.f32.vlgmr.msra.gmra.mrb[74].mxu0 %v19679_v8 }
0x5304   :  { %23142 = vmatpush1.bf16.msra.mxu0 %v23913_v17  ;;  %20141 = vmatprep.mubr.f32.mxu0 %v26449_v22 }
0x5305   :  { %23144 = vmatprep.subr.bf16.mxu0 %v23924_v27 }
0x5308   :  { %23146 = vmatpush1.bf16.msra.mxu0 %v23928_v28 }
0x5309   :  { %23196 = vmatprep.subr.bf16.mxu0 %v23919_v23 }
0x530b   :  { %20143 = vmatmul.mubr.f32.vlgmr.msra.gmra.mrb[74].mxu0 %v19679_v8 }
0x530c   :  { %23198 = vmatpush1.bf16.msra.mxu0 %v23913_v17  ;;  %20866 = vmatprep.mubr.f32.mxu0 %v26449_v22 }
0x530d   :  { %23200 = vmatprep.subr.bf16.mxu0 %v23924_v27 }
0x5310   :  { %23202 = vmatpush1.bf16.msra.mxu0 %v23928_v28 }
0x5311   :  { %23204 = vmatprep.subr.bf16.mxu0 %v23997_v4 }
0x53de   :  { %v20144_v50 = vpop.f32.mrb[74].mxu0 }
0x53df   :  { %v20171_v42 = vadd.f32 %v24187_v12, %v20144_v50  ;;  %v20146_v51 = vpop.f32.mrb[75].mxu0 }
0x53e0   :  { %v26217_v16 = vadd.f32 %v26088_v9, %v20146_v51 }
0x53e1   :  { %23766 = vtanh.f32 %v20171_v42 }
0x53e2   :  { %v21433_v19 = vmul.f32 -1.442695, %v26217_v16 }
0x53e4   :  { %23768 = vpow2.f32 %v21433_v19 }
0x53eb   :  { %v23767_v29 = vpop.eup %23766 }
0x53ec   :  { %20177 = vrot.lane.b32.xlu1 %v23767_v29, %s23864_s0  ;;  %v20173_v13 = vmul.f32 0.5, %v23767_v29 }
0x53ee   :  { %v23769_v46 = vpop.eup %23768  ;;  %v20174_v52 = vadd.f32 0.5, %v20173_v13 }
0x53ef   :  { %v20153_v30 = vadd.f32 1.0, %v23769_v46 }
0x53f1   :  { %23770 = vrcp.f32 %v20153_v30 }
0x53fb   :  { %v23771_v36 = vpop.eup %23770 }
0x53fc   :  { %v26222_v4 = vadd.f32 %v23771_v36, %v26164_v11  ;;  %v20175_v11 = vmul.f32 %v20174_v52, %v26178_v1 }
0x53fe   :  { %v26225_v18 = vmin.f32 %v26222_v4, 1.0 }
0x5400   :  { %vm20166_vm5 = vcmp.lt.f32.partialorder %v26225_v18, 1.0 }
0x5401   :  { %v26232_v39 = vsel %vm20166_vm5, %v26225_v18, %v26174_v40 }
0x545e   :  { %v20178_v62 = vpop.permute.xlu1 %20177 }
0x545f   :  { %v20180_v10 = vmul.f32 %v20178_v62, %v20174_v52 }
0x5461   :  { %20182 = vrot.lane.b32.xlu0 %v20180_v10, %s23865_s4 }
0x54d3   :  { %v20183_v24 = vpop.permute.xlu0 %20182 }
0x54d4   :  { %v26236_v8 = vadd.f32 %v20183_v24, %v20175_v11 }
0x54d6   :  { %23772 = vtanh.f32 %v26236_v8 }
0x54e0   :  { %v23773_v20 = vpop.eup %23772 }
0x54e1   :  { %20188 = vrot.lane.b32.xlu1 %v23773_v20, %s23864_s0 }
0x5553   :  { %v20189_v0 = vpop.permute.xlu1 %20188 }
0x5554   :  { %v20191_v3 = vmul.f32 %v20189_v0, %v20174_v52 }
0x5556   :  { %20193 = vrot.lane.b32.xlu0 %v20191_v3, %s23865_s4 }
0x55c8   :  { %v20194_v40 = vpop.permute.xlu0 %20193 }
0x55c9   :  { %20197 = vst.msk [vmem:[#allocation6 + $0x70] sm:$0xf] %vm1165_vm3, %v20194_v40  ;;  %v20198_v37 = vsel %vm599_vm2, %v20194_v40, 0 }
0x55ca   :  { %v20273_v50 = vand.u32 4294901760, %v20198_v37 }
0x55cc   :  { %v20274_v42 = vsub.f32 %v20198_v37, %v20273_v50 }
0x55ce   :  { %v20275_v1 = vand.u32 4294901760, %v20274_v42 }
0x55d0   :  { %v20276_v51 = vsub.f32 %v20274_v42, %v20275_v1 }
0x55d2   :  { %v20277_v19 = vand.u32 4294901760, %v20276_v51 }
0x55d4   :  { %20278 = vmatmul.mubr.f32.vlgmr.msra.gmra.mrb[66].mxu1 %v20277_v19  ;;  %v21430_v19 = vsel %vm18978_vm1, 1.0, %v26449_v22 }
0x55d5   :  { %23158 = vmatpush1.bf16.msra.mxu1 %v24002_v7  ;;  %20388 = vmatprep.mubr.f32.mxu1 %v26449_v22 }
0x55d6   :  { %23160 = vmatprep.subr.bf16.mxu1 %v24038_v31 }
0x55d9   :  { %23162 = vmatpush1.bf16.msra.mxu1 %v24048_v49 }
0x55da   :  { %23164 = vmatprep.subr.bf16.mxu1 %v24045_v48 }
0x55dc   :  { %20390 = vmatmul.mubr.f32.vlgmr.msra.gmra.mrb[66].mxu1 %v20273_v50 }
0x55dd   :  { %23166 = vmatpush1.bf16.msra.mxu1 %v24056_v53  ;;  %20476 = vmatprep.mubr.f32.mxu1 %v26449_v22 }
0x55de   :  { %23168 = vmatprep.subr.bf16.mxu1 %v24061_v54 }
0x55e1   :  { %23170 = vmatpush1.bf16.msra.mxu1 %v24071_v56 }
0x55e2   :  { %23172 = vmatprep.subr.bf16.mxu1 %v23919_v23 }
0x55e4   :  { %20479 = vmatmul.mubr.f32.vlgmr.msra.gmra.mrb[66].mxu1 %v20274_v42 }
0x55e5   :  { %23174 = vmatpush1.bf16.msra.mxu1 %v23913_v17  ;;  %20557 = vmatprep.mubr.f32.mxu1 %v26449_v22 }
0x55e6   :  { %23176 = vmatprep.subr.bf16.mxu1 %v23924_v27 }
0x55e9   :  { %23178 = vmatpush1.bf16.msra.mxu1 %v23928_v28 }
0x55ea   :  { %23180 = vmatprep.subr.bf16.mxu1 %v24092_v57 }
0x55ec   :  { %20561 = vmatmul.mubr.f32.vlgmr.msra.gmra.mrb[66].mxu1 %v20275_v1 }
0x55ed   :  { %23182 = vmatpush1.bf16.msra.mxu1 %v24102_v60  ;;  %20655 = vmatprep.mubr.f32.mxu1 %v26449_v22 }
0x55ee   :  { %23184 = vmatprep.subr.bf16.mxu1 %v24109_v26 }
0x55f1   :  { %23186 = vmatpush1.bf16.msra.mxu1 %v24117_v34 }
0x55f2   :  { %23188 = vmatprep.subr.bf16.mxu1 %v23919_v23 }
0x55f4   :  { %20657 = vmatmul.mubr.f32.vlgmr.msra.gmra.mrb[66].mxu1 %v20273_v50 }
0x55f5   :  { %23190 = vmatpush1.bf16.msra.mxu1 %v23913_v17  ;;  %20735 = vmatprep.mubr.f32.mxu1 %v26449_v22 }
0x55f6   :  { %23192 = vmatprep.subr.bf16.mxu1 %v23924_v27 }
0x55f9   :  { %23194 = vmatpush1.bf16.msra.mxu1 %v23928_v28 }
0x55fc   :  { %20737 = vmatmul.mubr.f32.vlgmr.msra.gmra.mrb[66].mxu1 %v20273_v50 }
0x56cf   :  { %v20738_v29 = vpop.f32.mrb[66].mxu1 }
0x56d0   :  { %v20765_v46 = vadd.f32 %v24187_v12, %v20738_v29  ;;  %v20740_v30 = vpop.f32.mrb[67].mxu1  ;;  %v21432_v29 = vsel %vm19572_vm4, 1.0, %v26449_v22 }
0x56d1   :  { %v26269_v36 = vadd.f32 %v26088_v9, %v20740_v30  ;;  %v21434_v30 = vsel %vm20166_vm5, 1.0, %v26449_v22 }
0x56d2   :  { %23774 = vtanh.f32 %v20765_v46 }
0x56d3   :  { %v21435_v13 = vmul.f32 -1.442695, %v26269_v36 }
0x56d5   :  { %23776 = vpow2.f32 %v21435_v13 }
0x56dc   :  { %v23775_v52 = vpop.eup %23774 }
0x56dd   :  { %20771 = vrot.lane.b32.xlu1 %v23775_v52, %s23864_s0  ;;  %v20767_v0 = vmul.f32 0.5, %v23775_v52 }
0x56df   :  { %v23777_v62 = vpop.eup %23776  ;;  %v20768_v3 = vadd.f32 0.5, %v20767_v0 }
0x56e0   :  { %v20747_v10 = vadd.f32 1.0, %v23777_v62 }
0x56e1   :  { %v20769_v50 = vmul.f32 %v20768_v3, %v26236_v8  ;;  %v21428_v8 = vsel %vm18384_vm0, 1.0, %v26449_v22 }
0x56e2   :  { %23778 = vrcp.f32 %v20747_v10  ;;  %v18981_v46 = vadd.f32 %v21430_v19, %v21428_v8 }
0x56e4   :  { %v19575_v13 = vadd.f32 %v21432_v29, %v18981_v46 }
0x56e6   :  { %v20169_v62 = vadd.f32 %v21434_v30, %v19575_v13 }
0x56ec   :  { %v23779_v11 = vpop.eup %23778 }
0x56ed   :  { %v20750_v24 = vadd.f32 %v23779_v11, %v26222_v4  ;;  %v19564_v4 = vsub.f32 %v26167_v5, %v26107_v2 }
0x56ef   :  { %v20751_v20 = vmin.f32 %v20750_v24, 1.0 }
0x56f1   :  { %vm20760_vm6 = vcmp.lt.f32.partialorder %v20751_v20, 1.0 }
0x56f2   :  { %v26276_v12 = vsel %vm20760_vm6, %v20751_v20, %v26232_v39  ;;  %v20752_v39 = vsub.f32 %v20751_v20, %v26225_v18  ;;  %v21436_v52 = vsel %vm20760_vm6, 1.0, %v26449_v22 }
0x56f3   :  { %v26301_v10 = vadd.f32 %v21436_v52, %v20169_v62 }
0x574f   :  { %v20772_v40 = vpop.permute.xlu1 %20771 }
0x5750   :  { %v20774_v37 = vmul.f32 %v20772_v40, %v20768_v3 }
0x5752   :  { %20776 = vrot.lane.b32.xlu0 %v20774_v37, %s23865_s4 }
0x57c4   :  { %v20777_v42 = vpop.permute.xlu0 %20776 }
0x57c5   :  { %v20779_v1 = vadd.f32 %v20777_v42, %v20769_v50 }
0x57c7   :  { %23780 = vtanh.f32 %v20779_v1 }
0x57d1   :  { %v23781_v51 = vpop.eup %23780 }
0x57d2   :  { %20782 = vrot.lane.b32.xlu1 %v23781_v51, %s23864_s0 }
0x57d6   :  { %18379 = vperm.xlu1 %23561, %v26101_v14  }
0x57da   :  { %19567 = vperm.xlu1 %23561, %v19564_v4  }
0x57de   :  { %20755 = vperm.xlu1 %23561, %v20752_v39  }
0x57e2   :  { %4718 = vrot.lane.b32.xlu1 %v24624_v38, %s23868_s6 }
0x57e6   :  { %13046 = vrot.lane.b32.xlu1 %v25553_v6, %s23868_s6 }
0x57ea   :  { %21347 = vrot.lane.b32.xlu1 %v26301_v10, %s23868_s6 }
0x57ee   :  { %5907 = vrot.lane.b32.xlu1 %v24705_v41, %s23865_s4  ;;  %v18970_v41 = vsub.f32 %v26107_v2, %v26101_v14  ;;  %v26451_v2 = vld [vmem:[#allocation11_spill] sm:$0xff] }
0x57f2   :  { %7127 = vrot.lane.b32.xlu1 %v24842_v32, %s23865_s4  ;;  %v20158_v32 = vsub.f32 %v26225_v18, %v26167_v5  ;;  %v26452_v5 = vld [vmem:[#allocation12_spill] sm:$0xff] }
0x57f6   :  { %8347 = vrot.lane.b32.xlu1 %v24973_v59, %s23865_s4  ;;  %v21332_v59 = vsub.f32 1.0, %v20751_v20 }
0x57fa   :  { %14232 = vrot.lane.b32.xlu1 %v25601_v45, %s23865_s4 }
0x57fe   :  { %15452 = vrot.lane.b32.xlu1 %v25738_v21, %s23865_s4 }
0x5802   :  { %16672 = vrot.lane.b32.xlu1 %v25869_v47, %s23865_s4 }
0x5844   :  { %v20783_v38 = vpop.permute.xlu1 %20782 }
0x5845   :  { %v20785_v6 = vmul.f32 %v20783_v38, %v20768_v3 }
0x5847   :  { %20787 = vrot.lane.b32.xlu0 %v20785_v6, %s23865_s4 }
0x584b   :  { %18973 = vperm.xlu0 %23560, %v18970_v41  }
0x584f   :  { %20161 = vperm.xlu0 %23560, %v20158_v32  }
0x5853   :  { %21335 = vperm.xlu0 %23560, %v21332_v59  }
0x5855   :  { %v18380_v45 = vpop.permute.xlu1 %18379 }
0x5856   :  { %v18382_v19 = vmul.f32 %v18380_v45, %v26092_v58 }
0x5857   :  { %8920 = vrot.lane.b32.xlu0 %v25102_v33, %s23868_s6 }
0x5859   :  { %v19568_v21 = vpop.permute.xlu1 %19567 }
0x585a   :  { %v19570_v29 = vmul.f32 %v19568_v21, %v26159_v63  ;;  %v26455_v63 = vld [vmem:[#allocation14_spill] sm:$0xff] }
0x585b   :  { %17245 = vrot.lane.b32.xlu0 %v25998_v25, %s23868_s6  ;;  %v26453_v25 = vld [vmem:[#allocation13_spill] sm:$0xff] }
0x585d   :  { %v20756_v47 = vpop.permute.xlu1 %20755 }
0x585f   :  { %5297 = vrot.lane.b32.xlu0 %v24657_v61, %s23865_s4 }
0x5861   :  { %v4719_v14 = vpop.permute.xlu1 %4718 }
0x5862   :  { %v4724_v11 = vsel %vm4723_vm7, %v26451_v2, %v4719_v14 }
0x5863   :  { %4726 = vst.msk [vmem:[#allocation5] sm:$0xf] %vm4725_vm8, %v4724_v11  ;;  %6517 = vrot.lane.b32.xlu0 %v26452_v5, %s23865_s4 }
0x5865   :  { %v13047_v18 = vpop.permute.xlu1 %13046 }
0x5866   :  { %v13050_v33 = vsel %vm4723_vm7, %v25572_v44, %v13047_v18  ;;  %v26454_v44 = vld [vmem:[#allocation15_spill] sm:$0xff] }
0x5867   :  { %13052 = vst.msk [vmem:[#allocation5 + $0x8] sm:$0xf] %vm4725_vm8, %v13050_v33  ;;  %7737 = vrot.lane.b32.xlu0 %v26453_v25, %s23865_s4 }
0x5869   :  { %v26335_v61 = vpop.permute.xlu1 %21347 }
0x586b   :  { %13623 = vrot.lane.b32.xlu0 %v25525_v55, %s23865_s4 }
0x586d   :  { %v5908_v24 = vpop.permute.xlu1 %5907 }
0x586e   :  { %5911 = vst.msk [vmem:[#allocation6 + $0x18] sm:$0xf0] %vm5301_vm9, %v5908_v24 }
0x586f   :  { %14842 = vrot.lane.b32.xlu0 %v25675_v15, %s23865_s4 }
0x5871   :  { %v7128_v20 = vpop.permute.xlu1 %7127 }
0x5872   :  { %7131 = vst.msk [vmem:[#allocation6 + $0x20] sm:$0xf0] %vm5301_vm9, %v7128_v20 }
0x5873   :  { %16062 = vrot.lane.b32.xlu0 %v26454_v44, %s23865_s4 }
0x5875   :  { %v8348_v0 = vpop.permute.xlu1 %8347 }
0x5876   :  { %8351 = vst.msk [vmem:[#allocation6 + $0x28] sm:$0xf0] %vm5301_vm9, %v8348_v0 }
0x5879   :  { %v14233_v3 = vpop.permute.xlu1 %14232 }
0x587a   :  { %14236 = vst.msk [vmem:[#allocation6 + $0x48] sm:$0xf0] %vm5301_vm9, %v14233_v3 }
0x587d   :  { %v15453_v55 = vpop.permute.xlu1 %15452 }
0x587e   :  { %15456 = vst.msk [vmem:[#allocation6 + $0x50] sm:$0xf0] %vm5301_vm9, %v15453_v55 }
0x5881   :  { %v16673_v40 = vpop.permute.xlu1 %16672 }
0x5882   :  { %16676 = vst.msk [vmem:[#allocation6 + $0x58] sm:$0xf0] %vm5301_vm9, %v16673_v40 }
0x58b9   :  { %v20788_v37 = vpop.permute.xlu0 %20787 }
0x58ba   :  { %20791 = vst.msk [vmem:[#allocation6 + $0x74] sm:$0xf] %vm1165_vm3, %v20788_v37  ;;  %v20792_v15 = vsel %vm599_vm2, %v20788_v37, 0 }
0x58bb   :  { %v20867_v50 = vand.u32 4294901760, %v20792_v15 }
0x58bd   :  { %v20868_v42 = vsub.f32 %v20792_v15, %v20867_v50 }
0x58bf   :  { %v20869_v1 = vand.u32 4294901760, %v20868_v42 }
0x58c1   :  { %v20870_v51 = vsub.f32 %v20868_v42, %v20869_v1 }
0x58c3   :  { %v20871_v4 = vand.u32 4294901760, %v20870_v51 }
0x58c5   :  { %20872 = vmatmul.mubr.f32.vlgmr.msra.gmra.mrb[76].mxu0 %v20871_v4 }
0x58c6   :  { %23206 = vmatpush1.bf16.msra.mxu0 %v24002_v7  ;;  %20981 = vmatprep.mubr.f32.mxu0 %v26449_v22 }
0x58c7   :  { %23208 = vmatprep.subr.bf16.mxu0 %v24038_v31 }
0x58ca   :  { %23210 = vmatpush1.bf16.msra.mxu0 %v24048_v49  ;;  %v18974_v39 = vpop.permute.xlu0 %18973  ;;  %v20758_v49 = vmul.f32 %v20756_v47, %v26269_v36 }
0x58cb   :  { %v18976_v8 = vmul.f32 %v18974_v39, %v26097_v43  ;;  %23212 = vmatprep.subr.bf16.mxu0 %v24045_v48 }
0x58cd   :  { %v18977_v46 = vadd.f32 %v18976_v8, %v18382_v19  ;;  %20983 = vmatmul.mubr.f32.vlgmr.msra.gmra.mrb[78].mxu0 %v20867_v50 }
0x58ce   :  { %23214 = vmatpush1.bf16.msra.mxu0 %v24056_v53  ;;  %v20162_v7 = vpop.permute.xlu0 %20161  ;;  %21068 = vmatprep.mubr.f32.mxu0 %v26449_v22 }
0x58cf   :  { %v19571_v30 = vadd.f32 %v19570_v29, %v18977_v46  ;;  %v20164_v31 = vmul.f32 %v20162_v7, %v26217_v16  ;;  %23216 = vmatprep.subr.bf16.mxu0 %v24061_v54 }
0x58d1   :  { %v20165_v58 = vadd.f32 %v20164_v31, %v19571_v30 }
0x58d2   :  { %23218 = vmatpush1.bf16.msra.mxu0 %v24071_v56  ;;  %v26365_v48 = vpop.permute.xlu0 %21335 }
0x58d3   :  { %v26367_v43 = vadd.f32 %v20758_v49, %v20165_v58  ;;  %23220 = vmatprep.subr.bf16.mxu0 %v23919_v23 }
0x58d5   :  { %21071 = vmatmul.mubr.f32.vlgmr.msra.gmra.mrb[80].mxu0 %v20868_v42 }
0x58d6   :  { %23222 = vmatpush1.bf16.msra.mxu0 %v23913_v17  ;;  %v8921_v53 = vpop.permute.xlu0 %8920  ;;  %21148 = vmatprep.mubr.f32.mxu0 %v26449_v22 }
0x58d7   :  { %v8924_v54 = vsel %vm4723_vm7, %v26455_v63, %v8921_v53  ;;  %23224 = vmatprep.subr.bf16.mxu0 %v23924_v27 }
0x58d8   :  { %8926 = vst.msk [vmem:[#allocation5 + $0x4] sm:$0xf] %vm4725_vm8, %v8924_v54 }
0x58da   :  { %23226 = vmatpush1.bf16.msra.mxu0 %v23928_v28  ;;  %v17246_v56 = vpop.permute.xlu0 %17245 }
0x58db   :  { %v17249_v16 = vsel %vm4723_vm7, %v26007_v35, %v17246_v56  ;;  %23228 = vmatprep.subr.bf16.mxu0 %v24092_v57 }
0x58dc   :  { %17251 = vst.msk [vmem:[#allocation5 + $0xc] sm:$0xf] %vm4725_vm8, %v17249_v16 }
0x58dd   :  { %21152 = vmatmul.mubr.f32.vlgmr.msra.gmra.mrb[82].mxu0 %v20869_v1 }
0x58de   :  { %23230 = vmatpush1.bf16.msra.mxu0 %v24102_v60  ;;  %v5298_v36 = vpop.permute.xlu0 %5297  ;;  %21245 = vmatprep.mubr.f32.mxu0 %v26449_v22 }
0x58df   :  { %5302 = vst.msk [vmem:[#allocation6 + $0x14] sm:$0xf0] %vm5301_vm9, %v5298_v36  ;;  %23232 = vmatprep.subr.bf16.mxu0 %v24109_v26 }
0x58e2   :  { %23234 = vmatpush1.bf16.msra.mxu0 %v24117_v34  ;;  %v6518_v13 = vpop.permute.xlu0 %6517 }
0x58e3   :  { %6521 = vst.msk [vmem:[#allocation6 + $0x1c] sm:$0xf0] %vm5301_vm9, %v6518_v13  ;;  %23236 = vmatprep.subr.bf16.mxu0 %v23919_v23 }
0x58e5   :  { %21247 = vmatmul.mubr.f32.vlgmr.msra.gmra.mrb[84].mxu0 %v20867_v50 }
0x58e6   :  { %23238 = vmatpush1.bf16.msra.mxu0 %v23913_v17  ;;  %v7738_v57 = vpop.permute.xlu0 %7737  ;;  %21324 = vmatprep.mubr.f32.mxu0 %v26449_v22 }
0x58e7   :  { %7741 = vst.msk [vmem:[#allocation6 + $0x24] sm:$0xf0] %vm5301_vm9, %v7738_v57  ;;  %23240 = vmatprep.subr.bf16.mxu0 %v23924_v27 }
0x58ea   :  { %23242 = vmatpush1.bf16.msra.mxu0 %v23928_v28  ;;  %v13624_v60 = vpop.permute.xlu0 %13623 }
0x58eb   :  { %13627 = vst.msk [vmem:[#allocation6 + $0x44] sm:$0xf0] %vm5301_vm9, %v13624_v60 }
0x58ed   :  { %21326 = vmatmul.mubr.f32.vlgmr.msra.gmra.mrb[86].mxu0 %v20867_v50 }
0x58ee   :  { %v14843_v26 = vpop.permute.xlu0 %14842 }
0x58ef   :  { %14846 = vst.msk [vmem:[#allocation6 + $0x4c] sm:$0xf0] %vm5301_vm9, %v14843_v26 }
0x58f2   :  { %v16063_v23 = vpop.permute.xlu0 %16062 }
0x58f3   :  { %16066 = vst.msk [vmem:[#allocation6 + $0x54] sm:$0xf0] %vm5301_vm9, %v16063_v23 }
0x58f4   :  { %23819 = shalt.err (!%p23816_p12)
}
0x58f5   :  { %s23820_s12 = scalar_lea.hbm %s26439_s3, 1920 }
0x58f6   :  { %p23821_p13 = scmp.ne.s32.totalorder %s26439_s3, %s23820_s12  ;;  %p23824_p0 = scmp.lt.u32.totalorder %s23820_s12, %s26439_s3 }
0x58f8   :  { %p23826_p1 = pnand %p23824_p0, %p23821_p13 }
0x58fa   :  { %23829 = shalt.err (!%p23826_p1)
}
0x58fb   :  { %s23870_s17 = smov 4   ;;  %v21343_v47 = vsub.f32 1.0, %v26276_v12  ;;  %vm21342_vm2 = vcmp.gt.f32.partialorder %v26301_v10, 0.0 }
0x58fc   :  { %21377 = dma.vmem_to_hbm [thread:$0]  %s21372_s8, 1920, %s26439_s3, [#allocation7], %s23864_s0, %s23864_s0, %s23870_s17  }
0x58fd   :  { %v21344_v5 = vsel %vm21342_vm2, %v21343_v47, 0.0  ;;  %s23871_s3 = smov [#allocation5]  }
0x58fe   :  { %s21359_s20 = sshll.u32 %s23871_s3, 4  ;;  %v21345_v33 = vadd.f32 %v21344_v5, %v26301_v10  ;;  %s21360_s20 = int_to_ptr.vmem [resolvable:$true] %s21359_s20 }
0x58ff   :  { %s23830_s21 = scalar_lea.vmem %s21360_s20, 320  ;;  %p23835_p3 = scmp.lt.s32.totalorder %s21360_s20, %s21360_s20 }
0x5900   :  { %p23831_p2 = scmp.ne.s32.totalorder %s21360_s20, %s23830_s21  ;;  %p23836_p4 = scmp.lt.s32.totalorder %s23830_s21, %s23830_s21 }
0x5902   :  { %p23837_p5 = por %p23836_p4, %p23835_p3 }
0x5904   :  { %p23838_p6 = pnand %p23837_p5, %p23831_p2 }
0x5998   :  { %v20873_v17 = vpop.f32.mrb[76].mxu0 }
0x5999   :  { %v20874_v27 = vpop.f32.mrb[77].mxu0 }
0x59a0   :  { %v20984_v28 = vpop.f32.mrb[78].mxu0 }
0x59a1   :  { %v20985_v34 = vpop.f32.mrb[79].mxu0 }
0x59a2   :  { %v20986_v22 = vadd.f32 %v20985_v34, %v20874_v27 }
0x59a8   :  { %v21072_v35 = vpop.f32.mrb[80].mxu0 }
0x59a9   :  { %v21073_v52 = vpop.f32.mrb[81].mxu0 }
0x59aa   :  { %v21074_v62 = vadd.f32 %v21073_v52, %v20986_v22 }
0x59b0   :  { %v21153_v38 = vpop.f32.mrb[82].mxu0 }
0x59b1   :  { %v21154_v6 = vpop.f32.mrb[83].mxu0 }
0x59b2   :  { %v21155_v41 = vadd.f32 %v21154_v6, %v21074_v62 }
0x59b8   :  { %v21248_v32 = vpop.f32.mrb[84].mxu0 }
0x59b9   :  { %v21249_v59 = vpop.f32.mrb[85].mxu0 }
0x59ba   :  { %v21250_v45 = vadd.f32 %v21249_v59, %v21155_v41 }
0x59c0   :  { %v21327_v21 = vpop.f32.mrb[86].mxu0 }
0x59c1   :  { %v21328_v14 = vpop.f32.mrb[87].mxu0 }
0x59c2   :  { %v21329_v2 = vadd.f32 %v21328_v14, %v21250_v45 }
0x59c4   :  { %v21331_v11 = vadd.f32 %v26088_v9, %v21329_v2 }
0x59c6   :  { %v21338_v18 = vmul.f32 %v26365_v48, %v21331_v11 }
0x59c8   :  { %v21339_v25 = vadd.f32 %v21338_v18, %v26367_v43 }
0x59ca   :  { %v21350_v24 = vsel %vm4721_vm10, %v21339_v25, %v21345_v33 }
0x59cb   :  { %v21351_v12 = vsel %vm4723_vm7, %v21350_v24, %v26335_v61 }
0x59cc   :  { %21353 = vst.msk [vmem:[#allocation5 + $0x10] sm:$0xf] %vm4725_vm8, %v21351_v12 }
0x59cd   :  { %23841 = shalt.err (!%p23838_p6)
}
0x59ce   :  { %s23842_s24 = scalar_lea.hbm %s26438_s2, 320 }
0x59cf   :  { %p23843_p7 = scmp.ne.s32.totalorder %s26438_s2, %s23842_s24  ;;  %p23846_p8 = scmp.lt.u32.totalorder %s23842_s24, %s26438_s2 }
0x59d1   :  { %p23848_p9 = pnand %p23846_p8, %p23843_p7 }
0x59d3   :  { %23851 = shalt.err (!%p23848_p9)
}
0x59d4   :  { %21365 = dma.vmem_to_hbm [thread:$0]  %s21360_s20, 320, %s26438_s2, [#allocation4], %s23864_s0, %s23864_s0, %s23870_s17  }
0x59d5   :  { %23854 = dma.done.wait [#allocation4], 320  }
0x59d6   :  { %23855 = vsyncadd [#allocation4], 4294966976 }
0x59d7   :  { %23856 = dma.done.wait [#allocation7], 1920  }
0x59d8   :  { %23857 = vsyncadd [#allocation7], 4294965376 }
0x59d9   :  { %21384 = vsyncpa [#allocation3], 1 }
0x59da   :  { %21385 = vsyncpa [#allocation4], 1 }
0x59db   :  { %21386 = vsyncpa [#allocation7], 1 }

</bundles_post_ra>
